<compile_context>
chip_gen: v6e
topology: v6e:2x2x1
jax: 0.10.0
libtpu: 0.0.40
codegen_flags: <defaults>
</compile_context>

<pallas_src>
import functools

import jax
import jax.numpy as jnp
from jax.experimental import pallas as pl
from jax.experimental.pallas import tpu as pltpu


def _se_gate_kernel(xse_ref, w_ref, b_ref, x_ref, o_ref, *, g, cin, hw):
    """xse_ref: [cin, 1] f32 squeeze vector
       w_ref:   [tcr, g*cin] bf16 grouped conv weight
       b_ref:   [tcr, g]     f32 grouped bias
       x_ref:   [tcr, g*hw]  f32 grouped feature map
       o_ref:   [tcr, g*hw]  f32 output"""
    # ---- build the block-diagonal squeeze operand in-kernel (no HBM stream) ----
    # xsed[j'*cin + k, j] = xse[k] * (j' == j)
    xse_col = xse_ref[...]                                        # [cin, 1]
    xse_rep = jnp.concatenate([xse_col] * g, axis=0)              # [g*cin, 1]
    row = jax.lax.broadcasted_iota(jnp.int32, (g * cin, g), 0)
    col = jax.lax.broadcasted_iota(jnp.int32, (g * cin, g), 1)
    blk_mask = (row >= col * cin) & (row < (col + 1) * cin)       # row // cin == col
    xsed = jnp.where(blk_mask, xse_rep, 0.0).astype(w_ref.dtype)  # [g*cin, g] bf16

    # ---- 1x1 conv (block-diagonal MXU matvec) + bias + sigmoid ----
    #   [tcr, g*cin] @ [g*cin, g] -> [tcr, g], f32 accumulation.
    pre = jnp.dot(w_ref[...], xsed, preferred_element_type=jnp.float32)
    gate = jax.nn.sigmoid(pre + b_ref[...])                       # [tcr, g] f32

    # ---- broadcast each channel's gate over its hw lanes with a 0/1 matmul ----
    # E[j, j'*hw + s] = 1.0 iff j == j'   (built in-kernel, exact in bf16)
    lrow = jax.lax.broadcasted_iota(jnp.int32, (g, g * hw), 0)
    lcol = jax.lax.broadcasted_iota(jnp.int32, (g, g * hw), 1)
    emask = (lcol >= lrow * hw) & (lcol < (lrow + 1) * hw)
    emat = jnp.where(emask, 1.0, 0.0).astype(jnp.bfloat16)        # [g, g*hw]

    # Two-pass hi/lo split keeps the f32 gate (numerically) exact through the
    # bf16 MXU: gate == g_hi + g_lo with |error| ~ 2^-18.
    g_hi = gate.astype(jnp.bfloat16)
    g_lo = (gate - g_hi.astype(jnp.float32)).astype(jnp.bfloat16)
    gate_full = (jnp.dot(g_hi, emat, preferred_element_type=jnp.float32)
                 + jnp.dot(g_lo, emat, preferred_element_type=jnp.float32))

    o_ref[...] = (x_ref[...] * gate_full).astype(o_ref.dtype)


def _pick_group(cout, hw, max_g=16):
    """Channel-group size g: view the feature map as [cout//g, g*hw] so the
    output lane width is as close as possible to a multiple of 128 (mostly
    unmasked stores) while keeping an 8-tileable row count."""
    best_g, best_util = 1, -1.0
    for g in range(1, max_g + 1):
        if cout % g or (cout // g) % 8:
            continue
        lanes = g * hw
        util = lanes / (pl.cdiv(lanes, 128) * 128)
        if util > best_util + 1e-9:
            best_g, best_util = g, util
    if best_util < 0:           # robustness fallback: any divisor, single block
        for g in range(max_g, 0, -1):
            if cout % g == 0:
                return g
    return best_g


def _num_tensorcores():
    """Best-effort TensorCore count per device (megacore v4/v5p and v7x -> 2)."""
    try:
        kind = jax.devices()[0].device_kind.lower()
    except Exception:
        return 1
    return 2 if any(t in kind for t in ("v4", "v5p", "v7")) else 1


def _num_row_blocks(rows, bytes_per_row, vmem_budget_bytes=12 * 1024 * 1024):
    """Grid steps: one per TensorCore (so dual-TC parts can shard the
    "parallel" grid), growing only if the double-buffered per-step footprint
    would exceed a VMEM budget safe for every generation."""
    nb = _num_tensorcores()
    if rows % (nb * 8):
        nb = 1
    while (rows // nb) * bytes_per_row > vmem_budget_bytes and rows % (nb * 2 * 8) == 0:
        nb *= 2
    return nb


def prepare_se_gate_params(weight, bias, feature_hw, *, weight_dtype=jnp.bfloat16):
    """One-time (init-time) parameter prep: pick the channel grouping and store
    the conv weight already in bf16 grouped layout so no per-call convert op or
    extra HBM traffic is paid."""
    cout, cin, kh, kw = weight.shape
    assert kh == 1 and kw == 1, "1x1 convolution expected"
    g = _pick_group(cout, feature_hw)
    rows = cout // g
    wm = weight.reshape(rows, g * cin).astype(weight_dtype)   # [rows, g*Cin] bf16
    bm = bias.reshape(rows, g).astype(jnp.float32)            # [rows, g]     f32
    return wm, bm, g


def se_gate(x581, x578, wm, bm, *, g):
    """x581: [1, Cin, 1, 1] squeeze input; x578: [1, Cout, H, W] feature map;
       wm/bm: prepared grouped weight/bias (see prepare_se_gate_params).
       Returns sigmoid(Conv2d_1x1(x581)) * x578."""
    n, cin, h1, w1 = x581.shape
    n2, cout, h, w = x578.shape
    assert n == 1 and n2 == 1 and h1 == 1 and w1 == 1
    hw = h * w
    rows = cout // g
    lanes = g * hw
    assert wm.shape == (rows, g * cin) and bm.shape == (rows, g)

    # Free (bitcast) 2-D views of the NCHW tensors -- no extra XLA kernels.
    xse2d = x581.reshape(cin, 1)
    xm = x578.reshape(rows, lanes)

    bytes_per_row = 2 * (wm.dtype.itemsize * g * cin
                         + bm.dtype.itemsize * g
                         + 2 * x578.dtype.itemsize * lanes)   # in + out, dbl-buffered
    nb = _num_row_blocks(rows, bytes_per_row)
    tcr = rows // nb

    out = pl.pallas_call(
        functools.partial(_se_gate_kernel, g=g, cin=cin, hw=hw),
        out_shape=jax.ShapeDtypeStruct((rows, lanes), x578.dtype),
        grid_spec=pltpu.PrefetchScalarGridSpec(
            num_scalar_prefetch=0,
            grid=(nb,),
            in_specs=[
                pl.BlockSpec((cin, 1), lambda i: (0, 0)),        # squeeze vector (shared)
                pl.BlockSpec((tcr, g * cin), lambda i: (i, 0)),  # weight tile (bf16)
                pl.BlockSpec((tcr, g), lambda i: (i, 0)),        # bias tile
                pl.BlockSpec((tcr, lanes), lambda i: (i, 0)),    # feature tile
            ],
            out_specs=pl.BlockSpec((tcr, lanes), lambda i: (i, 0)),
        ),
        compiler_params=pltpu.CompilerParams(
            dimension_semantics=("parallel",)),
    )(xse2d, wm, bm, xm)

    return out.reshape(1, cout, h, w)


if __name__ == "__main__":
    # Shapes from the original module: Conv2d(128 -> 3072, 1x1) SE gate applied
    # to a [1, 3072, 7, 7] feature map.
    Cin, Cout, H, W = 128, 3072, 7, 7

    key = jax.random.PRNGKey(0)
    k1, k2, k3, k4 = jax.random.split(key, 4)

    x581 = jax.random.normal(k1, (1, Cin, 1, 1), jnp.float32)    # squeeze input
    x578 = jax.random.normal(k2, (1, Cout, H, W), jnp.float32)   # feature map
    weight = jax.random.normal(k3, (Cout, Cin, 1, 1), jnp.float32) * 0.05
    bias = jax.random.normal(k4, (Cout,), jnp.float32) * 0.05

    # Init-time parameter prep (bf16 weight cast happens exactly once, here).
    wm, bm, g = prepare_se_gate_params(weight, bias, H * W)
    wm, bm = jax.block_until_ready((wm, bm))

    se_fn = jax.jit(functools.partial(se_gate, g=g))
    out = se_fn(x581, x578, wm, bm)
    out = jax.block_until_ready(out)

    # Pure-JAX reference.  The kernel streams the conv weight / squeeze vector
    # as bfloat16 (with f32 MXU accumulation), so the reference applies the
    # same quantization; the gate broadcast itself is exact to ~4e-6.
    wq = weight.reshape(Cout, Cin).astype(jnp.bfloat16).astype(jnp.float32)
    xq = x581.reshape(Cin).astype(jnp.bfloat16).astype(jnp.float32)
    gate_ref = jax.nn.sigmoid(wq @ xq + bias).reshape(1, Cout, 1, 1)
    ref = gate_ref * x578

    assert out.shape == (1, Cout, H, W)
    assert jnp.allclose(out, ref, atol=1e-3, rtol=1e-3), \
        float(jnp.max(jnp.abs(out - ref)))

    print("KERNEL_OK")
</pallas_src>

<mosaic_0001>
module attributes {stable_mosaic.version = 11 : i64} {
  func.func @_se_gate_kernel(%arg0: i32, %arg1: memref<128x1xf32, #tpu.memory_space<vmem>>, %arg2: memref<256x1536xbf16, #tpu.memory_space<vmem>>, %arg3: memref<256x12xf32, #tpu.memory_space<vmem>>, %arg4: memref<256x588xf32, #tpu.memory_space<vmem>>, %arg5: memref<256x588xf32, #tpu.memory_space<vmem>>) attributes {dimension_semantics = [#tpu.dimension_semantics<parallel>], iteration_bounds = array<i64: 1>, scalar_prefetch = 0 : i64, scratch_operands = 0 : i64, tpu.core_type = #tpu.core_type<tc>, window_params = [{pipeline_mode = #tpu.pipeline_mode<synchronous>, transform_indices = @transform_0, window_bounds = array<i64: 128, 1>}, {transform_indices = @transform_1, window_bounds = array<i64: 256, 1536>}, {transform_indices = @transform_2, window_bounds = array<i64: 256, 12>}, {transform_indices = @transform_3, window_bounds = array<i64: 256, 588>}, {transform_indices = @transform_4, window_bounds = array<i64: 256, 588>}]} {
    %c0 = arith.constant 0 : index
    %c0_0 = arith.constant 0 : index
    %0 = vector.load %arg1[%c0, %c0_0] : memref<128x1xf32, #tpu.memory_space<vmem>>, vector<128x1xf32>
    %1 = tpu.concatenate %0, %0, %0, %0, %0, %0, %0, %0, %0, %0, %0, %0 in 0 : vector<128x1xf32>, vector<128x1xf32>, vector<128x1xf32>, vector<128x1xf32>, vector<128x1xf32>, vector<128x1xf32>, vector<128x1xf32>, vector<128x1xf32>, vector<128x1xf32>, vector<128x1xf32>, vector<128x1xf32>, vector<128x1xf32> -> vector<1536x1xf32>
    %2 = tpu.iota {dimensions = array<i32: 0>} : vector<1536x12xi32>
    %3 = tpu.iota {dimensions = array<i32: 1>} : vector<1536x12xi32>
    %c128_i32 = arith.constant 128 : i32
    %4 = vector.broadcast %c128_i32 : i32 to vector<1536x12xi32>
    %5 = arith.muli %3, %4 : vector<1536x12xi32>
    %6 = arith.cmpi sge, %2, %5 : vector<1536x12xi32>
    %c1_i32 = arith.constant 1 : i32
    %7 = vector.broadcast %c1_i32 : i32 to vector<1536x12xi32>
    %8 = arith.addi %3, %7 : vector<1536x12xi32>
    %c128_i32_1 = arith.constant 128 : i32
    %9 = vector.broadcast %c128_i32_1 : i32 to vector<1536x12xi32>
    %10 = arith.muli %8, %9 : vector<1536x12xi32>
    %11 = arith.cmpi slt, %2, %10 : vector<1536x12xi32>
    %12 = arith.andi %6, %11 : vector<1536x12xi1>
    %cst = arith.constant 0.000000e+00 : f32
    %13 = vector.shape_cast %1 : vector<1536x1xf32> to vector<1536x1xf32>
    %14 = vector.broadcast %13 : vector<1536x1xf32> to vector<1536x12xf32>
    %15 = vector.broadcast %cst : f32 to vector<1536x12xf32>
    %16 = arith.select %12, %14, %15 : vector<1536x12xi1>, vector<1536x12xf32>
    %17 = arith.truncf %16 : vector<1536x12xf32> to vector<1536x12xbf16>
    %c0_2 = arith.constant 0 : index
    %c0_3 = arith.constant 0 : index
    %18 = vector.load %arg2[%c0_2, %c0_3] : memref<256x1536xbf16, #tpu.memory_space<vmem>>, vector<256x1536xbf16>
    %cst_4 = arith.constant dense<0.000000e+00> : vector<256x12xf32>
    %19 = tpu.matmul %18, %17, %cst_4 {dimension_numbers = #tpu.dot_dimension_numbers<[1], [0], [0], [1], [0, 0, 1, 1], [], []>} : vector<256x1536xbf16>, vector<1536x12xbf16>, vector<256x12xf32> -> vector<256x12xf32>
    %c0_5 = arith.constant 0 : index
    %c0_6 = arith.constant 0 : index
    %20 = vector.load %arg3[%c0_5, %c0_6] : memref<256x12xf32, #tpu.memory_space<vmem>>, vector<256x12xf32>
    %21 = arith.addf %19, %20 : vector<256x12xf32>
    %22 = arith.negf %21 : vector<256x12xf32>
    %23 = math.exp %22 : vector<256x12xf32>
    %cst_7 = arith.constant 1.000000e+00 : f32
    %24 = vector.broadcast %cst_7 : f32 to vector<256x12xf32>
    %25 = arith.addf %24, %23 : vector<256x12xf32>
    %26 = arith.divf %24, %25 : vector<256x12xf32>
    %27 = tpu.iota {dimensions = array<i32: 0>} : vector<12x588xi32>
    %28 = tpu.iota {dimensions = array<i32: 1>} : vector<12x588xi32>
    %c49_i32 = arith.constant 49 : i32
    %29 = vector.broadcast %c49_i32 : i32 to vector<12x588xi32>
    %30 = arith.muli %27, %29 : vector<12x588xi32>
    %31 = arith.cmpi sge, %28, %30 : vector<12x588xi32>
    %c1_i32_8 = arith.constant 1 : i32
    %32 = vector.broadcast %c1_i32_8 : i32 to vector<12x588xi32>
    %33 = arith.addi %27, %32 : vector<12x588xi32>
    %c49_i32_9 = arith.constant 49 : i32
    %34 = vector.broadcast %c49_i32_9 : i32 to vector<12x588xi32>
    %35 = arith.muli %33, %34 : vector<12x588xi32>
    %36 = arith.cmpi slt, %28, %35 : vector<12x588xi32>
    %37 = arith.andi %31, %36 : vector<12x588xi1>
    %cst_10 = arith.constant 1.000000e+00 : f32
    %cst_11 = arith.constant 0.000000e+00 : f32
    %38 = vector.broadcast %cst_10 : f32 to vector<12x588xf32>
    %39 = vector.broadcast %cst_11 : f32 to vector<12x588xf32>
    %40 = arith.select %37, %38, %39 : vector<12x588xi1>, vector<12x588xf32>
    %41 = arith.truncf %40 : vector<12x588xf32> to vector<12x588xbf16>
    %42 = arith.truncf %26 : vector<256x12xf32> to vector<256x12xbf16>
    %43 = arith.extf %42 : vector<256x12xbf16> to vector<256x12xf32>
    %44 = arith.subf %26, %43 : vector<256x12xf32>
    %45 = arith.truncf %44 : vector<256x12xf32> to vector<256x12xbf16>
    %cst_12 = arith.constant dense<0.000000e+00> : vector<256x588xf32>
    %46 = tpu.matmul %42, %41, %cst_12 {dimension_numbers = #tpu.dot_dimension_numbers<[1], [0], [0], [1], [0, 0, 1, 1], [], []>} : vector<256x12xbf16>, vector<12x588xbf16>, vector<256x588xf32> -> vector<256x588xf32>
    %cst_13 = arith.constant dense<0.000000e+00> : vector<256x588xf32>
    %47 = tpu.matmul %45, %41, %cst_13 {dimension_numbers = #tpu.dot_dimension_numbers<[1], [0], [0], [1], [0, 0, 1, 1], [], []>} : vector<256x12xbf16>, vector<12x588xbf16>, vector<256x588xf32> -> vector<256x588xf32>
    %48 = arith.addf %46, %47 : vector<256x588xf32>
    %c0_14 = arith.constant 0 : index
    %c0_15 = arith.constant 0 : index
    %49 = vector.load %arg4[%c0_14, %c0_15] : memref<256x588xf32, #tpu.memory_space<vmem>>, vector<256x588xf32>
    %50 = arith.mulf %49, %48 : vector<256x588xf32>
    %c0_16 = arith.constant 0 : index
    %c0_17 = arith.constant 0 : index
    %51 = vector.load %arg5[%c0_16, %c0_17] : memref<256x588xf32, #tpu.memory_space<vmem>>, vector<256x588xf32>
    tpu.vector_store %arg5[%c0_16, %c0_17], %50 {strides = array<i32>} : memref<256x588xf32, #tpu.memory_space<vmem>>, vector<256x588xf32>,
    return
  }
  func.func @transform_0(%arg0: i32) -> (i32, i32) {
    %c0_i32 = arith.constant 0 : i32
    %c0_i32_0 = arith.constant 0 : i32
    %c0_i32_1 = arith.constant 0 : i32
    return %c0_i32, %c0_i32_0 : i32, i32
  }
  func.func @transform_1(%arg0: i32) -> (i32, i32) {
    %c0_i32 = arith.constant 0 : i32
    %c0_i32_0 = arith.constant 0 : i32
    return %arg0, %c0_i32 : i32, i32
  }
  func.func @transform_2(%arg0: i32) -> (i32, i32) {
    %c0_i32 = arith.constant 0 : i32
    %c0_i32_0 = arith.constant 0 : i32
    return %arg0, %c0_i32 : i32, i32
  }
  func.func @transform_3(%arg0: i32) -> (i32, i32) {
    %c0_i32 = arith.constant 0 : i32
    %c0_i32_0 = arith.constant 0 : i32
    return %arg0, %c0_i32 : i32, i32
  }
  func.func @transform_4(%arg0: i32) -> (i32, i32) {
    %c0_i32 = arith.constant 0 : i32
    %c0_i32_0 = arith.constant 0 : i32
    return %arg0, %c0_i32 : i32, i32
  }
}

</mosaic_0001>

<bundles_post_ra>
// kernel: se_gate.1
= control target key start
LH: loop header
LB: loop body
LE: loop exit
PB: predicated region body
PF: predicated region fallthrough
CT: control target
= control target key end

     0   :  { %v13598_v0 = vmov 0   ;;  %v34_v27 = vlaneseq  ;;  %s13575_s0 = inlined_call_operand.vmem [shape: f32[128,1], index: 0, kind: input, shape index: {}]   ;;  %s13576_s1 = inlined_call_operand.vmem [shape: bf16[256,1536], index: 1, kind: input, shape index: {}]   ;;  %s13577_s2 = inlined_call_operand.vmem [shape: f32[256,12], index: 2, kind: input, shape index: {}]   ;;  %s13578_s3 = inlined_call_operand.vmem [shape: f32[256,588], index: 3, kind: input, shape index: {}]   ;;  %s13579_s4 = inlined_call_operand.vmem [shape: f32[256,588], index: 4, kind: output, shape index: {}]  }
   0x1   :  { %6762 = vset.pattern.permute.xlu1 %v13598_v0  ;;  %6751 = vset.pattern.permute.xlu0 %v13598_v0  ;;  %v32_v1 = vld [vmem:[%s13575_s0 + $0x70] sm:$0xff]  ;;  %v33_v2 = vld [vmem:[%s13575_s0 + $0x78] sm:$0xff]  ;;  %v30_v6 = vld [vmem:[%s13575_s0 + $0x60] sm:$0xff] }
   0x2   :  { %v28_v3 = vld [vmem:[%s13575_s0 + $0x50] sm:$0xff]  ;;  %v6752_v4 = vpack.i.bf16 %v33_v2, %v32_v1  ;;  %v29_v5 = vld [vmem:[%s13575_s0 + $0x58] sm:$0xff]  ;;  %v31_v7 = vld [vmem:[%s13575_s0 + $0x68] sm:$0xff]  ;;  %v7292_v28 = vand.u32 127, %v34_v27  ;;  %v7294_v29 = vshrl.u32 %v34_v27, 7  ;;  %v13859_v27 = vmov 0 }
   0x3   :  { %v6763_v8 = vpack.i.bf16 %v29_v5, %v28_v3  ;;  %v26_v9 = vld [vmem:[%s13575_s0 + $0x40] sm:$0xff]  ;;  %v27_v10 = vld [vmem:[%s13575_s0 + $0x48] sm:$0xff]  ;;  %v6757_v11 = vpack.i.bf16 %v31_v7, %v30_v6  ;;  %v24_v13 = vld [vmem:[%s13575_s0 + $0x30] sm:$0xff]  ;;  %v13812_v6 = vmov 0 }
   0x4   :  { %6753 = vperm.xlu0 %6751, %v6752_v4   ;;  %v6768_v12 = vpack.i.bf16 %v27_v10, %v26_v9  ;;  %v25_v14 = vld [vmem:[%s13575_s0 + $0x38] sm:$0xff]  ;;  %v22_v15 = vld [vmem:[%s13575_s0 + $0x20] sm:$0xff]  ;;  %v23_v16 = vld [vmem:[%s13575_s0 + $0x28] sm:$0xff]  ;;  %13807 = vst [vmem:[#allocation2_spill] sm:$0xff] %v7292_v28  ;;  %v422_v30 = vadd.s32 1, %v7292_v28  ;;  %v7298_v31 = vadd.s32 240, %v7294_v29 }
   0x5   :  { %6764 = vperm.xlu1 %6762, %v6763_v8   ;;  %v6773_v17 = vpack.i.bf16 %v25_v14, %v24_v13  ;;  %v6778_v18 = vpack.i.bf16 %v23_v16, %v22_v15  ;;  %v20_v19 = vld [vmem:[%s13575_s0 + $0x10] sm:$0xff]  ;;  %v21_v20 = vld [vmem:[%s13575_s0 + $0x18] sm:$0xff]  ;;  %v18_v21 = vld [vmem:[%s13575_s0] sm:$0xff]  ;;  %v7301_v32 = vadd.s32 248, %v7294_v29  ;;  %v7304_v33 = vmul.u32 128, %v7292_v28 }
   0x6   :  { %v19_v22 = vld [vmem:[%s13575_s0 + $0x8] sm:$0xff]  ;;  %v6783_v23 = vpack.i.bf16 %v21_v20, %v20_v19  ;;  %v6795_v25 = vld [vmem:[%s13576_s1 + $0x4] ss:$48 sps:$4 sm:$0xff]   ;;  %v7306_v34 = vmul.u32 128, %v422_v30  ;;  %v7309_v35 = vadd.s32 496, %v7294_v29  ;;  %v7312_v36 = vadd.s32 504, %v7294_v29 }
   0x7   :  { %v6788_v24 = vpack.i.bf16 %v19_v22, %v18_v21  ;;  %2392 = vmatprep.mubr.bf16.mxu0 %v6795_v25  ;;  %v6798_v26 = vld [vmem:[%s13576_s1 + $0xc] ss:$48 sps:$4 sm:$0xff]   ;;  %v7315_v37 = vadd.s32 112, %v7294_v29  ;;  %v7318_v38 = vadd.s32 120, %v7294_v29  ;;  %v7321_v39 = vadd.s32 368, %v7294_v29 }
   0x8   :  { %6758 = vperm.xlu0 %6751, %v6757_v11   ;;  %2553 = vmatprep.mubr.bf16.mxu1 %v6798_v26  ;;  %v7324_v40 = vadd.s32 376, %v7294_v29  ;;  %vm260_vm0 = vcmp.ge.s32.totalorder %v7298_v31, %v7304_v33  ;;  %vm261_vm1 = vcmp.ge.s32.totalorder %v7301_v32, %v7304_v33  ;;  %vm454_vm2 = vcmp.lt.s32.totalorder %v7298_v31, %v7306_v34 }
   0x9   :  { %6769 = vperm.xlu1 %6762, %v6768_v12   ;;  %vm455_vm3 = vcmp.lt.s32.totalorder %v7301_v32, %v7306_v34  ;;  %vm292_vm4 = vcmp.ge.s32.totalorder %v7309_v35, %v7304_v33  ;;  %vm293_vm5 = vcmp.ge.s32.totalorder %v7312_v36, %v7304_v33  ;;  %vm486_vm6 = vcmp.lt.s32.totalorder %v7309_v35, %v7306_v34  ;;  %vm7510_vm11 = vmand %vm260_vm0, %vm454_vm2 }
   0xa   :  { %vm487_vm7 = vcmp.lt.s32.totalorder %v7312_v36, %v7306_v34  ;;  %v7343_v41 = vadd.s32 224, %v7294_v29  ;;  %v7346_v42 = vadd.s32 232, %v7294_v29  ;;  %v7349_v43 = vadd.s32 480, %v7294_v29  ;;  %vm7520_vm12 = vmand %vm261_vm1, %vm455_vm3 }
   0xb   :  { %v7352_v44 = vadd.s32 488, %v7294_v29  ;;  %vm438_vm10 = vcmp.lt.s32.totalorder %v7315_v37, %v7306_v34  ;;  %v7361_v45 = vadd.s32 96, %v7294_v29  ;;  %v7364_v46 = vadd.s32 104, %v7294_v29  ;;  %vm7530_vm0 = vmand %vm292_vm4, %vm486_vm6 }
   0xc   :  { %6774 = vperm.xlu0 %6751, %v6773_v17   ;;  %v7367_v47 = vadd.s32 352, %v7294_v29  ;;  %v7370_v48 = vadd.s32 360, %v7294_v29  ;;  %v7377_v49 = vadd.s32 208, %v7294_v29  ;;  %v7380_v50 = vadd.s32 216, %v7294_v29  ;;  %vm7540_vm1 = vmand %vm293_vm5, %vm487_vm7 }
   0xd   :  { %6779 = vperm.xlu1 %6762, %v6778_v18   ;;  %v7389_v51 = vadd.s32 464, %v7294_v29  ;;  %v7408_v52 = vadd.s32 472, %v7294_v29  ;;  %v7427_v53 = vadd.s32 80, %v7294_v29  ;;  %v7430_v54 = vadd.s32 88, %v7294_v29 }
   0xe   :  { %v7433_v55 = vadd.s32 336, %v7294_v29  ;;  %v7436_v56 = vadd.s32 344, %v7294_v29  ;;  %v7443_v57 = vadd.s32 192, %v7294_v29  ;;  %v7446_v58 = vadd.s32 200, %v7294_v29 }
   0xf   :  { %v7455_v59 = vadd.s32 448, %v7294_v29  ;;  %v7464_v60 = vadd.s32 456, %v7294_v29  ;;  %v7483_v61 = vadd.s32 64, %v7294_v29  ;;  %v7486_v62 = vadd.s32 72, %v7294_v29 }
  0x10   :  { %6784 = vperm.xlu0 %6751, %v6783_v23   ;;  %v7489_v63 = vadd.s32 320, %v7294_v29  ;;  %v7492_v1 = vadd.s32 328, %v7294_v29  ;;  %v7499_v2 = vadd.s32 176, %v7294_v29  ;;  %v7502_v3 = vadd.s32 184, %v7294_v29 }
  0x11   :  { %6789 = vperm.xlu1 %6762, %v6788_v24   ;;  %v13813_v6 = vsel %vm7530_vm0, 4294967295, %v13812_v6  ;;  %v7551_v8 = vadd.s32 432, %v7294_v29  ;;  %vm13816_vm5 = vcmp.ge.s32.totalorder %v7315_v37, %v7304_v33  ;;  %v13817_v9 = vmov 0 }
  0x12   :  { %vm7559_vm6 = vmand %vm13816_vm5, %vm438_vm10  ;;  %vm13819_vm7 = vcmp.lt.s32.totalorder %v7318_v38, %v7306_v34  ;;  %vm13820_vm3 = vcmp.ge.s32.totalorder %v7318_v38, %v7304_v33  ;;  %v13821_v10 = vmov 0  ;;  %v7580_v11 = vadd.s32 440, %v7294_v29 }
  0x13   :  { %v13818_v9 = vsel %vm7559_vm6, 4294967295, %v13817_v9  ;;  %vm7569_vm4 = vmand %vm13820_vm3, %vm13819_vm7  ;;  %vm13823_vm5 = vcmp.lt.s32.totalorder %v7321_v39, %v7306_v34  ;;  %vm13824_vm3 = vcmp.ge.s32.totalorder %v7321_v39, %v7304_v33  ;;  %v13825_v12 = vmov 0 }
  0x14   :  { %v13822_v10 = vsel %vm7569_vm4, 4294967295, %v13821_v10  ;;  %vm7588_vm7 = vmand %vm13824_vm3, %vm13823_vm5  ;;  %v7609_v13 = vadd.s32 48, %v7294_v29  ;;  %v7612_v14 = vadd.s32 56, %v7294_v29  ;;  %v7615_v15 = vadd.s32 304, %v7294_v29 }
  0x15   :  { %v13826_v12 = vsel %vm7588_vm7, 4294967295, %v13825_v12  ;;  %v7618_v16 = vadd.s32 312, %v7294_v29  ;;  %vm13827_vm5 = vcmp.lt.s32.totalorder %v7324_v40, %v7306_v34  ;;  %vm13828_vm13 = vcmp.ge.s32.totalorder %v7324_v40, %v7304_v33 }
  0x16   :  { %vm7626_vm3 = vmand %vm13828_vm13, %vm13827_vm5  ;;  %v13829_v17 = vmov 0  ;;  %v7635_v18 = vadd.s32 160, %v7294_v29  ;;  %v7638_v19 = vadd.s32 168, %v7294_v29  ;;  %vm13831_vm14 = vcmp.lt.s32.totalorder %v7343_v41, %v7306_v34 }
  0x17   :  { %v13830_v17 = vsel %vm7626_vm3, 4294967295, %v13829_v17  ;;  %vm13832_vm13 = vcmp.ge.s32.totalorder %v7343_v41, %v7304_v33  ;;  %v13833_v20 = vmov 0  ;;  %vm13835_vm15 = vcmp.lt.s32.totalorder %v7346_v42, %v7306_v34 }
  0x18   :  { %vm7646_vm5 = vmand %vm13832_vm13, %vm13831_vm14  ;;  %vm13836_vm2 = vcmp.ge.s32.totalorder %v7346_v42, %v7304_v33  ;;  %v13837_v21 = vmov 0  ;;  %vm13839_vm8 = vcmp.lt.s32.totalorder %v7349_v43, %v7306_v34  ;;  %vm13840_vm9 = vcmp.ge.s32.totalorder %v7349_v43, %v7304_v33 }
  0x19   :  { %v13834_v20 = vsel %vm7646_vm5, 4294967295, %v13833_v20  ;;  %vm7656_vm10 = vmand %vm13836_vm2, %vm13835_vm15  ;;  %v13841_v22 = vmov 0  ;;  %vm13844_vm13 = vcmp.lt.s32.totalorder %v7352_v44, %v7306_v34  ;;  %vm13845_vm5 = vcmp.ge.s32.totalorder %v7352_v44, %v7304_v33 }
  0x1a   :  { %v13838_v21 = vsel %vm7656_vm10, 4294967295, %v13837_v21  ;;  %vm7666_vm14 = vmand %vm13840_vm9, %vm13839_vm8  ;;  %v13846_v23 = vmov 0  ;;  %v7687_v24 = vadd.s32 416, %v7294_v29  ;;  %vm13849_vm9 = vcmp.lt.s32.totalorder %v7361_v45, %v7306_v34 }
  0x1b   :  { %v13842_v22 = vsel %vm7666_vm14, 4294967295, %v13841_v22  ;;  %vm7676_vm15 = vmand %vm13845_vm5, %vm13844_vm13  ;;  %vm13850_vm5 = vcmp.ge.s32.totalorder %v7361_v45, %v7304_v33  ;;  %v13851_v25 = vmov 0  ;;  %vm13853_vm2 = vcmp.lt.s32.totalorder %v7364_v46, %v7306_v34 }
  0x1c   :  { %13843 = vst [vmem:[#allocation3_spill] sm:$0xff] %v13842_v22  ;;  %v13847_v23 = vsel %vm7676_vm15, 4294967295, %v13846_v23  ;;  %vm7695_vm13 = vmand %vm13850_vm5, %vm13849_vm9  ;;  %vm13854_vm10 = vcmp.ge.s32.totalorder %v7364_v46, %v7304_v33  ;;  %v13855_v26 = vmov 0  ;;  %vm13857_vm15 = vcmp.lt.s32.totalorder %v7367_v47, %v7306_v34 }
  0x1d   :  { %13848 = vst [vmem:[#allocation4_spill] sm:$0xff] %v13847_v23  ;;  %v13852_v25 = vsel %vm7695_vm13, 4294967295, %v13851_v25  ;;  %vm7705_vm8 = vmand %vm13854_vm10, %vm13853_vm2  ;;  %vm13858_vm14 = vcmp.ge.s32.totalorder %v7367_v47, %v7304_v33  ;;  %vm13862_vm5 = vcmp.lt.s32.totalorder %v7370_v48, %v7306_v34  ;;  %vm13863_vm13 = vcmp.ge.s32.totalorder %v7370_v48, %v7304_v33 }
  0x1e   :  { %v13856_v26 = vsel %vm7705_vm8, 4294967295, %v13855_v26  ;;  %vm7715_vm9 = vmand %vm13858_vm14, %vm13857_vm15  ;;  %v13864_v30 = vmov 0  ;;  %v7736_v31 = vadd.s32 424, %v7294_v29  ;;  %vm13867_vm15 = vcmp.lt.s32.totalorder %v7377_v49, %v7306_v34 }
  0x1f   :  { %v13860_v27 = vsel %vm7715_vm9, 4294967295, %v13859_v27  ;;  %vm7725_vm10 = vmand %vm13863_vm13, %vm13862_vm5  ;;  %vm13868_vm13 = vcmp.ge.s32.totalorder %v7377_v49, %v7304_v33  ;;  %v13869_v32 = vmov 0  ;;  %vm13871_vm2 = vcmp.lt.s32.totalorder %v7380_v50, %v7306_v34 }
  0x20   :  { %13861 = vst [vmem:[#allocation5_spill] sm:$0xff] %v13860_v27  ;;  %v13865_v30 = vsel %vm7725_vm10, 4294967295, %v13864_v30  ;;  %vm7744_vm5 = vmand %vm13868_vm13, %vm13867_vm15  ;;  %vm13872_vm8 = vcmp.ge.s32.totalorder %v7380_v50, %v7304_v33  ;;  %v13873_v35 = vmov 0  ;;  %v7775_v36 = vadd.s32 32, %v7294_v29 }
  0x21   :  { %13866 = vst [vmem:[#allocation6_spill] sm:$0xff] %v13865_v30  ;;  %v13870_v32 = vsel %vm7744_vm5, 4294967295, %v13869_v32  ;;  %vm7754_vm14 = vmand %vm13872_vm8, %vm13871_vm2  ;;  %v7778_v37 = vadd.s32 40, %v7294_v29  ;;  %v7781_v38 = vadd.s32 288, %v7294_v29  ;;  %v7784_v39 = vadd.s32 296, %v7294_v29 }
  0x22   :  { %v13874_v35 = vsel %vm7754_vm14, 4294967295, %v13873_v35  ;;  %vm13875_vm8 = vcmp.lt.s32.totalorder %v7389_v51, %v7306_v34  ;;  %vm13876_vm5 = vcmp.ge.s32.totalorder %v7389_v51, %v7304_v33  ;;  %v13877_v40 = vmov 0 }
  0x23   :  { %vm7792_vm2 = vmand %vm13876_vm5, %vm13875_vm8  ;;  %v7801_v41 = vadd.s32 144, %v7294_v29  ;;  %v7804_v42 = vadd.s32 152, %v7294_v29  ;;  %vm13880_vm13 = vcmp.lt.s32.totalorder %v7408_v52, %v7306_v34  ;;  %vm13881_vm5 = vcmp.ge.s32.totalorder %v7408_v52, %v7304_v33 }
  0x24   :  { %v13878_v40 = vsel %vm7792_vm2, 4294967295, %v13877_v40  ;;  %vm7812_vm8 = vmand %vm13881_vm5, %vm13880_vm13  ;;  %v13882_v43 = vmov 0  ;;  %v7823_v44 = vadd.s32 400, %v7294_v29  ;;  %vm13884_vm2 = vcmp.lt.s32.totalorder %v7427_v53, %v7306_v34 }
  0x25   :  { %13879 = vst [vmem:[#allocation7_spill] sm:$0xff] %v13878_v40  ;;  %v13883_v43 = vsel %vm7812_vm8, 4294967295, %v13882_v43  ;;  %vm13885_vm13 = vcmp.ge.s32.totalorder %v7427_v53, %v7304_v33  ;;  %v13886_v45 = vmov 0  ;;  %vm13888_vm10 = vcmp.lt.s32.totalorder %v7430_v54, %v7306_v34 }
  0x26   :  { %vm7831_vm5 = vmand %vm13885_vm13, %vm13884_vm2  ;;  %vm13889_vm9 = vcmp.ge.s32.totalorder %v7430_v54, %v7304_v33  ;;  %v13890_v46 = vmov 0  ;;  %vm13892_vm8 = vcmp.lt.s32.totalorder %v7433_v55, %v7306_v34  ;;  %vm13893_vm14 = vcmp.ge.s32.totalorder %v7433_v55, %v7304_v33 }
  0x27   :  { %v13887_v45 = vsel %vm7831_vm5, 4294967295, %v13886_v45  ;;  %vm7841_vm15 = vmand %vm13889_vm9, %vm13888_vm10  ;;  %v13894_v47 = vmov 0  ;;  %vm13896_vm13 = vcmp.lt.s32.totalorder %v7436_v56, %v7306_v34  ;;  %vm13897_vm5 = vcmp.ge.s32.totalorder %v7436_v56, %v7304_v33 }
  0x28   :  { %v13891_v46 = vsel %vm7841_vm15, 4294967295, %v13890_v46  ;;  %vm7851_vm2 = vmand %vm13893_vm14, %vm13892_vm8  ;;  %v13898_v48 = vmov 0  ;;  %v7872_v49 = vadd.s32 408, %v7294_v29  ;;  %vm13901_vm8 = vcmp.lt.s32.totalorder %v7443_v57, %v7306_v34 }
  0x29   :  { %v13895_v47 = vsel %vm7851_vm2, 4294967295, %v13894_v47  ;;  %vm7861_vm9 = vmand %vm13897_vm5, %vm13896_vm13  ;;  %vm13902_vm5 = vcmp.ge.s32.totalorder %v7443_v57, %v7304_v33  ;;  %v13903_v50 = vmov 0  ;;  %vm13905_vm10 = vcmp.lt.s32.totalorder %v7446_v58, %v7306_v34 }
  0x2a   :  { %v13899_v48 = vsel %vm7861_vm9, 4294967295, %v13898_v48  ;;  %13900 = vst [vmem:[#allocation8_spill] sm:$0xff] %v7872_v49  ;;  %vm7880_vm13 = vmand %vm13902_vm5, %vm13901_vm8  ;;  %vm13906_vm15 = vcmp.ge.s32.totalorder %v7446_v58, %v7304_v33  ;;  %v7911_v52 = vadd.s32 16, %v7294_v29  ;;  %v7914_v53 = vadd.s32 24, %v7294_v29 }
  0x2b   :  { %v13904_v50 = vsel %vm7880_vm13, 4294967295, %v13903_v50  ;;  %vm7890_vm14 = vmand %vm13906_vm15, %vm13905_vm10  ;;  %v7917_v54 = vadd.s32 272, %v7294_v29  ;;  %v7920_v55 = vadd.s32 280, %v7294_v29  ;;  %vm13911_vm13 = vcmp.lt.s32.totalorder %v7455_v59, %v7306_v34 }
  0x2c   :  { %13909 = vst [vmem:[#allocation9_spill] sm:$0xff] %v7914_v53  ;;  %vm13912_vm10 = vcmp.ge.s32.totalorder %v7455_v59, %v7304_v33  ;;  %v13913_v56 = vmov 0  ;;  %v7945_v57 = vadd.s32 128, %v7294_v29  ;;  %v7948_v58 = vadd.s32 136, %v7294_v29 }
  0x2d   :  { %13910 = vst [vmem:[#allocation10_spill] sm:$0xff] %v7920_v55  ;;  %vm7936_vm2 = vmand %vm13912_vm10, %vm13911_vm13  ;;  %vm13915_vm5 = vcmp.lt.s32.totalorder %v7464_v60, %v7306_v34  ;;  %vm13916_vm15 = vcmp.ge.s32.totalorder %v7464_v60, %v7304_v33  ;;  %v13917_v59 = vmov 0  ;;  %v7975_v0 = vadd.s32 384, %v7294_v29 }
  0x2e   :  { %v13914_v56 = vsel %vm7936_vm2, 4294967295, %v13913_v56  ;;  %vm7964_vm9 = vmand %vm13916_vm15, %vm13915_vm5  ;;  %vm13919_vm10 = vcmp.lt.s32.totalorder %v7483_v61, %v7306_v34  ;;  %vm13920_vm5 = vcmp.ge.s32.totalorder %v7483_v61, %v7304_v33  ;;  %v13921_v60 = vmov 0 }
  0x2f   :  { %v13918_v59 = vsel %vm7964_vm9, 4294967295, %v13917_v59  ;;  %vm7983_vm15 = vmand %vm13920_vm5, %vm13919_vm10  ;;  %vm13923_vm8 = vcmp.lt.s32.totalorder %v7486_v62, %v7306_v34  ;;  %vm13924_vm13 = vcmp.ge.s32.totalorder %v7486_v62, %v7304_v33  ;;  %v13925_v28 = vmov 0 }
  0x30   :  { %v13922_v60 = vsel %vm7983_vm15, 4294967295, %v13921_v60  ;;  %vm7993_vm6 = vmand %vm13924_vm13, %vm13923_vm8  ;;  %vm13927_vm7 = vcmp.lt.s32.totalorder %v7489_v63, %v7306_v34  ;;  %vm13928_vm3 = vcmp.ge.s32.totalorder %v7489_v63, %v7304_v33  ;;  %v13929_v61 = vmov 0 }
  0x31   :  { %v13926_v28 = vsel %vm7993_vm6, 4294967295, %v13925_v28  ;;  %vm8003_vm10 = vmand %vm13928_vm3, %vm13927_vm7  ;;  %vm13931_vm5 = vcmp.lt.s32.totalorder %v7492_v1, %v7306_v34  ;;  %vm13932_vm15 = vcmp.ge.s32.totalorder %v7492_v1, %v7304_v33  ;;  %v13933_v62 = vmov 0 }
  0x32   :  { %v13930_v61 = vsel %vm8003_vm10, 4294967295, %v13929_v61  ;;  %vm8013_vm8 = vmand %vm13932_vm15, %vm13931_vm5  ;;  %v8024_v63 = vadd.s32 392, %v7294_v29  ;;  %vm13936_vm3 = vcmp.lt.s32.totalorder %v7499_v2, %v7306_v34  ;;  %vm13937_vm15 = vcmp.ge.s32.totalorder %v7499_v2, %v7304_v33 }
  0x33   :  { %v13934_v62 = vsel %vm8013_vm8, 4294967295, %v13933_v62  ;;  %vm8032_vm5 = vmand %vm13937_vm15, %vm13936_vm3  ;;  %v13938_v1 = vmov 0  ;;  %vm13940_vm13 = vcmp.lt.s32.totalorder %v7502_v3, %v7306_v34  ;;  %vm13941_vm6 = vcmp.ge.s32.totalorder %v7502_v3, %v7304_v33 }
  0x34   :  { %13935 = vst [vmem:[#allocation11_spill] sm:$0xff] %v8024_v63  ;;  %v13939_v1 = vsel %vm8032_vm5, 4294967295, %v13938_v1  ;;  %vm8042_vm7 = vmand %vm13941_vm6, %vm13940_vm13  ;;  %v13942_v49 = vmov 0  ;;  %v8063_v2 = vadd.s32 8, %v7294_v29  ;;  %v8066_v3 = vadd.s32 256, %v7294_v29 }
  0x35   :  { %v13943_v49 = vsel %vm8042_vm7, 4294967295, %v13942_v49  ;;  %v8069_v53 = vadd.s32 264, %v7294_v29  ;;  %vm13951_vm8 = vcmp.lt.s32.totalorder %v7551_v8, %v7306_v34  ;;  %vm13952_vm7 = vcmp.ge.s32.totalorder %v7551_v8, %v7304_v33 }
  0x36   :  { %13944 = vst [vmem:[#allocation12_spill] sm:$0xff] %v8063_v2  ;;  %13945 = vst [vmem:[#allocation13_spill] sm:$0xff] %v8066_v3  ;;  %v13953_v55 = vmov 0  ;;  %v8096_v22 = vadd.s32 752, %v7294_v29  ;;  %v8099_v23 = vadd.s32 760, %v7294_v29  ;;  %vm13959_vm6 = vcmp.lt.s32.totalorder %v7580_v11, %v7306_v34 }
  0x37   :  { %13946 = vst [vmem:[#allocation14_spill] sm:$0xff] %v8069_v53  ;;  %vm8085_vm4 = vmand %vm13952_vm7, %vm13951_vm8  ;;  %vm13960_vm5 = vcmp.ge.s32.totalorder %v7580_v11, %v7304_v33  ;;  %v13961_v8 = vmov 0  ;;  %v8126_v27 = vadd.s32 1008, %v7294_v29  ;;  %vm13967_vm3 = vcmp.lt.s32.totalorder %v7609_v13, %v7306_v34 }
  0x38   :  { %v13954_v55 = vsel %vm8085_vm4, 4294967295, %v13953_v55  ;;  %vm8115_vm10 = vmand %vm13960_vm5, %vm13959_vm6  ;;  %vm13968_vm8 = vcmp.ge.s32.totalorder %v7609_v13, %v7304_v33  ;;  %v13969_v11 = vmov 0  ;;  %vm13973_vm6 = vcmp.ge.s32.totalorder %v7612_v14, %v7304_v33 }
  0x39   :  { %v13962_v8 = vsel %vm8115_vm10, 4294967295, %v13961_v8  ;;  %vm8142_vm7 = vmand %vm13968_vm8, %vm13967_vm3  ;;  %vm13972_vm10 = vcmp.lt.s32.totalorder %v7612_v14, %v7306_v34  ;;  %v13974_v40 = vmov 0  ;;  %vm13977_vm4 = vcmp.lt.s32.totalorder %v7615_v15, %v7306_v34 }
  0x3a   :  { %v13970_v11 = vsel %vm8142_vm7, 4294967295, %v13969_v11  ;;  %vm8152_vm13 = vmand %vm13973_vm6, %vm13972_vm10  ;;  %vm13978_vm15 = vcmp.ge.s32.totalorder %v7615_v15, %v7304_v33  ;;  %v13979_v13 = vmov 0  ;;  %vm13982_vm8 = vcmp.lt.s32.totalorder %v7618_v16, %v7306_v34 }
  0x3b   :  { %13971 = vst [vmem:[#allocation15_spill] sm:$0xff] %v13970_v11  ;;  %v13975_v40 = vsel %vm8152_vm13, 4294967295, %v13974_v40  ;;  %vm8162_vm3 = vmand %vm13978_vm15, %vm13977_vm4  ;;  %vm13983_vm7 = vcmp.ge.s32.totalorder %v7618_v16, %v7304_v33  ;;  %v13984_v14 = vmov 0  ;;  %v8181_v15 = vadd.s32 1016, %v7294_v29 }
  0x3c   :  { %13976 = vst [vmem:[#allocation16_spill] sm:$0xff] %v13975_v40  ;;  %v13980_v13 = vsel %vm8162_vm3, 4294967295, %v13979_v13  ;;  %vm8172_vm10 = vmand %vm13983_vm7, %vm13982_vm8  ;;  %v8187_v40 = vadd.s32 632, %v7294_v29  ;;  %vm13987_vm4 = vcmp.lt.s32.totalorder %v7635_v18, %v7306_v34  ;;  %vm13988_vm15 = vcmp.ge.s32.totalorder %v7635_v18, %v7304_v33 }
  0x3d   :  { %13981 = vst [vmem:[#allocation17_spill] sm:$0xff] %v13980_v13  ;;  %v13985_v14 = vsel %vm8172_vm10, 4294967295, %v13984_v14  ;;  %v8184_v13 = vadd.s32 624, %v7294_v29  ;;  %vm8195_vm7 = vmand %vm13988_vm15, %vm13987_vm4  ;;  %vm13992_vm8 = vcmp.lt.s32.totalorder %v7638_v19, %v7306_v34  ;;  %vm13993_vm6 = vcmp.ge.s32.totalorder %v7638_v19, %v7304_v33 }
  0x3e   :  { %13986 = vst [vmem:[#allocation18_spill] sm:$0xff] %v13985_v14  ;;  %v13989_v14 = vmov 0  ;;  %vm8205_vm13 = vmand %vm13993_vm6, %vm13992_vm8  ;;  %v13994_v63 = vmov 0  ;;  %v8226_v18 = vadd.s32 880, %v7294_v29  ;;  %v8229_v19 = vadd.s32 888, %v7294_v29 }
  0x3f   :  { %v13990_v14 = vsel %vm8195_vm7, 4294967295, %v13989_v14  ;;  %v13995_v63 = vsel %vm8205_vm13, 4294967295, %v13994_v63  ;;  %vm13997_vm3 = vcmp.lt.s32.totalorder %v7687_v24, %v7306_v34  ;;  %vm13998_vm7 = vcmp.ge.s32.totalorder %v7687_v24, %v7304_v33 }
  0x40   :  { %13991 = vst [vmem:[#allocation19_spill] sm:$0xff] %v13990_v14  ;;  %13996 = vst [vmem:[#allocation20_spill] sm:$0xff] %v13995_v63  ;;  %v13999_v2 = vmov 0  ;;  %v8250_v53 = vadd.s32 736, %v7294_v29  ;;  %v8253_v24 = vadd.s32 744, %v7294_v29  ;;  %vm14006_vm15 = vnez %v13899_v48 }
  0x41   :  { %vm8237_vm6 = vmand %vm13998_vm7, %vm13997_vm3  ;;  %vm14004_vm7 = vnez %v13891_v46  ;;  %vm14008_vm13 = vcmp.ge.s32.totalorder %v7736_v31, %v7304_v33  ;;  %vm14017_vm5 = vcmp.lt.s32.totalorder %v7778_v37, %v7306_v34  ;;  %vm14018_vm3 = vcmp.ge.s32.totalorder %v7778_v37, %v7304_v33 }
  0x42   :  { %v14000_v2 = vsel %vm8237_vm6, 4294967295, %v13999_v2  ;;  %vm14007_vm6 = vcmp.lt.s32.totalorder %v7736_v31, %v7306_v34  ;;  %v14015_v31 = vmov 0  ;;  %vm8301_vm8 = vmand %vm14018_vm3, %vm14017_vm5  ;;  %vm14022_vm4 = vcmp.lt.s32.totalorder %v7781_v38, %v7306_v34 }
  0x43   :  { %14001 = vst [vmem:[#allocation21_spill] sm:$0xff] %v14000_v2  ;;  %vm8271_vm0 = vmand %vm14008_vm13, %vm14007_vm6  ;;  %vm14013_vm13 = vcmp.lt.s32.totalorder %v7775_v36, %v7306_v34  ;;  %vm14014_vm6 = vcmp.ge.s32.totalorder %v7775_v36, %v7304_v33  ;;  %vm14023_vm2 = vcmp.ge.s32.totalorder %v7781_v38, %v7304_v33  ;;  %v14024_v36 = vmov 0 }
  0x44   :  { %vm8291_vm10 = vmand %vm14014_vm6, %vm14013_vm13  ;;  %vm14027_vm6 = vcmp.lt.s32.totalorder %v7784_v39, %v7306_v34  ;;  %v14029_v37 = vmov 0  ;;  %v8332_v38 = vadd.s32 992, %v7294_v29  ;;  %vm14034_vm3 = vcmp.lt.s32.totalorder %v7801_v41, %v7306_v34 }
  0x45   :  { %v14016_v31 = vsel %vm8291_vm10, 4294967295, %v14015_v31  ;;  %vm8311_vm13 = vmand %vm14023_vm2, %vm14022_vm4  ;;  %vm14028_vm10 = vcmp.ge.s32.totalorder %v7784_v39, %v7304_v33  ;;  %vm14032_vm4 = vnez %v13813_v6  ;;  %vm14035_vm2 = vcmp.ge.s32.totalorder %v7801_v41, %v7304_v33 }
  0x46   :  { %v14025_v36 = vsel %vm8311_vm13, 4294967295, %v14024_v36  ;;  %vm8321_vm5 = vmand %vm14028_vm10, %vm14027_vm6  ;;  %v14036_v39 = vmov 0  ;;  %v14040_v4 = vmov 0  ;;  %v8383_v5 = vadd.s32 1000, %v7294_v29 }
  0x47   :  { %14026 = vst [vmem:[#allocation25_spill] sm:$0xff] %v14025_v36  ;;  %v14030_v37 = vsel %vm8321_vm5, 4294967295, %v14029_v37  ;;  %vm14031_vm10 = vmpackc.low %vm7520_vm12, %vm7510_vm11  ;;  %vm14038_vm11 = vcmp.lt.s32.totalorder %v7804_v42, %v7306_v34  ;;  %vm14039_vm12 = vcmp.ge.s32.totalorder %v7804_v42, %v7304_v33  ;;  %v14050_v6 = vmov 0 }
  0x48   :  { %vm14033_vm6 = vmpackc.low %vm7540_vm1, %vm14032_vm4  ;;  %vm14042_vm4 = vnez %v13822_v10  ;;  %vm14048_vm1 = vcmp.lt.s32.totalorder %v7823_v44, %v7306_v34  ;;  %v8412_v7 = vadd.s32 608, %v7294_v29  ;;  %v14061_v41 = vmov 0 }
  0x49   :  { %v8442_v42 = vadd.s32 864, %v7294_v29  ;;  %vm14068_vm5 = vcmp.ge.s32.totalorder %v7911_v52, %v7304_v33  ;;  %v14153_v14 = vmov 0  ;;  %v8754_v48 = vadd.s32 848, %v7294_v29 }
  0x4a   :  { %v14200_v51 = vmov 0 }
  0x4e   :  { %v14187_v46 = vld [vmem:[#allocation25_spill] sm:$0xff] }
  0x7f   :  { %v6754_v30 = vpop.permute.xlu0 %6753 }
  0x80   :  { %v6756_v16 = vunpack.i.h.bf16 %v6754_v30  ;;  %v6755_v11 = vunpack.i.l.bf16 %v6754_v30  ;;  %v6765_v30 = vpop.permute.xlu1 %6764 }
  0x81   :  { %v6767_v2 = vunpack.i.h.bf16 %v6765_v30  ;;  %v6766_v63 = vunpack.i.l.bf16 %v6765_v30  ;;  %v14019_v30 = vmov 0 }
  0x82   :  { %v8255_v3 = vpack.c.bf16 %v6756_v16, %v6755_v11  ;;  %v14009_v11 = vmov 0  ;;  %v14020_v30 = vsel %vm8301_vm8, 4294967295, %v14019_v30  ;;  %vm8352_vm8 = vmand %vm14035_vm2, %vm14034_vm3  ;;  %vm14043_vm2 = vnez %v13818_v9 }
  0x83   :  { %v14010_v11 = vsel %vm8271_vm0, 4294967295, %v14009_v11  ;;  %v6759_v16 = vpop.permute.xlu0 %6758  ;;  %14021 = vst [vmem:[#allocation24_spill] sm:$0xff] %v14020_v30  ;;  %v14037_v39 = vsel %vm8352_vm8, 4294967295, %v14036_v39  ;;  %vm14044_vm3 = vmpackc.low %vm14042_vm4, %vm14043_vm2  ;;  %v8415_v9 = vadd.s32 616, %v7294_v29  ;;  %v8417_v10 = vpack.c.bf16 %v6767_v2, %v6766_v63  ;;  %v14071_v2 = vld [vmem:[#allocation9_spill] sm:$0xff] }
  0x84   :  { %14002 = vst [vmem:[#allocation22_spill] sm:$0xff] %v8255_v3  ;;  %14011 = vst [vmem:[#allocation23_spill] sm:$0xff] %v14010_v11  ;;  %v6761_v36 = vunpack.i.h.bf16 %v6759_v16  ;;  %v6760_v30 = vunpack.i.l.bf16 %v6759_v16  ;;  %5973 = vmatprep.subr.msk.bf16.mxu0 %vm14031_vm10, %v8255_v3  ;;  %6085 = vmatprep.subr.msk.bf16.mxu1 %vm14033_vm6, %v8255_v3  ;;  %vm14045_vm6 = vnez %v13830_v17  ;;  %v14058_v17 = vld [vmem:[#allocation8_spill] sm:$0xff]  ;;  %v14069_v63 = vmov 0  ;;  %v14150_v11 = vld [vmem:[#allocation13_spill] sm:$0xff] }
  0x85   :  { %vm8362_vm10 = vmand %vm14039_vm12, %vm14038_vm11  ;;  %5974 = vmatpush3.bf16.msk.msra.mxu0 %vm14044_vm3, %v8255_v3  ;;  %vm14046_vm11 = vnez %v13826_v12  ;;  %vm14049_vm12 = vcmp.ge.s32.totalorder %v7823_v44, %v7304_v33  ;;  %14052 = vst [vmem:[#allocation26_spill] sm:$0xff] %v8417_v10  ;;  %vm14059_vm3 = vcmp.lt.s32.totalorder %v14058_v17, %v7306_v34  ;;  %vm14060_vm4 = vcmp.ge.s32.totalorder %v14058_v17, %v7304_v33  ;;  %v6770_v44 = vpop.permute.xlu1 %6769 }
  0x86   :  { %v14041_v4 = vsel %vm8362_vm10, 4294967295, %v14040_v4  ;;  %vm14047_vm10 = vmpackc.low %vm14045_vm6, %vm14046_vm11  ;;  %v8419_v12 = vpack.c.bf16 %v6761_v36, %v6760_v30  ;;  %vm14073_vm6 = vcmp.ge.s32.totalorder %v14071_v2, %v7304_v33  ;;  %v14074_v16 = vmov 0  ;;  %v14080_v30 = vld [vmem:[#allocation10_spill] sm:$0xff] }
  0x87   :  { %6086 = vmatpush3.bf16.msk.msra.mxu1 %vm14047_vm10, %v8255_v3  ;;  %vm8403_vm8 = vmand %vm14049_vm12, %vm14048_vm1  ;;  %vm14077_vm11 = vcmp.ge.s32.totalorder %v7917_v54, %v7304_v33  ;;  %v14083_v36 = vmov 0  ;;  %v8500_v17 = vadd.s32 720, %v7294_v29  ;;  %v6771_v3 = vunpack.i.l.bf16 %v6770_v44 }
  0x88   :  { %v14051_v6 = vsel %vm8403_vm8, 4294967295, %v14050_v6  ;;  %14053 = vst [vmem:[#allocation27_spill] sm:$0xff] %v8419_v12  ;;  %vm8435_vm8 = vmand %vm14060_vm4, %vm14059_vm3  ;;  %vm14067_vm3 = vcmp.lt.s32.totalorder %v7911_v52, %v7306_v34  ;;  %vm14076_vm4 = vcmp.lt.s32.totalorder %v7917_v54, %v7306_v34  ;;  %v14078_v52 = vmov 0 }
  0x89   :  { %v14062_v41 = vsel %vm8435_vm8, 4294967295, %v14061_v41  ;;  %vm8458_vm1 = vmand %vm14068_vm5, %vm14067_vm3  ;;  %vm14072_vm8 = vcmp.lt.s32.totalorder %v14071_v2, %v7306_v34  ;;  %vm14081_vm3 = vcmp.lt.s32.totalorder %v14080_v30, %v7306_v34  ;;  %v8497_v54 = vadd.s32 872, %v7294_v29 }
  0x8a   :  { %v14070_v63 = vsel %vm8458_vm1, 4294967295, %v14069_v63  ;;  %vm8468_vm2 = vmand %vm14073_vm6, %vm14072_vm8  ;;  %vm14082_vm1 = vcmp.ge.s32.totalorder %v14080_v30, %v7304_v33  ;;  %v6772_v2 = vunpack.i.h.bf16 %v6770_v44  ;;  %v14089_v30 = vld [vmem:[#allocation4_spill] sm:$0xff]  ;;  %v14096_v44 = vmov 0 }
  0x8b   :  { %v14075_v16 = vsel %vm8468_vm2, 4294967295, %v14074_v16  ;;  %vm8478_vm5 = vmand %vm14077_vm11, %vm14076_vm4  ;;  %vm14087_vm11 = vnez %v13834_v20  ;;  %v14100_v20 = vmov 0  ;;  %vm14152_vm13 = vcmp.ge.s32.totalorder %v14150_v11, %v7304_v33 }
  0x8c   :  { %v14079_v52 = vsel %vm8478_vm5, 4294967295, %v14078_v52  ;;  %vm8488_vm8 = vmand %vm14082_vm1, %vm14081_vm3  ;;  %vm14086_vm1 = vnez %v13838_v21  ;;  %vm14090_vm3 = vnez %v14089_v30  ;;  %vm14095_vm5 = vcmp.ge.s32.totalorder %v7945_v57, %v7304_v33  ;;  %v6775_v21 = vpop.permute.xlu0 %6774  ;;  %v14123_v30 = vld [vmem:[#allocation16_spill] sm:$0xff] }
  0x8d   :  { %v14084_v36 = vsel %vm8488_vm8, 4294967295, %v14083_v36  ;;  %vm14088_vm4 = vmpackc.low %vm14086_vm1, %vm14087_vm11  ;;  %vm14094_vm8 = vcmp.lt.s32.totalorder %v7945_v57, %v7306_v34  ;;  %vm14098_vm1 = vcmp.lt.s32.totalorder %v7948_v58, %v7306_v34  ;;  %vm14099_vm11 = vcmp.ge.s32.totalorder %v7948_v58, %v7304_v33  ;;  %v14105_v57 = vld [vmem:[#allocation6_spill] sm:$0xff]  ;;  %v14107_v58 = vld [vmem:[#allocation5_spill] sm:$0xff] }
  0x8e   :  { %14085 = vst [vmem:[#allocation8_spill] sm:$0xff] %v14084_v36  ;;  %5975 = vmatprep.subr.msk.bf16.mxu0 %vm14088_vm4, %v8419_v12  ;;  %v14091_v36 = vld [vmem:[#allocation3_spill] sm:$0xff]  ;;  %vm8520_vm10 = vmand %vm14095_vm5, %vm14094_vm8  ;;  %vm14102_vm5 = vnez %v13856_v26  ;;  %vm14103_vm8 = vnez %v13852_v25  ;;  %v8567_v25 = vadd.s32 728, %v7294_v29  ;;  %vm14256_vm0 = vcmp.ge.s32.totalorder %v8415_v9, %v7304_v33 }
  0x8f   :  { %vm14092_vm2 = vnez %v14091_v36  ;;  %v14097_v44 = vsel %vm8520_vm10, 4294967295, %v14096_v44  ;;  %vm8530_vm4 = vmand %vm14099_vm11, %vm14098_vm1  ;;  %vm14106_vm1 = vnez %v14105_v57  ;;  %vm14108_vm11 = vnez %v14107_v58  ;;  %v14121_v26 = vld [vmem:[#allocation15_spill] sm:$0xff]  ;;  %v14125_v57 = vld [vmem:[#allocation17_spill] sm:$0xff] }
  0x90   :  { %vm14093_vm6 = vmpackc.low %vm14090_vm3, %vm14092_vm2  ;;  %v14101_v20 = vsel %vm8530_vm4, 4294967295, %v14100_v20  ;;  %vm14110_vm2 = vcmp.lt.s32.totalorder %v7975_v0, %v7306_v34  ;;  %v14112_v36 = vmov 0  ;;  %v14127_v58 = vld [vmem:[#allocation18_spill] sm:$0xff] }
  0x91   :  { %6087 = vmatprep.subr.msk.bf16.mxu1 %vm14093_vm6, %v8419_v12  ;;  %vm14104_vm3 = vmpackc.low %vm14102_vm5, %vm14103_vm8  ;;  %vm14111_vm6 = vcmp.ge.s32.totalorder %v7975_v0, %v7304_v33  ;;  %v14118_v0 = vld [vmem:[#allocation7_spill] sm:$0xff]  ;;  %vm14122_vm8 = vnez %v14121_v26  ;;  %v14302_v26 = vmov 0 }
  0x92   :  { %5976 = vmatpush3.bf16.msk.msra.mxu0 %vm14104_vm3, %v8419_v12  ;;  %vm14109_vm4 = vmpackc.low %vm14106_vm1, %vm14108_vm11  ;;  %vm14117_vm1 = vnez %v13883_v43  ;;  %vm14119_vm11 = vnez %v14118_v0  ;;  %vm14124_vm3 = vnez %v14123_v30  ;;  %v14135_v43 = vld [vmem:[#allocation20_spill] sm:$0xff]  ;;  %v14147_v0 = vmov 0  ;;  %v14284_v30 = vld [vmem:[#allocation19_spill] sm:$0xff] }
  0x93   :  { %6088 = vmatpush3.bf16.msk.msra.mxu1 %vm14109_vm4, %v8419_v12  ;;  %vm8556_vm10 = vmand %vm14111_vm6, %vm14110_vm2  ;;  %vm14114_vm4 = vnez %v13874_v35  ;;  %vm14115_vm2 = vnez %v13870_v32  ;;  %v14129_v32 = vld [vmem:[#allocation11_spill] sm:$0xff]  ;;  %v14132_v35 = vmov 0  ;;  %v14144_v12 = vld [vmem:[#allocation12_spill] sm:$0xff] }
  0x94   :  { %v14113_v36 = vsel %vm8556_vm10, 4294967295, %v14112_v36  ;;  %vm14116_vm6 = vmpackc.low %vm14114_vm4, %vm14115_vm2  ;;  %vm14130_vm4 = vcmp.lt.s32.totalorder %v14129_v32, %v7306_v34  ;;  %vm14131_vm2 = vcmp.ge.s32.totalorder %v14129_v32, %v7304_v33  ;;  %vm14136_vm10 = vnez %v14135_v43 }
  0x95   :  { %5977 = vmatprep.subr.msk.bf16.mxu0 %vm14116_vm6, %v8417_v10  ;;  %vm14120_vm5 = vmpackc.low %vm14117_vm1, %vm14119_vm11  ;;  %v14141_v32 = vmov 0  ;;  %vm14145_vm11 = vcmp.lt.s32.totalorder %v14144_v12, %v7306_v34  ;;  %vm14146_vm12 = vcmp.ge.s32.totalorder %v14144_v12, %v7304_v33  ;;  %v14159_v12 = vmov 0 }
  0x96   :  { %6089 = vmatprep.subr.msk.bf16.mxu1 %vm14120_vm5, %v8417_v10  ;;  %vm8595_vm6 = vmand %vm14131_vm2, %vm14130_vm4  ;;  %vm14139_vm2 = vcmp.lt.s32.totalorder %v7294_v29, %v7306_v34  ;;  %vm14140_vm5 = vcmp.ge.s32.totalorder %v7294_v29, %v7304_v33  ;;  %vm14151_vm4 = vcmp.lt.s32.totalorder %v14150_v11, %v7306_v34  ;;  %v8658_v11 = vadd.s32 976, %v7294_v29 }
  0x97   :  { %v14133_v35 = vsel %vm8595_vm6, 4294967295, %v14132_v35  ;;  %vm8619_vm1 = vmand %vm14140_vm5, %vm14139_vm2  ;;  %v6777_v43 = vunpack.i.h.bf16 %v6775_v21 }
  0x98   :  { %v14142_v32 = vsel %vm8619_vm1, 4294967295, %v14141_v32  ;;  %vm8629_vm9 = vmand %vm14146_vm12, %vm14145_vm11  ;;  %vm14168_vm11 = vcmp.ge.s32.totalorder %v8099_v23, %v7304_v33 }
  0x99   :  { %14143 = vst [vmem:[#allocation9_spill] sm:$0xff] %v14142_v32  ;;  %v14148_v0 = vsel %vm8629_vm9, 4294967295, %v14147_v0  ;;  %vm8639_vm5 = vmand %vm14152_vm13, %vm14151_vm4  ;;  %v14156_v32 = vld [vmem:[#allocation14_spill] sm:$0xff]  ;;  %vm14163_vm13 = vcmp.lt.s32.totalorder %v8096_v22, %v7306_v34 }
  0x9a   :  { %14149 = vst [vmem:[#allocation10_spill] sm:$0xff] %v14148_v0  ;;  %v14154_v14 = vsel %vm8639_vm5, 4294967295, %v14153_v14  ;;  %vm14157_vm2 = vcmp.lt.s32.totalorder %v14156_v32, %v7306_v34  ;;  %vm14158_vm1 = vcmp.ge.s32.totalorder %v14156_v32, %v7304_v33  ;;  %v8663_v0 = vpack.c.bf16 %v6772_v2, %v6771_v3  ;;  %v6780_v2 = vpop.permute.xlu1 %6779 }
  0x9b   :  { %14155 = vst [vmem:[#allocation4_spill] sm:$0xff] %v14154_v14  ;;  %vm8649_vm12 = vmand %vm14158_vm1, %vm14157_vm2  ;;  %v8661_v14 = vadd.s32 984, %v7294_v29  ;;  %v6776_v32 = vunpack.i.l.bf16 %v6775_v21  ;;  %vm14164_vm1 = vcmp.ge.s32.totalorder %v8096_v22, %v7304_v33  ;;  %vm14167_vm2 = vcmp.lt.s32.totalorder %v8099_v23, %v7306_v34 }
  0x9c   :  { %v14160_v12 = vsel %vm8649_vm12, 4294967295, %v14159_v12  ;;  %14162 = vst [vmem:[#allocation6_spill] sm:$0xff] %v8663_v0  ;;  %vm8671_vm4 = vmand %vm14164_vm1, %vm14163_vm13  ;;  %v14169_v3 = vmov 0  ;;  %vm14171_vm13 = vnez %v13887_v45  ;;  %vm14176_vm12 = vcmp.ge.s32.totalorder %v8126_v27, %v7304_v33 }
  0x9d   :  { %14161 = vst [vmem:[#allocation3_spill] sm:$0xff] %v14160_v12  ;;  %v14165_v12 = vmov 0  ;;  %vm8681_vm9 = vmand %vm14168_vm11, %vm14167_vm2  ;;  %vm14175_vm2 = vcmp.lt.s32.totalorder %v8126_v27, %v7306_v34  ;;  %v14177_v22 = vmov 0  ;;  %v8714_v23 = vadd.s32 592, %v7294_v29  ;;  %v14185_v27 = vld [vmem:[#allocation24_spill] sm:$0xff] }
  0x9e   :  { %v14166_v12 = vsel %vm8671_vm4, 4294967295, %v14165_v12  ;;  %v14170_v3 = vsel %vm8681_vm9, 4294967295, %v14169_v3  ;;  %vm14172_vm1 = vmpackc.low %vm14004_vm7, %vm14171_vm13  ;;  %vm14173_vm4 = vnez %v13895_v47  ;;  %v8717_v45 = vadd.s32 600, %v7294_v29 }
  0x9f   :  { %5978 = vmatpush3.bf16.msk.msra.mxu0 %vm14172_vm1, %v8417_v10  ;;  %vm14174_vm11 = vmpackc.low %vm14006_vm15, %vm14173_vm4  ;;  %vm14179_vm15 = vnez %v13904_v50  ;;  %vm14181_vm4 = vnez %v13918_v59  ;;  %vm14182_vm1 = vnez %v13914_v56  ;;  %v14192_v47 = vmov 0 }
  0xa0   :  { %6090 = vmatpush3.bf16.msk.msra.mxu1 %vm14174_vm11, %v8417_v10  ;;  %vm8705_vm9 = vmand %vm14176_vm12, %vm14175_vm2  ;;  %v8757_v50 = vadd.s32 856, %v7294_v29  ;;  %vm14202_vm2 = vcmp.lt.s32.totalorder %v8187_v40, %v7306_v34  ;;  %v14204_v56 = vmov 0  ;;  %v14208_v59 = vmov 0 }
  0xa1   :  { %v14178_v22 = vsel %vm8705_vm9, 4294967295, %v14177_v22  ;;  %vm14180_vm12 = vmpackc.low %vm7890_vm14, %vm14179_vm15  ;;  %vm14190_vm14 = vcmp.lt.s32.totalorder %v8181_v15, %v7306_v34  ;;  %vm14191_vm15 = vcmp.ge.s32.totalorder %v8181_v15, %v7304_v33  ;;  %vm14206_vm9 = vcmp.lt.s32.totalorder %v8226_v18, %v7306_v34 }
  0xa2   :  { %5979 = vmatprep.subr.msk.bf16.mxu0 %vm14180_vm12, %v8663_v0  ;;  %vm14183_vm11 = vmpackc.low %vm14181_vm4, %vm14182_vm1  ;;  %vm14198_vm4 = vcmp.lt.s32.totalorder %v8184_v13, %v7306_v34  ;;  %vm14199_vm1 = vcmp.ge.s32.totalorder %v8184_v13, %v7304_v33  ;;  %v8814_v13 = vadd.s32 704, %v7294_v29  ;;  %v8816_v15 = vpack.c.bf16 %v6777_v43, %v6776_v32  ;;  %v6785_v32 = vpop.permute.xlu0 %6784 }
  0xa3   :  { %6091 = vmatprep.subr.msk.bf16.mxu1 %vm14183_vm11, %v8663_v0  ;;  %vm8745_vm12 = vmand %vm14191_vm15, %vm14190_vm14  ;;  %vm14203_vm14 = vcmp.ge.s32.totalorder %v8187_v40, %v7304_v33  ;;  %vm14207_vm15 = vcmp.ge.s32.totalorder %v8226_v18, %v7304_v33  ;;  %v14212_v40 = vmov 0  ;;  %v6782_v18 = vunpack.i.h.bf16 %v6780_v2 }
  0xa4   :  { %v14193_v47 = vsel %vm8745_vm12, 4294967295, %v14192_v47  ;;  %vm8773_vm5 = vmand %vm14199_vm1, %vm14198_vm4  ;;  %vm14210_vm1 = vcmp.lt.s32.totalorder %v8229_v19, %v7306_v34  ;;  %14214 = vst [vmem:[#allocation5_spill] sm:$0xff] %v8816_v15  ;;  %v14217_v21 = vmov 0  ;;  %v14221_v43 = vmov 0 }
  0xa5   :  { %v14201_v51 = vsel %vm8773_vm5, 4294967295, %v14200_v51  ;;  %vm8783_vm11 = vmand %vm14203_vm14, %vm14202_vm2  ;;  %vm14211_vm5 = vcmp.ge.s32.totalorder %v8229_v19, %v7304_v33  ;;  %v6781_v19 = vunpack.i.l.bf16 %v6780_v2  ;;  %vm14220_vm14 = vcmp.ge.s32.totalorder %v8253_v24, %v7304_v33  ;;  %v6790_v2 = vpop.permute.xlu1 %6789 }
  0xa6   :  { %v14205_v56 = vsel %vm8783_vm11, 4294967295, %v14204_v56  ;;  %vm8793_vm4 = vmand %vm14207_vm15, %vm14206_vm9  ;;  %vm14216_vm15 = vcmp.ge.s32.totalorder %v8250_v53, %v7304_v33  ;;  %vm14219_vm11 = vcmp.lt.s32.totalorder %v8253_v24, %v7306_v34  ;;  %vm14227_vm7 = vnez %v13930_v61 }
  0xa7   :  { %v14209_v59 = vsel %vm8793_vm4, 4294967295, %v14208_v59  ;;  %vm8803_vm2 = vmand %vm14211_vm5, %vm14210_vm1  ;;  %vm14215_vm5 = vcmp.lt.s32.totalorder %v8250_v53, %v7306_v34  ;;  %vm14226_vm4 = vnez %v13934_v62  ;;  %v14231_v53 = vmov 0 }
  0xa8   :  { %v14213_v40 = vsel %vm8803_vm2, 4294967295, %v14212_v40  ;;  %vm8824_vm1 = vmand %vm14216_vm15, %vm14215_vm5  ;;  %vm14223_vm5 = vnez %v13926_v28  ;;  %vm14224_vm15 = vnez %v13922_v60  ;;  %vm14230_vm2 = vcmp.ge.s32.totalorder %v8332_v38, %v7304_v33  ;;  %v14242_v60 = vld [vmem:[#allocation8_spill] sm:$0xff] }
  0xa9   :  { %v14218_v21 = vsel %vm8824_vm1, 4294967295, %v14217_v21  ;;  %vm8834_vm9 = vmand %vm14220_vm14, %vm14219_vm11  ;;  %vm14229_vm14 = vcmp.lt.s32.totalorder %v8332_v38, %v7306_v34  ;;  %v124_v28 = vadd.s32 712, %v7294_v29  ;;  %v14253_v61 = vmov 0 }
  0xaa   :  { %v14222_v43 = vsel %vm8834_vm9, 4294967295, %v14221_v43  ;;  %vm14225_vm1 = vmpackc.low %vm14223_vm5, %vm14224_vm15  ;;  %vm14234_vm15 = vnez %v13939_v1  ;;  %vm14239_vm5 = vnez %v14070_v63  ;;  %v14257_v62 = vmov 0 }
  0xab   :  { %5980 = vmatpush3.bf16.msk.msra.mxu0 %vm14225_vm1, %v8663_v0  ;;  %vm14228_vm11 = vmpackc.low %vm14226_vm4, %vm14227_vm7  ;;  %vm14233_vm4 = vnez %v13943_v49  ;;  %vm14240_vm7 = vnez %v14075_v16  ;;  %v14246_v49 = vmov 0  ;;  %v14261_v1 = vmov 0  ;;  %v6793_v16 = vld [vmem:[%s13576_s1] ss:$48 sps:$4 sm:$0xff]  }
  0xac   :  { %6092 = vmatpush3.bf16.msk.msra.mxu1 %vm14228_vm11, %v8663_v0  ;;  %vm8858_vm9 = vmand %vm14230_vm2, %vm14229_vm14  ;;  %vm14236_vm11 = vnez %v13962_v8  ;;  %vm14237_vm14 = vnez %v13954_v55  ;;  %v155_v55 = vadd.s32 960, %v7294_v29  ;;  %v14265_v8 = vmov 0 }
  0xad   :  { %v14232_v53 = vsel %vm8858_vm9, 4294967295, %v14231_v53  ;;  %vm14235_vm2 = vmpackc.low %vm14233_vm4, %vm14234_vm15  ;;  %vm14244_vm4 = vcmp.lt.s32.totalorder %v8383_v5, %v7306_v34  ;;  %vm14245_vm15 = vcmp.ge.s32.totalorder %v8383_v5, %v7304_v33  ;;  %vm14249_vm9 = vnez %v14101_v20 }
  0xae   :  { %5981 = vmatprep.subr.msk.bf16.mxu0 %vm14235_vm2, %v8816_v15  ;;  %vm14238_vm1 = vmpackc.low %vm14236_vm11, %vm14237_vm14  ;;  %vm14252_vm11 = vcmp.ge.s32.totalorder %v8412_v7, %v7304_v33  ;;  %vm14255_vm14 = vcmp.lt.s32.totalorder %v8415_v9, %v7306_v34  ;;  %v156_v24 = vadd.s32 968, %v7294_v29  ;;  %v107_v38 = vadd.s32 576, %v7294_v29 }
  0xaf   :  { %6093 = vmatprep.subr.msk.bf16.mxu1 %vm14238_vm1, %v8816_v15  ;;  %vm8895_vm2 = vmand %vm14245_vm15, %vm14244_vm4  ;;  %vm14251_vm1 = vcmp.lt.s32.totalorder %v8412_v7, %v7306_v34  ;;  %vm14259_vm15 = vcmp.lt.s32.totalorder %v8442_v42, %v7306_v34  ;;  %vm14260_vm4 = vcmp.ge.s32.totalorder %v8442_v42, %v7304_v33  ;;  %v8960_v5 = vpack.c.bf16 %v6782_v18, %v6781_v19  ;;  %v14294_v18 = vld [vmem:[#allocation10_spill] sm:$0xff]  ;;  %v14296_v19 = vld [vmem:[#allocation4_spill] sm:$0xff] }
  0xb0   :  { %v14247_v49 = vsel %vm8895_vm2, 4294967295, %v14246_v49  ;;  %vm8920_vm13 = vmand %vm14252_vm11, %vm14251_vm1  ;;  %vm14263_vm11 = vcmp.lt.s32.totalorder %v8497_v54, %v7306_v34  ;;  %v6787_v7 = vunpack.i.h.bf16 %v6785_v32  ;;  %v6786_v9 = vunpack.i.l.bf16 %v6785_v32  ;;  %v14298_v32 = vld [vmem:[#allocation3_spill] sm:$0xff] }
  0xb1   :  { %v14254_v61 = vsel %vm8920_vm13, 4294967295, %v14253_v61  ;;  %vm8930_vm12 = vmand %vm14256_vm0, %vm14255_vm14  ;;  %vm14264_vm13 = vcmp.ge.s32.totalorder %v8497_v54, %v7304_v33  ;;  %v14269_v42 = vmov 0  ;;  %v14273_v54 = vmov 0 }
  0xb2   :  { %v14258_v62 = vsel %vm8930_vm12, 4294967295, %v14257_v62  ;;  %vm8940_vm1 = vmand %vm14260_vm4, %vm14259_vm15  ;;  %vm14268_vm4 = vcmp.ge.s32.totalorder %v8500_v17, %v7304_v33  ;;  %vm14272_vm12 = vcmp.ge.s32.totalorder %v8567_v25, %v7304_v33  ;;  %v6792_v0 = vunpack.i.h.bf16 %v6790_v2 }
  0xb3   :  { %v14262_v1 = vsel %vm8940_vm1, 4294967295, %v14261_v1  ;;  %vm8950_vm0 = vmand %vm14264_vm13, %vm14263_vm11  ;;  %vm14267_vm13 = vcmp.lt.s32.totalorder %v8500_v17, %v7306_v34  ;;  %vm14271_vm11 = vcmp.lt.s32.totalorder %v8567_v25, %v7306_v34  ;;  %v14281_v17 = vmov 0 }
  0xb4   :  { %v14266_v8 = vsel %vm8950_vm0, 4294967295, %v14265_v8  ;;  %vm8968_vm15 = vmand %vm14268_vm4, %vm14267_vm13  ;;  %vm14276_vm4 = vnez %v14127_v58  ;;  %vm14280_vm0 = vcmp.ge.s32.totalorder %v8658_v11, %v7304_v33  ;;  %v108_v25 = vadd.s32 584, %v7294_v29  ;;  %v14289_v58 = vld [vmem:[#allocation21_spill] sm:$0xff] }
  0xb5   :  { %v14270_v42 = vsel %vm8968_vm15, 4294967295, %v14269_v42  ;;  %vm8978_vm14 = vmand %vm14272_vm12, %vm14271_vm11  ;;  %vm14277_vm15 = vnez %v14125_v57  ;;  %vm14279_vm11 = vcmp.lt.s32.totalorder %v8658_v11, %v7306_v34  ;;  %v14287_v57 = vld [vmem:[#allocation23_spill] sm:$0xff]  ;;  %v14292_v11 = vld [vmem:[#allocation9_spill] sm:$0xff]  ;;  %vm14308_vm1 = vcmp.lt.s32.totalorder %v8714_v23, %v7306_v34 }
  0xb6   :  { %v14274_v54 = vsel %vm8978_vm14, 4294967295, %v14273_v54  ;;  %vm14275_vm13 = vmpackc.low %vm14124_vm3, %vm14122_vm8  ;;  %vm14312_vm8 = vcmp.lt.s32.totalorder %v8717_v45, %v7306_v34  ;;  %vm14313_vm3 = vcmp.ge.s32.totalorder %v8717_v45, %v7304_v33  ;;  %v14322_v45 = vmov 0 }
  0xb7   :  { %5982 = vmatpush3.bf16.msk.msra.mxu0 %vm14275_vm13, %v8816_v15  ;;  %vm14278_vm12 = vmpackc.low %vm14276_vm4, %vm14277_vm15  ;;  %vm14285_vm15 = vnez %v14284_v30  ;;  %v139_v30 = vadd.s32 832, %v7294_v29  ;;  %v6791_v10 = vunpack.i.l.bf16 %v6790_v2  ;;  %v106_v63 = vadd.s32 568, %v7294_v29 }
  0xb8   :  { %6094 = vmatpush3.bf16.msk.msra.mxu1 %vm14278_vm12, %v8816_v15  ;;  %vm9002_vm14 = vmand %vm14280_vm0, %vm14279_vm11  ;;  %vm14288_vm0 = vnez %v14287_v57  ;;  %vm14290_vm12 = vnez %v14289_v58  ;;  %v140_v57 = vadd.s32 840, %v7294_v29  ;;  %v14314_v58 = vmov 0 }
  0xb9   :  { %v14282_v17 = vsel %vm9002_vm14, 4294967295, %v14281_v17  ;;  %vm14286_vm4 = vmpackc.low %vm14136_vm10, %vm14285_vm15  ;;  %vm14300_vm10 = vcmp.lt.s32.totalorder %v8661_v14, %v7306_v34  ;;  %vm14301_vm15 = vcmp.ge.s32.totalorder %v8661_v14, %v7304_v33  ;;  %v14310_v14 = vmov 0 }
  0xba   :  { %5983 = vmatprep.subr.msk.bf16.mxu0 %vm14286_vm4, %v8960_v5  ;;  %vm14291_vm11 = vmpackc.low %vm14288_vm0, %vm14290_vm12  ;;  %vm14309_vm0 = vcmp.ge.s32.totalorder %v8714_v23, %v7304_v33  ;;  %vm14317_vm14 = vcmp.ge.s32.totalorder %v8754_v48, %v7304_v33  ;;  %v14318_v23 = vmov 0  ;;  %v9097_v15 = vpack.c.bf16 %v6787_v7, %v6786_v9  ;;  %v14411_v7 = vld [vmem:[#allocation22_spill] sm:$0xff] }
  0xbb   :  { %6095 = vmatprep.subr.msk.bf16.mxu1 %vm14291_vm11, %v8960_v5  ;;  %vm9037_vm4 = vmand %vm14301_vm15, %vm14300_vm10  ;;  %vm14316_vm15 = vcmp.lt.s32.totalorder %v8754_v48, %v7306_v34  ;;  %v121_v48 = vadd.s32 688, %v7294_v29  ;;  %vm14330_vm10 = vcmp.ge.s32.totalorder %v124_v28, %v7304_v33  ;;  %v137_v20 = vadd.s32 816, %v7294_v29 }
  0xbc   :  { %v14303_v26 = vsel %vm9037_vm4, 4294967295, %v14302_v26  ;;  %vm9059_vm12 = vmand %vm14309_vm0, %vm14308_vm1  ;;  %vm14320_vm0 = vcmp.lt.s32.totalorder %v8757_v50, %v7306_v34  ;;  %v193_v2 = vadd.s32 1264, %v7294_v29 }
  0xbd   :  { %v14311_v14 = vsel %vm9059_vm12, 4294967295, %v14310_v14  ;;  %vm9069_vm11 = vmand %vm14313_vm3, %vm14312_vm8  ;;  %vm14321_vm12 = vcmp.ge.s32.totalorder %v8757_v50, %v7304_v33  ;;  %v14327_v50 = vmov 0 }
  0xbe   :  { %v14315_v58 = vsel %vm9069_vm11, 4294967295, %v14314_v58  ;;  %vm9079_vm1 = vmand %vm14317_vm14, %vm14316_vm15  ;;  %vm14325_vm14 = vcmp.lt.s32.totalorder %v8814_v13, %v7306_v34  ;;  %vm14350_vm11 = vnez %v14205_v56  ;;  %v14447_v56 = vld [vmem:[#allocation27_spill] sm:$0xff] }
  0xbf   :  { %v14319_v23 = vsel %vm9079_vm1, 4294967295, %v14318_v23  ;;  %vm9089_vm8 = vmand %vm14321_vm12, %vm14320_vm0  ;;  %vm14326_vm12 = vcmp.ge.s32.totalorder %v8814_v13, %v7304_v33  ;;  %vm14329_vm0 = vcmp.lt.s32.totalorder %v124_v28, %v7306_v34  ;;  %vm14334_vm1 = vnez %v14016_v31 }
  0xc0   :  { %v14323_v45 = vsel %vm9089_vm8, 4294967295, %v14322_v45  ;;  %vm9105_vm15 = vmand %vm14326_vm12, %vm14325_vm14  ;;  %vm14333_vm8 = vnez %v14185_v27  ;;  %vm14336_vm14 = vnez %v14030_v37  ;;  %vm14337_vm12 = vnez %v14187_v46 }
  0xc1   :  { %14324 = vst [vmem:[#allocation7_spill] sm:$0xff] %v14323_v45  ;;  %v14328_v50 = vsel %vm9105_vm15, 4294967295, %v14327_v50  ;;  %vm9113_vm3 = vmand %vm14330_vm10, %vm14329_vm0  ;;  %v14331_v45 = vmov 0  ;;  %vm14339_vm10 = vcmp.lt.s32.totalorder %v155_v55, %v7306_v34  ;;  %vm14340_vm0 = vcmp.ge.s32.totalorder %v155_v55, %v7304_v33  ;;  %v6801_v55 = vld [vmem:[%s13576_s1 + $0x6c] ss:$48 sps:$4 sm:$0xff]  }
  0xc2   :  { %v14332_v45 = vsel %vm9113_vm3, 4294967295, %v14331_v45  ;;  %vm14335_vm6 = vmpackc.low %vm14333_vm8, %vm14334_vm1  ;;  %v14341_v13 = vmov 0  ;;  %v122_v31 = vadd.s32 696, %v7294_v29  ;;  %vm14344_vm8 = vnez %v14037_v39 }
  0xc3   :  { %5984 = vmatpush3.bf16.msk.msra.mxu0 %vm14335_vm6, %v8960_v5  ;;  %vm14338_vm15 = vmpackc.low %vm14336_vm14, %vm14337_vm12  ;;  %vm14343_vm6 = vnez %v14041_v4  ;;  %vm14346_vm14 = vnez %v14062_v41  ;;  %vm14347_vm12 = vnez %v14051_v6  ;;  %v14355_v37 = vmov 0 }
  0xc4   :  { %6096 = vmatpush3.bf16.msk.msra.mxu1 %vm14338_vm15, %v8960_v5  ;;  %vm9134_vm3 = vmand %vm14340_vm0, %vm14339_vm10  ;;  %v153_v39 = vadd.s32 944, %v7294_v29  ;;  %vm14358_vm1 = vnez %v14222_v43  ;;  %v14362_v4 = vmov 0  ;;  %v154_v6 = vadd.s32 952, %v7294_v29 }
  0xc5   :  { %v14342_v13 = vsel %vm9134_vm3, 4294967295, %v14341_v13  ;;  %vm14345_vm15 = vmpackc.low %vm14343_vm6, %vm14344_vm8  ;;  %vm14353_vm6 = vcmp.lt.s32.totalorder %v156_v24, %v7306_v34  ;;  %vm14354_vm8 = vcmp.ge.s32.totalorder %v156_v24, %v7304_v33  ;;  %v9191_v41 = vpack.c.bf16 %v6792_v0, %v6791_v10 }
  0xc6   :  { %5985 = vmatprep.subr.msk.bf16.mxu0 %vm14345_vm15, %v9097_v15  ;;  %vm14348_vm10 = vmpackc.low %vm14346_vm14, %vm14347_vm12  ;;  %vm14364_vm0 = vcmp.lt.s32.totalorder %v108_v25, %v7306_v34  ;;  %vm14365_vm3 = vcmp.ge.s32.totalorder %v108_v25, %v7304_v33  ;;  %v14366_v27 = vmov 0  ;;  %v105_v46 = vadd.s32 560, %v7294_v29 }
  0xc7   :  { %6097 = vmatprep.subr.msk.bf16.mxu1 %vm14348_vm10, %v9097_v15  ;;  %vm9165_vm15 = vmand %vm14354_vm8, %vm14353_vm6  ;;  %vm14357_vm10 = vnez %v14218_v21  ;;  %vm14360_vm6 = vcmp.lt.s32.totalorder %v107_v38, %v7306_v34  ;;  %vm14361_vm8 = vcmp.ge.s32.totalorder %v107_v38, %v7304_v33  ;;  %vm14369_vm12 = vnez %v14242_v60  ;;  %v6799_v60 = vld [vmem:[%s13576_s1 + $0x64] ss:$48 sps:$4 sm:$0xff]  }
  0xc8   :  { %v14356_v37 = vsel %vm9165_vm15, 4294967295, %v14355_v37  ;;  %vm9184_vm13 = vmand %vm14361_vm8, %vm14360_vm6  ;;  %vm14372_vm6 = vcmp.lt.s32.totalorder %v139_v30, %v7306_v34  ;;  %vm14373_vm8 = vcmp.ge.s32.totalorder %v139_v30, %v7304_v33  ;;  %v14374_v10 = vmov 0  ;;  %v14421_v9 = vld [vmem:[#allocation7_spill] sm:$0xff] }
  0xc9   :  { %v14363_v4 = vsel %vm9184_vm13, 4294967295, %v14362_v4  ;;  %vm9197_vm4 = vmand %vm14365_vm3, %vm14364_vm0  ;;  %vm14370_vm3 = vnez %v14079_v52  ;;  %v6796_v52 = vld [vmem:[%s13576_s1 + $0x8] ss:$48 sps:$4 sm:$0xff]   ;;  %v14399_v0 = vmov 0  ;;  %v119_v28 = vadd.s32 672, %v7294_v29 }
  0xca   :  { %v14367_v27 = vsel %vm9197_vm4, 4294967295, %v14366_v27  ;;  %vm14368_vm14 = vmpackc.low %vm14240_vm7, %vm14239_vm5  ;;  %vm14376_vm7 = vnez %v14097_v44  ;;  %v14387_v44 = vmov 0  ;;  %vm14402_vm5 = vnez %v14292_v11 }
  0xcb   :  { %5986 = vmatpush3.bf16.msk.msra.mxu0 %vm14368_vm14, %v9097_v15  ;;  %vm14371_vm0 = vmpackc.low %vm14369_vm12, %vm14370_vm3  ;;  %vm14378_vm12 = vnez %v14133_v35  ;;  %v138_v35 = vadd.s32 824, %v7294_v29  ;;  %vm14404_vm13 = vnez %v14298_v32  ;;  %v14409_v24 = vmov 0 }
  0xcc   :  { %6098 = vmatpush3.bf16.msk.msra.mxu1 %vm14371_vm0, %v9097_v15  ;;  %vm9220_vm4 = vmand %vm14373_vm8, %vm14372_vm6  ;;  %vm14379_vm6 = vnez %v14113_v36  ;;  %v14395_v36 = vmov 0  ;;  %vm14398_vm0 = vcmp.ge.s32.totalorder %v122_v31, %v7304_v33  ;;  %v120_v38 = vadd.s32 680, %v7294_v29 }
  0xcd   :  { %v14375_v10 = vsel %vm9220_vm4, 4294967295, %v14374_v10  ;;  %vm14377_vm14 = vmpackc.low %vm14249_vm9, %vm14376_vm7  ;;  %vm14397_vm9 = vcmp.lt.s32.totalorder %v122_v31, %v7306_v34  ;;  %vm14415_vm7 = vnez %v14193_v47  ;;  %v152_v47 = vadd.s32 936, %v7294_v29 }
  0xce   :  { %5987 = vmatprep.subr.msk.bf16.mxu0 %vm14377_vm14, %v9191_v41  ;;  %vm14380_vm8 = vmpackc.low %vm14378_vm12, %vm14379_vm6  ;;  %vm14385_vm12 = vcmp.lt.s32.totalorder %v140_v57, %v7306_v34  ;;  %vm14386_vm6 = vcmp.ge.s32.totalorder %v140_v57, %v7304_v33  ;;  %vm14407_vm14 = vcmp.lt.s32.totalorder %v153_v39, %v7306_v34  ;;  %vm14440_vm15 = vnez %v14213_v40  ;;  %v6804_v40 = vld [vmem:[%s13576_s1 + $0x68] ss:$48 sps:$4 sm:$0xff]  }
  0xcf   :  { %6099 = vmatprep.subr.msk.bf16.mxu1 %vm14380_vm8, %v9191_v41  ;;  %vm9257_vm8 = vmand %vm14386_vm6, %vm14385_vm12  ;;  %vm14393_vm12 = vcmp.lt.s32.totalorder %v121_v48, %v7306_v34  ;;  %vm14394_vm6 = vcmp.ge.s32.totalorder %v121_v48, %v7304_v33  ;;  %v14445_v25 = vmov 0  ;;  %v14458_v21 = vmov 0 }
  0xd0   :  { %v14388_v44 = vsel %vm9257_vm8, 4294967295, %v14387_v44  ;;  %vm9276_vm8 = vmand %vm14394_vm6, %vm14393_vm12  ;;  %vm14401_vm6 = vnez %v14294_v18  ;;  %v104_v43 = vadd.s32 552, %v7294_v29  ;;  %v135_v11 = vadd.s32 800, %v7294_v29 }
  0xd1   :  { %v14396_v36 = vsel %vm9276_vm8, 4294967295, %v14395_v36  ;;  %vm9287_vm3 = vmand %vm14398_vm0, %vm14397_vm9  ;;  %vm14405_vm9 = vnez %v14296_v19  ;;  %v14477_v18 = vmov 0  ;;  %v118_v19 = vadd.s32 664, %v7294_v29 }
  0xd2   :  { %v14400_v0 = vsel %vm9287_vm3, 4294967295, %v14399_v0  ;;  %vm14403_vm4 = vmpackc.low %vm14401_vm6, %vm14402_vm5  ;;  %vm14408_vm5 = vcmp.ge.s32.totalorder %v153_v39, %v7304_v33  ;;  %vm14434_vm6 = vcmp.lt.s32.totalorder %v106_v63, %v7306_v34  ;;  %vm14435_vm3 = vcmp.ge.s32.totalorder %v106_v63, %v7304_v33  ;;  %v6811_v39 = vld [vmem:[%s13576_s1 + $0x124] ss:$48 sps:$4 sm:$0xff]  }
  0xd3   :  { %5988 = vmatpush3.bf16.msk.msra.mxu0 %vm14403_vm4, %v9191_v41  ;;  %vm14406_vm0 = vmpackc.low %vm14404_vm13, %vm14405_vm9  ;;  %vm14412_vm9 = vnez %v14170_v3  ;;  %v151_v3 = vadd.s32 928, %v7294_v29  ;;  %vm347_vm13 = vcmp.ge.s32.totalorder %v152_v47, %v7304_v33  ;;  %v14503_v32 = vmov 0 }
  0xd4   :  { %6100 = vmatpush3.bf16.msk.msra.mxu1 %vm14406_vm0, %v9191_v41  ;;  %vm9316_vm4 = vmand %vm14408_vm5, %vm14407_vm14  ;;  %vm14413_vm0 = vnez %v14166_v12  ;;  %vm14416_vm14 = vnez %v14178_v22  ;;  %v14425_v12 = vmov 0  ;;  %v149_v30 = vadd.s32 912, %v7294_v29  ;;  %v6823_v22 = vld [vmem:[%s13576_s1 + $0x1e4] ss:$48 sps:$4 sm:$0xff]  }
  0xd5   :  { %v14410_v24 = vsel %vm9316_vm4, 4294967295, %v14409_v24  ;;  %vm14414_vm12 = vmpackc.low %vm14412_vm9, %vm14413_vm0  ;;  %vm14423_vm9 = vcmp.lt.s32.totalorder %v154_v6, %v7306_v34  ;;  %v14512_v57 = vmov 0  ;;  %v101_v48 = vadd.s32 528, %v7294_v29 }
  0xd6   :  { %6197 = vmatprep.subr.msk.bf16.mxu0 %vm14414_vm12, %v14411_v7  ;;  %vm14417_vm5 = vmpackc.low %vm14415_vm7, %vm14416_vm14  ;;  %vm14424_vm12 = vcmp.ge.s32.totalorder %v154_v6, %v7304_v33  ;;  %2393 = vmatmul.mubr.bf16.vlgmr.msra.gmra.mxu0 %v6793_v16  ;;  %vm14438_vm7 = vnez %v14201_v51  ;;  %v103_v51 = vadd.s32 544, %v7294_v29  ;;  %v102_v31 = vadd.s32 536, %v7294_v29  ;;  %v6815_v16 = vld [vmem:[%s13576_s1 + $0x120] ss:$48 sps:$4 sm:$0xff]  }
  0xd7   :  { %6309 = vmatprep.subr.msk.bf16.mxu1 %vm14417_vm5, %v14411_v7  ;;  %vm9347_vm0 = vmand %vm14424_vm12, %vm14423_vm9  ;;  %vm14430_vm9 = vcmp.lt.s32.totalorder %v105_v46, %v7306_v34  ;;  %vm14431_vm12 = vcmp.ge.s32.totalorder %v105_v46, %v7304_v33  ;;  %2554 = vmatmul.mubr.bf16.vlgmr.msra.gmra.mxu1 %v6796_v52  ;;  %vm14441_vm5 = vnez %v14209_v59  ;;  %v6803_v59 = vld [vmem:[%s13576_s1 + $0x60] ss:$48 sps:$4 sm:$0xff]   ;;  %v133_v6 = vadd.s32 784, %v7294_v29  ;;  %v6816_v52 = vld [vmem:[%s13576_s1 + $0x128] ss:$48 sps:$4 sm:$0xff]  }
  0xd8   :  { %v14426_v12 = vsel %vm9347_vm0, 4294967295, %v14425_v12  ;;  %vm9366_vm8 = vmand %vm14431_vm12, %vm14430_vm9  ;;  %vm14444_vm9 = vcmp.ge.s32.totalorder %v137_v20, %v7304_v33  ;;  %vm346_vm12 = vcmp.ge.s32.totalorder %v151_v3, %v7304_v33  ;;  %2400 = vmatprep.mubr.bf16.mxu0 %v6799_v60  ;;  %2561 = vmatprep.mubr.bf16.mxu1 %v6801_v55  ;;  %vm14475_vm0 = vnez %v14262_v1 }
  0xd9   :  { %vm9377_vm2 = vmand %vm14435_vm3, %vm14434_vm6  ;;  %vm14443_vm6 = vcmp.lt.s32.totalorder %v137_v20, %v7306_v34  ;;  %v14488_v1 = vmov 0  ;;  %v134_v46 = vadd.s32 792, %v7294_v29  ;;  %v115_v63 = vadd.s32 640, %v7294_v29 }
  0xda   :  { %vm14439_vm14 = vmpackc.low %vm14350_vm11, %vm14438_vm7  ;;  %vm14449_vm7 = vnez %v14247_v49  ;;  %vm540_vm11 = vcmp.lt.s32.totalorder %v151_v3, %v7306_v34  ;;  %v14469_v49 = vmov 0  ;;  %v116_v20 = vadd.s32 648, %v7294_v29  ;;  %v6822_v3 = vld [vmem:[%s13576_s1 + $0x188] ss:$48 sps:$4 sm:$0xff]  }
  0xdb   :  { %6198 = vmatpush3.bf16.msk.msra.mxu0 %vm14439_vm14, %v14411_v7  ;;  %vm14442_vm3 = vmpackc.low %vm14440_vm15, %vm14441_vm5  ;;  %vm14450_vm14 = vnez %v14232_v53  ;;  %v14465_v53 = vmov 0  ;;  %v148_v60 = vadd.s32 904, %v7294_v29  ;;  %v99_v55 = vadd.s32 512, %v7294_v29 }
  0xdc   :  { %6310 = vmatpush3.bf16.msk.msra.mxu1 %vm14442_vm3, %v14411_v7  ;;  %vm9399_vm4 = vmand %vm14444_vm9, %vm14443_vm6  ;;  %vm14464_vm9 = vcmp.ge.s32.totalorder %v119_v28, %v7304_v33  ;;  %vm14468_vm3 = vcmp.ge.s32.totalorder %v120_v38, %v7304_v33  ;;  %vm14474_vm6 = vnez %v14266_v8  ;;  %v6805_v8 = vld [vmem:[%s13576_s1 + $0xc4] ss:$48 sps:$4 sm:$0xff]  }
  0xdd   :  { %v14446_v25 = vsel %vm9399_vm4, 4294967295, %v14445_v25  ;;  %vm14448_vm15 = vmpackc.low %vm14358_vm1, %vm14357_vm10  ;;  %vm14467_vm4 = vcmp.lt.s32.totalorder %v120_v38, %v7306_v34  ;;  %v131_v38 = vadd.s32 768, %v7294_v29 }
  0xde   :  { %6199 = vmatprep.subr.msk.bf16.mxu0 %vm14448_vm15, %v14447_v56  ;;  %vm14451_vm5 = vmpackc.low %vm14449_vm7, %vm14450_vm14  ;;  %vm14456_vm7 = vcmp.lt.s32.totalorder %v138_v35, %v7306_v34  ;;  %vm14457_vm14 = vcmp.ge.s32.totalorder %v138_v35, %v7304_v33  ;;  %2401 = vmatmul.mubr.bf16.gmra.mxu0 %v6803_v59  ;;  %v6817_v35 = vld [vmem:[%s13576_s1 + $0x184] ss:$48 sps:$4 sm:$0xff]   ;;  %v226_v59 = vadd.s32 1528, %v7294_v29 }
  0xdf   :  { %6311 = vmatprep.subr.msk.bf16.mxu1 %vm14451_vm5, %v14447_v56  ;;  %vm9436_vm5 = vmand %vm14457_vm14, %vm14456_vm7  ;;  %vm14463_vm14 = vcmp.lt.s32.totalorder %v119_v28, %v7306_v34  ;;  %2562 = vmatmul.mubr.bf16.gmra.mxu1 %v6804_v40  ;;  %v6819_v28 = vld [vmem:[%s13576_s1 + $0x18c] ss:$48 sps:$4 sm:$0xff]   ;;  %v6827_v40 = vld [vmem:[%s13576_s1 + $0x1e0] ss:$48 sps:$4 sm:$0xff]  }
  0xe0   :  { %v14459_v21 = vsel %vm9436_vm5, 4294967295, %v14458_v21  ;;  %vm9455_vm1 = vmand %vm14464_vm9, %vm14463_vm14  ;;  %vm541_vm5 = vcmp.lt.s32.totalorder %v152_v47, %v7306_v34  ;;  %vm14471_vm9 = vnez %v14258_v62  ;;  %vm14472_vm14 = vnez %v14254_v61  ;;  %v14479_v61 = vld [vmem:[#allocation26_spill] sm:$0xff]  ;;  %2408 = vmatprep.mubr.bf16.mxu0 %v6805_v8  ;;  %v6825_v47 = vld [vmem:[%s13576_s1 + $0x1ec] ss:$48 sps:$4 sm:$0xff]  }
  0xe1   :  { %v14466_v53 = vsel %vm9455_vm1, 4294967295, %v14465_v53  ;;  %vm9465_vm10 = vmand %vm14468_vm3, %vm14467_vm4  ;;  %v136_v62 = vadd.s32 808, %v7294_v29  ;;  %vm14502_vm1 = vcmp.ge.s32.totalorder %v104_v43, %v7304_v33  ;;  %v6840_v8 = vld [vmem:[%s13576_s1 + $0x2a8] ss:$48 sps:$4 sm:$0xff]  }
  0xe2   :  { %v14470_v49 = vsel %vm9465_vm10, 4294967295, %v14469_v49  ;;  %vm14473_vm7 = vmpackc.low %vm14471_vm9, %vm14472_vm14  ;;  %vm14481_vm9 = vnez %v14270_v42  ;;  %v6807_v42 = vld [vmem:[%s13576_s1 + $0xcc] ss:$48 sps:$4 sm:$0xff]  }
  0xe3   :  { %6200 = vmatpush3.bf16.msk.msra.mxu0 %vm14473_vm7, %v14447_v56  ;;  %vm14476_vm15 = vmpackc.low %vm14474_vm6, %vm14475_vm0  ;;  %vm14480_vm7 = vnez %v14274_v54  ;;  %vm14483_vm0 = vnez %v14303_v26  ;;  %v117_v54 = vadd.s32 656, %v7294_v29  ;;  %vm330_vm6 = vcmp.ge.s32.totalorder %v135_v11, %v7304_v33  ;;  %v14505_v26 = vld [vmem:[#allocation6_spill] sm:$0xff]  ;;  %2569 = vmatprep.mubr.bf16.mxu1 %v6807_v42 }
  0xe4   :  { %6312 = vmatpush3.bf16.msk.msra.mxu1 %vm14476_vm15, %v14447_v56  ;;  %vm9482_vm4 = vmand %vm346_vm12, %vm540_vm11  ;;  %vm14484_vm12 = vnez %v14282_v17  ;;  %v14494_v17 = vmov 0  ;;  %vm331_vm15 = vcmp.ge.s32.totalorder %v136_v62, %v7304_v33  ;;  %vm525_vm3 = vcmp.lt.s32.totalorder %v136_v62, %v7306_v34  ;;  %v6837_v62 = vld [vmem:[%s13576_s1 + $0x2ac] ss:$48 sps:$4 sm:$0xff]   ;;  %v6841_v42 = vld [vmem:[%s13576_s1 + $0x304] ss:$48 sps:$4 sm:$0xff]  }
  0xe5   :  { %v14478_v18 = vsel %vm9482_vm4, 4294967295, %v14477_v18  ;;  %vm14482_vm14 = vmpackc.low %vm14480_vm7, %vm14481_vm9  ;;  %vm493_vm9 = vcmp.lt.s32.totalorder %v104_v43, %v7306_v34  ;;  %vm14497_vm7 = vnez %v14311_v14  ;;  %v150_v14 = vadd.s32 920, %v7294_v29  ;;  %v6829_v43 = vld [vmem:[%s13576_s1 + $0x244] ss:$48 sps:$4 sm:$0xff]  }
  0xe6   :  { %6201 = vmatprep.subr.msk.bf16.mxu0 %vm14482_vm14, %v14479_v61  ;;  %vm14485_vm11 = vmpackc.low %vm14483_vm0, %vm14484_vm12  ;;  %vm14492_vm12 = vcmp.lt.s32.totalorder %v103_v51, %v7306_v34  ;;  %vm14496_vm0 = vnez %v14315_v58  ;;  %v6809_v58 = vld [vmem:[%s13576_s1 + $0xc0] ss:$48 sps:$4 sm:$0xff]  }
  0xe7   :  { %6313 = vmatprep.subr.msk.bf16.mxu1 %vm14485_vm11, %v14479_v61  ;;  %vm9509_vm4 = vmand %vm347_vm13, %vm541_vm5  ;;  %vm14493_vm11 = vcmp.ge.s32.totalorder %v103_v51, %v7304_v33  ;;  %vm524_vm13 = vcmp.lt.s32.totalorder %v135_v11, %v7306_v34  ;;  %2409 = vmatmul.mubr.bf16.gmra.mxu0 %v6809_v58  ;;  %v225_v51 = vadd.s32 1520, %v7294_v29  ;;  %v6834_v11 = vld [vmem:[%s13576_s1 + $0x248] ss:$48 sps:$4 sm:$0xff]   ;;  %v6853_v58 = vld [vmem:[%s13576_s1 + $0x3c4] ss:$48 sps:$4 sm:$0xff]  }
  0xe8   :  { %v14489_v1 = vsel %vm9509_vm4, 4294967295, %v14488_v1  ;;  %vm9534_vm10 = vmand %vm14493_vm11, %vm14492_vm12  ;;  %vm14499_vm4 = vnez %v14421_v9  ;;  %vm14500_vm12 = vnez %v14319_v23  ;;  %v6810_v23 = vld [vmem:[%s13576_s1 + $0xc8] ss:$48 sps:$4 sm:$0xff]   ;;  %2416 = vmatprep.mubr.bf16.mxu0 %v6811_v39  ;;  %v6821_v9 = vld [vmem:[%s13576_s1 + $0x180] ss:$48 sps:$4 sm:$0xff]  }
  0xe9   :  { %v14495_v17 = vsel %vm9534_vm10, 4294967295, %v14494_v17  ;;  %vm14498_vm5 = vmpackc.low %vm14496_vm0, %vm14497_vm7  ;;  %vm14506_vm7 = vnez %v14332_v45  ;;  %v14514_v45 = vmov 0  ;;  %vm14520_vm10 = vnez %v14375_v10  ;;  %2570 = vmatmul.mubr.bf16.gmra.mxu1 %v6810_v23  ;;  %v6855_v23 = vld [vmem:[%s13576_s1 + $0x3cc] ss:$48 sps:$4 sm:$0xff]   ;;  %v6864_v39 = vld [vmem:[%s13576_s1 + $0x428] ss:$48 sps:$4 sm:$0xff]  }
  0xea   :  { %6202 = vmatpush3.bf16.msk.msra.mxu0 %vm14498_vm5, %v14479_v61  ;;  %vm14501_vm11 = vmpackc.low %vm14499_vm4, %vm14500_vm12  ;;  %vm14507_vm5 = vnez %v14328_v50  ;;  %vm14509_vm4 = vnez %v14356_v37  ;;  %vm14510_vm12 = vnez %v14342_v13  ;;  %v14522_v50 = vld [vmem:[#allocation5_spill] sm:$0xff]  ;;  %v6859_v13 = vld [vmem:[%s13576_s1 + $0x424] ss:$48 sps:$4 sm:$0xff]   ;;  %v9894_v10 = vadd.s32 1144, %v7294_v29 }
  0xeb   :  { %6314 = vmatpush3.bf16.msk.msra.mxu1 %vm14501_vm11, %v14479_v61  ;;  %vm9555_vm14 = vmand %vm14502_vm1, %vm493_vm9  ;;  %vm14519_vm9 = vnez %v14388_v44  ;;  %v14547_v44 = vmov 0  ;;  %v6863_v37 = vld [vmem:[%s13576_s1 + $0x420] ss:$48 sps:$4 sm:$0xff]  }
  0xec   :  { %v14504_v32 = vsel %vm9555_vm14, 4294967295, %v14503_v32  ;;  %vm14508_vm0 = vmpackc.low %vm14506_vm7, %vm14507_vm5  ;;  %vm312_vm7 = vcmp.ge.s32.totalorder %v117_v54, %v7304_v33  ;;  %vm506_vm5 = vcmp.lt.s32.totalorder %v117_v54, %v7306_v34  ;;  %vm14523_vm14 = vnez %v14400_v0  ;;  %v6843_v54 = vld [vmem:[%s13576_s1 + $0x30c] ss:$48 sps:$4 sm:$0xff]  }
  0xed   :  { %6203 = vmatprep.subr.msk.bf16.mxu0 %vm14508_vm0, %v14505_v26  ;;  %vm14511_vm1 = vmpackc.low %vm14509_vm4, %vm14510_vm12  ;;  %vm14516_vm4 = vnez %v14367_v27  ;;  %vm14517_vm12 = vnez %v14363_v4  ;;  %v6813_v4 = vld [vmem:[%s13576_s1 + $0x12c] ss:$48 sps:$4 sm:$0xff]   ;;  %v14537_v27 = vmov 0  ;;  %v147_v0 = vadd.s32 896, %v7294_v29 }
  0xee   :  { %6315 = vmatprep.subr.msk.bf16.mxu1 %vm14511_vm1, %v14505_v26  ;;  %vm9578_vm11 = vmand %vm330_vm6, %vm524_vm13  ;;  %vm313_vm6 = vcmp.ge.s32.totalorder %v118_v19, %v7304_v33  ;;  %vm507_vm13 = vcmp.lt.s32.totalorder %v118_v19, %v7306_v34  ;;  %2577 = vmatprep.mubr.bf16.mxu1 %v6813_v4  ;;  %v6846_v19 = vld [vmem:[%s13576_s1 + $0x308] ss:$48 sps:$4 sm:$0xff]   ;;  %v6865_v4 = vld [vmem:[%s13576_s1 + $0x484] ss:$48 sps:$4 sm:$0xff]  }
  0xef   :  { %v14513_v57 = vsel %vm9578_vm11, 4294967295, %v14512_v57  ;;  %vm9591_vm0 = vmand %vm331_vm15, %vm525_vm3  ;;  %vm344_vm15 = vcmp.ge.s32.totalorder %v149_v30, %v7304_v33  ;;  %vm538_vm11 = vcmp.lt.s32.totalorder %v149_v30, %v7306_v34  ;;  %2417 = vmatmul.mubr.bf16.gmra.mxu0 %v6815_v16  ;;  %v6849_v30 = vld [vmem:[%s13576_s1 + $0x36c] ss:$48 sps:$4 sm:$0xff]   ;;  %v6871_v16 = vld [vmem:[%s13576_s1 + $0x4e4] ss:$48 sps:$4 sm:$0xff]  }
  0xf0   :  { %v14515_v45 = vsel %vm9591_vm0, 4294967295, %v14514_v45  ;;  %vm14518_vm1 = vmpackc.low %vm14516_vm4, %vm14517_vm12  ;;  %vm14524_vm4 = vnez %v14396_v36  ;;  %2424 = vmatprep.mubr.bf16.mxu0 %v6817_v35  ;;  %v9912_v36 = vadd.s32 1248, %v7294_v29  ;;  %v9915_v35 = vadd.s32 1256, %v7294_v29 }
  0xf1   :  { %6204 = vmatpush3.bf16.msk.msra.mxu0 %vm14518_vm1, %v14505_v26  ;;  %vm14521_vm3 = vmpackc.low %vm14519_vm9, %vm14520_vm10  ;;  %vm14526_vm1 = vnez %v14426_v12  ;;  %vm14527_vm10 = vnez %v14410_v24  ;;  %2578 = vmatmul.mubr.bf16.gmra.mxu1 %v6816_v52  ;;  %v100_v24 = vadd.s32 520, %v7294_v29  ;;  %v132_v12 = vadd.s32 776, %v7294_v29 }
  0xf2   :  { %6316 = vmatpush3.bf16.msk.msra.mxu1 %vm14521_vm3, %v14505_v26  ;;  %vm14525_vm12 = vmpackc.low %vm14523_vm14, %vm14524_vm4  ;;  %vm345_vm14 = vcmp.ge.s32.totalorder %v150_v14, %v7304_v33  ;;  %vm539_vm4 = vcmp.lt.s32.totalorder %v150_v14, %v7306_v34  ;;  %2585 = vmatprep.mubr.bf16.mxu1 %v6819_v28  ;;  %v6852_v14 = vld [vmem:[%s13576_s1 + $0x368] ss:$48 sps:$4 sm:$0xff]   ;;  %v9903_v52 = vadd.s32 1392, %v7294_v29  ;;  %v9927_v28 = vadd.s32 1512, %v7294_v29 }
  0xf3   :  { %6205 = vmatprep.subr.msk.bf16.mxu0 %vm14525_vm12, %v14522_v50  ;;  %vm14528_vm9 = vmpackc.low %vm14526_vm1, %vm14527_vm10  ;;  %vm296_vm10 = vcmp.ge.s32.totalorder %v101_v48, %v7304_v33 }
  0xf4   :  { %6317 = vmatprep.subr.msk.bf16.mxu1 %vm14528_vm9, %v14522_v50  ;;  %vm9626_vm3 = vmand %vm312_vm7, %vm506_vm5  ;;  %vm490_vm9 = vcmp.lt.s32.totalorder %v101_v48, %v7306_v34  ;;  %v6858_v48 = vld [vmem:[%s13576_s1 + $0x3c8] ss:$48 sps:$4 sm:$0xff]  }
  0xf5   :  { %vm9633_vm0 = vmand %vm313_vm6, %vm507_vm13  ;;  %vm14534_vm6 = vnez %v14459_v21  ;;  %vm14535_vm13 = vnez %v14446_v25  ;;  %v194_v25 = vadd.s32 1272, %v7294_v29  ;;  %v6828_v21 = vld [vmem:[%s13576_s1 + $0x1e8] ss:$48 sps:$4 sm:$0xff]  }
  0xf6   :  { %vm14533_vm5 = vmpackc.low %vm9377_vm2, %vm9366_vm8  ;;  %vm14539_vm2 = vnez %v14470_v49  ;;  %vm14540_vm8 = vnez %v14466_v53  ;;  %v6831_v53 = vld [vmem:[%s13576_s1 + $0x24c] ss:$48 sps:$4 sm:$0xff]   ;;  %v6833_v49 = vld [vmem:[%s13576_s1 + $0x240] ss:$48 sps:$4 sm:$0xff]  }
  0xf7   :  { %6206 = vmatpush3.bf16.msk.msra.mxu0 %vm14533_vm5, %v14522_v50  ;;  %vm14536_vm12 = vmpackc.low %vm14534_vm6, %vm14535_vm13  ;;  %vm14542_vm6 = vnez %v14489_v1  ;;  %v6839_v1 = vld [vmem:[%s13576_s1 + $0x2a0] ss:$48 sps:$4 sm:$0xff]  }
  0xf8   :  { %6318 = vmatpush3.bf16.msk.msra.mxu1 %vm14536_vm12, %v14522_v50  ;;  %vm9662_vm1 = vmand %vm344_vm15, %vm538_vm11  ;;  %vm14543_vm11 = vnez %v14478_v18  ;;  %vm297_vm12 = vcmp.ge.s32.totalorder %v102_v31, %v7304_v33  ;;  %2425 = vmatmul.mubr.bf16.gmra.mxu0 %v6821_v9  ;;  %v6835_v18 = vld [vmem:[%s13576_s1 + $0x2a4] ss:$48 sps:$4 sm:$0xff]   ;;  %v9964_v9 = vadd.s32 1384, %v7294_v29 }
  0xf9   :  { %v14538_v27 = vsel %vm9662_vm1, 4294967295, %v14537_v27  ;;  %vm14541_vm5 = vmpackc.low %vm14539_vm2, %vm14540_vm8  ;;  %vm491_vm2 = vcmp.lt.s32.totalorder %v102_v31, %v7306_v34  ;;  %vm14552_vm8 = vnez %v14515_v45  ;;  %vm523_vm1 = vcmp.lt.s32.totalorder %v134_v46, %v7306_v34  ;;  %2586 = vmatmul.mubr.bf16.gmra.mxu1 %v6822_v3  ;;  %2432 = vmatprep.mubr.bf16.mxu0 %v6823_v22  ;;  %v6857_v45 = vld [vmem:[%s13576_s1 + $0x3c0] ss:$48 sps:$4 sm:$0xff]   ;;  %v6861_v31 = vld [vmem:[%s13576_s1 + $0x42c] ss:$48 sps:$4 sm:$0xff]  }
  0xfa   :  { %6207 = vmatprep.subr.msk.bf16.mxu0 %vm14541_vm5, %v8960_v5  ;;  %vm14544_vm15 = vmpackc.low %vm14542_vm6, %vm14543_vm11  ;;  %vm522_vm5 = vcmp.lt.s32.totalorder %v133_v6, %v7306_v34  ;;  %vm14549_vm6 = vnez %v14504_v32  ;;  %vm14550_vm11 = vnez %v14495_v17  ;;  %2593 = vmatprep.mubr.bf16.mxu1 %v6825_v47  ;;  %v6845_v17 = vld [vmem:[%s13576_s1 + $0x300] ss:$48 sps:$4 sm:$0xff]   ;;  %v6847_v32 = vld [vmem:[%s13576_s1 + $0x364] ss:$48 sps:$4 sm:$0xff]   ;;  %v9982_v47 = vadd.s32 1240, %v7294_v29 }
  0xfb   :  { %6319 = vmatprep.subr.msk.bf16.mxu1 %vm14544_vm15, %v8960_v5  ;;  %vm9685_vm13 = vmand %vm345_vm14, %vm539_vm4  ;;  %vm328_vm4 = vcmp.ge.s32.totalorder %v133_v6, %v7304_v33  ;;  %v6867_v6 = vld [vmem:[%s13576_s1 + $0x48c] ss:$48 sps:$4 sm:$0xff]   ;;  %v6876_v3 = vld [vmem:[%s13576_s1 + $0x4e8] ss:$48 sps:$4 sm:$0xff]  }
  0xfc   :  { %vm9702_vm14 = vmand %vm296_vm10, %vm490_vm9  ;;  %vm14553_vm10 = vnez %v14513_v57  ;;  %v6851_v57 = vld [vmem:[%s13576_s1 + $0x360] ss:$48 sps:$4 sm:$0xff]   ;;  %v6877_v22 = vld [vmem:[%s13576_s1 + $0x544] ss:$48 sps:$4 sm:$0xff]  }
  0xfd   :  { %v14548_v44 = vsel %vm9702_vm14, 4294967295, %v14547_v44  ;;  %vm14551_vm15 = vmpackc.low %vm14549_vm6, %vm14550_vm11  ;;  %vm329_vm14 = vcmp.ge.s32.totalorder %v134_v46, %v7304_v33  ;;  %v9891_v46 = vadd.s32 1136, %v7294_v29 }
  0xfe   :  { %6208 = vmatpush3.bf16.msk.msra.mxu0 %vm14551_vm15, %v8960_v5  ;;  %vm14554_vm9 = vmpackc.low %vm14552_vm8, %vm14553_vm10  ;;  %vm14560_vm8 = vnez %v14548_v44  ;;  %vm504_vm15 = vcmp.lt.s32.totalorder %v115_v63, %v7306_v34  ;;  %vm311_vm10 = vcmp.ge.s32.totalorder %v116_v20, %v7304_v33  ;;  %v9906_v44 = vadd.s32 1400, %v7294_v29 }
  0xff   :  { %6320 = vmatpush3.bf16.msk.msra.mxu1 %vm14554_vm9, %v8960_v5  ;;  %vm9721_vm7 = vmand %vm297_vm12, %vm491_vm2  ;;  %vm14558_vm12 = vnez %v14538_v27  ;;  %v6869_v27 = vld [vmem:[%s13576_s1 + $0x480] ss:$48 sps:$4 sm:$0xff]  }
 0x100   :  { %vm14557_vm6 = vmpackc.low %vm9633_vm0, %vm9626_vm3  ;;  %vm310_vm3 = vcmp.ge.s32.totalorder %v115_v63, %v7304_v33  ;;  %2433 = vmatmul.mubr.bf16.gmra.mxu0 %v6827_v40  ;;  %v6870_v63 = vld [vmem:[%s13576_s1 + $0x488] ss:$48 sps:$4 sm:$0xff]   ;;  %v10013_v40 = vadd.s32 1112, %v7294_v29 }
 0x101   :  { %6209 = vmatprep.subr.msk.bf16.mxu0 %vm14557_vm6, %v9097_v15  ;;  %vm14559_vm2 = vmpackc.low %vm9685_vm13, %vm14558_vm12  ;;  %vm536_vm6 = vcmp.lt.s32.totalorder %v147_v0, %v7306_v34  ;;  %vm537_vm12 = vcmp.lt.s32.totalorder %v148_v60, %v7306_v34  ;;  %2594 = vmatmul.mubr.bf16.gmra.mxu1 %v6828_v21  ;;  %v10020_v21 = vadd.s32 1360, %v7294_v29 }
 0x102   :  { %6321 = vmatprep.subr.msk.bf16.mxu1 %vm14559_vm2, %v9097_v15  ;;  %vm5667_vm11 = vmpackc.low %vm9721_vm7, %vm14560_vm8  ;;  %vm505_vm7 = vcmp.lt.s32.totalorder %v116_v20, %v7306_v34  ;;  %2440 = vmatprep.mubr.bf16.mxu0 %v6829_v43  ;;  %v6873_v20 = vld [vmem:[%s13576_s1 + $0x4ec] ss:$48 sps:$4 sm:$0xff]   ;;  %v10023_v43 = vadd.s32 1368, %v7294_v29 }
 0x103   :  { %vm714_vm0 = vmand %vm328_vm4, %vm522_vm5  ;;  %6210 = vmatpush3.bf16.msk.msra.mxu0 %vm5667_vm11, %v9097_v15  ;;  %vm342_vm5 = vcmp.ge.s32.totalorder %v147_v0, %v7304_v33  ;;  %vm294_vm11 = vcmp.ge.s32.totalorder %v99_v55, %v7304_v33  ;;  %2601 = vmatprep.mubr.bf16.mxu1 %v6831_v53  ;;  %v9918_v0 = vadd.s32 1504, %v7294_v29  ;;  %v10032_v53 = vadd.s32 1216, %v7294_v29 }
 0x104   :  { %vm715_vm13 = vmand %vm329_vm14, %vm523_vm1  ;;  %vm343_vm14 = vcmp.ge.s32.totalorder %v148_v60, %v7304_v33  ;;  %v9936_v60 = vadd.s32 1120, %v7294_v29 }
 0x105   :  { %vm5715_vm9 = vmpackc.low %vm715_vm13, %vm714_vm0  ;;  %vm488_vm0 = vcmp.lt.s32.totalorder %v99_v55, %v7306_v34  ;;  %vm489_vm13 = vcmp.lt.s32.totalorder %v100_v24, %v7306_v34  ;;  %v9945_v55 = vadd.s32 1128, %v7294_v29 }
 0x106   :  { %6322 = vmatpush3.bf16.msk.msra.mxu1 %vm5715_vm9, %v9097_v15  ;;  %vm696_vm4 = vmand %vm310_vm3, %vm504_vm15  ;;  %vm295_vm15 = vcmp.ge.s32.totalorder %v100_v24, %v7304_v33  ;;  %vm326_vm9 = vcmp.ge.s32.totalorder %v131_v38, %v7304_v33  ;;  %v9954_v24 = vadd.s32 1376, %v7294_v29 }
 0x107   :  { %vm697_vm1 = vmand %vm311_vm10, %vm505_vm7 }
 0x108   :  { %vm5694_vm2 = vmpackc.low %vm697_vm1, %vm696_vm4  ;;  %vm520_vm4 = vcmp.lt.s32.totalorder %v131_v38, %v7306_v34  ;;  %vm521_vm1 = vcmp.lt.s32.totalorder %v132_v12, %v7306_v34  ;;  %2441 = vmatmul.mubr.bf16.gmra.mxu0 %v6833_v49  ;;  %v6875_v38 = vld [vmem:[%s13576_s1 + $0x4e0] ss:$48 sps:$4 sm:$0xff]   ;;  %v14561_v49 = vmov 0 }
 0x109   :  { %6211 = vmatprep.subr.msk.bf16.mxu0 %vm5694_vm2, %v9191_v41  ;;  %vm728_vm8 = vmand %vm342_vm5, %vm536_vm6  ;;  %vm327_vm6 = vcmp.ge.s32.totalorder %v132_v12, %v7304_v33  ;;  %vm388_vm2 = vcmp.ge.s32.totalorder %v193_v2, %v7304_v33  ;;  %2602 = vmatmul.mubr.bf16.gmra.mxu1 %v6834_v11  ;;  %v9967_v12 = vadd.s32 1232, %v7294_v29  ;;  %v14563_v11 = vmov 0 }
 0x10a   :  { %vm729_vm3 = vmand %vm343_vm14, %vm537_vm12  ;;  %2448 = vmatprep.mubr.bf16.mxu0 %v6835_v18  ;;  %2609 = vmatprep.mubr.bf16.mxu1 %v6837_v62  ;;  %v188_v18 = vadd.s32 1224, %v7294_v29  ;;  %v6881_v62 = vld [vmem:[%s13576_s1 + $0x540] ss:$48 sps:$4 sm:$0xff]  }
 0x10b   :  { %vm5742_vm10 = vmpackc.low %vm729_vm3, %vm728_vm8  ;;  %vm582_vm8 = vcmp.lt.s32.totalorder %v193_v2, %v7306_v34  ;;  %vm583_vm3 = vcmp.lt.s32.totalorder %v194_v25, %v7306_v34  ;;  %v6879_v2 = vld [vmem:[%s13576_s1 + $0x54c] ss:$48 sps:$4 sm:$0xff]  }
 0x10c   :  { %6323 = vmatprep.subr.msk.bf16.mxu1 %vm5742_vm10, %v9191_v41  ;;  %vm680_vm7 = vmand %vm294_vm11, %vm488_vm0  ;;  %vm389_vm0 = vcmp.ge.s32.totalorder %v194_v25, %v7304_v33  ;;  %vm420_vm10 = vcmp.ge.s32.totalorder %v225_v51, %v7304_v33  ;;  %v9992_v25 = vadd.s32 1488, %v7294_v29 }
 0x10d   :  { %vm681_vm5 = vmand %vm295_vm15, %vm489_vm13 }
 0x10e   :  { %vm5670_vm14 = vmpackc.low %vm681_vm5, %vm680_vm7  ;;  %vm614_vm7 = vcmp.lt.s32.totalorder %v225_v51, %v7306_v34  ;;  %vm615_vm5 = vcmp.lt.s32.totalorder %v226_v59, %v7306_v34  ;;  %v9995_v51 = vadd.s32 1496, %v7294_v29 }
 0x10f   :  { %6212 = vmatpush3.bf16.msk.msra.mxu0 %vm5670_vm14, %v9191_v41  ;;  %vm712_vm12 = vmand %vm326_vm9, %vm520_vm4  ;;  %vm421_vm4 = vcmp.ge.s32.totalorder %v226_v59, %v7304_v33  ;;  %v10004_v59 = vadd.s32 1104, %v7294_v29 }
 0x110   :  { %vm713_vm11 = vmand %vm327_vm6, %vm521_vm1  ;;  %2449 = vmatmul.mubr.bf16.gmra.mxu0 %v6839_v1  ;;  %v14565_v1 = vmov 0 }
 0x111   :  { %vm5718_vm15 = vmpackc.low %vm713_vm11, %vm712_vm12  ;;  %2610 = vmatmul.mubr.bf16.gmra.mxu1 %v6840_v8  ;;  %2456 = vmatprep.mubr.bf16.mxu0 %v6841_v42  ;;  %vm566_vm11 = vcmp.lt.s32.totalorder %v9891_v46, %v7306_v34  ;;  %v14567_v8 = vmov 0  ;;  %v14569_v42 = vmov 0 }
 0x112   :  { %6324 = vmatpush3.bf16.msk.msra.mxu1 %vm5718_vm15, %v9191_v41  ;;  %vm774_vm13 = vmand %vm388_vm2, %vm582_vm8  ;;  %2617 = vmatprep.mubr.bf16.mxu1 %v6843_v54  ;;  %vm372_vm2 = vcmp.ge.s32.totalorder %v9891_v46, %v7304_v33  ;;  %vm373_vm8 = vcmp.ge.s32.totalorder %v9894_v10, %v7304_v33  ;;  %vm405_vm15 = vcmp.ge.s32.totalorder %v9906_v44, %v7304_v33  ;;  %v14573_v54 = vmov 0 }
 0x113   :  { %vm775_vm9 = vmand %vm389_vm0, %vm583_vm3  ;;  %vm567_vm0 = vcmp.lt.s32.totalorder %v9894_v10, %v7306_v34  ;;  %vm404_vm3 = vcmp.ge.s32.totalorder %v9903_v52, %v7304_v33  ;;  %v185_v46 = vadd.s32 1200, %v7294_v29  ;;  %v14608_v10 = vmov 0 }
 0x114   :  { %vm5769_vm6 = vmpackc.low %vm775_vm9, %vm774_vm13  ;;  %vm598_vm13 = vcmp.lt.s32.totalorder %v9903_v52, %v7306_v34  ;;  %v217_v52 = vadd.s32 1456, %v7294_v29 }
 0x115   :  { %6421 = vmatprep.subr.msk.bf16.mxu0 %vm5769_vm6, %v14411_v7  ;;  %vm806_vm1 = vmand %vm420_vm10, %vm614_vm7  ;;  %vm599_vm10 = vcmp.lt.s32.totalorder %v9906_v44, %v7306_v34  ;;  %vm386_vm7 = vcmp.ge.s32.totalorder %v9912_v36, %v7304_v33  ;;  %vm14583_vm6 = vcmp.lt.s32.totalorder %v9936_v60, %v7306_v34  ;;  %v14616_v44 = vmov 0 }
 0x116   :  { %vm807_vm14 = vmand %vm421_vm4, %vm615_vm5  ;;  %vm580_vm4 = vcmp.lt.s32.totalorder %v9912_v36, %v7306_v34  ;;  %vm14595_vm5 = vcmp.ge.s32.totalorder %v9964_v9, %v7304_v33  ;;  %v218_v36 = vadd.s32 1464, %v7294_v29 }
 0x117   :  { %vm5817_vm12 = vmpackc.low %vm807_vm14, %vm806_vm1  ;;  %vm565_vm1 = vcmp.lt.s32.totalorder %v9945_v55, %v7306_v34 }
 0x118   :  { %6533 = vmatprep.subr.msk.bf16.mxu1 %vm5817_vm12, %v14411_v7  ;;  %2457 = vmatmul.mubr.bf16.gmra.mxu0 %v6845_v17  ;;  %vm10040_vm12 = vmand %vm372_vm2, %vm566_vm11  ;;  %v219_v17 = vadd.s32 1472, %v7294_v29 }
 0x119   :  { %2618 = vmatmul.mubr.bf16.gmra.mxu1 %v6846_v19  ;;  %2464 = vmatprep.mubr.bf16.mxu0 %v6847_v32  ;;  %v14562_v49 = vsel %vm10040_vm12, 4294967295, %v14561_v49  ;;  %vm10050_vm9 = vmand %vm373_vm8, %vm567_vm0  ;;  %v10110_v19 = vadd.s32 1480, %v7294_v29  ;;  %v6882_v32 = vld [vmem:[%s13576_s1 + $0x548] ss:$48 sps:$4 sm:$0xff]  }
 0x11a   :  { %2625 = vmatprep.mubr.bf16.mxu1 %v6849_v30  ;;  %v14564_v11 = vsel %vm10050_vm9, 4294967295, %v14563_v11  ;;  %vm10070_vm8 = vmand %vm404_vm3, %vm598_vm13  ;;  %vm14571_vm3 = vcmp.lt.s32.totalorder %v9915_v35, %v7306_v34  ;;  %vm14572_vm13 = vcmp.ge.s32.totalorder %v9915_v35, %v7304_v33  ;;  %v6883_v30 = vld [vmem:[%s13576_s1 + $0x5a4] ss:$48 sps:$4 sm:$0xff]   ;;  %v169_v35 = vadd.s32 1072, %v7294_v29 }
 0x11b   :  { %v14566_v1 = vsel %vm10070_vm8, 4294967295, %v14565_v1  ;;  %vm10080_vm11 = vmand %vm405_vm15, %vm599_vm10  ;;  %vm14587_vm10 = vcmp.ge.s32.totalorder %v9945_v55, %v7304_v33  ;;  %v14632_v55 = vmov 0 }
 0x11c   :  { %v14568_v8 = vsel %vm10080_vm11, 4294967295, %v14567_v8  ;;  %vm10090_vm0 = vmand %vm386_vm7, %vm580_vm4  ;;  %vm14575_vm7 = vcmp.lt.s32.totalorder %v9918_v0, %v7306_v34  ;;  %vm14576_vm4 = vcmp.ge.s32.totalorder %v9918_v0, %v7304_v33  ;;  %v6887_v0 = vld [vmem:[%s13576_s1 + $0x5a0] ss:$48 sps:$4 sm:$0xff]  }
 0x11d   :  { %v14570_v42 = vsel %vm10090_vm0, 4294967295, %v14569_v42  ;;  %vm10100_vm15 = vmand %vm14572_vm13, %vm14571_vm3 }
 0x11e   :  { %v14574_v54 = vsel %vm10100_vm15, 4294967295, %v14573_v54  ;;  %vm10124_vm3 = vmand %vm14576_vm4, %vm14575_vm7  ;;  %vm14579_vm7 = vcmp.lt.s32.totalorder %v9927_v28, %v7306_v34  ;;  %vm14580_vm4 = vcmp.ge.s32.totalorder %v9927_v28, %v7304_v33  ;;  %v14624_v28 = vmov 0 }
 0x11f   :  { %vm10146_vm13 = vmand %vm14580_vm4, %vm14579_vm7  ;;  %vm14584_vm7 = vcmp.ge.s32.totalorder %v9936_v60, %v7304_v33  ;;  %v14628_v60 = vmov 0 }
 0x120   :  { %2465 = vmatmul.mubr.bf16.gmra.mxu0 %v6851_v57  ;;  %v14577_v57 = vmov 0  ;;  %vm10163_vm4 = vmand %vm14584_vm7, %vm14583_vm6  ;;  %vm14590_vm6 = vcmp.lt.s32.totalorder %v9954_v24, %v7306_v34  ;;  %vm14591_vm7 = vcmp.ge.s32.totalorder %v9954_v24, %v7304_v33  ;;  %v14636_v24 = vmov 0 }
 0x121   :  { %2626 = vmatmul.mubr.bf16.gmra.mxu1 %v6852_v14  ;;  %2472 = vmatprep.mubr.bf16.mxu0 %v6853_v58  ;;  %v14578_v57 = vsel %vm10124_vm3, 4294967295, %v14577_v57  ;;  %v10135_v14 = vadd.s32 1088, %v7294_v29  ;;  %v6885_v58 = vld [vmem:[%s13576_s1 + $0x5ac] ss:$48 sps:$4 sm:$0xff]   ;;  %vm10173_vm2 = vmand %vm14587_vm10, %vm565_vm1  ;;  %vm14594_vm10 = vcmp.lt.s32.totalorder %v9964_v9, %v7306_v34  ;;  %v6888_v9 = vld [vmem:[%s13576_s1 + $0x5a8] ss:$48 sps:$4 sm:$0xff]  }
 0x122   :  { %2633 = vmatprep.mubr.bf16.mxu1 %v6855_v23  ;;  %v14581_v23 = vmov 0  ;;  %vm10188_vm1 = vmand %vm14591_vm7, %vm14590_vm6  ;;  %vm14602_vm7 = vcmp.lt.s32.totalorder %v9982_v47, %v7306_v34 }
 0x123   :  { %v14582_v23 = vsel %vm10146_vm13, 4294967295, %v14581_v23  ;;  %vm10198_vm14 = vmand %vm14595_vm5, %vm14594_vm10 }
 0x128   :  { %2473 = vmatmul.mubr.bf16.gmra.mxu0 %v6857_v45  ;;  %v172_v45 = vadd.s32 1096, %v7294_v29 }
 0x129   :  { %2634 = vmatmul.mubr.bf16.gmra.mxu1 %v6858_v48  ;;  %2480 = vmatprep.mubr.bf16.mxu0 %v6859_v13  ;;  %v14585_v48 = vmov 0  ;;  %v14588_v13 = vmov 0 }
 0x12a   :  { %2641 = vmatprep.mubr.bf16.mxu1 %v6861_v31  ;;  %v14586_v48 = vsel %vm10163_vm4, 4294967295, %v14585_v48  ;;  %v14589_v13 = vsel %vm10173_vm2, 4294967295, %v14588_v13  ;;  %v203_v31 = vadd.s32 1344, %v7294_v29  ;;  %vm14598_vm2 = vcmp.lt.s32.totalorder %v9967_v12, %v7306_v34 }
 0x12b   :  { %vm14599_vm4 = vcmp.ge.s32.totalorder %v9967_v12, %v7304_v33  ;;  %v6891_v12 = vld [vmem:[%s13576_s1 + $0x14] ss:$48 sps:$4 sm:$0xff]   ;;  %vm14651_vm9 = vcmp.ge.s32.totalorder %v172_v45, %v7304_v33 }
 0x12c   :  { %vm10208_vm6 = vmand %vm14599_vm4, %vm14598_vm2  ;;  %vm14606_vm4 = vcmp.lt.s32.totalorder %v9992_v25, %v7306_v34 }
 0x130   :  { %2481 = vmatmul.mubr.bf16.gmra.mxu0 %v6863_v37  ;;  %v204_v37 = vadd.s32 1352, %v7294_v29 }
 0x131   :  { %2642 = vmatmul.mubr.bf16.gmra.mxu1 %v6864_v39  ;;  %2488 = vmatprep.mubr.bf16.mxu0 %v6865_v4  ;;  %v14592_v39 = vmov 0  ;;  %v14596_v4 = vmov 0 }
 0x132   :  { %2649 = vmatprep.mubr.bf16.mxu1 %v6867_v6  ;;  %v14593_v39 = vsel %vm10188_vm1, 4294967295, %v14592_v39  ;;  %v14597_v4 = vsel %vm10198_vm14, 4294967295, %v14596_v4  ;;  %v14600_v6 = vmov 0  ;;  %vm14603_vm1 = vcmp.ge.s32.totalorder %v9982_v47, %v7304_v33  ;;  %v6894_v47 = vld [vmem:[%s13576_s1 + $0x1c] ss:$48 sps:$4 sm:$0xff]  }
 0x133   :  { %v14601_v6 = vsel %vm10208_vm6, 4294967295, %v14600_v6  ;;  %vm10218_vm5 = vmand %vm14603_vm1, %vm14602_vm7  ;;  %vm14607_vm1 = vcmp.ge.s32.totalorder %v9992_v25, %v7304_v33  ;;  %vm14615_vm6 = vcmp.ge.s32.totalorder %v10004_v59, %v7304_v33  ;;  %vm14627_vm14 = vcmp.ge.s32.totalorder %v10023_v43, %v7304_v33 }
 0x134   :  { %vm10233_vm7 = vmand %vm14607_vm1, %vm14606_vm4  ;;  %vm14611_vm4 = vcmp.ge.s32.totalorder %v9995_v51, %v7304_v33  ;;  %v202_v25 = vadd.s32 1336, %v7294_v29  ;;  %vm14659_vm12 = vcmp.lt.s32.totalorder %v204_v37, %v7306_v34  ;;  %vm14660_vm15 = vcmp.ge.s32.totalorder %v204_v37, %v7304_v33 }
 0x135   :  { %v14609_v10 = vsel %vm10233_vm7, 4294967295, %v14608_v10  ;;  %vm14614_vm7 = vcmp.lt.s32.totalorder %v10004_v59, %v7306_v34  ;;  %v14652_v59 = vmov 0  ;;  %vm10411_vm0 = vmand %vm14660_vm15, %vm14659_vm12  ;;  %v14697_v37 = vmov 0 }
 0x136   :  { %vm10264_vm13 = vmand %vm14615_vm6, %vm14614_vm7  ;;  %vm14622_vm6 = vcmp.lt.s32.totalorder %v10020_v21, %v7306_v34  ;;  %vm14623_vm7 = vcmp.ge.s32.totalorder %v10020_v21, %v7304_v33  ;;  %v14657_v21 = vmov 0 }
 0x137   :  { %v14617_v44 = vsel %vm10264_vm13, 4294967295, %v14616_v44  ;;  %vm14631_vm13 = vcmp.ge.s32.totalorder %v10032_v53, %v7304_v33 }
 0x138   :  { %2489 = vmatmul.mubr.bf16.gmra.mxu0 %v6869_v27  ;;  %v14604_v27 = vmov 0 }
 0x139   :  { %2650 = vmatmul.mubr.bf16.gmra.mxu1 %v6870_v63  ;;  %2496 = vmatprep.mubr.bf16.mxu0 %v6871_v16  ;;  %v14605_v27 = vsel %vm10218_vm5, 4294967295, %v14604_v27  ;;  %v186_v63 = vadd.s32 1208, %v7294_v29  ;;  %vm14610_vm5 = vcmp.lt.s32.totalorder %v9995_v51, %v7306_v34  ;;  %v14612_v16 = vmov 0 }
 0x13a   :  { %2657 = vmatprep.mubr.bf16.mxu1 %v6873_v20  ;;  %vm10249_vm1 = vmand %vm14611_vm4, %vm14610_vm5  ;;  %vm14618_vm5 = vcmp.lt.s32.totalorder %v10013_v40, %v7306_v34  ;;  %vm14619_vm4 = vcmp.ge.s32.totalorder %v10013_v40, %v7304_v33  ;;  %v14620_v20 = vmov 0  ;;  %v14648_v51 = vmov 0 }
 0x13b   :  { %v14613_v16 = vsel %vm10249_vm1, 4294967295, %v14612_v16  ;;  %vm10274_vm10 = vmand %vm14619_vm4, %vm14618_vm5  ;;  %vm14626_vm4 = vcmp.lt.s32.totalorder %v10023_v43, %v7306_v34  ;;  %v183_v40 = vadd.s32 1184, %v7294_v29  ;;  %v14661_v43 = vmov 0 }
 0x13c   :  { %v14621_v20 = vsel %vm10274_vm10, 4294967295, %v14620_v20  ;;  %vm10291_vm5 = vmand %vm14623_vm7, %vm14622_vm6  ;;  %vm14630_vm10 = vcmp.lt.s32.totalorder %v10032_v53, %v7306_v34  ;;  %vm14634_vm7 = vcmp.lt.s32.totalorder %v188_v18, %v7306_v34  ;;  %v14662_v43 = vsel %vm10411_vm0, 4294967295, %v14661_v43 }
 0x13d   :  { %v14625_v28 = vsel %vm10291_vm5, 4294967295, %v14624_v28  ;;  %vm10301_vm2 = vmand %vm14627_vm14, %vm14626_vm4  ;;  %vm14635_vm5 = vcmp.ge.s32.totalorder %v188_v18, %v7304_v33  ;;  %vm14650_vm14 = vcmp.lt.s32.totalorder %v172_v45, %v7306_v34  ;;  %v14665_v53 = vmov 0 }
 0x13e   :  { %v14629_v60 = vsel %vm10301_vm2, 4294967295, %v14628_v60  ;;  %vm10311_vm6 = vmand %vm14631_vm13, %vm14630_vm10  ;;  %vm14638_vm13 = vcmp.lt.s32.totalorder %v219_v17, %v7306_v34  ;;  %vm14639_vm10 = vcmp.ge.s32.totalorder %v219_v17, %v7304_v33  ;;  %v14669_v18 = vmov 0 }
 0x13f   :  { %v14633_v55 = vsel %vm10311_vm6, 4294967295, %v14632_v55  ;;  %vm10319_vm1 = vmand %vm14635_vm5, %vm14634_vm7  ;;  %vm14643_vm7 = vcmp.ge.s32.totalorder %v10110_v19, %v7304_v33  ;;  %v14673_v17 = vmov 0  ;;  %vm572_vm0 = vcmp.lt.s32.totalorder %v183_v40, %v7306_v34 }
 0x140   :  { %2497 = vmatmul.mubr.bf16.gmra.mxu0 %v6875_v38  ;;  %v14637_v24 = vsel %vm10319_vm1, 4294967295, %v14636_v24  ;;  %v170_v38 = vadd.s32 1080, %v7294_v29  ;;  %vm10337_vm5 = vmand %vm14639_vm10, %vm14638_vm13  ;;  %vm14642_vm10 = vcmp.lt.s32.totalorder %v10110_v19, %v7306_v34  ;;  %v215_v19 = vadd.s32 1440, %v7294_v29 }
 0x141   :  { %2658 = vmatmul.mubr.bf16.gmra.mxu1 %v6876_v3  ;;  %2504 = vmatprep.mubr.bf16.mxu0 %v6877_v22  ;;  %v14640_v3 = vmov 0  ;;  %v201_v22 = vadd.s32 1328, %v7294_v29  ;;  %vm10358_vm2 = vmand %vm14643_vm7, %vm14642_vm10  ;;  %vm14646_vm7 = vcmp.lt.s32.totalorder %v10135_v14, %v7306_v34  ;;  %vm14647_vm10 = vcmp.ge.s32.totalorder %v10135_v14, %v7304_v33 }
 0x142   :  { %2665 = vmatprep.mubr.bf16.mxu1 %v6879_v2  ;;  %v14641_v3 = vsel %vm10337_vm5, 4294967295, %v14640_v3  ;;  %v14644_v2 = vmov 0  ;;  %vm10379_vm4 = vmand %vm14647_vm10, %vm14646_vm7  ;;  %vm14664_vm10 = vcmp.ge.s32.totalorder %v185_v46, %v7304_v33  ;;  %vm14678_vm7 = vcmp.ge.s32.totalorder %v218_v36, %v7304_v33 }
 0x143   :  { %v14645_v2 = vsel %vm10358_vm2, 4294967295, %v14644_v2  ;;  %v14649_v51 = vsel %vm10379_vm4, 4294967295, %v14648_v51  ;;  %vm10387_vm13 = vmand %vm14651_vm9, %vm14650_vm14  ;;  %vm14655_vm4 = vcmp.lt.s32.totalorder %v203_v31, %v7306_v34  ;;  %vm14656_vm9 = vcmp.ge.s32.totalorder %v203_v31, %v7304_v33  ;;  %v6889_v31 = vld [vmem:[%s13576_s1 + $0x10] ss:$48 sps:$4 sm:$0xff]  }
 0x144   :  { %v14653_v59 = vsel %vm10387_vm13, 4294967295, %v14652_v59  ;;  %vm10403_vm14 = vmand %vm14656_vm9, %vm14655_vm4  ;;  %vm14663_vm13 = vcmp.lt.s32.totalorder %v185_v46, %v7306_v34  ;;  %vm14667_vm4 = vcmp.lt.s32.totalorder %v186_v63, %v7306_v34  ;;  %vm14668_vm9 = vcmp.ge.s32.totalorder %v186_v63, %v7304_v33  ;;  %v6892_v63 = vld [vmem:[%s13576_s1 + $0x18] ss:$48 sps:$4 sm:$0xff]  }
 0x145   :  { %v14658_v21 = vsel %vm10403_vm14, 4294967295, %v14657_v21  ;;  %vm10419_vm3 = vmand %vm14664_vm10, %vm14663_vm13  ;;  %vm14671_vm13 = vcmp.lt.s32.totalorder %v217_v52, %v7306_v34  ;;  %vm14672_vm10 = vcmp.ge.s32.totalorder %v217_v52, %v7304_v33  ;;  %v14687_v14 = vmov 0 }
 0x146   :  { %v14666_v53 = vsel %vm10419_vm3, 4294967295, %v14665_v53  ;;  %vm10427_vm14 = vmand %vm14668_vm9, %vm14667_vm4  ;;  %vm14690_vm4 = vcmp.ge.s32.totalorder %v170_v38, %v7304_v33  ;;  %v167_v45 = vadd.s32 1056, %v7294_v29  ;;  %v168_v46 = vadd.s32 1064, %v7294_v29 }
 0x147   :  { %v14670_v18 = vsel %vm10427_vm14, 4294967295, %v14669_v18  ;;  %vm10439_vm3 = vmand %vm14672_vm10, %vm14671_vm13  ;;  %vm14677_vm14 = vcmp.lt.s32.totalorder %v218_v36, %v7306_v34  ;;  %vm14689_vm10 = vcmp.lt.s32.totalorder %v170_v38, %v7306_v34  ;;  %v14701_v52 = vmov 0  ;;  %v6895_v38 = vld [vmem:[%s13576_s1 + $0x74] ss:$48 sps:$4 sm:$0xff]  }
 0x148   :  { %2505 = vmatmul.mubr.bf16.gmra.mxu0 %v6881_v62  ;;  %v184_v62 = vadd.s32 1192, %v7294_v29  ;;  %v14674_v17 = vsel %vm10439_vm3, 4294967295, %v14673_v17  ;;  %vm10454_vm13 = vmand %vm14678_vm7, %vm14677_vm14  ;;  %vm14682_vm3 = vnez %v14597_v4  ;;  %vm14685_vm7 = vcmp.lt.s32.totalorder %v169_v35, %v7306_v34 }
 0x149   :  { %2666 = vmatmul.mubr.bf16.gmra.mxu1 %v6882_v32  ;;  %2512 = vmatprep.mubr.bf16.mxu0 %v6883_v30  ;;  %v14679_v32 = vmov 0  ;;  %v216_v30 = vadd.s32 1448, %v7294_v29  ;;  %vm14686_vm14 = vcmp.ge.s32.totalorder %v169_v35, %v7304_v33  ;;  %vm10481_vm11 = vmand %vm14690_vm4, %vm14689_vm10  ;;  %vm14695_vm4 = vcmp.lt.s32.totalorder %v201_v22, %v7306_v34 }
 0x14a   :  { %2673 = vmatprep.mubr.bf16.mxu1 %v6885_v58  ;;  %v14680_v32 = vsel %vm10454_vm13, 4294967295, %v14679_v32  ;;  %vm10473_vm13 = vmand %vm14686_vm14, %vm14685_vm7  ;;  %v14691_v58 = vmov 0  ;;  %vm14696_vm10 = vcmp.ge.s32.totalorder %v201_v22, %v7304_v33  ;;  %vm14700_vm7 = vcmp.ge.s32.totalorder %v202_v25, %v7304_v33  ;;  %v6897_v22 = vld [vmem:[%s13576_s1 + $0x7c] ss:$48 sps:$4 sm:$0xff]  }
 0x14b   :  { %v14688_v14 = vsel %vm10473_vm13, 4294967295, %v14687_v14  ;;  %v14692_v58 = vsel %vm10481_vm11, 4294967295, %v14691_v58  ;;  %vm10499_vm11 = vmand %vm14696_vm10, %vm14695_vm4  ;;  %vm14699_vm13 = vcmp.lt.s32.totalorder %v202_v25, %v7306_v34  ;;  %v199_v36 = vadd.s32 1312, %v7294_v29 }
 0x14c   :  { %v14698_v37 = vsel %vm10499_vm11, 4294967295, %v14697_v37  ;;  %vm10513_vm14 = vmand %vm14700_vm7, %vm14699_vm13  ;;  %vm14705_vm12 = vcmp.ge.s32.totalorder %v183_v40, %v7304_v33  ;;  %v14706_v35 = vmov 0  ;;  %vm14711_vm13 = vcmp.ge.s32.totalorder %v184_v62, %v7304_v33 }
 0x14d   :  { %v14702_v52 = vsel %vm10513_vm14, 4294967295, %v14701_v52  ;;  %vm10526_vm9 = vmand %vm14705_vm12, %vm572_vm0  ;;  %vm14710_vm12 = vcmp.lt.s32.totalorder %v184_v62, %v7306_v34  ;;  %v182_v25 = vadd.s32 1176, %v7294_v29  ;;  %vm14718_vm6 = vnez %v14564_v11 }
 0x14e   :  { %v14707_v35 = vsel %vm10526_vm9, 4294967295, %v14706_v35  ;;  %vm10548_vm7 = vmand %vm14711_vm13, %vm14710_vm12  ;;  %vm14714_vm13 = vcmp.lt.s32.totalorder %v215_v19, %v7306_v34  ;;  %vm14715_vm12 = vcmp.ge.s32.totalorder %v215_v19, %v7304_v33  ;;  %vm14719_vm0 = vnez %v14562_v49 }
 0x14f   :  { %vm10566_vm10 = vmand %vm14715_vm12, %vm14714_vm13  ;;  %vm14721_vm2 = vcmp.lt.s32.totalorder %v216_v30, %v7306_v34  ;;  %vm14722_vm13 = vcmp.ge.s32.totalorder %v216_v30, %v7304_v33  ;;  %v14723_v40 = vmov 0  ;;  %v213_v62 = vadd.s32 1424, %v7294_v29 }
 0x150   :  { %2513 = vmatmul.mubr.bf16.gmra.mxu0 %v6887_v0  ;;  %v200_v0 = vadd.s32 1320, %v7294_v29  ;;  %vm14720_vm5 = vmpackc.low %vm14718_vm6, %vm14719_vm0  ;;  %vm14725_vm1 = vnez %v14568_v8  ;;  %vm14726_vm6 = vnez %v14566_v1  ;;  %vm14728_vm0 = vnez %v14574_v54  ;;  %v6899_v8 = vld [vmem:[%s13576_s1 + $0x70] ss:$48 sps:$4 sm:$0xff]  }
 0x151   :  { %2674 = vmatmul.mubr.bf16.gmra.mxu1 %v6888_v9  ;;  %2714 = vmatprep.mubr.bf16.mxu0 %v6891_v12  ;;  %v14712_v9 = vmov 0  ;;  %v181_v12 = vadd.s32 1168, %v7294_v29  ;;  %vm10583_vm12 = vmand %vm14722_vm13, %vm14721_vm2  ;;  %vm14729_vm2 = vnez %v14570_v42  ;;  %vm14733_vm11 = vcmp.lt.s32.totalorder %v167_v45, %v7306_v34 }
 0x152   :  { %2875 = vmatprep.mubr.bf16.mxu1 %v6894_v47  ;;  %v14713_v9 = vsel %vm10548_vm7, 4294967295, %v14712_v9  ;;  %v14716_v47 = vmov 0  ;;  %v14724_v40 = vsel %vm10583_vm12, 4294967295, %v14723_v40  ;;  %vm14730_vm13 = vmpackc.low %vm14728_vm0, %vm14729_vm2  ;;  %vm14734_vm12 = vcmp.ge.s32.totalorder %v167_v45, %v7304_v33  ;;  %v6915_v45 = vld [vmem:[%s13576_s1 + $0x19c] ss:$48 sps:$4 sm:$0xff]  }
 0x153   :  { %v14717_v47 = vsel %vm10566_vm10, 4294967295, %v14716_v47  ;;  %vm10610_vm10 = vmand %vm14734_vm12, %vm14733_vm11  ;;  %v14735_v49 = vmov 0  ;;  %vm14738_vm0 = vnez %v14578_v57  ;;  %vm14744_vm8 = vcmp.lt.s32.totalorder %v168_v46, %v7306_v34  ;;  %v6900_v57 = vld [vmem:[%s13576_s1 + $0x78] ss:$48 sps:$4 sm:$0xff]  }
 0x154   :  { %v14736_v49 = vsel %vm10610_vm10, 4294967295, %v14735_v49  ;;  %vm14745_vm15 = vcmp.ge.s32.totalorder %v168_v46, %v7304_v33  ;;  %v14746_v11 = vmov 0  ;;  %v165_v1 = vadd.s32 1040, %v7294_v29  ;;  %v6921_v46 = vld [vmem:[%s13576_s1 + $0x1fc] ss:$48 sps:$4 sm:$0xff]  }
 0x155   :  { %vm10635_vm10 = vmand %vm14745_vm15, %vm14744_vm8  ;;  %vm14750_vm8 = vcmp.lt.s32.totalorder %v199_v36, %v7306_v34  ;;  %vm14751_vm15 = vcmp.ge.s32.totalorder %v199_v36, %v7304_v33  ;;  %v14752_v42 = vmov 0  ;;  %v166_v54 = vadd.s32 1048, %v7294_v29  ;;  %v6927_v36 = vld [vmem:[%s13576_s1 + $0x25c] ss:$48 sps:$4 sm:$0xff]  }
 0x156   :  { %v14747_v11 = vsel %vm10635_vm10, 4294967295, %v14746_v11  ;;  %vm10653_vm4 = vmand %vm14751_vm15, %vm14750_vm8  ;;  %vm14757_vm8 = vcmp.lt.s32.totalorder %v200_v0, %v7306_v34  ;;  %vm14758_vm15 = vcmp.ge.s32.totalorder %v200_v0, %v7304_v33  ;;  %vm14768_vm11 = vcmp.lt.s32.totalorder %v181_v12, %v7306_v34  ;;  %v6930_v0 = vld [vmem:[%s13576_s1 + $0x258] ss:$48 sps:$4 sm:$0xff]  }
 0x157   :  { %v14753_v42 = vsel %vm10653_vm4, 4294967295, %v14752_v42  ;;  %v14778_v4 = vmov 0  ;;  %vm14786_vm7 = vnez %v14621_v20  ;;  %v14791_v19 = vmov 0 }
 0x158   :  { %2715 = vmatmul.mubr.bf16.vlgmr.msra.gmra.mxu0 %v6889_v31  ;;  %v211_v30 = vadd.s32 1408, %v7294_v29  ;;  %vm14800_vm14 = vcmp.lt.s32.totalorder %v165_v1, %v7306_v34  ;;  %v14811_v20 = vmov 0  ;;  %vm14853_vm10 = vnez %v14707_v35  ;;  %v6918_v31 = vld [vmem:[%s13576_s1 + $0x198] ss:$48 sps:$4 sm:$0xff]   ;;  %v6929_v35 = vld [vmem:[%s13576_s1 + $0x250] ss:$48 sps:$4 sm:$0xff]  }
 0x159   :  { %2876 = vmatmul.mubr.bf16.vlgmr.msra.gmra.mxu1 %v6892_v63  ;;  %6422 = vmatpush3.bf16.msk.msra.mxu0 %vm14720_vm5, %v14411_v7  ;;  %vm14727_vm5 = vmpackc.low %vm14725_vm1, %vm14726_vm6  ;;  %vm14754_vm1 = vnez %v14589_v13  ;;  %v14770_v13 = vmov 0  ;;  %vm14776_vm6 = vcmp.lt.s32.totalorder %v182_v25, %v7306_v34  ;;  %v6923_v63 = vld [vmem:[%s13576_s1 + $0x1f0] ss:$48 sps:$4 sm:$0xff]  }
 0x15a   :  { %6534 = vmatpush3.bf16.msk.msra.mxu1 %vm14727_vm5, %v14411_v7  ;;  %6423 = vmatprep.subr.msk.bf16.mxu0 %vm14730_vm13, %v14447_v56  ;;  %v214_v7 = vadd.s32 1432, %v7294_v29  ;;  %vm14737_vm5 = vnez %v14582_v23  ;;  %vm14755_vm13 = vnez %v14586_v48  ;;  %v14759_v23 = vmov 0 }
 0x15b   :  { %vm14739_vm2 = vmpackc.low %vm14737_vm5, %vm14738_vm0  ;;  %2722 = vmatprep.mubr.bf16.mxu0 %v6895_v38  ;;  %2883 = vmatprep.mubr.bf16.mxu1 %v6897_v22  ;;  %v197_v48 = vadd.s32 1296, %v7294_v29  ;;  %vm14801_vm0 = vcmp.ge.s32.totalorder %v165_v1, %v7304_v33  ;;  %v6931_v38 = vld [vmem:[%s13576_s1 + $0x2b4] ss:$48 sps:$4 sm:$0xff]   ;;  %v6936_v22 = vld [vmem:[%s13576_s1 + $0x2b8] ss:$48 sps:$4 sm:$0xff]  }
 0x15c   :  { %6535 = vmatprep.subr.msk.bf16.mxu1 %vm14739_vm2, %v14447_v56  ;;  %vm14756_vm12 = vmpackc.low %vm14754_vm1, %vm14755_vm13  ;;  %vm14761_vm1 = vnez %v14593_v39  ;;  %v6901_v39 = vld [vmem:[%s13576_s1 + $0xd4] ss:$48 sps:$4 sm:$0xff]  }
 0x15d   :  { %6424 = vmatpush3.bf16.msk.msra.mxu0 %vm14756_vm12, %v14447_v56  ;;  %vm10673_vm5 = vmand %vm14758_vm15, %vm14757_vm8  ;;  %vm14763_vm12 = vnez %v14605_v27  ;;  %vm14764_vm8 = vnez %v14601_v6  ;;  %v179_v6 = vadd.s32 1152, %v7294_v29  ;;  %v6903_v27 = vld [vmem:[%s13576_s1 + $0xdc] ss:$48 sps:$4 sm:$0xff]  }
 0x15e   :  { %v14760_v23 = vsel %vm10673_vm5, 4294967295, %v14759_v23  ;;  %vm14762_vm13 = vmpackc.low %vm14682_vm3, %vm14761_vm1  ;;  %vm14769_vm5 = vcmp.ge.s32.totalorder %v181_v12, %v7304_v33  ;;  %vm14777_vm3 = vcmp.ge.s32.totalorder %v182_v25, %v7304_v33  ;;  %vm14787_vm1 = vnez %v14617_v44  ;;  %v6935_v12 = vld [vmem:[%s13576_s1 + $0x2b0] ss:$48 sps:$4 sm:$0xff]   ;;  %v6939_v25 = vld [vmem:[%s13576_s1 + $0x31c] ss:$48 sps:$4 sm:$0xff]  }
 0x15f   :  { %6536 = vmatpush3.bf16.msk.msra.mxu1 %vm14762_vm13, %v14447_v56  ;;  %vm14765_vm15 = vmpackc.low %vm14763_vm12, %vm14764_vm8  ;;  %v198_v56 = vadd.s32 1304, %v7294_v29  ;;  %vm14772_vm13 = vnez %v14613_v16  ;;  %vm14773_vm12 = vnez %v14609_v10  ;;  %v14784_v10 = vmov 0 }
 0x160   :  { %6425 = vmatprep.subr.msk.bf16.mxu0 %vm14765_vm15, %v14479_v61  ;;  %vm10700_vm4 = vmand %vm14769_vm5, %vm14768_vm11  ;;  %2723 = vmatmul.mubr.bf16.gmra.mxu0 %v6899_v8  ;;  %v180_v16 = vadd.s32 1160, %v7294_v29  ;;  %vm14789_vm5 = vcmp.lt.s32.totalorder %v214_v7, %v7306_v34  ;;  %vm14793_vm11 = vnez %v14629_v60  ;;  %v14802_v44 = vmov 0  ;;  %v1368_v8 = vld [vmem:[%s13577_s2] sm:$0xff] }
 0x161   :  { %v14771_v13 = vsel %vm10700_vm4, 4294967295, %v14770_v13  ;;  %vm14774_vm8 = vmpackc.low %vm14772_vm13, %vm14773_vm12  ;;  %2884 = vmatmul.mubr.bf16.gmra.mxu1 %v6900_v57  ;;  %2730 = vmatprep.mubr.bf16.mxu0 %v6901_v39  ;;  %v14815_v60 = vmov 0  ;;  %vm14818_vm4 = vnez %v14649_v51  ;;  %v14839_v51 = vmov 0 }
 0x162   :  { %6537 = vmatprep.subr.msk.bf16.mxu1 %vm14774_vm8, %v14479_v61  ;;  %vm10728_vm13 = vmand %vm14777_vm3, %vm14776_vm6  ;;  %vm14782_vm6 = vcmp.lt.s32.totalorder %v213_v62, %v7306_v34  ;;  %vm14783_vm3 = vcmp.ge.s32.totalorder %v213_v62, %v7304_v33  ;;  %2891 = vmatprep.mubr.bf16.mxu1 %v6903_v27  ;;  %vm14813_vm8 = vcmp.lt.s32.totalorder %v197_v48, %v7306_v34  ;;  %v6942_v62 = vld [vmem:[%s13576_s1 + $0x318] ss:$48 sps:$4 sm:$0xff]  }
 0x163   :  { %v14779_v4 = vsel %vm10728_vm13, 4294967295, %v14778_v4  ;;  %vm10746_vm9 = vmand %vm14783_vm3, %vm14782_vm6  ;;  %vm14790_vm6 = vcmp.ge.s32.totalorder %v214_v7, %v7304_v33  ;;  %v6945_v7 = vld [vmem:[%s13576_s1 + $0x37c] ss:$48 sps:$4 sm:$0xff]  }
 0x164   :  { %v14785_v10 = vsel %vm10746_vm9, 4294967295, %v14784_v10  ;;  %vm14788_vm15 = vmpackc.low %vm14786_vm7, %vm14787_vm1  ;;  %vm14794_vm7 = vnez %v14625_v28  ;;  %v6905_v28 = vld [vmem:[%s13576_s1 + $0xd0] ss:$48 sps:$4 sm:$0xff]   ;;  %vm14827_vm9 = vnez %v14670_v18  ;;  %v14847_v18 = vmov 0  ;;  %v1369_v27 = vld [vmem:[%s13577_s2 + $0x8] sm:$0xff] }
 0x165   :  { %6426 = vmatpush3.bf16.msk.msra.mxu0 %vm14788_vm15, %v14479_v61  ;;  %vm10763_vm3 = vmand %vm14790_vm6, %vm14789_vm5  ;;  %vm14796_vm15 = vnez %v14637_v24  ;;  %vm14797_vm5 = vnez %v14633_v55  ;;  %v6906_v55 = vld [vmem:[%s13576_s1 + $0xd8] ss:$48 sps:$4 sm:$0xff]   ;;  %v14822_v24 = vmov 0 }
 0x166   :  { %v14792_v19 = vsel %vm10763_vm3, 4294967295, %v14791_v19  ;;  %vm14795_vm1 = vmpackc.low %vm14793_vm11, %vm14794_vm7  ;;  %vm14809_vm11 = vcmp.lt.s32.totalorder %v166_v54, %v7306_v34  ;;  %vm14810_vm7 = vcmp.ge.s32.totalorder %v166_v54, %v7304_v33  ;;  %vm14828_vm3 = vnez %v14666_v53 }
 0x167   :  { %6538 = vmatpush3.bf16.msk.msra.mxu1 %vm14795_vm1, %v14479_v61  ;;  %vm14798_vm6 = vmpackc.low %vm14796_vm15, %vm14797_vm5  ;;  %v212_v61 = vadd.s32 1416, %v7294_v29  ;;  %vm14804_vm1 = vnez %v14645_v2  ;;  %vm14805_vm15 = vnez %v14641_v3  ;;  %v14832_v3 = vmov 0  ;;  %v6907_v2 = vld [vmem:[%s13576_s1 + $0x134] ss:$48 sps:$4 sm:$0xff]  }
 0x168   :  { %6427 = vmatprep.subr.msk.bf16.mxu0 %vm14798_vm6, %v14505_v26  ;;  %vm10790_vm2 = vmand %vm14801_vm0, %vm14800_vm14  ;;  %vm14830_vm0 = vcmp.lt.s32.totalorder %v179_v6, %v7306_v34  ;;  %vm14831_vm6 = vcmp.ge.s32.totalorder %v179_v6, %v7304_v33  ;;  %2731 = vmatmul.mubr.bf16.gmra.mxu0 %v6905_v28  ;;  %v195_v53 = vadd.s32 1280, %v7294_v29  ;;  %v6949_v6 = vld [vmem:[%s13576_s1 + $0x3d4] ss:$48 sps:$4 sm:$0xff]  }
 0x169   :  { %v14803_v44 = vsel %vm10790_vm2, 4294967295, %v14802_v44  ;;  %vm14806_vm5 = vmpackc.low %vm14804_vm1, %vm14805_vm15  ;;  %vm14817_vm15 = vnez %v14653_v59  ;;  %vm600_vm1 = vcmp.lt.s32.totalorder %v211_v30, %v7306_v34  ;;  %v164_v59 = vadd.s32 1032, %v7294_v29  ;;  %2892 = vmatmul.mubr.bf16.gmra.mxu1 %v6906_v55  ;;  %2738 = vmatprep.mubr.bf16.mxu0 %v6907_v2  ;;  %v1370_v55 = vld [vmem:[%s13577_s2 + $0x10] sm:$0xff] }
 0x16a   :  { %6539 = vmatprep.subr.msk.bf16.mxu1 %vm14806_vm5, %v14505_v26  ;;  %vm10815_vm12 = vmand %vm14810_vm7, %vm14809_vm11  ;;  %vm14814_vm11 = vcmp.ge.s32.totalorder %v197_v48, %v7304_v33 }
 0x16b   :  { %v14812_v20 = vsel %vm10815_vm12, 4294967295, %v14811_v20  ;;  %vm10832_vm7 = vmand %vm14814_vm11, %vm14813_vm8  ;;  %vm14820_vm8 = vcmp.lt.s32.totalorder %v198_v56, %v7306_v34  ;;  %vm14821_vm11 = vcmp.ge.s32.totalorder %v198_v56, %v7304_v33  ;;  %vm14852_vm12 = vnez %v14713_v9  ;;  %v6933_v9 = vld [vmem:[%s13576_s1 + $0x2bc] ss:$48 sps:$4 sm:$0xff]   ;;  %v6947_v56 = vld [vmem:[%s13576_s1 + $0x370] ss:$48 sps:$4 sm:$0xff]  }
 0x16c   :  { %v14816_v60 = vsel %vm10832_vm7, 4294967295, %v14815_v60  ;;  %vm14819_vm13 = vmpackc.low %vm14817_vm15, %vm14818_vm4  ;;  %vm14824_vm4 = vnez %v14662_v43  ;;  %v14842_v43 = vmov 0 }
 0x16d   :  { %6428 = vmatpush3.bf16.msk.msra.mxu0 %vm14819_vm13, %v14505_v26  ;;  %vm10851_vm5 = vmand %vm14821_vm11, %vm14820_vm8  ;;  %vm14825_vm13 = vnez %v14658_v21  ;;  %v6909_v21 = vld [vmem:[%s13576_s1 + $0x13c] ss:$48 sps:$4 sm:$0xff]  }
 0x16e   :  { %v14823_v24 = vsel %vm10851_vm5, 4294967295, %v14822_v24  ;;  %vm14826_vm15 = vmpackc.low %vm14824_vm4, %vm14825_vm13  ;;  %vm407_vm4 = vcmp.ge.s32.totalorder %v212_v61, %v7304_v33  ;;  %vm601_vm13 = vcmp.lt.s32.totalorder %v212_v61, %v7306_v34  ;;  %2899 = vmatprep.mubr.bf16.mxu1 %v6909_v21 }
 0x16f   :  { %6540 = vmatpush3.bf16.msk.msra.mxu1 %vm14826_vm15, %v14505_v26  ;;  %vm14829_vm8 = vmpackc.low %vm14827_vm9, %vm14828_vm3  ;;  %v163_v26 = vadd.s32 1024, %v7294_v29  ;;  %vm14834_vm9 = vnez %v14680_v32  ;;  %vm14835_vm3 = vnez %v14674_v17  ;;  %v196_v17 = vadd.s32 1288, %v7294_v29  ;;  %v6912_v32 = vld [vmem:[%s13576_s1 + $0x138] ss:$48 sps:$4 sm:$0xff]  }
 0x170   :  { %6429 = vmatprep.subr.msk.bf16.mxu0 %vm14829_vm8, %v14522_v50  ;;  %vm10877_vm14 = vmand %vm14831_vm6, %vm14830_vm0  ;;  %vm14837_vm6 = vcmp.lt.s32.totalorder %v180_v16, %v7306_v34  ;;  %vm14838_vm0 = vcmp.ge.s32.totalorder %v180_v16, %v7304_v33 }
 0x171   :  { %v14833_v3 = vsel %vm10877_vm14, 4294967295, %v14832_v3  ;;  %vm14836_vm15 = vmpackc.low %vm14834_vm9, %vm14835_vm3  ;;  %vm14841_vm9 = vcmp.ge.s32.totalorder %v211_v30, %v7304_v33  ;;  %2900 = vmatmul.mubr.bf16.gmra.mxu1 %v6912_v32 }
 0x172   :  { %6541 = vmatprep.subr.msk.bf16.mxu1 %vm14836_vm15, %v14522_v50  ;;  %vm10897_vm8 = vmand %vm14838_vm0, %vm14837_vm6  ;;  %vm14844_vm15 = vnez %v14692_v58  ;;  %vm14845_vm6 = vnez %v14688_v14  ;;  %v14861_v14 = vmov 0  ;;  %2907 = vmatprep.mubr.bf16.mxu1 %v6915_v45  ;;  %v6957_v58 = vld [vmem:[%s13576_s1 + $0x43c] ss:$48 sps:$4 sm:$0xff]  }
 0x173   :  { %v14840_v51 = vsel %vm10897_vm8, 4294967295, %v14839_v51  ;;  %vm10907_vm3 = vmand %vm14841_vm9, %vm600_vm1  ;;  %vm14849_vm1 = vnez %v14702_v52  ;;  %vm14850_vm9 = vnez %v14698_v37  ;;  %vm14864_vm8 = vnez %v14753_v42  ;;  %v6919_v37 = vld [vmem:[%s13576_s1 + $0x1f4] ss:$48 sps:$4 sm:$0xff]   ;;  %v6924_v52 = vld [vmem:[%s13576_s1 + $0x1f8] ss:$48 sps:$4 sm:$0xff]  }
 0x174   :  { %v14843_v43 = vsel %vm10907_vm3, 4294967295, %v14842_v43  ;;  %vm14846_vm0 = vmpackc.low %vm14844_vm15, %vm14845_vm6  ;;  %vm552_vm6 = vcmp.lt.s32.totalorder %v163_v26, %v7306_v34  ;;  %vm585_vm3 = vcmp.lt.s32.totalorder %v196_v17, %v7306_v34 }
 0x175   :  { %6430 = vmatpush3.bf16.msk.msra.mxu0 %vm14846_vm0, %v14522_v50  ;;  %vm10918_vm11 = vmand %vm407_vm4, %vm601_vm13  ;;  %vm358_vm13 = vcmp.ge.s32.totalorder %v163_v26, %v7304_v33  ;;  %vm14855_vm0 = vnez %v14724_v40  ;;  %v6941_v40 = vld [vmem:[%s13576_s1 + $0x310] ss:$48 sps:$4 sm:$0xff]  }
 0x176   :  { %v14848_v18 = vsel %vm10918_vm11, 4294967295, %v14847_v18  ;;  %vm14851_vm2 = vmpackc.low %vm14849_vm1, %vm14850_vm9  ;;  %vm553_vm9 = vcmp.lt.s32.totalorder %v164_v59, %v7306_v34  ;;  %vm14863_vm11 = vnez %v14760_v23 }
 0x177   :  { %6542 = vmatpush3.bf16.msk.msra.mxu1 %vm14851_vm2, %v14522_v50  ;;  %vm14854_vm15 = vmpackc.low %vm14852_vm12, %vm14853_vm10  ;;  %vm14856_vm2 = vnez %v14717_v47  ;;  %vm359_vm12 = vcmp.ge.s32.totalorder %v164_v59, %v7304_v33  ;;  %v6911_v50 = vld [vmem:[%s13576_s1 + $0x130] ss:$48 sps:$4 sm:$0xff]   ;;  %vm14859_vm10 = vnez %v14736_v49  ;;  %v6937_v47 = vld [vmem:[%s13576_s1 + $0x314] ss:$48 sps:$4 sm:$0xff]  }
 0x178   :  { %6431 = vmatprep.subr.msk.bf16.mxu0 %vm14854_vm15, %v8960_v5  ;;  %vm14857_vm1 = vmpackc.low %vm14855_vm0, %vm14856_vm2  ;;  %vm390_vm0 = vcmp.ge.s32.totalorder %v195_v53, %v7304_v33  ;;  %vm584_vm2 = vcmp.lt.s32.totalorder %v195_v53, %v7306_v34  ;;  %vm391_vm15 = vcmp.ge.s32.totalorder %v196_v17, %v7304_v33  ;;  %v6913_v34 = vld [vmem:[%s13576_s1 + $0x194] ss:$48 sps:$4 sm:$0xff]   ;;  %2739 = vmatmul.mubr.bf16.gmra.mxu0 %v6911_v50  ;;  %v1371_v50 = vld [vmem:[%s13577_s2 + $0x18] sm:$0xff] }
 0x179   :  { %6543 = vmatprep.subr.msk.bf16.mxu1 %vm14857_vm1, %v8960_v5  ;;  %vm14858_vm1 = vnez %v14747_v11  ;;  %vm10971_vm14 = vmand %vm358_vm13, %vm552_vm6  ;;  %2746 = vmatprep.mubr.bf16.mxu0 %v6913_v34  ;;  %v6943_v49 = vld [vmem:[%s13576_s1 + $0x374] ss:$48 sps:$4 sm:$0xff]  }
 0x17a   :  { %vm14860_vm4 = vmpackc.low %vm14858_vm1, %vm14859_vm10  ;;  %v14862_v14 = vsel %vm10971_vm14, 4294967295, %v14861_v14  ;;  %vm14867_vm10 = vnez %v14771_v13  ;;  %vm14871_vm1 = vnez %v14792_v19  ;;  %vm14872_vm14 = vnez %v14785_v10  ;;  %2908 = vmatmul.mubr.bf16.gmra.mxu1 %v6918_v31  ;;  %v6951_v19 = vld [vmem:[%s13576_s1 + $0x3dc] ss:$48 sps:$4 sm:$0xff]   ;;  %v6955_v17 = vld [vmem:[%s13576_s1 + $0x434] ss:$48 sps:$4 sm:$0xff]  }
 0x17b   :  { %6432 = vmatpush3.bf16.msk.msra.mxu0 %vm14860_vm4, %v8960_v5  ;;  %vm14865_vm7 = vmpackc.low %vm14863_vm11, %vm14864_vm8  ;;  %vm14866_vm4 = vnez %v14779_v4  ;;  %2915 = vmatprep.mubr.bf16.mxu1 %v6921_v46  ;;  %v6948_v4 = vld [vmem:[%s13576_s1 + $0x378] ss:$48 sps:$4 sm:$0xff]  }
 0x17c   :  { %6544 = vmatpush3.bf16.msk.msra.mxu1 %vm14865_vm7, %v8960_v5  ;;  %vm14868_vm13 = vmpackc.low %vm14866_vm4, %vm14867_vm10  ;;  %vm14887_vm4 = vnez %v14862_v14 }
 0x17d   :  { %6433 = vmatprep.subr.msk.bf16.mxu0 %vm14868_vm13, %v9097_v15  ;;  %vm10989_vm6 = vmand %vm359_vm12, %vm553_vm9  ;;  %vm14881_vm12 = vnez %v14823_v24  ;;  %vm14888_vm13 = vnez %v14848_v18  ;;  %v6954_v18 = vld [vmem:[%s13576_s1 + $0x3d8] ss:$48 sps:$4 sm:$0xff]  }
 0x17e   :  { %vm14873_vm5 = vmpackc.low %vm14871_vm1, %vm14872_vm14  ;;  %vm14878_vm14 = vnez %v14812_v20  ;;  %vm14889_vm1 = vnez %v14843_v43  ;;  %v6953_v43 = vld [vmem:[%s13576_s1 + $0x3d0] ss:$48 sps:$4 sm:$0xff]  }
 0x17f   :  { %6545 = vmatprep.subr.msk.bf16.mxu1 %vm14873_vm5, %v9097_v15  ;;  %vm10999_vm11 = vmand %vm390_vm0, %vm584_vm2  ;;  %vm14879_vm5 = vnez %v14803_v44  ;;  %vm14885_vm0 = vnez %v14833_v3 }
 0x180   :  { %vm11006_vm7 = vmand %vm391_vm15, %vm585_vm3  ;;  %vm14882_vm3 = vnez %v14816_v60  ;;  %vm14884_vm15 = vnez %v14840_v51 }
 0x181   :  { %vm14880_vm8 = vmpackc.low %vm14878_vm14, %vm14879_vm5 }
 0x182   :  { %6434 = vmatpush3.bf16.msk.msra.mxu0 %vm14880_vm8, %v9097_v15  ;;  %vm14883_vm9 = vmpackc.low %vm14881_vm12, %vm14882_vm3  ;;  %2916 = vmatmul.mubr.bf16.gmra.mxu1 %v6924_v52  ;;  %vm3718_vm8 = vcmask 1045504  }
 0x183   :  { %6546 = vmatpush3.bf16.msk.msra.mxu1 %vm14883_vm9, %v9097_v15  ;;  %vm14886_vm2 = vmpackc.low %vm14884_vm15, %vm14885_vm0  ;;  %v6917_v15 = vld [vmem:[%s13576_s1 + $0x190] ss:$48 sps:$4 sm:$0xff]   ;;  %2923 = vmatprep.mubr.bf16.mxu1 %v6927_v36 }
 0x184   :  { %6435 = vmatprep.subr.msk.bf16.mxu0 %vm14886_vm2, %v9191_v41  ;;  %vm5766_vm10 = vmpackc.low %vm10989_vm6, %vm14887_vm4  ;;  %2747 = vmatmul.mubr.bf16.gmra.mxu0 %v6917_v15 }
 0x185   :  { %vm14890_vm14 = vmpackc.low %vm14888_vm13, %vm14889_vm1  ;;  %2754 = vmatprep.mubr.bf16.mxu0 %v6919_v37  ;;  %v1372_v37 = vld [vmem:[%s13577_s2 + $0x20] sm:$0xff] }
 0x186   :  { %6547 = vmatprep.subr.msk.bf16.mxu1 %vm14890_vm14, %v9191_v41  ;;  %vm5814_vm5 = vmpackc.low %vm11006_vm7, %vm10999_vm11  ;;  %6436 = vmatpush3.bf16.msk.msra.mxu0 %vm5766_vm10, %v9191_v41 }
 0x187   :  { %6548 = vmatpush3.bf16.msk.msra.mxu1 %vm5814_vm5, %v9191_v41  ;;  %v6925_v41 = vld [vmem:[%s13576_s1 + $0x254] ss:$48 sps:$4 sm:$0xff]  }
 0x18a   :  { %2924 = vmatmul.mubr.bf16.gmra.mxu1 %v6930_v0 }
 0x18b   :  { %2931 = vmatprep.mubr.bf16.mxu1 %v6933_v9 }
 0x18c   :  { %2755 = vmatmul.mubr.bf16.gmra.mxu0 %v6923_v63 }
 0x18d   :  { %2762 = vmatprep.mubr.bf16.mxu0 %v6925_v41 }
 0x192   :  { %2932 = vmatmul.mubr.bf16.gmra.mxu1 %v6936_v22  ;;  %v6963_v22 = vld [vmem:[%s13576_s1 + $0x494] ss:$48 sps:$4 sm:$0xff]  }
 0x193   :  { %2939 = vmatprep.mubr.bf16.mxu1 %v6939_v25 }
 0x194   :  { %2763 = vmatmul.mubr.bf16.gmra.mxu0 %v6929_v35 }
 0x195   :  { %2770 = vmatprep.mubr.bf16.mxu0 %v6931_v38  ;;  %v6959_v38 = vld [vmem:[%s13576_s1 + $0x430] ss:$48 sps:$4 sm:$0xff]  }
 0x196   :  { %v5989_v11 = vpop.f32.mrf.mxu0 }
 0x197   :  { %v6101_v1 = vpop.f32.mrf.mxu1 }
 0x198   :  { %v5990_v42 = vpop.f32.mrf.mxu0 }
 0x199   :  { %v6102_v54 = vpop.f32.mrf.mxu1  ;;  %v5991_v57 = vadd.f32 %v5990_v42, %v5989_v11 }
 0x19a   :  { %2940 = vmatmul.mubr.bf16.gmra.mxu1 %v6942_v62  ;;  %v6103_v23 = vadd.f32 %v6102_v54, %v6101_v1  ;;  %v5992_v48 = vpop.f32.mrf.mxu0  ;;  %v6966_v62 = vld [vmem:[%s13576_s1 + $0x49c] ss:$48 sps:$4 sm:$0xff]   ;;  %v1374_v54 = vld [vmem:[%s13577_s2 + $0x30] sm:$0xff] }
 0x19b   :  { %2947 = vmatprep.mubr.bf16.mxu1 %v6945_v7  ;;  %v6104_v13 = vpop.f32.mrf.mxu1  ;;  %v2395_v39 = vadd.f32 %v5991_v57, %v1368_v8 }
 0x19c   :  { %2771 = vmatmul.mubr.bf16.gmra.mxu0 %v6935_v12  ;;  %v5993_v10 = vpop.f32.mrf.mxu0  ;;  %v6960_v12 = vld [vmem:[%s13576_s1 + $0x438] ss:$48 sps:$4 sm:$0xff]  }
 0x19d   :  { %2778 = vmatprep.mubr.bf16.mxu0 %v6937_v47  ;;  %v6105_v16 = vpop.f32.mrf.mxu1  ;;  %v11125_v30 = vadd.f32 %v6103_v23, %v2395_v39  ;;  %v5994_v44 = vadd.f32 %v5993_v10, %v5992_v48  ;;  %v1373_v47 = vld [vmem:[%s13577_s2 + $0x28] sm:$0xff] }
 0x19e   :  { %v6106_v61 = vadd.f32 %v6105_v16, %v6104_v13  ;;  %v5995_v20 = vpop.f32.mrf.mxu0  ;;  %v6964_v10 = vld [vmem:[%s13576_s1 + $0x498] ss:$48 sps:$4 sm:$0xff]   ;;  %v6969_v16 = vld [vmem:[%s13576_s1 + $0x4f4] ss:$48 sps:$4 sm:$0xff]  }
 0x19f   :  { %v6107_v28 = vpop.f32.mrf.mxu1  ;;  %v2398_v60 = vadd.f32 %v5994_v44, %v1369_v27 }
 0x1a0   :  { %v5996_v24 = vpop.f32.mrf.mxu0 }
 0x1a1   :  { %v6108_v3 = vpop.f32.mrf.mxu1  ;;  %v11130_v26 = vadd.f32 %v6106_v61, %v2398_v60  ;;  %v5997_v2 = vadd.f32 %v5996_v24, %v5995_v20  ;;  %v6972_v20 = vld [vmem:[%s13576_s1 + $0x4fc] ss:$48 sps:$4 sm:$0xff]  }
 0x1a2   :  { %2948 = vmatmul.mubr.bf16.gmra.mxu1 %v6948_v4  ;;  %v6109_v51 = vadd.f32 %v6108_v3, %v6107_v28  ;;  %v5998_v59 = vpop.f32.mrf.mxu0 }
 0x1a3   :  { %2955 = vmatprep.mubr.bf16.mxu1 %v6951_v19  ;;  %v6110_v21 = vpop.f32.mrf.mxu1  ;;  %v2403_v53 = vadd.f32 %v5997_v2, %v1370_v55  ;;  %v1375_v19 = vld [vmem:[%s13577_s2 + $0x38] sm:$0xff] }
 0x1a4   :  { %2779 = vmatmul.mubr.bf16.gmra.mxu0 %v6941_v40  ;;  %v5999_v32 = vpop.f32.mrf.mxu0 }
 0x1a5   :  { %2786 = vmatprep.mubr.bf16.mxu0 %v6943_v49  ;;  %v6111_v14 = vpop.f32.mrf.mxu1  ;;  %v11147_v33 = vadd.f32 %v6109_v51, %v2403_v53  ;;  %v6000_v34 = vadd.f32 %v5999_v32, %v5998_v59  ;;  %v1376_v51 = vld [vmem:[%s13577_s2 + $0x40] sm:$0xff] }
 0x1a6   :  { %v6112_v5 = vadd.f32 %v6111_v14, %v6110_v21 }
 0x1a7   :  { %v6001_v45 = vpop.f32.mrf.mxu0  ;;  %v2406_v31 = vadd.f32 %v6000_v34, %v1371_v50  ;;  %v6967_v50 = vld [vmem:[%s13576_s1 + $0x4f0] ss:$48 sps:$4 sm:$0xff]   ;;  %v6975_v34 = vld [vmem:[%s13576_s1 + $0x554] ss:$48 sps:$4 sm:$0xff]  }
 0x1a9   :  { %v6113_v15 = vpop.f32.mrf.mxu1  ;;  %v6002_v46 = vpop.f32.mrf.mxu0  ;;  %v11152_v52 = vadd.f32 %v6112_v5, %v2406_v31  ;;  %v1377_v5 = vld [vmem:[%s13577_s2 + $0x48] sm:$0xff] }
 0x1aa   :  { %2956 = vmatmul.mubr.bf16.gmra.mxu1 %v6954_v18  ;;  %v6003_v41 = vadd.f32 %v6002_v46, %v6001_v45 }
 0x1ab   :  { %v6114_v63 = vpop.f32.mrf.mxu1  ;;  %2963 = vmatprep.mubr.bf16.mxu1 %v6957_v58  ;;  %v6004_v35 = vpop.f32.mrf.mxu0  ;;  %v6970_v58 = vld [vmem:[%s13576_s1 + $0x4f8] ss:$48 sps:$4 sm:$0xff]  }
 0x1ac   :  { %2787 = vmatmul.mubr.bf16.gmra.mxu0 %v6947_v56  ;;  %v6115_v36 = vadd.f32 %v6114_v63, %v6113_v15  ;;  %v2411_v9 = vadd.f32 %v6003_v41, %v1372_v37  ;;  %v6978_v15 = vld [vmem:[%s13576_s1 + $0x55c] ss:$48 sps:$4 sm:$0xff]  }
 0x1ad   :  { %2794 = vmatprep.mubr.bf16.mxu0 %v6949_v6  ;;  %v6116_v0 = vpop.f32.mrf.mxu1  ;;  %v6005_v25 = vpop.f32.mrf.mxu0  ;;  %v6961_v6 = vld [vmem:[%s13576_s1 + $0x490] ss:$48 sps:$4 sm:$0xff]  }
 0x1ae   :  { %v11169_v49 = vadd.f32 %v6115_v36, %v2411_v9  ;;  %v6006_v7 = vadd.f32 %v6005_v25, %v6004_v35 }
 0x1af   :  { %v6117_v40 = vpop.f32.mrf.mxu1  ;;  %v6007_v1 = vpop.f32.mrf.mxu0 }
 0x1b0   :  { %v6118_v11 = vadd.f32 %v6117_v40, %v6116_v0  ;;  %v2414_v42 = vadd.f32 %v6006_v7, %v1373_v47  ;;  %v1378_v0 = vld [vmem:[%s13577_s2 + $0x50] sm:$0xff] }
 0x1b1   :  { %v6119_v8 = vpop.f32.mrf.mxu1  ;;  %v6008_v57 = vpop.f32.mrf.mxu0  ;;  %v6973_v40 = vld [vmem:[%s13576_s1 + $0x550] ss:$48 sps:$4 sm:$0xff]  }
 0x1b2   :  { %2964 = vmatmul.mubr.bf16.gmra.mxu1 %v6960_v12  ;;  %v11174_v48 = vadd.f32 %v6118_v11, %v2414_v42  ;;  %v6009_v13 = vadd.f32 %v6008_v57, %v6007_v1  ;;  %v6976_v11 = vld [vmem:[%s13576_s1 + $0x558] ss:$48 sps:$4 sm:$0xff]   ;;  %v6981_v1 = vld [vmem:[%s13576_s1 + $0x5b4] ss:$48 sps:$4 sm:$0xff]  }
 0x1b3   :  { %v6120_v23 = vpop.f32.mrf.mxu1  ;;  %2971 = vmatprep.mubr.bf16.mxu1 %v6966_v62  ;;  %v6010_v39 = vpop.f32.mrf.mxu0 }
 0x1b4   :  { %2795 = vmatmul.mubr.bf16.gmra.mxu0 %v6953_v43  ;;  %v6121_v56 = vadd.f32 %v6120_v23, %v6119_v8  ;;  %v2419_v27 = vadd.f32 %v6009_v13, %v1374_v54  ;;  %v1379_v8 = vld [vmem:[%s13577_s2 + $0x58] sm:$0xff] }
 0x1b5   :  { %2802 = vmatprep.mubr.bf16.mxu0 %v6955_v17  ;;  %v6122_v4 = vpop.f32.mrf.mxu1  ;;  %v6011_v44 = vpop.f32.mrf.mxu0  ;;  %v6984_v54 = vld [vmem:[%s13576_s1 + $0x5bc] ss:$48 sps:$4 sm:$0xff]  }
 0x1b6   :  { %v11191_v28 = vadd.f32 %v6121_v56, %v2419_v27  ;;  %v6012_v60 = vadd.f32 %v6011_v44, %v6010_v39  ;;  %v14891_v27 = vld [vmem:[#allocation12_spill] sm:$0xff] }
 0x1b7   :  { %v6123_v61 = vpop.f32.mrf.mxu1 }
 0x1b8   :  { %v6124_v55 = vadd.f32 %v6123_v61, %v6122_v4  ;;  %v6013_v24 = vpop.f32.mrf.mxu0  ;;  %v2422_v3 = vadd.f32 %v6012_v60, %v1375_v19 }
 0x1b9   :  { %v6125_v2 = vpop.f32.mrf.mxu1 }
 0x1ba   :  { %2972 = vmatmul.mubr.bf16.gmra.mxu1 %v6964_v10  ;;  %v6014_v59 = vpop.f32.mrf.mxu0  ;;  %v11196_v21 = vadd.f32 %v6124_v55, %v2422_v3  ;;  %v3535_v10 = vadd.s32 1, %v14891_v27  ;;  %v11247_v3 = vmul.u32 49, %v14891_v27 }
 0x1bb   :  { %2979 = vmatprep.mubr.bf16.mxu1 %v6972_v20  ;;  %v6015_v43 = vadd.f32 %v6014_v59, %v6013_v24  ;;  %v6126_v53 = vpop.f32.mrf.mxu1  ;;  %v6979_v24 = vld [vmem:[%s13576_s1 + $0x5b0] ss:$48 sps:$4 sm:$0xff]   ;;  %v6982_v59 = vld [vmem:[%s13576_s1 + $0x5b8] ss:$48 sps:$4 sm:$0xff]  }
 0x1bc   :  { %2803 = vmatmul.mubr.bf16.gmra.mxu0 %v6959_v38  ;;  %v6127_v18 = vadd.f32 %v6126_v53, %v6125_v2  ;;  %v6016_v17 = vpop.f32.mrf.mxu0  ;;  %v11255_v53 = vmul.u32 49, %v3535_v10 }
 0x1bd   :  { %2810 = vmatprep.mubr.bf16.mxu0 %v6963_v22  ;;  %v2427_v32 = vadd.f32 %v6015_v43, %v1376_v51  ;;  %v6128_v14 = vpop.f32.mrf.mxu1  ;;  %v6987_v43 = vld [vmem:[%s13576_s1 + $0x24] ss:$48 sps:$4 sm:$0xff]  }
 0x1be   :  { %v6017_v45 = vpop.f32.mrf.mxu0 }
 0x1bf   :  { %v11213_v31 = vadd.f32 %v6127_v18, %v2427_v32  ;;  %v6018_v37 = vadd.f32 %v6017_v45, %v6016_v17  ;;  %v6129_v46 = vpop.f32.mrf.mxu1  ;;  %v1381_v18 = vld [vmem:[%s13577_s2 + $0x68] sm:$0xff]  ;;  %v11267_v45 = vmul.u32 49, %v7294_v29 }
 0x1c0   :  { %v6130_v63 = vadd.f32 %v6129_v46, %v6128_v14  ;;  %v6019_v41 = vpop.f32.mrf.mxu0  ;;  %v3534_v46 = vadd.s32 1, %v7294_v29 }
 0x1c1   :  { %v2430_v36 = vadd.f32 %v6018_v37, %v1377_v5  ;;  %v6131_v35 = vpop.f32.mrf.mxu1 }
 0x1c2   :  { %2980 = vmatmul.mubr.bf16.gmra.mxu1 %v6970_v58  ;;  %v6020_v38 = vpop.f32.mrf.mxu0 }
 0x1c3   :  { %2987 = vmatprep.mubr.bf16.mxu1 %v6978_v15  ;;  %v11218_v9 = vadd.f32 %v6130_v63, %v2430_v36  ;;  %v6021_v12 = vadd.f32 %v6020_v38, %v6019_v41  ;;  %v6132_v22 = vpop.f32.mrf.mxu1  ;;  %v11276_v38 = vmul.u32 49, %v3534_v46 }
 0x1c4   :  { %2811 = vmatmul.mubr.bf16.gmra.mxu0 %v6961_v6  ;;  %v6133_v47 = vadd.f32 %v6132_v22, %v6131_v35  ;;  %v6022_v25 = vpop.f32.mrf.mxu0  ;;  %v1382_v35 = vld [vmem:[%s13577_s2 + $0x70] sm:$0xff] }
 0x1c5   :  { %2818 = vmatprep.mubr.bf16.mxu0 %v6969_v16  ;;  %v2435_v62 = vadd.f32 %v6021_v12, %v1378_v0  ;;  %v6134_v7 = vpop.f32.mrf.mxu1  ;;  %v1380_v16 = vld [vmem:[%s13577_s2 + $0x60] sm:$0xff] }
 0x1c6   :  { %v6023_v42 = vpop.f32.mrf.mxu0 }
 0x1c7   :  { %v11235_v57 = vadd.f32 %v6133_v47, %v2435_v62  ;;  %v6024_v23 = vadd.f32 %v6023_v42, %v6022_v25  ;;  %v6135_v13 = vpop.f32.mrf.mxu1  ;;  %v7210_v62 = vmov 0.0   ;;  %v6993_v42 = vld [vmem:[%s13576_s1 + $0x84] ss:$48 sps:$4 sm:$0xff]  }
 0x1c8   :  { %v6136_v56 = vadd.f32 %v6135_v13, %v6134_v7  ;;  %v6025_v39 = vpop.f32.mrf.mxu0  ;;  %v6996_v13 = vld [vmem:[%s13576_s1 + $0x8c] ss:$48 sps:$4 sm:$0xff]  }
 0x1c9   :  { %v2438_v4 = vadd.f32 %v6024_v23, %v1379_v8  ;;  %v6137_v6 = vpop.f32.mrf.mxu1  ;;  %v6988_v8 = vld [vmem:[%s13576_s1 + $0x28] ss:$48 sps:$4 sm:$0xff]  }
 0x1ca   :  { %2988 = vmatmul.mubr.bf16.gmra.mxu1 %v6976_v11  ;;  %v6026_v19 = vpop.f32.mrf.mxu0 }
 0x1cb   :  { %2995 = vmatprep.mubr.bf16.mxu1 %v6984_v54  ;;  %v11241_v44 = vadd.f32 %v6136_v56, %v2438_v4  ;;  %v6027_v61 = vadd.f32 %v6026_v19, %v6025_v39  ;;  %v6138_v20 = vpop.f32.mrf.mxu1  ;;  %v1383_v54 = vld [vmem:[%s13577_s2 + $0x78] sm:$0xff] }
 0x1cc   :  { %2819 = vmatmul.mubr.bf16.gmra.mxu0 %v6967_v50  ;;  %v6139_v60 = vadd.f32 %v6138_v20, %v6137_v6  ;;  %v6028_v55 = vpop.f32.mrf.mxu0  ;;  %v6990_v50 = vld [vmem:[%s13576_s1 + $0x2c] ss:$48 sps:$4 sm:$0xff]  }
 0x1cd   :  { %2826 = vmatprep.mubr.bf16.mxu0 %v6975_v34  ;;  %v2443_v2 = vadd.f32 %v6027_v61, %v1380_v16  ;;  %v6140_v51 = vpop.f32.mrf.mxu1  ;;  %v14892_v34 = vld [vmem:[#allocation2_spill] sm:$0xff] }
 0x1ce   :  { %v6029_v17 = vpop.f32.mrf.mxu0  ;;  %v3518_v5 = vadd.s32 128, %v14892_v34  ;;  %v3520_v36 = vadd.s32 384, %v14892_v34  ;;  %vm3524_vm10 = vcmp.ge.s32.totalorder %v14892_v34, %v11267_v45  ;;  %vm3529_vm13 = vcmp.ge.s32.totalorder %v14892_v34, %v11247_v3 }
 0x1cf   :  { %v11263_v32 = vadd.f32 %v6139_v60, %v2443_v2  ;;  %v6030_v14 = vadd.f32 %v6029_v17, %v6028_v55  ;;  %v6141_v58 = vpop.f32.mrf.mxu1  ;;  %vm3538_vm14 = vcmp.lt.s32.totalorder %v14892_v34, %v11276_v38  ;;  %vm3543_vm5 = vcmp.lt.s32.totalorder %v14892_v34, %v11255_v53 }
 0x1d0   :  { %v6142_v15 = vadd.f32 %v6141_v58, %v6140_v51  ;;  %v6031_v37 = vpop.f32.mrf.mxu0  ;;  %vm3530_vm6 = vcmp.ge.s32.totalorder %v3518_v5, %v11247_v3  ;;  %vm3525_vm11 = vcmp.ge.s32.totalorder %v3518_v5, %v11267_v45  ;;  %vm3544_vm7 = vcmp.lt.s32.totalorder %v3518_v5, %v11255_v53  ;;  %v1384_v51 = vld [vmem:[%s13577_s2 + $0x80] sm:$0xff] }
 0x1d1   :  { %v2446_v63 = vadd.f32 %v6030_v14, %v1381_v18  ;;  %v6143_v41 = vpop.f32.mrf.mxu1  ;;  %vm3554_vm12 = vmand %vm3530_vm6, %vm3544_vm7  ;;  %vm3527_vm3 = vcmp.ge.s32.totalorder %v3520_v36, %v11267_v45  ;;  %vm3532_vm9 = vcmp.ge.s32.totalorder %v3520_v36, %v11247_v3  ;;  %vm3539_vm15 = vcmp.lt.s32.totalorder %v3518_v5, %v11276_v38 }
 0x1d2   :  { %2996 = vmatmul.mubr.bf16.gmra.mxu1 %v6982_v59  ;;  %v6032_v0 = vpop.f32.mrf.mxu0  ;;  %v3564_v7 = vsel %vm3554_vm12, 1.0, %v7210_v62  ;;  %vm3541_vm0 = vcmp.lt.s32.totalorder %v3520_v36, %v11276_v38  ;;  %vm3549_vm2 = vmand %vm3525_vm11, %vm3539_vm15  ;;  %vm3546_vm4 = vcmp.lt.s32.totalorder %v3520_v36, %v11255_v53  ;;  %v3519_v39 = vadd.s32 256, %v14892_v34  ;;  %v6994_v36 = vld [vmem:[%s13576_s1 + $0x88] ss:$48 sps:$4 sm:$0xff]  }
 0x1d3   :  { %3197 = vmatprep.mubr.bf16.mxu1 %v6990_v50  ;;  %v11279_v29 = vadd.f32 %v6142_v15, %v2446_v63  ;;  %v6033_v12 = vadd.f32 %v6032_v0, %v6031_v37  ;;  %v6144_v22 = vpop.f32.mrf.mxu1  ;;  %v3559_v56 = vsel %vm3549_vm2, 1.0, %v7210_v62  ;;  %vm3551_vm1 = vmand %vm3527_vm3, %vm3541_vm0  ;;  %v6991_v37 = vld [vmem:[%s13576_s1 + $0x80] ss:$48 sps:$4 sm:$0xff]  }
 0x1d4   :  { %2827 = vmatmul.mubr.bf16.gmra.mxu0 %v6973_v40  ;;  %v6145_v47 = vadd.f32 %v6144_v22, %v6143_v41  ;;  %v6034_v25 = vpop.f32.mrf.mxu0  ;;  %v6985_v40 = vld [vmem:[%s13576_s1 + $0x20] ss:$48 sps:$4 sm:$0xff]   ;;  %v3569_v10 = vpack.c.bf16 %v3564_v7, %v3559_v56  ;;  %vm3556_vm6 = vmand %vm3532_vm9, %vm3546_vm4  ;;  %v3561_v16 = vsel %vm3551_vm1, 1.0, %v7210_v62  ;;  %vm3526_vm7 = vcmp.ge.s32.totalorder %v3519_v39, %v11267_v45  ;;  %v1385_v22 = vld [vmem:[%s13577_s2 + $0x88] sm:$0xff] }
 0x1d5   :  { %2834 = vmatprep.mubr.bf16.mxu0 %v6981_v1  ;;  %v2451_v11 = vadd.f32 %v6033_v12, %v1382_v35  ;;  %v6146_v1 = vpop.f32.mrf.mxu1  ;;  %v3566_v20 = vsel %vm3556_vm6, 1.0, %v7210_v62  ;;  %vm3548_vm11 = vmand %vm3524_vm10, %vm3538_vm14  ;;  %vm3531_vm12 = vcmp.ge.s32.totalorder %v3519_v39, %v11247_v3  ;;  %vm3540_vm9 = vcmp.lt.s32.totalorder %v3519_v39, %v11276_v38  ;;  %v6999_v35 = vld [vmem:[%s13576_s1 + $0xe4] ss:$48 sps:$4 sm:$0xff]  }
 0x1d6   :  { %v6035_v23 = vpop.f32.mrf.mxu0  ;;  %vm3553_vm3 = vmand %vm3529_vm13, %vm3543_vm5  ;;  %v3558_v2 = vsel %vm3548_vm11, 1.0, %v7210_v62  ;;  %5873 = vmatprep.subr.msk.bf16.mxu0 %vm3718_vm8, %v3569_v10  ;;  %vm3545_vm15 = vcmp.lt.s32.totalorder %v3519_v39, %v11255_v53  ;;  %vm3669_vm6 = vcmask 97280  }
 0x1d7   :  { %v11316_v4 = vadd.f32 %v6145_v47, %v2451_v11  ;;  %v6036_v6 = vadd.f32 %v6035_v23, %v6034_v25  ;;  %v6147_v27 = vpop.f32.mrf.mxu1  ;;  %vm3550_vm0 = vmand %vm3526_vm7, %vm3540_vm9  ;;  %v7002_v25 = vld [vmem:[%s13576_s1 + $0xec] ss:$48 sps:$4 sm:$0xff]  }
 0x1d8   :  { %v6148_v19 = vadd.f32 %v6147_v27, %v6146_v1  ;;  %v6037_v61 = vpop.f32.mrf.mxu0  ;;  %vm3555_vm2 = vmand %vm3531_vm12, %vm3545_vm15  ;;  %v3560_v58 = vsel %vm3550_vm0, 1.0, %v7210_v62 }
 0x1d9   :  { %v2454_v60 = vadd.f32 %v6036_v6, %v1383_v54  ;;  %v6149_v55 = vpop.f32.mrf.mxu1  ;;  %v3565_v46 = vsel %vm3555_vm2, 1.0, %v7210_v62 }
 0x1da   :  { %3198 = vmatmul.mubr.bf16.vlgmr.msra.gmra.mxu1 %v6988_v8  ;;  %v6038_v59 = vpop.f32.mrf.mxu0  ;;  %v3570_v12 = vpack.c.bf16 %v3565_v46, %v3560_v58 }
 0x1db   :  { %3205 = vmatprep.mubr.bf16.mxu1 %v6996_v13  ;;  %v11347_v18 = vadd.f32 %v6148_v19, %v2454_v60  ;;  %v6039_v17 = vadd.f32 %v6038_v59, %v6037_v61  ;;  %v6150_v50 = vpop.f32.mrf.mxu1  ;;  %v1386_v13 = vld [vmem:[%s13577_s2 + $0x90] sm:$0xff]  ;;  %v7008_v59 = vld [vmem:[%s13576_s1 + $0x14c] ss:$48 sps:$4 sm:$0xff]  }
 0x1dc   :  { %2835 = vmatmul.mubr.bf16.gmra.mxu0 %v6979_v24  ;;  %v11329_v24 = vpack.c.bf16 %v3566_v20, %v3561_v16  ;;  %v6151_v5 = vadd.f32 %v6150_v50, %v6149_v55  ;;  %v6040_v15 = vpop.f32.mrf.mxu0  ;;  %v11377_v1 = vsel %vm3718_vm8, %v3570_v12, 0  ;;  %v6997_v61 = vld [vmem:[%s13576_s1 + $0xe0] ss:$48 sps:$4 sm:$0xff]   ;;  %v7000_v55 = vld [vmem:[%s13576_s1 + $0xe8] ss:$48 sps:$4 sm:$0xff]  }
 0x1dd   :  { %3036 = vmatprep.mubr.bf16.mxu0 %v6987_v43  ;;  %v3563_v43 = vsel %vm3553_vm3, 1.0, %v7210_v62  ;;  %v2459_v63 = vadd.f32 %v6039_v17, %v1384_v51  ;;  %v6152_v41 = vpop.f32.mrf.mxu1 }
 0x1de   :  { %5890 = vmatprep.subr.msk.bf16.mxu1 %vm3718_vm8, %v11329_v24  ;;  %v3568_v14 = vpack.c.bf16 %v3563_v43, %v3558_v2  ;;  %v6041_v47 = vpop.f32.mrf.mxu0  ;;  %v1387_v2 = vld [vmem:[%s13577_s2 + $0x98] sm:$0xff] }
 0x1df   :  { %v6042_v7 = vadd.f32 %v6041_v47, %v6040_v15  ;;  %v6153_v11 = vpop.f32.mrf.mxu1  ;;  %3942 = vmatpush1.bf16.msra.mxu1 %v11377_v1 }
 0x1e0   :  { %v11365_v0 = vsel %vm3718_vm8, %v3568_v14, 0  ;;  %v6154_v8 = vadd.f32 %v6153_v11, %v6152_v41  ;;  %5923 = vmatprep.subr.msk.bf16.mxu1 %vm3718_vm8, %v3569_v10  ;;  %v7005_v10 = vld [vmem:[%s13576_s1 + $0x144] ss:$48 sps:$4 sm:$0xff]  }
 0x1e1   :  { %v2462_v54 = vadd.f32 %v6042_v7, %v1385_v22  ;;  %v6155_v23 = vpop.f32.mrf.mxu1  ;;  %v7003_v22 = vld [vmem:[%s13576_s1 + $0x140] ss:$48 sps:$4 sm:$0xff]   ;;  %v7006_v7 = vld [vmem:[%s13576_s1 + $0x148] ss:$48 sps:$4 sm:$0xff]   ;;  %v7011_v11 = vld [vmem:[%s13576_s1 + $0x1a4] ss:$48 sps:$4 sm:$0xff]  }
 0x1e2   :  { %3206 = vmatmul.mubr.bf16.gmra.mxu1 %v6994_v36 }
 0x1e3   :  { %3213 = vmatprep.mubr.bf16.mxu1 %v7002_v25  ;;  %v11384_v39 = vadd.f32 %v6154_v8, %v2462_v54  ;;  %v6156_v27 = vpop.f32.mrf.mxu1  ;;  %v1389_v8 = vld [vmem:[%s13577_s2 + $0xa8] sm:$0xff] }
 0x1e4   :  { %3037 = vmatmul.mubr.bf16.vlgmr.msra.gmra.mxu0 %v6985_v40  ;;  %v11374_v40 = vadd.f32 %v6151_v5, %v2459_v63  ;;  %v6157_v16 = vadd.f32 %v6156_v27, %v6155_v23  ;;  %v7014_v54 = vld [vmem:[%s13576_s1 + $0x1ac] ss:$48 sps:$4 sm:$0xff]  }
 0x1e5   :  { %3044 = vmatprep.mubr.bf16.mxu0 %v6993_v42  ;;  %3749 = vmatpush1.bf16.msra.mxu0 %v11365_v0  ;;  %v6043_v42 = vpop.f32.mrf.mxu0  ;;  %v6158_v60 = vpop.f32.mrf.mxu1 }
 0x1e7   :  { %v6044_v56 = vpop.f32.mrf.mxu0  ;;  %v6159_v50 = vpop.f32.mrf.mxu1 }
 0x1e8   :  { %v6045_v6 = vadd.f32 %v6044_v56, %v6043_v42  ;;  %v6160_v14 = vadd.f32 %v6159_v50, %v6158_v60 }
 0x1e9   :  { %v6046_v19 = vpop.f32.mrf.mxu0  ;;  %v6161_v15 = vpop.f32.mrf.mxu1 }
 0x1ea   :  { %v2467_v20 = vadd.f32 %v6045_v6, %v1386_v13  ;;  %3214 = vmatmul.mubr.bf16.gmra.mxu1 %v7000_v55 }
 0x1eb   :  { %v6047_v51 = vpop.f32.mrf.mxu0  ;;  %3221 = vmatprep.mubr.bf16.mxu1 %v7008_v59  ;;  %v6162_v36 = vpop.f32.mrf.mxu1  ;;  %v7009_v59 = vld [vmem:[%s13576_s1 + $0x1a0] ss:$48 sps:$4 sm:$0xff]  }
 0x1ec   :  { %3045 = vmatmul.mubr.bf16.gmra.mxu0 %v6991_v37  ;;  %v11401_v43 = vadd.f32 %v6157_v16, %v2467_v20  ;;  %v6048_v17 = vadd.f32 %v6047_v51, %v6046_v19  ;;  %v1388_v37 = vld [vmem:[%s13577_s2 + $0xa0] sm:$0xff] }
 0x1ed   :  { %3052 = vmatprep.mubr.bf16.mxu0 %v6999_v35  ;;  %v6049_v58 = vpop.f32.mrf.mxu0  ;;  %v6163_v35 = vadd.f32 %v6162_v36, %v6161_v15  ;;  %v6164_v25 = vpop.f32.mrf.mxu1 }
 0x1ee   :  { %v2470_v5 = vadd.f32 %v6048_v17, %v1387_v2 }
 0x1ef   :  { %v6050_v46 = vpop.f32.mrf.mxu0  ;;  %v6165_v56 = vpop.f32.mrf.mxu1 }
 0x1f0   :  { %v11406_v63 = vadd.f32 %v6160_v14, %v2470_v5  ;;  %v6051_v41 = vadd.f32 %v6050_v46, %v6049_v58  ;;  %v6166_v6 = vadd.f32 %v6165_v56, %v6164_v25  ;;  %v7012_v14 = vld [vmem:[%s13576_s1 + $0x1a8] ss:$48 sps:$4 sm:$0xff]   ;;  %v7017_v58 = vld [vmem:[%s13576_s1 + $0x204] ss:$48 sps:$4 sm:$0xff]   ;;  %v7015_v56 = vld [vmem:[%s13576_s1 + $0x200] ss:$48 sps:$4 sm:$0xff]  }
 0x1f1   :  { %v6052_v12 = vpop.f32.mrf.mxu0  ;;  %v6167_v19 = vpop.f32.mrf.mxu1  ;;  %v1391_v5 = vld [vmem:[%s13577_s2 + $0xb8] sm:$0xff]  ;;  %v1392_v25 = vld [vmem:[%s13577_s2 + $0xc0] sm:$0xff] }
 0x1f2   :  { %v2475_v47 = vadd.f32 %v6051_v41, %v1388_v37  ;;  %3222 = vmatmul.mubr.bf16.gmra.mxu1 %v7006_v7  ;;  %v7020_v37 = vld [vmem:[%s13576_s1 + $0x20c] ss:$48 sps:$4 sm:$0xff]  }
 0x1f3   :  { %v6053_v42 = vpop.f32.mrf.mxu0  ;;  %3229 = vmatprep.mubr.bf16.mxu1 %v7014_v54 }
 0x1f4   :  { %3053 = vmatmul.mubr.bf16.gmra.mxu0 %v6997_v61  ;;  %v11423_v23 = vadd.f32 %v6163_v35, %v2475_v47  ;;  %v6054_v13 = vadd.f32 %v6053_v42, %v6052_v12  ;;  %v1390_v61 = vld [vmem:[%s13577_s2 + $0xb0] sm:$0xff] }
 0x1f5   :  { %3060 = vmatprep.mubr.bf16.mxu0 %v7005_v10  ;;  %v6055_v27 = vpop.f32.mrf.mxu0  ;;  %v6168_v10 = vpop.f32.mrf.mxu1 }
 0x1f6   :  { %v2478_v16 = vadd.f32 %v6054_v13, %v1389_v8  ;;  %v6169_v2 = vadd.f32 %v6168_v10, %v6167_v19  ;;  %v7023_v19 = vld [vmem:[%s13576_s1 + $0x264] ss:$48 sps:$4 sm:$0xff]  }
 0x1f7   :  { %v6056_v20 = vpop.f32.mrf.mxu0  ;;  %v6170_v50 = vpop.f32.mrf.mxu1 }
 0x1f8   :  { %v11428_v60 = vadd.f32 %v6166_v6, %v2478_v16  ;;  %v6057_v55 = vadd.f32 %v6056_v20, %v6055_v27  ;;  %v7018_v16 = vld [vmem:[%s13576_s1 + $0x208] ss:$48 sps:$4 sm:$0xff]  }
 0x1f9   :  { %v6058_v51 = vpop.f32.mrf.mxu0  ;;  %v6171_v36 = vpop.f32.mrf.mxu1 }
 0x1fa   :  { %v2483_v17 = vadd.f32 %v6057_v55, %v1390_v61  ;;  %v6172_v35 = vadd.f32 %v6171_v36, %v6170_v50  ;;  %3230 = vmatmul.mubr.bf16.gmra.mxu1 %v7012_v14  ;;  %v1393_v61 = vld [vmem:[%s13577_s2 + $0xc8] sm:$0xff] }
 0x1fb   :  { %v6059_v15 = vpop.f32.mrf.mxu0  ;;  %v6173_v47 = vpop.f32.mrf.mxu1  ;;  %3237 = vmatprep.mubr.bf16.mxu1 %v7020_v37  ;;  %v7026_v55 = vld [vmem:[%s13576_s1 + $0x26c] ss:$48 sps:$4 sm:$0xff]  }
 0x1fc   :  { %3061 = vmatmul.mubr.bf16.gmra.mxu0 %v7003_v22  ;;  %v11445_v46 = vadd.f32 %v6169_v2, %v2483_v17  ;;  %v6060_v41 = vadd.f32 %v6059_v15, %v6058_v51 }
 0x1fd   :  { %3068 = vmatprep.mubr.bf16.mxu0 %v7011_v11  ;;  %v6061_v12 = vpop.f32.mrf.mxu0  ;;  %v6174_v42 = vpop.f32.mrf.mxu1 }
 0x1fe   :  { %v2486_v22 = vadd.f32 %v6060_v41, %v1391_v5  ;;  %v6175_v54 = vadd.f32 %v6174_v42, %v6173_v47 }
 0x1ff   :  { %v6062_v7 = vpop.f32.mrf.mxu0  ;;  %v6176_v27 = vpop.f32.mrf.mxu1 }
 0x200   :  { %v11450_v11 = vadd.f32 %v6172_v35, %v2486_v22  ;;  %v6063_v8 = vadd.f32 %v6062_v7, %v6061_v12  ;;  %v7021_v12 = vld [vmem:[%s13576_s1 + $0x260] ss:$48 sps:$4 sm:$0xff]   ;;  %v7029_v7 = vld [vmem:[%s13576_s1 + $0x2c4] ss:$48 sps:$4 sm:$0xff]  }
 0x201   :  { %v6064_v13 = vpop.f32.mrf.mxu0  ;;  %v6177_v51 = vpop.f32.mrf.mxu1 }
 0x202   :  { %v2491_v6 = vadd.f32 %v6063_v8, %v1392_v25  ;;  %3238 = vmatmul.mubr.bf16.gmra.mxu1 %v7018_v16  ;;  %v7024_v25 = vld [vmem:[%s13576_s1 + $0x268] ss:$48 sps:$4 sm:$0xff]  }
 0x203   :  { %v6065_v20 = vpop.f32.mrf.mxu0  ;;  %v6179_v14 = vpop.f32.mrf.mxu1  ;;  %3245 = vmatprep.mubr.bf16.mxu1 %v7026_v55  ;;  %v1395_v8 = vld [vmem:[%s13577_s2 + $0xd8] sm:$0xff] }
 0x204   :  { %3069 = vmatmul.mubr.bf16.gmra.mxu0 %v7009_v59  ;;  %v11467_v10 = vadd.f32 %v6175_v54, %v2491_v6  ;;  %v6066_v2 = vadd.f32 %v6065_v20, %v6064_v13  ;;  %v6178_v59 = vadd.f32 %v6177_v51, %v6176_v27  ;;  %v7032_v54 = vld [vmem:[%s13576_s1 + $0x2cc] ss:$48 sps:$4 sm:$0xff]   ;;  %v1396_v20 = vld [vmem:[%s13577_s2 + $0xe0] sm:$0xff] }
 0x205   :  { %3076 = vmatprep.mubr.bf16.mxu0 %v7017_v58  ;;  %v6067_v17 = vpop.f32.mrf.mxu0  ;;  %v1394_v58 = vld [vmem:[%s13577_s2 + $0xd0] sm:$0xff]  ;;  %v6180_v41 = vpop.f32.mrf.mxu1 }
 0x206   :  { %v2494_v50 = vadd.f32 %v6066_v2, %v1393_v61  ;;  %v6181_v36 = vadd.f32 %v6180_v41, %v6179_v14  ;;  %v7027_v14 = vld [vmem:[%s13576_s1 + $0x2c0] ss:$48 sps:$4 sm:$0xff]   ;;  %v7035_v41 = vld [vmem:[%s13576_s1 + $0x324] ss:$48 sps:$4 sm:$0xff]  }
 0x207   :  { %v6068_v5 = vpop.f32.mrf.mxu0  ;;  %v6182_v47 = vpop.f32.mrf.mxu1 }
 0x208   :  { %v11472_v15 = vadd.f32 %v6178_v59, %v2494_v50  ;;  %v6069_v37 = vadd.f32 %v6068_v5, %v6067_v17 }
 0x209   :  { %v6070_v35 = vpop.f32.mrf.mxu0  ;;  %v6183_v6 = vpop.f32.mrf.mxu1 }
 0x20a   :  { %v2499_v22 = vadd.f32 %v6069_v37, %v1394_v58  ;;  %v6184_v27 = vadd.f32 %v6183_v6, %v6182_v47  ;;  %3246 = vmatmul.mubr.bf16.gmra.mxu1 %v7024_v25  ;;  %v7030_v37 = vld [vmem:[%s13576_s1 + $0x2c8] ss:$48 sps:$4 sm:$0xff]  }
 0x20b   :  { %v6071_v42 = vpop.f32.mrf.mxu0  ;;  %v6185_v61 = vpop.f32.mrf.mxu1  ;;  %3253 = vmatprep.mubr.bf16.mxu1 %v7032_v54 }
 0x20c   :  { %3077 = vmatmul.mubr.bf16.gmra.mxu0 %v7015_v56  ;;  %v11489_v13 = vadd.f32 %v6181_v36, %v2499_v22  ;;  %v6072_v56 = vadd.f32 %v6071_v42, %v6070_v35  ;;  %v1397_v36 = vld [vmem:[%s13577_s2 + $0xe8] sm:$0xff] }
 0x20d   :  { %3084 = vmatprep.mubr.bf16.mxu0 %v7023_v19  ;;  %v6073_v16 = vpop.f32.mrf.mxu0  ;;  %v6186_v59 = vpop.f32.mrf.mxu1 }
 0x20e   :  { %v2502_v19 = vadd.f32 %v6072_v56, %v1395_v8  ;;  %v6187_v17 = vadd.f32 %v6186_v59, %v6185_v61  ;;  %v1398_v56 = vld [vmem:[%s13577_s2 + $0xf0] sm:$0xff] }
 0x20f   :  { %v6074_v55 = vpop.f32.mrf.mxu0  ;;  %v6188_v5 = vpop.f32.mrf.mxu1 }
 0x210   :  { %v11494_v2 = vadd.f32 %v6184_v27, %v2502_v19  ;;  %v6075_v51 = vadd.f32 %v6074_v55, %v6073_v16  ;;  %v7033_v55 = vld [vmem:[%s13576_s1 + $0x320] ss:$48 sps:$4 sm:$0xff]  }
 0x211   :  { %v6076_v50 = vpop.f32.mrf.mxu0  ;;  %v6189_v25 = vpop.f32.mrf.mxu1 }
 0x212   :  { %v2507_v58 = vadd.f32 %v6075_v51, %v1396_v20  ;;  %3254 = vmatmul.mubr.bf16.gmra.mxu1 %v7030_v37 }
 0x213   :  { %v6077_v35 = vpop.f32.mrf.mxu0  ;;  %v6191_v54 = vpop.f32.mrf.mxu1 }
 0x214   :  { %3085 = vmatmul.mubr.bf16.gmra.mxu0 %v7021_v12  ;;  %v7038_v12 = vld [vmem:[%s13576_s1 + $0x32c] ss:$48 sps:$4 sm:$0xff]   ;;  %v11511_v22 = vadd.f32 %v6187_v17, %v2507_v58  ;;  %v6078_v47 = vadd.f32 %v6077_v35, %v6076_v50  ;;  %v7036_v17 = vld [vmem:[%s13576_s1 + $0x328] ss:$48 sps:$4 sm:$0xff]   ;;  %v7041_v50 = vld [vmem:[%s13576_s1 + $0x384] ss:$48 sps:$4 sm:$0xff]  }
 0x215   :  { %3092 = vmatprep.mubr.bf16.mxu0 %v7029_v7  ;;  %v6190_v7 = vadd.f32 %v6189_v25, %v6188_v5  ;;  %v6079_v8 = vpop.f32.mrf.mxu0  ;;  %3261 = vmatprep.mubr.bf16.mxu1 %v7038_v12  ;;  %v6192_v19 = vpop.f32.mrf.mxu1  ;;  %v7044_v5 = vld [vmem:[%s13576_s1 + $0x38c] ss:$48 sps:$4 sm:$0xff]  }
 0x216   :  { %v2510_v42 = vadd.f32 %v6078_v47, %v1397_v36  ;;  %v6193_v61 = vadd.f32 %v6192_v19, %v6191_v54 }
 0x217   :  { %v6080_v6 = vpop.f32.mrf.mxu0  ;;  %v6194_v59 = vpop.f32.mrf.mxu1 }
 0x218   :  { %v11516_v27 = vadd.f32 %v6190_v7, %v2510_v42  ;;  %v6081_v16 = vadd.f32 %v6080_v6, %v6079_v8 }
 0x219   :  { %v6082_v20 = vpop.f32.mrf.mxu0  ;;  %v6195_v36 = vpop.f32.mrf.mxu1 }
 0x21a   :  { %v2515_v51 = vadd.f32 %v6081_v16, %v1398_v56  ;;  %v6196_v35 = vadd.f32 %v6195_v36, %v6194_v59  ;;  %3262 = vmatmul.mubr.bf16.gmra.mxu1 %v7036_v17  ;;  %v7039_v16 = vld [vmem:[%s13576_s1 + $0x380] ss:$48 sps:$4 sm:$0xff]   ;;  %v7050_v59 = vld [vmem:[%s13576_s1 + $0x3ec] ss:$48 sps:$4 sm:$0xff]  }
 0x21b   :  { %v6083_v58 = vpop.f32.mrf.mxu0  ;;  %v6325_v25 = vpop.f32.mrf.mxu1  ;;  %3269 = vmatprep.mubr.bf16.mxu1 %v7044_v5 }
 0x21c   :  { %3093 = vmatmul.mubr.bf16.gmra.mxu0 %v7027_v14  ;;  %v1399_v14 = vld [vmem:[%s13577_s2 + $0xf8] sm:$0xff]  ;;  %v11533_v37 = vadd.f32 %v6193_v61, %v2515_v51 }
 0x21d   :  { %3100 = vmatprep.mubr.bf16.mxu0 %v7035_v41  ;;  %v6084_v41 = vadd.f32 %v6083_v58, %v6082_v20  ;;  %v6213_v12 = vpop.f32.mrf.mxu0  ;;  %v6326_v54 = vpop.f32.mrf.mxu1  ;;  %v7042_v20 = vld [vmem:[%s13576_s1 + $0x388] ss:$48 sps:$4 sm:$0xff]  }
 0x21e   :  { %v6327_v56 = vadd.f32 %v6326_v54, %v6325_v25 }
 0x21f   :  { %v2518_v47 = vadd.f32 %v6084_v41, %v1399_v14  ;;  %v6214_v7 = vpop.f32.mrf.mxu0  ;;  %v6328_v61 = vpop.f32.mrf.mxu1 }
 0x220   :  { %v6215_v42 = vadd.f32 %v6214_v7, %v6213_v12 }
 0x221   :  { %v11535_v8 = vadd.f32 %v6196_v35, %v2518_v47  ;;  %v6216_v6 = vpop.f32.mrf.mxu0  ;;  %v6329_v14 = vpop.f32.mrf.mxu1 }
 0x222   :  { %v2717_v19 = vadd.f32 %v6215_v42, %v11125_v30  ;;  %v6330_v58 = vadd.f32 %v6329_v14, %v6328_v61  ;;  %3270 = vmatmul.mubr.bf16.gmra.mxu1 %v7042_v20  ;;  %v7045_v42 = vld [vmem:[%s13576_s1 + $0x3e0] ss:$48 sps:$4 sm:$0xff]  }
 0x223   :  { %v6217_v51 = vpop.f32.mrf.mxu0  ;;  %v6331_v41 = vpop.f32.mrf.mxu1  ;;  %3277 = vmatprep.mubr.bf16.mxu1 %v7050_v59 }
 0x224   :  { %3101 = vmatmul.mubr.bf16.gmra.mxu0 %v7033_v55  ;;  %v7047_v55 = vld [vmem:[%s13576_s1 + $0x3e4] ss:$48 sps:$4 sm:$0xff]   ;;  %v11550_v17 = vadd.f32 %v6327_v56, %v2717_v19  ;;  %v7056_v19 = vld [vmem:[%s13576_s1 + $0x44c] ss:$48 sps:$4 sm:$0xff]  }
 0x225   :  { %3108 = vmatprep.mubr.bf16.mxu0 %v7041_v50  ;;  %v6218_v50 = vadd.f32 %v6217_v51, %v6216_v6  ;;  %v6219_v30 = vpop.f32.mrf.mxu0  ;;  %v6332_v47 = vpop.f32.mrf.mxu1  ;;  %v7053_v6 = vld [vmem:[%s13576_s1 + $0x444] ss:$48 sps:$4 sm:$0xff]  }
 0x226   :  { %v6333_v25 = vadd.f32 %v6332_v47, %v6331_v41 }
 0x227   :  { %v2720_v5 = vadd.f32 %v6218_v50, %v11130_v26  ;;  %v6220_v36 = vpop.f32.mrf.mxu0  ;;  %v6334_v56 = vpop.f32.mrf.mxu1  ;;  %v7048_v26 = vld [vmem:[%s13576_s1 + $0x3e8] ss:$48 sps:$4 sm:$0xff]  }
 0x228   :  { %v6221_v12 = vadd.f32 %v6220_v36, %v6219_v30 }
 0x229   :  { %v11553_v35 = vadd.f32 %v6330_v58, %v2720_v5  ;;  %v6222_v7 = vpop.f32.mrf.mxu0 }
 0x22a   :  { %v2725_v54 = vadd.f32 %v6221_v12, %v11147_v33  ;;  %3278 = vmatmul.mubr.bf16.gmra.mxu1 %v7048_v26  ;;  %v7051_v12 = vld [vmem:[%s13576_s1 + $0x440] ss:$48 sps:$4 sm:$0xff]  }
 0x22b   :  { %3285 = vmatprep.mubr.bf16.mxu1 %v7056_v19 }
 0x22c   :  { %3109 = vmatmul.mubr.bf16.gmra.mxu0 %v7039_v16  ;;  %v6223_v16 = vpop.f32.mrf.mxu0  ;;  %v11568_v61 = vadd.f32 %v6333_v25, %v2725_v54  ;;  %v7062_v54 = vld [vmem:[%s13576_s1 + $0x4ac] ss:$48 sps:$4 sm:$0xff]  }
 0x22d   :  { %3116 = vmatprep.mubr.bf16.mxu0 %v7047_v55  ;;  %v6224_v20 = vadd.f32 %v6223_v16, %v6222_v7  ;;  %v6335_v55 = vpop.f32.mrf.mxu1  ;;  %v7059_v7 = vld [vmem:[%s13576_s1 + $0x4a4] ss:$48 sps:$4 sm:$0xff]  }
 0x22e   :  { %v6336_v51 = vadd.f32 %v6335_v55, %v6334_v56  ;;  %v6225_v33 = vpop.f32.mrf.mxu0 }
 0x22f   :  { %v2728_v59 = vadd.f32 %v6224_v20, %v11152_v52  ;;  %v6337_v50 = vpop.f32.mrf.mxu1  ;;  %v7054_v52 = vld [vmem:[%s13576_s1 + $0x448] ss:$48 sps:$4 sm:$0xff]  }
 0x230   :  { %v6226_v14 = vpop.f32.mrf.mxu0 }
 0x231   :  { %v11571_v58 = vadd.f32 %v6336_v51, %v2728_v59  ;;  %v6227_v30 = vadd.f32 %v6226_v14, %v6225_v33  ;;  %v6338_v5 = vpop.f32.mrf.mxu1 }
 0x232   :  { %v6339_v41 = vadd.f32 %v6338_v5, %v6337_v50  ;;  %v6228_v36 = vpop.f32.mrf.mxu0  ;;  %3286 = vmatmul.mubr.bf16.gmra.mxu1 %v7054_v52 }
 0x233   :  { %v2733_v47 = vadd.f32 %v6227_v30, %v11169_v49  ;;  %v6340_v25 = vpop.f32.mrf.mxu1  ;;  %3293 = vmatprep.mubr.bf16.mxu1 %v7062_v54  ;;  %v7057_v30 = vld [vmem:[%s13576_s1 + $0x4a0] ss:$48 sps:$4 sm:$0xff]  }
 0x234   :  { %3117 = vmatmul.mubr.bf16.gmra.mxu0 %v7045_v42  ;;  %v6229_v42 = vpop.f32.mrf.mxu0 }
 0x235   :  { %3124 = vmatprep.mubr.bf16.mxu0 %v7053_v6  ;;  %v11586_v56 = vadd.f32 %v6339_v41, %v2733_v47  ;;  %v6230_v26 = vadd.f32 %v6229_v42, %v6228_v36  ;;  %v6341_v6 = vpop.f32.mrf.mxu1  ;;  %v7065_v36 = vld [vmem:[%s13576_s1 + $0x504] ss:$48 sps:$4 sm:$0xff]   ;;  %v7068_v47 = vld [vmem:[%s13576_s1 + $0x50c] ss:$48 sps:$4 sm:$0xff]  }
 0x236   :  { %v6342_v16 = vadd.f32 %v6341_v6, %v6340_v25 }
 0x237   :  { %v2736_v19 = vadd.f32 %v6230_v26, %v11174_v48  ;;  %v6343_v20 = vpop.f32.mrf.mxu1  ;;  %v7060_v48 = vld [vmem:[%s13576_s1 + $0x4a8] ss:$48 sps:$4 sm:$0xff]  }
 0x238   :  { %v6231_v49 = vpop.f32.mrf.mxu0 }
 0x239   :  { %v11589_v51 = vadd.f32 %v6342_v16, %v2736_v19  ;;  %v6344_v59 = vpop.f32.mrf.mxu1 }
 0x23a   :  { %v6232_v55 = vpop.f32.mrf.mxu0  ;;  %v6345_v50 = vadd.f32 %v6344_v59, %v6343_v20  ;;  %3294 = vmatmul.mubr.bf16.gmra.mxu1 %v7060_v48 }
 0x23b   :  { %v6233_v33 = vadd.f32 %v6232_v55, %v6231_v49  ;;  %v6346_v41 = vpop.f32.mrf.mxu1  ;;  %3301 = vmatprep.mubr.bf16.mxu1 %v7068_v47 }
 0x23c   :  { %3125 = vmatmul.mubr.bf16.gmra.mxu0 %v7051_v12  ;;  %v6234_v14 = vpop.f32.mrf.mxu0 }
 0x23d   :  { %3132 = vmatprep.mubr.bf16.mxu0 %v7059_v7  ;;  %v2741_v5 = vadd.f32 %v6233_v33, %v11191_v28  ;;  %v6347_v7 = vpop.f32.mrf.mxu1  ;;  %v7063_v33 = vld [vmem:[%s13576_s1 + $0x500] ss:$48 sps:$4 sm:$0xff]  }
 0x23e   :  { %v6235_v12 = vpop.f32.mrf.mxu0  ;;  %v6348_v42 = vadd.f32 %v6347_v7, %v6346_v41 }
 0x23f   :  { %v11604_v25 = vadd.f32 %v6345_v50, %v2741_v5  ;;  %v6236_v52 = vadd.f32 %v6235_v12, %v6234_v14  ;;  %v6349_v26 = vpop.f32.mrf.mxu1  ;;  %v7071_v14 = vld [vmem:[%s13576_s1 + $0x564] ss:$48 sps:$4 sm:$0xff]   ;;  %v7074_v5 = vld [vmem:[%s13576_s1 + $0x56c] ss:$48 sps:$4 sm:$0xff]  }
 0x241   :  { %v2744_v54 = vadd.f32 %v6236_v52, %v11196_v21  ;;  %v6350_v19 = vpop.f32.mrf.mxu1  ;;  %v7066_v21 = vld [vmem:[%s13576_s1 + $0x508] ss:$48 sps:$4 sm:$0xff]  }
 0x242   :  { %v6351_v20 = vadd.f32 %v6350_v19, %v6349_v26  ;;  %3302 = vmatmul.mubr.bf16.gmra.mxu1 %v7066_v21 }
 0x243   :  { %v11607_v16 = vadd.f32 %v6348_v42, %v2744_v54  ;;  %v6352_v50 = vpop.f32.mrf.mxu1  ;;  %3309 = vmatprep.mubr.bf16.mxu1 %v7074_v5 }
 0x244   :  { %v6237_v28 = vpop.f32.mrf.mxu0  ;;  %3133 = vmatmul.mubr.bf16.gmra.mxu0 %v7057_v30 }
 0x245   :  { %3140 = vmatprep.mubr.bf16.mxu0 %v7065_v36  ;;  %v6353_v36 = vpop.f32.mrf.mxu1 }
 0x246   :  { %v6238_v6 = vpop.f32.mrf.mxu0  ;;  %v6354_v47 = vadd.f32 %v6353_v36, %v6352_v50 }
 0x247   :  { %v6239_v49 = vadd.f32 %v6238_v6, %v6237_v28  ;;  %v6355_v52 = vpop.f32.mrf.mxu1 }
 0x248   :  { %v6240_v55 = vpop.f32.mrf.mxu0 }
 0x249   :  { %v2749_v59 = vadd.f32 %v6239_v49, %v11213_v31  ;;  %v6356_v54 = vpop.f32.mrf.mxu1  ;;  %v7069_v49 = vld [vmem:[%s13576_s1 + $0x560] ss:$48 sps:$4 sm:$0xff]  }
 0x24a   :  { %v6241_v30 = vpop.f32.mrf.mxu0  ;;  %v6357_v26 = vadd.f32 %v6356_v54, %v6355_v52 }
 0x24b   :  { %v11622_v41 = vadd.f32 %v6351_v20, %v2749_v59  ;;  %v6242_v48 = vadd.f32 %v6241_v30, %v6240_v55  ;;  %v6358_v20 = vpop.f32.mrf.mxu1  ;;  %v7077_v55 = vld [vmem:[%s13576_s1 + $0x5c4] ss:$48 sps:$4 sm:$0xff]   ;;  %v7080_v59 = vld [vmem:[%s13576_s1 + $0x5cc] ss:$48 sps:$4 sm:$0xff]  }
 0x24c   :  { %v6243_v12 = vpop.f32.mrf.mxu0  ;;  %3141 = vmatmul.mubr.bf16.gmra.mxu0 %v7063_v33 }
 0x24d   :  { %v2752_v31 = vadd.f32 %v6242_v48, %v11218_v9  ;;  %3148 = vmatprep.mubr.bf16.mxu0 %v7071_v14  ;;  %v7072_v9 = vld [vmem:[%s13576_s1 + $0x568] ss:$48 sps:$4 sm:$0xff]   ;;  %v6359_v14 = vpop.f32.mrf.mxu1 }
 0x24e   :  { %v6244_v7 = vpop.f32.mrf.mxu0  ;;  %v6360_v5 = vadd.f32 %v6359_v14, %v6358_v20  ;;  %3310 = vmatmul.mubr.bf16.gmra.mxu1 %v7072_v9 }
 0x24f   :  { %v11625_v42 = vadd.f32 %v6354_v47, %v2752_v31  ;;  %v6245_v28 = vadd.f32 %v6244_v7, %v6243_v12  ;;  %v6361_v48 = vpop.f32.mrf.mxu1  ;;  %3317 = vmatprep.mubr.bf16.mxu1 %v7080_v59 }
 0x250   :  { %v6246_v6 = vpop.f32.mrf.mxu0 }
 0x251   :  { %v2757_v19 = vadd.f32 %v6245_v28, %v11235_v57  ;;  %v6362_v47 = vpop.f32.mrf.mxu1  ;;  %v7075_v28 = vld [vmem:[%s13576_s1 + $0x5c0] ss:$48 sps:$4 sm:$0xff]  }
 0x252   :  { %v6247_v33 = vpop.f32.mrf.mxu0  ;;  %v6363_v52 = vadd.f32 %v6362_v47, %v6361_v48 }
 0x253   :  { %v11640_v50 = vadd.f32 %v6357_v26, %v2757_v19  ;;  %v6248_v21 = vadd.f32 %v6247_v33, %v6246_v6  ;;  %v6364_v26 = vpop.f32.mrf.mxu1 }
 0x254   :  { %v6249_v30 = vpop.f32.mrf.mxu0  ;;  %3149 = vmatmul.mubr.bf16.gmra.mxu0 %v7069_v49 }
 0x255   :  { %v2760_v57 = vadd.f32 %v6248_v21, %v11241_v44  ;;  %3156 = vmatprep.mubr.bf16.mxu0 %v7077_v55  ;;  %v7078_v44 = vld [vmem:[%s13576_s1 + $0x5c8] ss:$48 sps:$4 sm:$0xff]   ;;  %v6365_v20 = vpop.f32.mrf.mxu1  ;;  %v14893_v21 = vmov 0  }
 0x256   :  { %v6250_v36 = vpop.f32.mrf.mxu0  ;;  %v6366_v33 = vadd.f32 %v6365_v20, %v6364_v26  ;;  %3318 = vmatmul.mubr.bf16.gmra.mxu1 %v7078_v44 }
 0x257   :  { %v11643_v12 = vadd.f32 %v6360_v5, %v2760_v57  ;;  %v6251_v31 = vadd.f32 %v6250_v36, %v6249_v30  ;;  %v6367_v59 = vpop.f32.mrf.mxu1  ;;  %3959 = vmatprep.mubr.bf16.mxu1 %v14893_v21 }
 0x258   :  { %v6252_v7 = vpop.f32.mrf.mxu0 }
 0x259   :  { %v2765_v54 = vadd.f32 %v6251_v31, %v11263_v32  ;;  %v6368_v57 = vpop.f32.mrf.mxu1 }
 0x25a   :  { %v6253_v6 = vpop.f32.mrf.mxu0  ;;  %v6369_v5 = vadd.f32 %v6368_v57, %v6367_v59 }
 0x25b   :  { %v11652_v49 = vadd.f32 %v6363_v52, %v2765_v54  ;;  %v6254_v19 = vadd.f32 %v6253_v6, %v6252_v7  ;;  %v6370_v31 = vpop.f32.mrf.mxu1 }
 0x25c   :  { %v6255_v9 = vpop.f32.mrf.mxu0  ;;  %3157 = vmatmul.mubr.bf16.gmra.mxu0 %v7075_v28 }
 0x25d   :  { %v2768_v55 = vadd.f32 %v6254_v19, %v11279_v29  ;;  %3766 = vmatprep.mubr.bf16.mxu0 %v14893_v21  ;;  %v6371_v7 = vpop.f32.mrf.mxu1 }
 0x25e   :  { %v6256_v32 = vpop.f32.mrf.mxu0  ;;  %v6372_v26 = vadd.f32 %v6371_v7, %v6370_v31 }
 0x25f   :  { %v11657_v14 = vadd.f32 %v6366_v33, %v2768_v55  ;;  %v6257_v30 = vadd.f32 %v6256_v32, %v6255_v9  ;;  %v6373_v44 = vpop.f32.mrf.mxu1 }
 0x260   :  { %v6258_v48 = vpop.f32.mrf.mxu0 }
 0x261   :  { %v2773_v36 = vadd.f32 %v6257_v30, %v11316_v4  ;;  %v6374_v9 = vpop.f32.mrf.mxu1 }
 0x262   :  { %v6259_v47 = vpop.f32.mrf.mxu0  ;;  %v6375_v55 = vadd.f32 %v6374_v9, %v6373_v44 }
 0x263   :  { %v11660_v52 = vadd.f32 %v6369_v5, %v2773_v36  ;;  %v6260_v29 = vadd.f32 %v6259_v47, %v6258_v48  ;;  %v6376_v59 = vpop.f32.mrf.mxu1 }
 0x264   :  { %v6261_v28 = vpop.f32.mrf.mxu0 }
 0x265   :  { %v2776_v54 = vadd.f32 %v6260_v29, %v11347_v18  ;;  %v6377_v5 = vpop.f32.mrf.mxu1 }
 0x266   :  { %v6262_v6 = vpop.f32.mrf.mxu0  ;;  %v6378_v36 = vadd.f32 %v6377_v5, %v6376_v59 }
 0x267   :  { %v11663_v19 = vadd.f32 %v6372_v26, %v2776_v54  ;;  %v6263_v20 = vadd.f32 %v6262_v6, %v6261_v28  ;;  %v6379_v31 = vpop.f32.mrf.mxu1 }
 0x268   :  { %v6264_v33 = vpop.f32.mrf.mxu0 }
 0x269   :  { %v2781_v4 = vadd.f32 %v6263_v20, %v11374_v40  ;;  %v6380_v28 = vpop.f32.mrf.mxu1 }
 0x26a   :  { %v6265_v32 = vpop.f32.mrf.mxu0  ;;  %v6381_v54 = vadd.f32 %v6380_v28, %v6379_v31 }
 0x26b   :  { %v11666_v30 = vadd.f32 %v6375_v55, %v2781_v4  ;;  %v6266_v57 = vadd.f32 %v6265_v32, %v6264_v33  ;;  %v6382_v44 = vpop.f32.mrf.mxu1 }
 0x26c   :  { %v6267_v48 = vpop.f32.mrf.mxu0 }
 0x26d   :  { %v2784_v18 = vadd.f32 %v6266_v57, %v11384_v39  ;;  %v6383_v55 = vpop.f32.mrf.mxu1 }
 0x26e   :  { %v6268_v47 = vpop.f32.mrf.mxu0  ;;  %v6384_v4 = vadd.f32 %v6383_v55, %v6382_v44 }
 0x26f   :  { %v11669_v29 = vadd.f32 %v6378_v36, %v2784_v18  ;;  %v6269_v7 = vadd.f32 %v6268_v47, %v6267_v48  ;;  %v6385_v59 = vpop.f32.mrf.mxu1  ;;  %v3521_v47 = vadd.s32 512, %v14892_v34 }
 0x270   :  { %v6270_v26 = vpop.f32.mrf.mxu0 }
 0x271   :  { %v2789_v40 = vadd.f32 %v6269_v7, %v11401_v43  ;;  %v6386_v48 = vpop.f32.mrf.mxu1  ;;  %vm3528_vm4 = vcmp.ge.s32.totalorder %v3521_v47, %v11267_v45  ;;  %vm3533_vm10 = vcmp.ge.s32.totalorder %v3521_v47, %v11247_v3  ;;  %vm3542_vm13 = vcmp.lt.s32.totalorder %v3521_v47, %v11276_v38 }
 0x272   :  { %v6271_v6 = vpop.f32.mrf.mxu0  ;;  %v6387_v18 = vadd.f32 %v6386_v48, %v6385_v59  ;;  %vm3547_vm1 = vcmp.lt.s32.totalorder %v3521_v47, %v11255_v53  ;;  %vm3552_vm14 = vmand %vm3528_vm4, %vm3542_vm13 }
 0x273   :  { %v11672_v20 = vadd.f32 %v6381_v54, %v2789_v40  ;;  %v6272_v9 = vadd.f32 %v6271_v6, %v6270_v26  ;;  %v6388_v31 = vpop.f32.mrf.mxu1  ;;  %vm3557_vm5 = vmand %vm3533_vm10, %vm3547_vm1  ;;  %v3562_v6 = vsel %vm3552_vm14, 1.0, %v7210_v62 }
 0x274   :  { %v6273_v33 = vpop.f32.mrf.mxu0  ;;  %v3567_v3 = vsel %vm3557_vm5, 1.0, %v7210_v62 }
 0x275   :  { %v2792_v39 = vadd.f32 %v6272_v9, %v11406_v63  ;;  %v6389_v26 = vpop.f32.mrf.mxu1  ;;  %v11690_v38 = vpack.c.bf16 %v3567_v3, %v3562_v6 }
 0x276   :  { %v6274_v32 = vpop.f32.mrf.mxu0 }
 0x277   :  { %v11675_v57 = vadd.f32 %v6384_v4, %v2792_v39  ;;  %v6275_v5 = vadd.f32 %v6274_v32, %v6273_v33  ;;  %v6391_v44 = vpop.f32.mrf.mxu1  ;;  %6747 = vmatprep.subr.msk.bf16.mxu0 %vm3718_vm8, %v11690_v38 }
 0x278   :  { %v6276_v36 = vpop.f32.mrf.mxu0 }
 0x279   :  { %v2797_v43 = vadd.f32 %v6275_v5, %v11423_v23  ;;  %v6390_v23 = vadd.f32 %v6389_v26, %v6388_v31  ;;  %v6392_v45 = vpop.f32.mrf.mxu1 }
 0x27a   :  { %v6277_v7 = vpop.f32.mrf.mxu0  ;;  %v6393_v33 = vadd.f32 %v6392_v45, %v6391_v44 }
 0x27b   :  { %v11679_v28 = vadd.f32 %v6387_v18, %v2797_v43  ;;  %v6278_v54 = vadd.f32 %v6277_v7, %v6276_v36 }
 0x27c   :  { %v6279_v63 = vpop.f32.mrf.mxu0 }
 0x27d   :  { %v2800_v40 = vadd.f32 %v6278_v54, %v11428_v60  ;;  %v6394_v60 = vpop.f32.mrf.mxu1 }
 0x27e   :  { %v6280_v34 = vpop.f32.mrf.mxu0 }
 0x27f   :  { %v11687_v9 = vadd.f32 %v6390_v23, %v2800_v40  ;;  %v6281_v55 = vadd.f32 %v6280_v34, %v6279_v63  ;;  %v6395_v5 = vpop.f32.mrf.mxu1 }
 0x280   :  { %v6282_v39 = vpop.f32.mrf.mxu0  ;;  %v6396_v36 = vadd.f32 %v6395_v5, %v6394_v60 }
 0x281   :  { %v2805_v53 = vadd.f32 %v6281_v55, %v11445_v46  ;;  %v6397_v62 = vpop.f32.mrf.mxu1 }
 0x282   :  { %v6283_v4 = vpop.f32.mrf.mxu0 }
 0x283   :  { %v11695_v59 = vadd.f32 %v6393_v33, %v2805_v53  ;;  %v6284_v32 = vadd.f32 %v6283_v4, %v6282_v39  ;;  %v6398_v7 = vpop.f32.mrf.mxu1 }
 0x284   :  { %v6285_v48 = vpop.f32.mrf.mxu0  ;;  %v6399_v46 = vadd.f32 %v6398_v7, %v6397_v62 }
 0x285   :  { %v2808_v18 = vadd.f32 %v6284_v32, %v11450_v11  ;;  %v6400_v63 = vpop.f32.mrf.mxu1 }
 0x286   :  { %v6286_v43 = vpop.f32.mrf.mxu0 }
 0x287   :  { %v11698_v31 = vadd.f32 %v6396_v36, %v2808_v18  ;;  %v6287_v47 = vadd.f32 %v6286_v43, %v6285_v48  ;;  %v6401_v34 = vpop.f32.mrf.mxu1 }
 0x288   :  { %v6288_v54 = vpop.f32.mrf.mxu0  ;;  %v6402_v55 = vadd.f32 %v6401_v34, %v6400_v63 }
 0x289   :  { %v2813_v26 = vadd.f32 %v6287_v47, %v11467_v10  ;;  %v6403_v45 = vpop.f32.mrf.mxu1 }
 0x28a   :  { %v6289_v40 = vpop.f32.mrf.mxu0 }
 0x28b   :  { %v11701_v23 = vadd.f32 %v6399_v46, %v2813_v26  ;;  %v6290_v44 = vadd.f32 %v6289_v40, %v6288_v54  ;;  %v6404_v53 = vpop.f32.mrf.mxu1 }
 0x28c   :  { %v6291_v6 = vpop.f32.mrf.mxu0  ;;  %v6405_v60 = vadd.f32 %v6404_v53, %v6403_v45 }
 0x28d   :  { %v2816_v11 = vadd.f32 %v6290_v44, %v11472_v15  ;;  %v6406_v32 = vpop.f32.mrf.mxu1 }
 0x28e   :  { %v6292_v3 = vpop.f32.mrf.mxu0 }
 0x28f   :  { %v11704_v33 = vadd.f32 %v6402_v55, %v2816_v11  ;;  %v6293_v39 = vadd.f32 %v6292_v3, %v6291_v6  ;;  %v6407_v36 = vpop.f32.mrf.mxu1 }
 0x290   :  { %v6294_v4 = vpop.f32.mrf.mxu0  ;;  %v6408_v43 = vadd.f32 %v6407_v36, %v6406_v32 }
 0x291   :  { %v2821_v10 = vadd.f32 %v6293_v39, %v11489_v13  ;;  %v6409_v47 = vpop.f32.mrf.mxu1 }
 0x292   :  { %v6295_v5 = vpop.f32.mrf.mxu0 }
 0x293   :  { %v11707_v48 = vadd.f32 %v6405_v60, %v2821_v10  ;;  %v6296_v18 = vadd.f32 %v6295_v5, %v6294_v4  ;;  %v6410_v26 = vpop.f32.mrf.mxu1 }
 0x294   :  { %v6297_v62 = vpop.f32.mrf.mxu0  ;;  %v6411_v63 = vadd.f32 %v6410_v26, %v6409_v47 }
 0x295   :  { %v2824_v15 = vadd.f32 %v6296_v18, %v11494_v2  ;;  %v6412_v44 = vpop.f32.mrf.mxu1 }
 0x296   :  { %v6298_v7 = vpop.f32.mrf.mxu0 }
 0x297   :  { %v11710_v46 = vadd.f32 %v6408_v43, %v2824_v15  ;;  %v6299_v54 = vadd.f32 %v6298_v7, %v6297_v62  ;;  %v6413_v55 = vpop.f32.mrf.mxu1 }
 0x298   :  { %v6300_v40 = vpop.f32.mrf.mxu0  ;;  %v6414_v3 = vadd.f32 %v6413_v55, %v6412_v44 }
 0x299   :  { %v2829_v13 = vadd.f32 %v6299_v54, %v11511_v22  ;;  %v6415_v39 = vpop.f32.mrf.mxu1 }
 0x29a   :  { %v6301_v34 = vpop.f32.mrf.mxu0 }
 0x29b   :  { %v11713_v6 = vadd.f32 %v6411_v63, %v2829_v13  ;;  %v6302_v11 = vadd.f32 %v6301_v34, %v6300_v40  ;;  %v6416_v10 = vpop.f32.mrf.mxu1 }
 0x29c   :  { %v6303_v45 = vpop.f32.mrf.mxu0  ;;  %v6417_v32 = vadd.f32 %v6416_v10, %v6415_v39 }
 0x29d   :  { %v2832_v2 = vadd.f32 %v6302_v11, %v11516_v27  ;;  %v6418_v18 = vpop.f32.mrf.mxu1 }
 0x29e   :  { %v6304_v53 = vpop.f32.mrf.mxu0 }
 0x29f   :  { %v11716_v60 = vadd.f32 %v6414_v3, %v2832_v2  ;;  %v6305_v4 = vadd.f32 %v6304_v53, %v6303_v45  ;;  %v6419_v43 = vpop.f32.mrf.mxu1 }
 0x2a0   :  { %v6306_v5 = vpop.f32.mrf.mxu0  ;;  %v6420_v7 = vadd.f32 %v6419_v43, %v6418_v18 }
 0x2a1   :  { %v2837_v22 = vadd.f32 %v6305_v4, %v11533_v37  ;;  %v6549_v54 = vpop.f32.mrf.mxu1 }
 0x2a2   :  { %v6307_v36 = vpop.f32.mrf.mxu0 }
 0x2a3   :  { %v11719_v62 = vadd.f32 %v6417_v32, %v2837_v22  ;;  %v6308_v15 = vadd.f32 %v6307_v36, %v6306_v5  ;;  %v6550_v13 = vpop.f32.mrf.mxu1 }
 0x2a4   :  { %v6437_v47 = vpop.f32.mrf.mxu0  ;;  %v6551_v37 = vadd.f32 %v6550_v13, %v6549_v54 }
 0x2a5   :  { %v2840_v27 = vadd.f32 %v6308_v15, %v11535_v8  ;;  %v6552_v11 = vpop.f32.mrf.mxu1 }
 0x2a6   :  { %v6438_v26 = vpop.f32.mrf.mxu0 }
 0x2a7   :  { %v11722_v63 = vadd.f32 %v6420_v7, %v2840_v27  ;;  %v6439_v40 = vadd.f32 %v6438_v26, %v6437_v47  ;;  %v6553_v3 = vpop.f32.mrf.mxu1 }
 0x2a8   :  { %v6440_v44 = vpop.f32.mrf.mxu0  ;;  %v6554_v4 = vadd.f32 %v6553_v3, %v6552_v11 }
 0x2a9   :  { %v3039_v34 = vadd.f32 %v6439_v40, %v11550_v17  ;;  %v6555_v10 = vpop.f32.mrf.mxu1 }
 0x2aa   :  { %v6441_v55 = vpop.f32.mrf.mxu0 }
 0x2ab   :  { %v3200_v45 = vadd.f32 %v6551_v37, %v3039_v34  ;;  %v6442_v2 = vadd.f32 %v6441_v55, %v6440_v44  ;;  %v6556_v18 = vpop.f32.mrf.mxu1 }
 0x2ac   :  { %v6443_v39 = vpop.f32.mrf.mxu0  ;;  %v6557_v43 = vadd.f32 %v6556_v18, %v6555_v10 }
 0x2ad   :  { %v5841_v53 = vmul.f32 -1.442695, %v3200_v45  ;;  %v3042_v8 = vadd.f32 %v6442_v2, %v11553_v35  ;;  %v6558_v47 = vpop.f32.mrf.mxu1 }
 0x2ae   :  { %v6444_v32 = vpop.f32.mrf.mxu0 }
 0x2af   :  { %7081 = vpow2.f32 %v5841_v53  ;;  %v3203_v5 = vadd.f32 %v6554_v4, %v3042_v8  ;;  %v6445_v22 = vadd.f32 %v6444_v32, %v6443_v39  ;;  %v6559_v26 = vpop.f32.mrf.mxu1 }
 0x2b0   :  { %v6446_v36 = vpop.f32.mrf.mxu0  ;;  %v6560_v44 = vadd.f32 %v6559_v26, %v6558_v47 }
 0x2b1   :  { %v5842_v15 = vmul.f32 -1.442695, %v3203_v5  ;;  %v3047_v17 = vadd.f32 %v6445_v22, %v11568_v61  ;;  %v6561_v34 = vpop.f32.mrf.mxu1 }
 0x2b2   :  { %v6447_v27 = vpop.f32.mrf.mxu0 }
 0x2b3   :  { %7083 = vpow2.f32 %v5842_v15  ;;  %v3208_v7 = vadd.f32 %v6557_v43, %v3047_v17  ;;  %v6448_v54 = vadd.f32 %v6447_v27, %v6446_v36  ;;  %v6562_v45 = vpop.f32.mrf.mxu1 }
 0x2b4   :  { %v6449_v40 = vpop.f32.mrf.mxu0  ;;  %v6563_v39 = vadd.f32 %v6562_v45, %v6561_v34 }
 0x2b5   :  { %v5843_v35 = vmul.f32 -1.442695, %v3208_v7  ;;  %v3050_v13 = vadd.f32 %v6448_v54, %v11571_v58  ;;  %v6564_v53 = vpop.f32.mrf.mxu1 }
 0x2b6   :  { %v6450_v37 = vpop.f32.mrf.mxu0 }
 0x2b7   :  { %7085 = vpow2.f32 %v5843_v35  ;;  %v3211_v11 = vadd.f32 %v6560_v44, %v3050_v13  ;;  %v6451_v55 = vadd.f32 %v6450_v37, %v6449_v40  ;;  %v6565_v32 = vpop.f32.mrf.mxu1 }
 0x2b8   :  { %v6452_v2 = vpop.f32.mrf.mxu0  ;;  %v6566_v36 = vadd.f32 %v6565_v32, %v6564_v53 }
 0x2b9   :  { %v5844_v61 = vmul.f32 -1.442695, %v3211_v11  ;;  %v3055_v3 = vadd.f32 %v6451_v55, %v11586_v56  ;;  %v6567_v15 = vpop.f32.mrf.mxu1 }
 0x2ba   :  { %v6453_v8 = vpop.f32.mrf.mxu0 }
 0x2bb   :  { %7087 = vpow2.f32 %v5844_v61  ;;  %v3216_v4 = vadd.f32 %v6563_v39, %v3055_v3  ;;  %v6454_v10 = vadd.f32 %v6453_v8, %v6452_v2  ;;  %v6568_v7 = vpop.f32.mrf.mxu1 }
 0x2bc   :  { %v7082_v5 = vpop.eup %7081  ;;  %v6455_v58 = vpop.f32.mrf.mxu0  ;;  %v6569_v13 = vadd.f32 %v6568_v7, %v6567_v15 }
 0x2bd   :  { %v5845_v22 = vmul.f32 -1.442695, %v3216_v4  ;;  %v3058_v18 = vadd.f32 %v6454_v10, %v11589_v51  ;;  %v3422_v17 = vadd.f32 1.0, %v7082_v5  ;;  %v6570_v44 = vpop.f32.mrf.mxu1 }
 0x2be   :  { %v6456_v43 = vpop.f32.mrf.mxu0 }
 0x2bf   :  { %v3219_v47 = vadd.f32 %v6566_v36, %v3058_v18  ;;  %v6457_v27 = vadd.f32 %v6456_v43, %v6455_v58  ;;  %7089 = vpow2.f32 %v5845_v22  ;;  %v6571_v11 = vpop.f32.mrf.mxu1 }
 0x2c0   :  { %v7084_v56 = vpop.eup %7083  ;;  %v6458_v54 = vpop.f32.mrf.mxu0  ;;  %7091 = vrcp.f32 %v3422_v17  ;;  %v6572_v3 = vadd.f32 %v6571_v11, %v6570_v44 }
 0x2c1   :  { %v3423_v26 = vadd.f32 1.0, %v7084_v56  ;;  %v5846_v40 = vmul.f32 -1.442695, %v3219_v47  ;;  %v3063_v35 = vadd.f32 %v6457_v27, %v11604_v25  ;;  %v6573_v39 = vpop.f32.mrf.mxu1 }
 0x2c2   :  { %v6459_v34 = vpop.f32.mrf.mxu0 }
 0x2c3   :  { %7093 = vrcp.f32 %v3423_v26  ;;  %v3224_v51 = vadd.f32 %v6569_v13, %v3063_v35  ;;  %v6460_v37 = vadd.f32 %v6459_v34, %v6458_v54  ;;  %v6574_v10 = vpop.f32.mrf.mxu1 }
 0x2c4   :  { %v7086_v55 = vpop.eup %7085  ;;  %7095 = vpow2.f32 %v5846_v40  ;;  %v6461_v45 = vpop.f32.mrf.mxu0  ;;  %v6575_v36 = vadd.f32 %v6574_v10, %v6573_v39 }
 0x2c5   :  { %v5847_v2 = vmul.f32 -1.442695, %v3224_v51  ;;  %v3066_v61 = vadd.f32 %v6460_v37, %v11607_v16  ;;  %v3424_v53 = vadd.f32 1.0, %v7086_v55  ;;  %v6576_v15 = vpop.f32.mrf.mxu1 }
 0x2c6   :  { %v6462_v8 = vpop.f32.mrf.mxu0 }
 0x2c7   :  { %v3227_v4 = vadd.f32 %v6572_v3, %v3066_v61  ;;  %v6463_v25 = vadd.f32 %v6462_v8, %v6461_v45  ;;  %7097 = vpow2.f32 %v5847_v2  ;;  %v6577_v47 = vpop.f32.mrf.mxu1 }
 0x2c8   :  { %v7088_v32 = vpop.eup %7087  ;;  %v6464_v5 = vpop.f32.mrf.mxu0  ;;  %7099 = vrcp.f32 %v3424_v53  ;;  %v6578_v26 = vadd.f32 %v6577_v47, %v6576_v15 }
 0x2c9   :  { %v3425_v58 = vadd.f32 1.0, %v7088_v32  ;;  %v5848_v22 = vmul.f32 -1.442695, %v3227_v4  ;;  %v3071_v18 = vadd.f32 %v6463_v25, %v11622_v41  ;;  %v6579_v40 = vpop.f32.mrf.mxu1 }
 0x2ca   :  { %v6465_v17 = vpop.f32.mrf.mxu0 }
 0x2cb   :  { %7101 = vrcp.f32 %v3425_v58  ;;  %v3232_v16 = vadd.f32 %v6575_v36, %v3071_v18  ;;  %v6466_v43 = vadd.f32 %v6465_v17, %v6464_v5  ;;  %v6580_v51 = vpop.f32.mrf.mxu1 }
 0x2cc   :  { %7103 = vpow2.f32 %v5848_v22  ;;  %v6467_v27 = vpop.f32.mrf.mxu0  ;;  %v7090_v7 = vpop.eup %7089  ;;  %v6581_v3 = vadd.f32 %v6580_v51, %v6579_v40 }
 0x2cd   :  { %v5849_v56 = vmul.f32 -1.442695, %v3232_v16  ;;  %v3074_v54 = vadd.f32 %v6466_v43, %v11625_v42  ;;  %v3426_v35 = vadd.f32 1.0, %v7090_v7  ;;  %v7092_v44 = vpop.eup %7091  ;;  %v6582_v39 = vpop.f32.mrf.mxu1 }
 0x2ce   :  { %v6468_v13 = vpop.f32.mrf.mxu0 }
 0x2cf   :  { %7105 = vpow2.f32 %v5849_v56  ;;  %v3235_v41 = vadd.f32 %v6578_v26, %v3074_v54  ;;  %v6469_v34 = vadd.f32 %v6468_v13, %v6467_v27  ;;  %v6583_v10 = vpop.f32.mrf.mxu1 }
 0x2d0   :  { %v7094_v37 = vpop.eup %7093  ;;  %v6470_v11 = vpop.f32.mrf.mxu0  ;;  %7107 = vrcp.f32 %v3426_v35  ;;  %v6584_v36 = vadd.f32 %v6583_v10, %v6582_v39  ;;  %v11744_v35 = vsel %vm3718_vm8, %v11690_v38, 0 }
 0x2d1   :  { %v7096_v55 = vpop.eup %7095  ;;  %v11734_v45 = vpack.c.bf16 %v7094_v37, %v7092_v44  ;;  %v5850_v2 = vmul.f32 -1.442695, %v3235_v41  ;;  %v3079_v61 = vadd.f32 %v6469_v34, %v11640_v50  ;;  %v6585_v15 = vpop.f32.mrf.mxu1 }
 0x2d2   :  { %v3427_v42 = vadd.f32 1.0, %v7096_v55  ;;  %v6471_v53 = vpop.f32.mrf.mxu0 }
 0x2d3   :  { %v3590_v8 = vunpack.c.h.bf16 %v11734_v45  ;;  %7109 = vpow2.f32 %v5850_v2  ;;  %v3240_v4 = vadd.f32 %v6581_v3, %v3079_v61  ;;  %v6472_v25 = vadd.f32 %v6471_v53, %v6470_v11  ;;  %v6586_v56 = vpop.f32.mrf.mxu1 }
 0x2d4   :  { %7111 = vrcp.f32 %v3427_v42  ;;  %v6473_v32 = vpop.f32.mrf.mxu0  ;;  %v3589_v5 = vunpack.c.l.bf16 %v11734_v45  ;;  %v7098_v58 = vpop.eup %7097  ;;  %v6587_v34 = vadd.f32 %v6586_v56, %v6585_v15 }
 0x2d5   :  { %v3622_v22 = vsub.f32 %v7094_v37, %v3590_v8  ;;  %v5851_v18 = vmul.f32 -1.442695, %v3240_v4  ;;  %v3082_v50 = vadd.f32 %v6472_v25, %v11643_v12  ;;  %v3428_v17 = vadd.f32 1.0, %v7098_v58  ;;  %v7100_v47 = vpop.eup %7099  ;;  %v6588_v51 = vpop.f32.mrf.mxu1 }
 0x2d6   :  { %v6474_v16 = vpop.f32.mrf.mxu0  ;;  %v3621_v43 = vsub.f32 %v7092_v44, %v3589_v5 }
 0x2d7   :  { %7113 = vpow2.f32 %v5851_v18  ;;  %v3243_v27 = vadd.f32 %v6584_v36, %v3082_v50  ;;  %v6475_v7 = vadd.f32 %v6474_v16, %v6473_v32  ;;  %v6589_v61 = vpop.f32.mrf.mxu1 }
 0x2d8   :  { %v7102_v54 = vpop.eup %7101  ;;  %v6476_v26 = vpop.f32.mrf.mxu0  ;;  %v11740_v40 = vpack.c.bf16 %v3622_v22, %v3621_v43  ;;  %7115 = vrcp.f32 %v3428_v17  ;;  %v6590_v4 = vadd.f32 %v6589_v61, %v6588_v51 }
 0x2d9   :  { %v7104_v12 = vpop.eup %7103  ;;  %v11746_v13 = vpack.c.bf16 %v7102_v54, %v7100_v47  ;;  %v5852_v41 = vmul.f32 -1.442695, %v3243_v27  ;;  %v3087_v44 = vadd.f32 %v6475_v7, %v11652_v49  ;;  %v6591_v25 = vpop.f32.mrf.mxu1 }
 0x2da   :  { %v3429_v37 = vadd.f32 1.0, %v7104_v12  ;;  %5874 = vmatmul.mubr.msk.bf16.vlgmr.msra.gmra.mxu0 %vm3669_vm6, %v11740_v40  ;;  %5891 = vmatmul.mubr.msk.bf16.vlgmr.msra.gmra.mxu1 %vm3669_vm6, %v11740_v40  ;;  %v6477_v11 = vpop.f32.mrf.mxu0 }
 0x2db   :  { %7117 = vpow2.f32 %v5852_v41  ;;  %v3248_v55 = vadd.f32 %v6587_v34, %v3087_v44  ;;  %v6478_v2 = vadd.f32 %v6477_v11, %v6476_v26  ;;  %6680 = vmatpush3.bf16.msra.mxu0 %v11744_v35  ;;  %4344 = vmatpush1.bf16.msra.mxu1 %v11365_v0  ;;  %v3591_v49 = vunpack.c.l.bf16 %v11746_v13  ;;  %v6592_v50 = vpop.f32.mrf.mxu1 }
 0x2dc   :  { %v7106_v3 = vpop.eup %7105  ;;  %7119 = vrcp.f32 %v3429_v37  ;;  %v6479_v39 = vpop.f32.mrf.mxu0  ;;  %3776 = vmatprep.mubr.bf16.mxu0 %v14893_v21  ;;  %3969 = vmatprep.mubr.bf16.mxu1 %v14893_v21  ;;  %v3592_v42 = vunpack.c.h.bf16 %v11746_v13 }
 0x2dd   :  { %v5853_v53 = vmul.f32 -1.442695, %v3248_v55  ;;  %v3090_v8 = vadd.f32 %v6478_v2, %v11657_v14  ;;  %v3623_v10 = vsub.f32 %v7100_v47, %v3591_v49  ;;  %5940 = vmatprep.subr.msk.bf16.mxu0 %vm3718_vm8, %v11329_v24  ;;  %6748 = vmatprep.subr.msk.bf16.mxu1 %vm3718_vm8, %v11690_v38  ;;  %v3430_v0 = vadd.f32 1.0, %v7106_v3  ;;  %v7108_v58 = vpop.eup %7107  ;;  %v6594_v27 = vpop.f32.mrf.mxu1 }
 0x2de   :  { %v6480_v32 = vpop.f32.mrf.mxu0  ;;  %v3624_v5 = vsub.f32 %v7102_v54, %v3592_v42  ;;  %v6593_v47 = vadd.f32 %v6592_v50, %v6591_v25  ;;  %vm5200_vm8 = vcmask 621568  }
 0x2df   :  { %v3251_v22 = vadd.f32 %v6590_v4, %v3090_v8  ;;  %v6481_v18 = vadd.f32 %v6480_v32, %v6479_v39  ;;  %7121 = vpow2.f32 %v5853_v53  ;;  %v6595_v26 = vpop.f32.mrf.mxu1 }
 0x2e0   :  { %v7110_v36 = vpop.eup %7109  ;;  %v6482_v15 = vpop.f32.mrf.mxu0  ;;  %v11764_v14 = vpack.c.bf16 %v3624_v5, %v3623_v10  ;;  %7123 = vrcp.f32 %v3430_v0  ;;  %v6596_v37 = vadd.f32 %v6595_v26, %v6594_v27 }
 0x2e1   :  { %v7112_v17 = vpop.eup %7111  ;;  %v3431_v16 = vadd.f32 1.0, %v7110_v36  ;;  %v5854_v43 = vmul.f32 -1.442695, %v3251_v22  ;;  %v3095_v24 = vadd.f32 %v6481_v18, %v11660_v52  ;;  %v6597_v11 = vpop.f32.mrf.mxu1 }
 0x2e2   :  { %v11767_v38 = vpack.c.bf16 %v7112_v17, %v7108_v58  ;;  %5875 = vmatmul.mubr.msk.bf16.gmra.mxu0 %vm3669_vm6, %v11764_v14  ;;  %5892 = vmatmul.mubr.msk.bf16.gmra.mxu1 %vm3669_vm6, %v11764_v14  ;;  %v6483_v7 = vpop.f32.mrf.mxu0 }
 0x2e3   :  { %7125 = vrcp.f32 %v3431_v16  ;;  %v3256_v56 = vadd.f32 %v6593_v47, %v3095_v24  ;;  %v6484_v54 = vadd.f32 %v6483_v7, %v6482_v15  ;;  %3786 = vmatprep.mubr.bf16.mxu0 %v14893_v21  ;;  %3979 = vmatprep.mubr.bf16.mxu1 %v14893_v21  ;;  %v6598_v53 = vpop.f32.mrf.mxu1 }
 0x2e4   :  { %v7114_v52 = vpop.eup %7113  ;;  %7127 = vpow2.f32 %v5854_v43  ;;  %v6485_v12 = vpop.f32.mrf.mxu0  ;;  %v3593_v41 = vunpack.c.l.bf16 %v11767_v38  ;;  %v3594_v44 = vunpack.c.h.bf16 %v11767_v38  ;;  %v6599_v5 = vadd.f32 %v6598_v53, %v6597_v11 }
 0x2e5   :  { %v5855_v34 = vmul.f32 -1.442695, %v3256_v56  ;;  %v3098_v51 = vadd.f32 %v6484_v54, %v11663_v19  ;;  %v3432_v55 = vadd.f32 1.0, %v7114_v52  ;;  %v7116_v3 = vpop.eup %7115  ;;  %v6600_v22 = vpop.f32.mrf.mxu1 }
 0x2e6   :  { %v6486_v2 = vpop.f32.mrf.mxu0  ;;  %v3625_v61 = vsub.f32 %v7108_v58, %v3593_v41  ;;  %v3626_v49 = vsub.f32 %v7112_v17, %v3594_v44 }
 0x2e7   :  { %v3259_v39 = vadd.f32 %v6596_v37, %v3098_v51  ;;  %v6487_v42 = vadd.f32 %v6486_v2, %v6485_v12  ;;  %7129 = vpow2.f32 %v5855_v34  ;;  %v6601_v15 = vpop.f32.mrf.mxu1 }
 0x2e8   :  { %v7118_v8 = vpop.eup %7117  ;;  %v6488_v4 = vpop.f32.mrf.mxu0  ;;  %v11778_v25 = vpack.c.bf16 %v3626_v49, %v3625_v61  ;;  %7131 = vrcp.f32 %v3432_v55  ;;  %v6602_v27 = vadd.f32 %v6601_v15, %v6600_v22 }
 0x2e9   :  { %v7120_v10 = vpop.eup %7119  ;;  %v3433_v0 = vadd.f32 1.0, %v7118_v8  ;;  %v5856_v32 = vmul.f32 -1.442695, %v3259_v39  ;;  %v3103_v19 = vadd.f32 %v6487_v42, %v11666_v30  ;;  %v6603_v7 = vpop.f32.mrf.mxu1 }
 0x2ea   :  { %v11781_v18 = vpack.c.bf16 %v7120_v10, %v7116_v3  ;;  %5876 = vmatmul.mubr.msk.bf16.gmra.mxu0 %vm3669_vm6, %v11778_v25  ;;  %5893 = vmatmul.mubr.msk.bf16.gmra.mxu1 %vm3669_vm6, %v11778_v25  ;;  %v6489_v58 = vpop.f32.mrf.mxu0 }
 0x2eb   :  { %7133 = vrcp.f32 %v3433_v0  ;;  %v3264_v50 = vadd.f32 %v6599_v5, %v3103_v19  ;;  %v6490_v36 = vadd.f32 %v6489_v58, %v6488_v4  ;;  %3796 = vmatprep.mubr.bf16.mxu0 %v14893_v21  ;;  %3989 = vmatprep.mubr.bf16.mxu1 %v14893_v21  ;;  %v6604_v34 = vpop.f32.mrf.mxu1 }
 0x2ec   :  { %7135 = vpow2.f32 %v5856_v32  ;;  %v6491_v30 = vpop.f32.mrf.mxu0  ;;  %v3595_v17 = vunpack.c.l.bf16 %v11781_v18  ;;  %v3596_v16 = vunpack.c.h.bf16 %v11781_v18  ;;  %v7122_v43 = vpop.eup %7121  ;;  %v6605_v49 = vadd.f32 %v6604_v34, %v6603_v7 }
 0x2ed   :  { %v5857_v24 = vmul.f32 -1.442695, %v3264_v50  ;;  %v3106_v47 = vadd.f32 %v6490_v36, %v11669_v29  ;;  %v3434_v56 = vadd.f32 1.0, %v7122_v43  ;;  %v7124_v12 = vpop.eup %7123  ;;  %v6606_v39 = vpop.f32.mrf.mxu1 }
 0x2ee   :  { %v6492_v54 = vpop.f32.mrf.mxu0  ;;  %v3627_v26 = vsub.f32 %v7116_v3, %v3595_v17  ;;  %v3628_v52 = vsub.f32 %v7120_v10, %v3596_v16 }
 0x2ef   :  { %7137 = vpow2.f32 %v5857_v24  ;;  %v3267_v41 = vadd.f32 %v6602_v27, %v3106_v47  ;;  %v6493_v44 = vadd.f32 %v6492_v54, %v6491_v30  ;;  %v6607_v4 = vpop.f32.mrf.mxu1 }
 0x2f0   :  { %v7126_v51 = vpop.eup %7125  ;;  %v6494_v37 = vpop.f32.mrf.mxu0  ;;  %v11792_v11 = vpack.c.bf16 %v3628_v52, %v3627_v26  ;;  %7139 = vrcp.f32 %v3434_v56  ;;  %v6608_v22 = vadd.f32 %v6607_v4, %v6606_v39 }
 0x2f1   :  { %v7128_v55 = vpop.eup %7127  ;;  %v11794_v2 = vpack.c.bf16 %v7126_v51, %v7124_v12  ;;  %v5858_v61 = vmul.f32 -1.442695, %v3267_v41  ;;  %v3111_v29 = vadd.f32 %v6493_v44, %v11672_v20  ;;  %v6609_v58 = vpop.f32.mrf.mxu1 }
 0x2f2   :  { %v3435_v3 = vadd.f32 1.0, %v7128_v55  ;;  %5877 = vmatmul.mubr.msk.bf16.gmra.mxu0 %vm3669_vm6, %v11792_v11  ;;  %5894 = vmatmul.mubr.msk.bf16.gmra.mxu1 %vm3669_vm6, %v11792_v11  ;;  %v6495_v42 = vpop.f32.mrf.mxu0 }
 0x2f3   :  { %7141 = vpow2.f32 %v5858_v61  ;;  %v3272_v53 = vadd.f32 %v6605_v49, %v3111_v29  ;;  %v6496_v8 = vadd.f32 %v6495_v42, %v6494_v37  ;;  %3806 = vmatprep.mubr.bf16.mxu0 %v14893_v21  ;;  %3999 = vmatprep.mubr.bf16.mxu1 %v14893_v21  ;;  %v3597_v20 = vunpack.c.l.bf16 %v11794_v2  ;;  %v6610_v24 = vpop.f32.mrf.mxu1 }
 0x2f4   :  { %7143 = vrcp.f32 %v3435_v3  ;;  %v6497_v10 = vpop.f32.mrf.mxu0  ;;  %v3598_v0 = vunpack.c.h.bf16 %v11794_v2  ;;  %v7130_v32 = vpop.eup %7129  ;;  %v6611_v52 = vadd.f32 %v6610_v24, %v6609_v58 }
 0x2f5   :  { %v5859_v19 = vmul.f32 -1.442695, %v3272_v53  ;;  %v3114_v5 = vadd.f32 %v6496_v8, %v11675_v57  ;;  %v3629_v50 = vsub.f32 %v7124_v12, %v3597_v20  ;;  %v3436_v36 = vadd.f32 1.0, %v7130_v32  ;;  %v7132_v17 = vpop.eup %7131  ;;  %v6612_v12 = vpop.f32.mrf.mxu1 }
 0x2f6   :  { %v6498_v15 = vpop.f32.mrf.mxu0  ;;  %v3630_v30 = vsub.f32 %v7126_v51, %v3598_v0 }
 0x2f7   :  { %7145 = vpow2.f32 %v5859_v19  ;;  %v3275_v16 = vadd.f32 %v6608_v22, %v3114_v5  ;;  %v6499_v43 = vadd.f32 %v6498_v15, %v6497_v10  ;;  %v6613_v37 = vpop.f32.mrf.mxu1 }
 0x2f8   :  { %v7134_v47 = vpop.eup %7133  ;;  %v6500_v27 = vpop.f32.mrf.mxu0  ;;  %v11806_v7 = vpack.c.bf16 %v3630_v30, %v3629_v50  ;;  %7147 = vrcp.f32 %v3436_v36  ;;  %v6614_v3 = vadd.f32 %v6613_v37, %v6612_v12 }
 0x2f9   :  { %v7136_v56 = vpop.eup %7135  ;;  %v11808_v54 = vpack.c.bf16 %v7134_v47, %v7132_v17  ;;  %v5860_v26 = vmul.f32 -1.442695, %v3275_v16  ;;  %v3119_v57 = vadd.f32 %v6499_v43, %v11679_v28  ;;  %v6615_v42 = vpop.f32.mrf.mxu1 }
 0x2fa   :  { %v3437_v41 = vadd.f32 1.0, %v7136_v56  ;;  %5878 = vmatmul.mubr.msk.bf16.gmra.mxu0 %vm3669_vm6, %v11806_v7  ;;  %5895 = vmatmul.mubr.msk.bf16.gmra.mxu1 %vm3669_vm6, %v11806_v7  ;;  %v6501_v44 = vpop.f32.mrf.mxu0 }
 0x2fb   :  { %7149 = vpow2.f32 %v5860_v26  ;;  %v3280_v34 = vadd.f32 %v6611_v52, %v3119_v57  ;;  %v6502_v51 = vadd.f32 %v6501_v44, %v6500_v27  ;;  %3816 = vmatprep.mubr.bf16.mxu0 %v14893_v21  ;;  %4009 = vmatprep.mubr.bf16.mxu1 %v14893_v21  ;;  %v3599_v28 = vunpack.c.l.bf16 %v11808_v54  ;;  %v6616_v19 = vpop.f32.mrf.mxu1 }
 0x2fc   :  { %v7138_v55 = vpop.eup %7137  ;;  %7151 = vrcp.f32 %v3437_v41  ;;  %v6503_v61 = vpop.f32.mrf.mxu0  ;;  %v3600_v29 = vunpack.c.h.bf16 %v11808_v54  ;;  %v6617_v30 = vadd.f32 %v6616_v19, %v6615_v42 }
 0x2fd   :  { %v5861_v49 = vmul.f32 -1.442695, %v3280_v34  ;;  %v3122_v39 = vadd.f32 %v6502_v51, %v11687_v9  ;;  %v3631_v53 = vsub.f32 %v7132_v17, %v3599_v28  ;;  %v3438_v8 = vadd.f32 1.0, %v7138_v55  ;;  %v7140_v10 = vpop.eup %7139  ;;  %v6618_v16 = vpop.f32.mrf.mxu1 }
 0x2fe   :  { %v6504_v4 = vpop.f32.mrf.mxu0  ;;  %v3632_v20 = vsub.f32 %v7134_v47, %v3600_v29 }
 0x2ff   :  { %v3283_v0 = vadd.f32 %v6614_v3, %v3122_v39  ;;  %v6505_v32 = vadd.f32 %v6504_v4, %v6503_v61  ;;  %7153 = vpow2.f32 %v5861_v49  ;;  %v6619_v27 = vpop.f32.mrf.mxu1 }
 0x300   :  { %v7142_v5 = vpop.eup %7141  ;;  %v6506_v22 = vpop.f32.mrf.mxu0  ;;  %v11820_v58 = vpack.c.bf16 %v3632_v20, %v3631_v53  ;;  %7155 = vrcp.f32 %v3438_v8  ;;  %v6620_v41 = vadd.f32 %v6619_v27, %v6618_v16 }
 0x301   :  { %v7144_v50 = vpop.eup %7143  ;;  %v3439_v36 = vadd.f32 1.0, %v7142_v5  ;;  %v5862_v15 = vmul.f32 -1.442695, %v3283_v0  ;;  %v3127_v9 = vadd.f32 %v6505_v32, %v11695_v59  ;;  %v6621_v44 = vpop.f32.mrf.mxu1 }
 0x302   :  { %v11823_v17 = vpack.c.bf16 %v7144_v50, %v7140_v10  ;;  %5879 = vmatmul.mubr.msk.bf16.gmra.mxu0 %vm3669_vm6, %v11820_v58  ;;  %5896 = vmatmul.mubr.msk.bf16.gmra.mxu1 %vm3669_vm6, %v11820_v58  ;;  %v6507_v43 = vpop.f32.mrf.mxu0 }
 0x303   :  { %7157 = vrcp.f32 %v3439_v36  ;;  %v3288_v24 = vadd.f32 %v6617_v30, %v3127_v9  ;;  %v6508_v47 = vadd.f32 %v6507_v43, %v6506_v22  ;;  %3826 = vmatprep.mubr.bf16.mxu0 %v14893_v21  ;;  %4019 = vmatprep.mubr.bf16.mxu1 %v14893_v21  ;;  %v6622_v49 = vpop.f32.mrf.mxu1 }
 0x304   :  { %v7146_v59 = vpop.eup %7145  ;;  %7159 = vpow2.f32 %v5862_v15  ;;  %v6509_v56 = vpop.f32.mrf.mxu0  ;;  %v3601_v26 = vunpack.c.l.bf16 %v11823_v17  ;;  %v3602_v57 = vunpack.c.h.bf16 %v11823_v17  ;;  %v6623_v20 = vadd.f32 %v6622_v49, %v6621_v44 }
 0x305   :  { %v5863_v52 = vmul.f32 -1.442695, %v3288_v24  ;;  %v3130_v12 = vadd.f32 %v6508_v47, %v11698_v31  ;;  %v3440_v34 = vadd.f32 1.0, %v7146_v59  ;;  %v7148_v55 = vpop.eup %7147  ;;  %v6624_v0 = vpop.f32.mrf.mxu1 }
 0x306   :  { %v6510_v51 = vpop.f32.mrf.mxu0  ;;  %v3633_v37 = vsub.f32 %v7140_v10, %v3601_v26  ;;  %v3634_v28 = vsub.f32 %v7144_v50, %v3602_v57 }
 0x307   :  { %v3291_v61 = vadd.f32 %v6620_v41, %v3130_v12  ;;  %v6511_v29 = vadd.f32 %v6510_v51, %v6509_v56  ;;  %7161 = vpow2.f32 %v5863_v52  ;;  %v6625_v22 = vpop.f32.mrf.mxu1 }
 0x308   :  { %v7150_v39 = vpop.eup %7149  ;;  %v6512_v3 = vpop.f32.mrf.mxu0  ;;  %v11834_v42 = vpack.c.bf16 %v3634_v28, %v3633_v37  ;;  %7163 = vrcp.f32 %v3440_v34  ;;  %v6626_v16 = vadd.f32 %v6625_v22, %v6624_v0 }
 0x309   :  { %v7152_v53 = vpop.eup %7151  ;;  %v3441_v8 = vadd.f32 1.0, %v7150_v39  ;;  %v5864_v4 = vmul.f32 -1.442695, %v3291_v61  ;;  %v3135_v31 = vadd.f32 %v6511_v29, %v11701_v23  ;;  %v6627_v43 = vpop.f32.mrf.mxu1 }
 0x30a   :  { %v11837_v32 = vpack.c.bf16 %v7152_v53, %v7148_v55  ;;  %5880 = vmatmul.mubr.msk.bf16.gmra.mxu0 %vm3669_vm6, %v11834_v42  ;;  %5897 = vmatmul.mubr.msk.bf16.gmra.mxu1 %vm3669_vm6, %v11834_v42  ;;  %v6513_v10 = vpop.f32.mrf.mxu0 }
 0x30b   :  { %7165 = vrcp.f32 %v3441_v8  ;;  %v3296_v19 = vadd.f32 %v6623_v20, %v3135_v31  ;;  %v6514_v5 = vadd.f32 %v6513_v10, %v6512_v3  ;;  %3836 = vmatprep.mubr.bf16.mxu0 %v14893_v21  ;;  %4029 = vmatprep.mubr.bf16.mxu1 %v14893_v21  ;;  %v6628_v52 = vpop.f32.mrf.mxu1 }
 0x30c   :  { %7167 = vpow2.f32 %v5864_v4  ;;  %v6515_v23 = vpop.f32.mrf.mxu0  ;;  %v3603_v50 = vunpack.c.l.bf16 %v11837_v32  ;;  %v3604_v36 = vunpack.c.h.bf16 %v11837_v32  ;;  %v7154_v15 = vpop.eup %7153  ;;  %v6629_v28 = vadd.f32 %v6628_v52, %v6627_v43 }
 0x30d   :  { %v5865_v9 = vmul.f32 -1.442695, %v3296_v19  ;;  %v3138_v30 = vadd.f32 %v6514_v5, %v11704_v33  ;;  %v3442_v24 = vadd.f32 1.0, %v7154_v15  ;;  %v7156_v56 = vpop.eup %7155  ;;  %v6630_v61 = vpop.f32.mrf.mxu1 }
 0x30e   :  { %v6516_v47 = vpop.f32.mrf.mxu0  ;;  %v3635_v27 = vsub.f32 %v7148_v55, %v3603_v50  ;;  %v3636_v59 = vsub.f32 %v7152_v53, %v3604_v36 }
 0x30f   :  { %7169 = vpow2.f32 %v5865_v9  ;;  %v3299_v26 = vadd.f32 %v6626_v16, %v3138_v30  ;;  %v6517_v57 = vadd.f32 %v6516_v47, %v6515_v23  ;;  %v6631_v3 = vpop.f32.mrf.mxu1 }
 0x310   :  { %v7158_v12 = vpop.eup %7157  ;;  %v6518_v41 = vpop.f32.mrf.mxu0  ;;  %v11848_v44 = vpack.c.bf16 %v3636_v59, %v3635_v27  ;;  %7171 = vrcp.f32 %v3442_v24  ;;  %v6632_v0 = vadd.f32 %v6631_v3, %v6630_v61 }
 0x311   :  { %v7160_v34 = vpop.eup %7159  ;;  %v11850_v51 = vpack.c.bf16 %v7158_v12, %v7156_v56  ;;  %v5866_v37 = vmul.f32 -1.442695, %v3299_v26  ;;  %v3143_v33 = vadd.f32 %v6517_v57, %v11707_v48  ;;  %v6633_v10 = vpop.f32.mrf.mxu1 }
 0x312   :  { %v3443_v55 = vadd.f32 1.0, %v7160_v34  ;;  %5881 = vmatmul.mubr.msk.bf16.gmra.mxu0 %vm3669_vm6, %v11848_v44  ;;  %5898 = vmatmul.mubr.msk.bf16.gmra.mxu1 %vm3669_vm6, %v11848_v44  ;;  %v6519_v29 = vpop.f32.mrf.mxu0 }
 0x313   :  { %7173 = vpow2.f32 %v5866_v37  ;;  %v3304_v49 = vadd.f32 %v6629_v28, %v3143_v33  ;;  %v6520_v39 = vadd.f32 %v6519_v29, %v6518_v41  ;;  %3846 = vmatprep.mubr.bf16.mxu0 %v14893_v21  ;;  %4039 = vmatprep.mubr.bf16.mxu1 %v14893_v21  ;;  %v3605_v48 = vunpack.c.l.bf16 %v11850_v51  ;;  %v6634_v9 = vpop.f32.mrf.mxu1 }
 0x314   :  { %7175 = vrcp.f32 %v3443_v55  ;;  %v6521_v53 = vpop.f32.mrf.mxu0  ;;  %v3606_v8 = vunpack.c.h.bf16 %v11850_v51  ;;  %v7162_v4 = vpop.eup %7161  ;;  %v6635_v59 = vadd.f32 %v6634_v9, %v6633_v10 }
 0x315   :  { %v5867_v31 = vmul.f32 -1.442695, %v3304_v49  ;;  %v3146_v20 = vadd.f32 %v6520_v39, %v11710_v46  ;;  %v3637_v19 = vsub.f32 %v7156_v56, %v3605_v48  ;;  %v3444_v5 = vadd.f32 1.0, %v7162_v4  ;;  %v7164_v50 = vpop.eup %7163  ;;  %v6636_v56 = vpop.f32.mrf.mxu1 }
 0x316   :  { %v6522_v22 = vpop.f32.mrf.mxu0  ;;  %v3638_v23 = vsub.f32 %v7158_v12, %v3606_v8 }
 0x317   :  { %7177 = vpow2.f32 %v5867_v31  ;;  %v3307_v36 = vadd.f32 %v6632_v0, %v3146_v20  ;;  %v6523_v15 = vadd.f32 %v6522_v22, %v6521_v53  ;;  %v6637_v41 = vpop.f32.mrf.mxu1 }
 0x318   :  { %v7166_v30 = vpop.eup %7165  ;;  %v6524_v16 = vpop.f32.mrf.mxu0  ;;  %v11862_v43 = vpack.c.bf16 %v3638_v23, %v3637_v19  ;;  %7179 = vrcp.f32 %v3444_v5  ;;  %v6638_v55 = vadd.f32 %v6637_v41, %v6636_v56 }
 0x319   :  { %v7168_v24 = vpop.eup %7167  ;;  %v11864_v47 = vpack.c.bf16 %v7166_v30, %v7164_v50  ;;  %v5868_v27 = vmul.f32 -1.442695, %v3307_v36  ;;  %v3151_v46 = vadd.f32 %v6523_v15, %v11713_v6  ;;  %v6639_v29 = vpop.f32.mrf.mxu1 }
 0x31a   :  { %v3445_v26 = vadd.f32 1.0, %v7168_v24  ;;  %5882 = vmatmul.mubr.msk.bf16.gmra.mxu0 %vm3669_vm6, %v11862_v43  ;;  %5899 = vmatmul.mubr.msk.bf16.gmra.mxu1 %vm3669_vm6, %v11862_v43  ;;  %v6525_v57 = vpop.f32.mrf.mxu0 }
 0x31b   :  { %7181 = vpow2.f32 %v5868_v27  ;;  %v3312_v52 = vadd.f32 %v6635_v59, %v3151_v46  ;;  %v6526_v12 = vadd.f32 %v6525_v57, %v6524_v16  ;;  %3856 = vmatprep.mubr.bf16.mxu0 %v14893_v21  ;;  %4049 = vmatprep.mubr.bf16.mxu1 %v14893_v21  ;;  %v3607_v6 = vunpack.c.l.bf16 %v11864_v47  ;;  %v6640_v31 = vpop.f32.mrf.mxu1 }
 0x31c   :  { %v7170_v34 = vpop.eup %7169  ;;  %7183 = vrcp.f32 %v3445_v26  ;;  %v6527_v37 = vpop.f32.mrf.mxu0  ;;  %v3608_v33 = vunpack.c.h.bf16 %v11864_v47  ;;  %v6641_v23 = vadd.f32 %v6640_v31, %v6639_v29 }
 0x31d   :  { %v5869_v28 = vmul.f32 -1.442695, %v3312_v52  ;;  %v3154_v61 = vadd.f32 %v6526_v12, %v11716_v60  ;;  %v3639_v49 = vsub.f32 %v7164_v50, %v3607_v6  ;;  %v3446_v39 = vadd.f32 1.0, %v7170_v34  ;;  %v7172_v53 = vpop.eup %7171  ;;  %v6642_v36 = vpop.f32.mrf.mxu1 }
 0x31e   :  { %v6528_v3 = vpop.f32.mrf.mxu0  ;;  %v3640_v48 = vsub.f32 %v7166_v30, %v3608_v33 }
 0x31f   :  { %v3315_v8 = vadd.f32 %v6638_v55, %v3154_v61  ;;  %v6529_v4 = vadd.f32 %v6528_v3, %v6527_v37  ;;  %7185 = vpow2.f32 %v5869_v28  ;;  %v6643_v16 = vpop.f32.mrf.mxu1 }
 0x320   :  { %v7174_v20 = vpop.eup %7173  ;;  %v6530_v0 = vpop.f32.mrf.mxu0  ;;  %v11876_v10 = vpack.c.bf16 %v3640_v48, %v3639_v49  ;;  %7187 = vrcp.f32 %v3446_v39  ;;  %v6644_v56 = vadd.f32 %v6643_v16, %v6642_v36 }
 0x321   :  { %v7176_v19 = vpop.eup %7175  ;;  %v3447_v5 = vadd.f32 1.0, %v7174_v20  ;;  %v5870_v22 = vmul.f32 -1.442695, %v3315_v8  ;;  %v3159_v60 = vadd.f32 %v6529_v4, %v11719_v62 }
 0x322   :  { %v11879_v50 = vpack.c.bf16 %v7176_v19, %v7172_v53  ;;  %5883 = vmatmul.mubr.msk.bf16.gmra.mxu0 %vm3669_vm6, %v11876_v10  ;;  %5900 = vmatmul.mubr.msk.bf16.gmra.mxu1 %vm3669_vm6, %v11876_v10  ;;  %v6531_v15 = vpop.f32.mrf.mxu0 }
 0x323   :  { %7189 = vrcp.f32 %v3447_v5  ;;  %v3320_v9 = vadd.f32 %v6641_v23, %v3159_v60  ;;  %v6532_v30 = vadd.f32 %v6531_v15, %v6530_v0  ;;  %3866 = vmatprep.mubr.bf16.mxu0 %v14893_v21  ;;  %4059 = vmatprep.mubr.bf16.mxu1 %v14893_v21 }
 0x324   :  { %v7178_v62 = vpop.eup %7177  ;;  %7191 = vpow2.f32 %v5870_v22  ;;  %v3609_v24 = vunpack.c.l.bf16 %v11879_v50  ;;  %v3610_v27 = vunpack.c.h.bf16 %v11879_v50 }
 0x325   :  { %v5871_v46 = vmul.f32 -1.442695, %v3320_v9  ;;  %v3162_v59 = vadd.f32 %v6532_v30, %v11722_v63  ;;  %v3448_v26 = vadd.f32 1.0, %v7178_v62  ;;  %v7180_v12 = vpop.eup %7179 }
 0x326   :  { %v3641_v57 = vsub.f32 %v7172_v53, %v3609_v24  ;;  %v3642_v52 = vsub.f32 %v7176_v19, %v3610_v27 }
 0x327   :  { %v3323_v41 = vadd.f32 %v6644_v56, %v3162_v59  ;;  %7193 = vpow2.f32 %v5871_v46 }
 0x328   :  { %v7182_v6 = vpop.eup %7181  ;;  %v11890_v34 = vpack.c.bf16 %v3642_v52, %v3641_v57  ;;  %7195 = vrcp.f32 %v3448_v26 }
 0x329   :  { %v7184_v37 = vpop.eup %7183  ;;  %v3449_v33 = vadd.f32 1.0, %v7182_v6  ;;  %v5872_v28 = vmul.f32 -1.442695, %v3323_v41 }
 0x32a   :  { %v11892_v61 = vpack.c.bf16 %v7184_v37, %v7180_v12  ;;  %5884 = vmatmul.mubr.msk.bf16.gmra.mxu0 %vm3669_vm6, %v11890_v34  ;;  %5901 = vmatmul.mubr.msk.bf16.gmra.mxu1 %vm3669_vm6, %v11890_v34 }
 0x32b   :  { %7197 = vrcp.f32 %v3449_v33  ;;  %3876 = vmatprep.mubr.bf16.mxu0 %v14893_v21  ;;  %4069 = vmatprep.mubr.bf16.mxu1 %v14893_v21 }
 0x32c   :  { %7199 = vpow2.f32 %v5872_v28  ;;  %v3611_v63 = vunpack.c.l.bf16 %v11892_v61  ;;  %v3612_v55 = vunpack.c.h.bf16 %v11892_v61  ;;  %v7186_v29 = vpop.eup %7185 }
 0x32d   :  { %v7188_v3 = vpop.eup %7187  ;;  %v3450_v48 = vadd.f32 1.0, %v7186_v29 }
 0x32e   :  { %v3643_v49 = vsub.f32 %v7180_v12, %v3611_v63  ;;  %v3644_v39 = vsub.f32 %v7184_v37, %v3612_v55 }
 0x32f   :  { %7201 = vrcp.f32 %v3450_v48 }
 0x330   :  { %v7190_v53 = vpop.eup %7189  ;;  %v11902_v8 = vpack.c.bf16 %v3644_v39, %v3643_v49 }
 0x331   :  { %v7192_v4 = vpop.eup %7191  ;;  %v11904_v31 = vpack.c.bf16 %v7190_v53, %v7188_v3 }
 0x332   :  { %v3451_v20 = vadd.f32 1.0, %v7192_v4  ;;  %5885 = vmatmul.mubr.msk.bf16.gmra.mxu0 %vm3669_vm6, %v11902_v8  ;;  %5902 = vmatmul.mubr.msk.bf16.gmra.mxu1 %vm3669_vm6, %v11902_v8 }
 0x333   :  { %3886 = vmatprep.mubr.bf16.mxu0 %v14893_v21  ;;  %4079 = vmatprep.mubr.bf16.mxu1 %v14893_v21  ;;  %v3613_v0 = vunpack.c.l.bf16 %v11904_v31  ;;  %v3614_v19 = vunpack.c.h.bf16 %v11904_v31 }
 0x334   :  { %7203 = vrcp.f32 %v3451_v20  ;;  %v7194_v5 = vpop.eup %7193 }
 0x335   :  { %v3645_v22 = vsub.f32 %v7188_v3, %v3613_v0  ;;  %v3646_v60 = vsub.f32 %v7190_v53, %v3614_v19  ;;  %v7196_v23 = vpop.eup %7195  ;;  %v3452_v36 = vadd.f32 1.0, %v7194_v5 }
 0x337   :  { %v11914_v15 = vpack.c.bf16 %v3646_v60, %v3645_v22  ;;  %7205 = vrcp.f32 %v3452_v36 }
 0x338   :  { %v7198_v9 = vpop.eup %7197 }
 0x339   :  { %v7200_v30 = vpop.eup %7199  ;;  %v11916_v16 = vpack.c.bf16 %v7198_v9, %v7196_v23 }
 0x33a   :  { %v3453_v62 = vadd.f32 1.0, %v7200_v30  ;;  %5886 = vmatmul.mubr.msk.bf16.gmra.mxu0 %vm3669_vm6, %v11914_v15  ;;  %5903 = vmatmul.mubr.msk.bf16.gmra.mxu1 %vm3669_vm6, %v11914_v15 }
 0x33b   :  { %3896 = vmatprep.mubr.bf16.mxu0 %v14893_v21  ;;  %4089 = vmatprep.mubr.bf16.mxu1 %v14893_v21  ;;  %v3615_v24 = vunpack.c.l.bf16 %v11916_v16  ;;  %v3616_v27 = vunpack.c.h.bf16 %v11916_v16 }
 0x33c   :  { %7207 = vrcp.f32 %v3453_v62  ;;  %v7202_v26 = vpop.eup %7201 }
 0x33d   :  { %v3647_v46 = vsub.f32 %v7196_v23, %v3615_v24  ;;  %v3648_v59 = vsub.f32 %v7198_v9, %v3616_v27 }
 0x33f   :  { %v3666_v56 = vpack.c.bf16 %v3648_v59, %v3647_v46 }
 0x341   :  { %v7204_v57 = vpop.eup %7203 }
 0x342   :  { %v11926_v52 = vpack.c.bf16 %v7204_v57, %v7202_v26  ;;  %5887 = vmatmul.mubr.msk.bf16.gmra.mxu0 %vm3669_vm6, %v3666_v56  ;;  %5904 = vmatmul.mubr.msk.bf16.gmra.mxu1 %vm3669_vm6, %v3666_v56 }
 0x343   :  { %3906 = vmatprep.mubr.bf16.mxu0 %v14893_v21  ;;  %4099 = vmatprep.mubr.bf16.mxu1 %v14893_v21 }
 0x344   :  { %v3617_v12 = vunpack.c.l.bf16 %v11926_v52  ;;  %v3618_v41 = vunpack.c.h.bf16 %v11926_v52  ;;  %v7206_v33 = vpop.eup %7205 }
 0x346   :  { %v3649_v6 = vsub.f32 %v7202_v26, %v3617_v12  ;;  %v3650_v37 = vsub.f32 %v7204_v57, %v3618_v41 }
 0x348   :  { %v3667_v28 = vpack.c.bf16 %v3650_v37, %v3649_v6 }
 0x349   :  { %v7208_v63 = vpop.eup %7207 }
 0x34a   :  { %v11934_v55 = vpack.c.bf16 %v7208_v63, %v7206_v33  ;;  %5888 = vmatmul.mubr.msk.bf16.gmra.mxu0 %vm3669_vm6, %v3667_v28  ;;  %5905 = vmatmul.mubr.msk.bf16.gmra.mxu1 %vm3669_vm6, %v3667_v28 }
 0x34b   :  { %3916 = vmatprep.mubr.bf16.mxu0 %v14893_v21  ;;  %4109 = vmatprep.mubr.bf16.mxu1 %v14893_v21 }
 0x34c   :  { %v3619_v29 = vunpack.c.l.bf16 %v11934_v55  ;;  %v3620_v49 = vunpack.c.h.bf16 %v11934_v55 }
 0x34e   :  { %v3651_v39 = vsub.f32 %v7206_v33, %v3619_v29  ;;  %v3652_v3 = vsub.f32 %v7208_v63, %v3620_v49 }
 0x350   :  { %v3668_v48 = vpack.c.bf16 %v3652_v3, %v3651_v39 }
 0x352   :  { %5889 = vmatmul.mubr.msk.bf16.gmra.mxu0 %vm3669_vm6, %v3668_v48  ;;  %5906 = vmatmul.mubr.msk.bf16.gmra.mxu1 %vm3669_vm6, %v3668_v48 }
 0x353   :  { %6681 = vmatprep.mubr.msk.bf16.mxu0 %vm3669_vm6, %v11740_v40  ;;  %4361 = vmatprep.mubr.bf16.mxu1 %v14893_v21 }
 0x35a   :  { %6682 = vmatmul.mubr.msk.bf16.vlgmr.msra.gmra.mxu0 %vm3669_vm6, %v11764_v14  ;;  %5924 = vmatmul.mubr.msk.bf16.vlgmr.msra.gmra.mxu1 %vm3669_vm6, %v11734_v45 }
 0x35b   :  { %6685 = vmatprep.mubr.msk.bf16.mxu0 %vm3669_vm6, %v11778_v25  ;;  %4537 = vmatpush1.bf16.msra.mxu0 %v11377_v1 }
 0x35c   :  { %6714 = vmatpush3.bf16.msra.mxu1 %v11744_v35  ;;  %4371 = vmatprep.mubr.bf16.mxu1 %v14893_v21 }
 0x362   :  { %6686 = vmatmul.mubr.msk.bf16.gmra.mxu0 %vm3669_vm6, %v11792_v11  ;;  %5925 = vmatmul.mubr.msk.bf16.gmra.mxu1 %vm3669_vm6, %v11746_v13 }
 0x363   :  { %6689 = vmatprep.mubr.msk.bf16.mxu0 %vm3669_vm6, %v11806_v7  ;;  %4381 = vmatprep.mubr.bf16.mxu1 %v14893_v21 }
 0x36a   :  { %6690 = vmatmul.mubr.msk.bf16.gmra.mxu0 %vm3669_vm6, %v11820_v58  ;;  %5926 = vmatmul.mubr.msk.bf16.gmra.mxu1 %vm3669_vm6, %v11767_v38 }
 0x36b   :  { %6693 = vmatprep.mubr.msk.bf16.mxu0 %vm3669_vm6, %v11834_v42  ;;  %4391 = vmatprep.mubr.bf16.mxu1 %v14893_v21 }
 0x372   :  { %6694 = vmatmul.mubr.msk.bf16.gmra.mxu0 %vm3669_vm6, %v11848_v44  ;;  %5927 = vmatmul.mubr.msk.bf16.gmra.mxu1 %vm3669_vm6, %v11781_v18 }
 0x373   :  { %6697 = vmatprep.mubr.msk.bf16.mxu0 %vm3669_vm6, %v11862_v43  ;;  %4401 = vmatprep.mubr.bf16.mxu1 %v14893_v21 }
 0x37a   :  { %6698 = vmatmul.mubr.msk.bf16.gmra.mxu0 %vm3669_vm6, %v11876_v10  ;;  %5928 = vmatmul.mubr.msk.bf16.gmra.mxu1 %vm3669_vm6, %v11794_v2 }
 0x37b   :  { %6701 = vmatprep.mubr.msk.bf16.mxu0 %vm3669_vm6, %v11890_v34  ;;  %4411 = vmatprep.mubr.bf16.mxu1 %v14893_v21 }
 0x382   :  { %6702 = vmatmul.mubr.msk.bf16.gmra.mxu0 %vm3669_vm6, %v11902_v8  ;;  %5929 = vmatmul.mubr.msk.bf16.gmra.mxu1 %vm3669_vm6, %v11808_v54 }
 0x383   :  { %6705 = vmatprep.mubr.msk.bf16.mxu0 %vm3669_vm6, %v11914_v15  ;;  %4421 = vmatprep.mubr.bf16.mxu1 %v14893_v21 }
 0x38a   :  { %6706 = vmatmul.mubr.msk.bf16.gmra.mxu0 %vm3669_vm6, %v3666_v56  ;;  %5930 = vmatmul.mubr.msk.bf16.gmra.mxu1 %vm3669_vm6, %v11823_v17 }
 0x38b   :  { %6709 = vmatprep.mubr.msk.bf16.mxu0 %vm3669_vm6, %v3667_v28  ;;  %4431 = vmatprep.mubr.bf16.mxu1 %v14893_v21 }
 0x392   :  { %6710 = vmatmul.mubr.msk.bf16.gmra.mxu0 %vm3669_vm6, %v3668_v48  ;;  %5931 = vmatmul.mubr.msk.bf16.gmra.mxu1 %vm3669_vm6, %v11837_v32 }
 0x393   :  { %4441 = vmatprep.mubr.bf16.mxu1 %v14893_v21  ;;  %4554 = vmatprep.mubr.bf16.mxu0 %v14893_v21 }
 0x39a   :  { %v12001_v1 = vpop.f32.mrf.mxu0  ;;  %v12003_v40 = vpop.f32.mrf.mxu1  ;;  %5932 = vmatmul.mubr.msk.bf16.gmra.mxu1 %vm3669_vm6, %v11850_v51  ;;  %5941 = vmatmul.mubr.msk.bf16.vlgmr.msra.gmra.mxu0 %vm3669_vm6, %v11734_v45 }
 0x39b   :  { %4451 = vmatprep.mubr.bf16.mxu1 %v14893_v21  ;;  %4564 = vmatprep.mubr.bf16.mxu0 %v14893_v21 }
 0x39c   :  { %v12011_v35 = vpop.f32.mrf.mxu0  ;;  %v12013_v14 = vpop.f32.mrf.mxu1 }
 0x39e   :  { %v12015_v25 = vpop.f32.mrf.mxu0  ;;  %v12017_v11 = vpop.f32.mrf.mxu1 }
 0x3a0   :  { %v12019_v7 = vpop.f32.mrf.mxu0  ;;  %v12021_v58 = vpop.f32.mrf.mxu1 }
 0x3a2   :  { %v12023_v42 = vpop.f32.mrf.mxu0  ;;  %v12025_v44 = vpop.f32.mrf.mxu1  ;;  %5933 = vmatmul.mubr.msk.bf16.gmra.mxu1 %vm3669_vm6, %v11864_v47  ;;  %5942 = vmatmul.mubr.msk.bf16.gmra.mxu0 %vm3669_vm6, %v11746_v13 }
 0x3a3   :  { %4461 = vmatprep.mubr.bf16.mxu1 %v14893_v21  ;;  %4574 = vmatprep.mubr.bf16.mxu0 %v14893_v21 }
 0x3a4   :  { %v12033_v43 = vpop.f32.mrf.mxu0  ;;  %v12035_v10 = vpop.f32.mrf.mxu1 }
 0x3a6   :  { %v12037_v34 = vpop.f32.mrf.mxu0  ;;  %v12039_v53 = vpop.f32.mrf.mxu1 }
 0x3a7   :  { %14894 = vst [vmem:[#allocation15_spill] sm:$0xff] %v12039_v53 }
 0x3a8   :  { %v12041_v8 = vpop.f32.mrf.mxu0  ;;  %v12043_v4 = vpop.f32.mrf.mxu1 }
 0x3a9   :  { %14895 = vst [vmem:[#allocation16_spill] sm:$0xff] %v12043_v4 }
 0x3aa   :  { %v12045_v20 = vpop.f32.mrf.mxu0  ;;  %v12047_v0 = vpop.f32.mrf.mxu1  ;;  %5934 = vmatmul.mubr.msk.bf16.gmra.mxu1 %vm3669_vm6, %v11879_v50  ;;  %5943 = vmatmul.mubr.msk.bf16.gmra.mxu0 %vm3669_vm6, %v11767_v38 }
 0x3ab   :  { %14896 = vst [vmem:[#allocation17_spill] sm:$0xff] %v12047_v0  ;;  %4471 = vmatprep.mubr.bf16.mxu1 %v14893_v21  ;;  %4584 = vmatprep.mubr.bf16.mxu0 %v14893_v21 }
 0x3ac   :  { %v12055_v19 = vpop.f32.mrf.mxu0  ;;  %v12057_v5 = vpop.f32.mrf.mxu1 }
 0x3ad   :  { %14897 = vst [vmem:[#allocation18_spill] sm:$0xff] %v12057_v5 }
 0x3ae   :  { %v12059_v22 = vpop.f32.mrf.mxu0  ;;  %v12061_v60 = vpop.f32.mrf.mxu1 }
 0x3af   :  { %14898 = vst [vmem:[#allocation11_spill] sm:$0xff] %v12061_v60 }
 0x3b0   :  { %v12063_v23 = vpop.f32.mrf.mxu0  ;;  %v12065_v36 = vpop.f32.mrf.mxu1 }
 0x3b1   :  { %14899 = vst [vmem:[#allocation13_spill] sm:$0xff] %v12065_v36 }
 0x3b2   :  { %v12067_v15 = vpop.f32.mrf.mxu0  ;;  %v12069_v9 = vpop.f32.mrf.mxu1  ;;  %5935 = vmatmul.mubr.msk.bf16.gmra.mxu1 %vm3669_vm6, %v11892_v61  ;;  %5944 = vmatmul.mubr.msk.bf16.gmra.mxu0 %vm3669_vm6, %v11781_v18 }
 0x3b3   :  { %14900 = vst [vmem:[#allocation14_spill] sm:$0xff] %v12069_v9  ;;  %4481 = vmatprep.mubr.bf16.mxu1 %v14893_v21  ;;  %4594 = vmatprep.mubr.bf16.mxu0 %v14893_v21 }
 0x3b4   :  { %v12077_v30 = vpop.f32.mrf.mxu0  ;;  %v12079_v62 = vpop.f32.mrf.mxu1 }
 0x3b5   :  { %14901 = vst [vmem:[#allocation24_spill] sm:$0xff] %v12079_v62 }
 0x3b6   :  { %v12081_v24 = vpop.f32.mrf.mxu0  ;;  %v12083_v27 = vpop.f32.mrf.mxu1 }
 0x3b7   :  { %14902 = vst [vmem:[#allocation25_spill] sm:$0xff] %v12083_v27 }
 0x3b8   :  { %v12085_v46 = vpop.f32.mrf.mxu0  ;;  %v12087_v59 = vpop.f32.mrf.mxu1 }
 0x3b9   :  { %14903 = vst [vmem:[#allocation8_spill] sm:$0xff] %v12087_v59 }
 0x3ba   :  { %v12089_v56 = vpop.f32.mrf.mxu0  ;;  %v12091_v26 = vpop.f32.mrf.mxu1  ;;  %5936 = vmatmul.mubr.msk.bf16.gmra.mxu1 %vm3669_vm6, %v11904_v31  ;;  %5945 = vmatmul.mubr.msk.bf16.gmra.mxu0 %vm3669_vm6, %v11794_v2 }
 0x3bb   :  { %14904 = vst [vmem:[#allocation20_spill] sm:$0xff] %v12091_v26  ;;  %4491 = vmatprep.mubr.bf16.mxu1 %v14893_v21  ;;  %4604 = vmatprep.mubr.bf16.mxu0 %v14893_v21 }
 0x3bc   :  { %v12099_v57 = vpop.f32.mrf.mxu0  ;;  %v12101_v12 = vpop.f32.mrf.mxu1 }
 0x3bd   :  { %14905 = vst [vmem:[#allocation19_spill] sm:$0xff] %v12101_v12 }
 0x3be   :  { %v12103_v41 = vpop.f32.mrf.mxu0  ;;  %v12105_v6 = vpop.f32.mrf.mxu1 }
 0x3bf   :  { %14906 = vst [vmem:[#allocation23_spill] sm:$0xff] %v12105_v6 }
 0x3c0   :  { %v12107_v37 = vpop.f32.mrf.mxu0  ;;  %v12109_v33 = vpop.f32.mrf.mxu1 }
 0x3c1   :  { %14907 = vst [vmem:[#allocation21_spill] sm:$0xff] %v12109_v33 }
 0x3c2   :  { %v12111_v28 = vpop.f32.mrf.mxu0  ;;  %v12113_v63 = vpop.f32.mrf.mxu1  ;;  %5937 = vmatmul.mubr.msk.bf16.gmra.mxu1 %vm3669_vm6, %v11916_v16  ;;  %5946 = vmatmul.mubr.msk.bf16.gmra.mxu0 %vm3669_vm6, %v11808_v54 }
 0x3c3   :  { %14908 = vst [vmem:[#allocation9_spill] sm:$0xff] %v12113_v63  ;;  %4501 = vmatprep.mubr.bf16.mxu1 %v14893_v21  ;;  %4614 = vmatprep.mubr.bf16.mxu0 %v14893_v21 }
 0x3c4   :  { %v12121_v29 = vpop.f32.mrf.mxu0  ;;  %v12123_v49 = vpop.f32.mrf.mxu1 }
 0x3c5   :  { %14909 = vst [vmem:[#allocation10_spill] sm:$0xff] %v12123_v49 }
 0x3c6   :  { %v12125_v39 = vpop.f32.mrf.mxu0  ;;  %v12127_v3 = vpop.f32.mrf.mxu1 }
 0x3c7   :  { %14910 = vst [vmem:[#allocation4_spill] sm:$0xff] %v12127_v3 }
 0x3c8   :  { %v12129_v48 = vpop.f32.mrf.mxu0  ;;  %v12131_v63 = vpop.f32.mrf.mxu1 }
 0x3c9   :  { %14911 = vst [vmem:[#allocation3_spill] sm:$0xff] %v12131_v63 }
 0x3ca   :  { %v12133_v33 = vpop.f32.mrf.mxu0  ;;  %v12135_v6 = vpop.f32.mrf.mxu1  ;;  %5938 = vmatmul.mubr.msk.bf16.gmra.mxu1 %vm3669_vm6, %v11926_v52  ;;  %5947 = vmatmul.mubr.msk.bf16.gmra.mxu0 %vm3669_vm6, %v11823_v17 }
 0x3cb   :  { %14912 = vst [vmem:[#allocation22_spill] sm:$0xff] %v12135_v6  ;;  %4511 = vmatprep.mubr.bf16.mxu1 %v14893_v21  ;;  %4624 = vmatprep.mubr.bf16.mxu0 %v14893_v21 }
 0x3cc   :  { %v12143_v49 = vpop.f32.mrf.mxu0  ;;  %v12145_v3 = vpop.f32.mrf.mxu1 }
 0x3cd   :  { %14913 = vst [vmem:[#allocation7_spill] sm:$0xff] %v12145_v3 }
 0x3ce   :  { %v12147_v12 = vpop.f32.mrf.mxu0  ;;  %v12149_v63 = vpop.f32.mrf.mxu1 }
 0x3cf   :  { %14914 = vst [vmem:[#allocation27_spill] sm:$0xff] %v12149_v63 }
 0x3d0   :  { %v12151_v26 = vpop.f32.mrf.mxu0  ;;  %v12153_v6 = vpop.f32.mrf.mxu1 }
 0x3d1   :  { %14915 = vst [vmem:[#allocation26_spill] sm:$0xff] %v12153_v6 }
 0x3d2   :  { %v12155_v59 = vpop.f32.mrf.mxu0  ;;  %v12157_v27 = vpop.f32.mrf.mxu1  ;;  %5939 = vmatmul.mubr.msk.bf16.gmra.mxu1 %vm3669_vm6, %v11934_v55  ;;  %5948 = vmatmul.mubr.msk.bf16.gmra.mxu0 %vm3669_vm6, %v11837_v32 }
 0x3d3   :  { %14916 = vst [vmem:[#allocation6_spill] sm:$0xff] %v12157_v27  ;;  %6715 = vmatprep.mubr.msk.bf16.mxu1 %vm3669_vm6, %v11734_v45  ;;  %4634 = vmatprep.mubr.bf16.mxu0 %v14893_v21 }
 0x3d4   :  { %v12166_v63 = vpop.f32.mrf.mxu0  ;;  %v12168_v3 = vpop.f32.mrf.mxu1 }
 0x3d5   :  { %14917 = vst [vmem:[#allocation5_spill] sm:$0xff] %v12168_v3 }
 0x3d6   :  { %v12170_v6 = vpop.f32.mrf.mxu0  ;;  %v12172_v62 = vpop.f32.mrf.mxu1 }
 0x3d7   :  { %14918 = vst [vmem:[#allocation12_spill] sm:$0xff] %v12172_v62 }
 0x3d8   :  { %v12174_v27 = vpop.f32.mrf.mxu0  ;;  %v12176_v9 = vpop.f32.mrf.mxu1 }
 0x3d9   :  { %14919 = vst [vmem:[#allocation2_spill] sm:$0xff] %v12176_v9 }
 0x3da   :  { %v12178_v36 = vpop.f32.mrf.mxu0  ;;  %v12180_v60 = vpop.f32.mrf.mxu1  ;;  %5949 = vmatmul.mubr.msk.bf16.gmra.mxu0 %vm3669_vm6, %v11850_v51  ;;  %6716 = vmatmul.mubr.msk.bf16.vlgmr.msra.gmra.mxu1 %vm3669_vm6, %v11746_v13 }
 0x3db   :  { %14920 = vst [vmem:[#allocation28_spill] sm:$0xff] %v12180_v60  ;;  %6719 = vmatprep.mubr.msk.bf16.mxu1 %vm3669_vm6, %v11767_v38  ;;  %4644 = vmatprep.mubr.bf16.mxu0 %v14893_v21 }
 0x3dc   :  { %v12189_v45 = vpop.f32.mrf.mxu0  ;;  %v12191_v62 = vpop.f32.mrf.mxu1 }
 0x3dd   :  { %14921 = vst [vmem:[#allocation29_spill] sm:$0xff] %v12191_v62 }
 0x3de   :  { %v12193_v9 = vpop.f32.mrf.mxu0  ;;  %v12195_v3 = vpop.f32.mrf.mxu1 }
 0x3df   :  { %14922 = vst [vmem:[#allocation30_spill] sm:$0xff] %v12195_v3 }
 0x3e0   :  { %v12197_v60 = vpop.f32.mrf.mxu0  ;;  %v12199_v5 = vpop.f32.mrf.mxu1 }
 0x3e1   :  { %14923 = vst [vmem:[#allocation31_spill] sm:$0xff] %v12199_v5 }
 0x3e2   :  { %v12201_v0 = vpop.f32.mrf.mxu0  ;;  %v12203_v13 = vpop.f32.mrf.mxu1  ;;  %5950 = vmatmul.mubr.msk.bf16.gmra.mxu0 %vm3669_vm6, %v11864_v47  ;;  %6720 = vmatmul.mubr.msk.bf16.gmra.mxu1 %vm3669_vm6, %v11781_v18 }
 0x3e3   :  { %14924 = vst [vmem:[#allocation32_spill] sm:$0xff] %v12203_v13  ;;  %6723 = vmatprep.mubr.msk.bf16.mxu1 %vm3669_vm6, %v11794_v2  ;;  %4654 = vmatprep.mubr.bf16.mxu0 %v14893_v21 }
 0x3e4   :  { %v12212_v38 = vpop.f32.mrf.mxu0  ;;  %v12214_v3 = vpop.f32.mrf.mxu1 }
 0x3e5   :  { %14925 = vst [vmem:[#allocation33_spill] sm:$0xff] %v12214_v3 }
 0x3e6   :  { %v12216_v5 = vpop.f32.mrf.mxu0  ;;  %v12218_v62 = vpop.f32.mrf.mxu1 }
 0x3e7   :  { %14926 = vst [vmem:[#allocation34_spill] sm:$0xff] %v12218_v62 }
 0x3e8   :  { %v12220_v13 = vpop.f32.mrf.mxu0  ;;  %v12222_v4 = vpop.f32.mrf.mxu1 }
 0x3e9   :  { %14927 = vst [vmem:[#allocation35_spill] sm:$0xff] %v12220_v13  ;;  %14928 = vst [vmem:[#allocation36_spill] sm:$0xff] %v12222_v4 }
 0x3ea   :  { %v12224_v53 = vpop.f32.mrf.mxu0  ;;  %v12226_v18 = vpop.f32.mrf.mxu1  ;;  %5951 = vmatmul.mubr.msk.bf16.gmra.mxu0 %vm3669_vm6, %v11879_v50  ;;  %6724 = vmatmul.mubr.msk.bf16.gmra.mxu1 %vm3669_vm6, %v11808_v54 }
 0x3eb   :  { %14929 = vst [vmem:[#allocation37_spill] sm:$0xff] %v12224_v53  ;;  %14930 = vst [vmem:[#allocation38_spill] sm:$0xff] %v12226_v18  ;;  %6727 = vmatprep.mubr.msk.bf16.mxu1 %vm3669_vm6, %v11823_v17  ;;  %4664 = vmatprep.mubr.bf16.mxu0 %v14893_v21 }
 0x3ec   :  { %v12235_v2 = vpop.f32.mrf.mxu0  ;;  %v12237_v62 = vpop.f32.mrf.mxu1 }
 0x3ed   :  { %14931 = vst [vmem:[#allocation39_spill] sm:$0xff] %v12237_v62 }
 0x3ee   :  { %v12239_v4 = vpop.f32.mrf.mxu0  ;;  %v12241_v3 = vpop.f32.mrf.mxu1 }
 0x3ef   :  { %14932 = vst [vmem:[#allocation40_spill] sm:$0xff] %v12241_v3 }
 0x3f0   :  { %v12243_v18 = vpop.f32.mrf.mxu0  ;;  %v12245_v53 = vpop.f32.mrf.mxu1 }
 0x3f1   :  { %14933 = vst [vmem:[#allocation41_spill] sm:$0xff] %v12243_v18  ;;  %14934 = vst [vmem:[#allocation42_spill] sm:$0xff] %v12245_v53 }
 0x3f2   :  { %v12247_v13 = vpop.f32.mrf.mxu0  ;;  %v12249_v54 = vpop.f32.mrf.mxu1  ;;  %5952 = vmatmul.mubr.msk.bf16.gmra.mxu0 %vm3669_vm6, %v11892_v61  ;;  %6728 = vmatmul.mubr.msk.bf16.gmra.mxu1 %vm3669_vm6, %v11837_v32 }
 0x3f3   :  { %14935 = vst [vmem:[#allocation43_spill] sm:$0xff] %v12247_v13  ;;  %14936 = vst [vmem:[#allocation44_spill] sm:$0xff] %v12249_v54  ;;  %6731 = vmatprep.mubr.msk.bf16.mxu1 %vm3669_vm6, %v11850_v51  ;;  %4674 = vmatprep.mubr.bf16.mxu0 %v14893_v21 }
 0x3f4   :  { %v12258_v17 = vpop.f32.mrf.mxu0  ;;  %v12260_v3 = vpop.f32.mrf.mxu1 }
 0x3f5   :  { %14937 = vst [vmem:[#allocation45_spill] sm:$0xff] %v12260_v3 }
 0x3f6   :  { %v12262_v53 = vpop.f32.mrf.mxu0  ;;  %v12264_v62 = vpop.f32.mrf.mxu1 }
 0x3f7   :  { %14938 = vst [vmem:[#allocation46_spill] sm:$0xff] %v12264_v62 }
 0x3f8   :  { %v12266_v54 = vpop.f32.mrf.mxu0  ;;  %v12268_v13 = vpop.f32.mrf.mxu1 }
 0x3f9   :  { %14939 = vst [vmem:[#allocation47_spill] sm:$0xff] %v12266_v54  ;;  %14940 = vst [vmem:[#allocation48_spill] sm:$0xff] %v12268_v13 }
 0x3fa   :  { %v12270_v18 = vpop.f32.mrf.mxu0  ;;  %v12272_v32 = vpop.f32.mrf.mxu1  ;;  %5953 = vmatmul.mubr.msk.bf16.gmra.mxu0 %vm3669_vm6, %v11904_v31  ;;  %6732 = vmatmul.mubr.msk.bf16.gmra.mxu1 %vm3669_vm6, %v11864_v47 }
 0x3fb   :  { %14941 = vst [vmem:[#allocation49_spill] sm:$0xff] %v12270_v18  ;;  %14942 = vst [vmem:[#allocation50_spill] sm:$0xff] %v12272_v32  ;;  %6735 = vmatprep.mubr.msk.bf16.mxu1 %vm3669_vm6, %v11879_v50  ;;  %4684 = vmatprep.mubr.bf16.mxu0 %v14893_v21 }
 0x3fc   :  { %v12281_v51 = vpop.f32.mrf.mxu0  ;;  %v12283_v62 = vpop.f32.mrf.mxu1 }
 0x3fd   :  { %14943 = vst [vmem:[#allocation51_spill] sm:$0xff] %v12283_v62 }
 0x3fe   :  { %v12285_v13 = vpop.f32.mrf.mxu0  ;;  %v12287_v3 = vpop.f32.mrf.mxu1 }
 0x3ff   :  { %14944 = vst [vmem:[#allocation52_spill] sm:$0xff] %v12287_v3 }
 0x400   :  { %v12289_v32 = vpop.f32.mrf.mxu0  ;;  %v12291_v18 = vpop.f32.mrf.mxu1 }
 0x401   :  { %14945 = vst [vmem:[#allocation53_spill] sm:$0xff] %v12289_v32  ;;  %14946 = vst [vmem:[#allocation54_spill] sm:$0xff] %v12291_v18 }
 0x402   :  { %v12293_v54 = vpop.f32.mrf.mxu0  ;;  %v12295_v47 = vpop.f32.mrf.mxu1  ;;  %5954 = vmatmul.mubr.msk.bf16.gmra.mxu0 %vm3669_vm6, %v11916_v16  ;;  %6736 = vmatmul.mubr.msk.bf16.gmra.mxu1 %vm3669_vm6, %v11892_v61 }
 0x403   :  { %14947 = vst [vmem:[#allocation55_spill] sm:$0xff] %v12293_v54  ;;  %14948 = vst [vmem:[#allocation56_spill] sm:$0xff] %v12295_v47  ;;  %6739 = vmatprep.mubr.msk.bf16.mxu1 %vm3669_vm6, %v11904_v31  ;;  %4694 = vmatprep.mubr.bf16.mxu0 %v14893_v21 }
 0x404   :  { %v12304_v50 = vpop.f32.mrf.mxu0  ;;  %v12306_v3 = vpop.f32.mrf.mxu1 }
 0x405   :  { %14949 = vst [vmem:[#allocation57_spill] sm:$0xff] %v12306_v3 }
 0x406   :  { %v12308_v18 = vpop.f32.mrf.mxu0  ;;  %v12310_v62 = vpop.f32.mrf.mxu1 }
 0x407   :  { %14950 = vst [vmem:[#allocation58_spill] sm:$0xff] %v12308_v18  ;;  %14951 = vst [vmem:[#allocation59_spill] sm:$0xff] %v12310_v62 }
 0x408   :  { %v12312_v47 = vpop.f32.mrf.mxu0  ;;  %v12314_v54 = vpop.f32.mrf.mxu1 }
 0x409   :  { %14952 = vst [vmem:[#allocation60_spill] sm:$0xff] %v12312_v47  ;;  %14953 = vst [vmem:[#allocation61_spill] sm:$0xff] %v12314_v54 }
 0x40a   :  { %v12316_v32 = vpop.f32.mrf.mxu0  ;;  %v12318_v61 = vpop.f32.mrf.mxu1  ;;  %5955 = vmatmul.mubr.msk.bf16.gmra.mxu0 %vm3669_vm6, %v11926_v52  ;;  %6740 = vmatmul.mubr.msk.bf16.gmra.mxu1 %vm3669_vm6, %v11916_v16 }
 0x40b   :  { %14954 = vst [vmem:[#allocation62_spill] sm:$0xff] %v12316_v32  ;;  %14955 = vst [vmem:[#allocation63_spill] sm:$0xff] %v12318_v61  ;;  %6743 = vmatprep.mubr.msk.bf16.mxu1 %vm3669_vm6, %v11926_v52  ;;  %4704 = vmatprep.mubr.bf16.mxu0 %v14893_v21 }
 0x40c   :  { %v12327_v31 = vpop.f32.mrf.mxu0  ;;  %v12329_v62 = vpop.f32.mrf.mxu1 }
 0x40d   :  { %14956 = vst [vmem:[#allocation64_spill] sm:$0xff] %v12327_v31  ;;  %14957 = vst [vmem:[#allocation65_spill] sm:$0xff] %v12329_v62  ;;  %v4881_v31 = vld [vmem:[%s13578_s3 + $0x28] sm:$0xff] }
 0x40e   :  { %v12331_v54 = vpop.f32.mrf.mxu0  ;;  %v12333_v3 = vpop.f32.mrf.mxu1 }
 0x40f   :  { %14958 = vst [vmem:[#allocation66_spill] sm:$0xff] %v12331_v54  ;;  %14959 = vst [vmem:[#allocation67_spill] sm:$0xff] %v12333_v3  ;;  %v4876_v54 = vld [vmem:[%s13578_s3] sm:$0xff] }
 0x410   :  { %v12335_v61 = vpop.f32.mrf.mxu0  ;;  %v12337_v32 = vpop.f32.mrf.mxu1 }
 0x411   :  { %14960 = vst [vmem:[#allocation68_spill] sm:$0xff] %v12335_v61  ;;  %14961 = vst [vmem:[#allocation69_spill] sm:$0xff] %v12337_v32 }
 0x412   :  { %v12339_v47 = vpop.f32.mrf.mxu0  ;;  %v12341_v16 = vpop.f32.mrf.mxu1  ;;  %5956 = vmatmul.mubr.msk.bf16.gmra.mxu0 %vm3669_vm6, %v11934_v55  ;;  %6744 = vmatmul.mubr.msk.bf16.gmra.mxu1 %vm3669_vm6, %v11934_v55 }
 0x413   :  { %14962 = vst [vmem:[#allocation70_spill] sm:$0xff] %v12339_v47  ;;  %14963 = vst [vmem:[#allocation71_spill] sm:$0xff] %v12341_v16 }
 0x414   :  { %v12347_v21 = vpop.f32.mrf.mxu0  ;;  %v12349_v52 = vpop.f32.mrf.mxu1 }
 0x415   :  { %14964 = vst [vmem:[#allocation72_spill] sm:$0xff] %v12347_v21  ;;  %14965 = vst [vmem:[#allocation73_spill] sm:$0xff] %v12349_v52 }
 0x416   :  { %v12351_v62 = vpop.f32.mrf.mxu0  ;;  %v12353_v3 = vpop.f32.mrf.mxu1 }
 0x417   :  { %14966 = vst [vmem:[#allocation74_spill] sm:$0xff] %v12351_v62  ;;  %14967 = vst [vmem:[#allocation75_spill] sm:$0xff] %v12353_v3  ;;  %v4877_v3 = vld [vmem:[%s13578_s3 + $0x8] sm:$0xff] }
 0x418   :  { %v12355_v61 = vpop.f32.mrf.mxu0  ;;  %v12357_v32 = vpop.f32.mrf.mxu1 }
 0x419   :  { %14968 = vst [vmem:[#allocation76_spill] sm:$0xff] %v12355_v61  ;;  %14969 = vst [vmem:[#allocation77_spill] sm:$0xff] %v12357_v32 }
 0x41a   :  { %v12359_v47 = vpop.f32.mrf.mxu0  ;;  %v4363_v16 = vpop.f32.mrf.mxu1 }
 0x41b   :  { %14970 = vst [vmem:[#allocation78_spill] sm:$0xff] %v12359_v47  ;;  %v4364_v55 = vadd.f32 %v4363_v16, %v12001_v1 }
 0x41c   :  { %v12365_v21 = vpop.f32.mrf.mxu0  ;;  %v4365_v52 = vpop.f32.mrf.mxu1 }
 0x41d   :  { %14971 = vst [vmem:[#allocation79_spill] sm:$0xff] %v12365_v21  ;;  %v5036_v62 = vmul.f32 %v4876_v54, %v4364_v55  ;;  %v4366_v61 = vadd.f32 %v4365_v52, %v12011_v35  ;;  %v4882_v35 = vld [vmem:[%s13578_s3 + $0x30] sm:$0xff] }
 0x41e   :  { %v12371_v32 = vpop.f32.mrf.mxu0  ;;  %v4367_v47 = vpop.f32.mrf.mxu1 }
 0x41f   :  { %5196 = vst [vmem:[%s13579_s4] sm:$0xff] %v5036_v62  ;;  %v5037_v1 = vmul.f32 %v4877_v3, %v4366_v61  ;;  %v4368_v16 = vadd.f32 %v4367_v47, %v12015_v25  ;;  %v4886_v25 = vld [vmem:[%s13578_s3 + $0x50] sm:$0xff] }
 0x420   :  { %v12380_v21 = vpop.f32.mrf.mxu0  ;;  %v4369_v18 = vpop.f32.mrf.mxu1 }
 0x421   :  { %5197 = vst [vmem:[%s13579_s4 + $0x8] sm:$0xff] %v5037_v1  ;;  %v5041_v54 = vmul.f32 %v4881_v31, %v4368_v16  ;;  %v4370_v52 = vadd.f32 %v4369_v18, %v12019_v7  ;;  %v4887_v7 = vld [vmem:[%s13578_s3 + $0x58] sm:$0xff] }
 0x422   :  { %v12389_v55 = vpop.f32.mrf.mxu0  ;;  %v4373_v62 = vpop.f32.mrf.mxu1 }
 0x423   :  { %5202 = vst [vmem:[%s13579_s4 + $0x28] sm:$0xff] %v5041_v54  ;;  %v5042_v3 = vmul.f32 %v4882_v35, %v4370_v52  ;;  %v4374_v47 = vadd.f32 %v4373_v62, %v12023_v42  ;;  %v4891_v42 = vld [vmem:[%s13578_s3 + $0x78] sm:$0xff] }
 0x424   :  { %v12398_v61 = vpop.f32.mrf.mxu0  ;;  %v4375_v1 = vpop.f32.mrf.mxu1 }
 0x425   :  { %5203 = vst [vmem:[%s13579_s4 + $0x30] sm:$0xff] %v5042_v3  ;;  %v5046_v18 = vmul.f32 %v4886_v25, %v4374_v47  ;;  %v4376_v31 = vadd.f32 %v4375_v1, %v12033_v43  ;;  %v4892_v43 = vld [vmem:[%s13578_s3 + $0x80] sm:$0xff] }
 0x426   :  { %v12407_v16 = vpop.f32.mrf.mxu0  ;;  %v4377_v54 = vpop.f32.mrf.mxu1 }
 0x427   :  { %5207 = vst [vmem:[%s13579_s4 + $0x50] sm:$0xff] %v5046_v18  ;;  %v5047_v35 = vmul.f32 %v4887_v7, %v4376_v31  ;;  %v4378_v52 = vadd.f32 %v4377_v54, %v12037_v34  ;;  %v4896_v34 = vld [vmem:[%s13578_s3 + $0xa0] sm:$0xff] }
 0x428   :  { %v12416_v62 = vpop.f32.mrf.mxu0  ;;  %v4379_v3 = vpop.f32.mrf.mxu1 }
 0x429   :  { %5208 = vst [vmem:[%s13579_s4 + $0x58] sm:$0xff] %v5047_v35  ;;  %v5051_v25 = vmul.f32 %v4891_v42, %v4378_v52  ;;  %v4380_v47 = vadd.f32 %v4379_v3, %v12041_v8  ;;  %v4897_v8 = vld [vmem:[%s13578_s3 + $0xa8] sm:$0xff] }
 0x42a   :  { %v12425_v1 = vpop.f32.mrf.mxu0  ;;  %v4383_v18 = vpop.f32.mrf.mxu1 }
 0x42b   :  { %5212 = vst [vmem:[%s13579_s4 + $0x78] sm:$0xff] %v5051_v25  ;;  %v5052_v7 = vmul.f32 %v4892_v43, %v4380_v47  ;;  %v4384_v31 = vadd.f32 %v4383_v18, %v12045_v20  ;;  %v4901_v20 = vld [vmem:[%s13578_s3 + $0xc8] sm:$0xff] }
 0x42c   :  { %v12434_v54 = vpop.f32.mrf.mxu0  ;;  %v4385_v35 = vpop.f32.mrf.mxu1 }
 0x42d   :  { %5213 = vst [vmem:[%s13579_s4 + $0x80] sm:$0xff] %v5052_v7  ;;  %v5056_v42 = vmul.f32 %v4896_v34, %v4384_v31  ;;  %v4386_v52 = vadd.f32 %v4385_v35, %v12055_v19  ;;  %v4902_v19 = vld [vmem:[%s13578_s3 + $0xd0] sm:$0xff] }
 0x42e   :  { %v12443_v3 = vpop.f32.mrf.mxu0  ;;  %v4387_v25 = vpop.f32.mrf.mxu1 }
 0x42f   :  { %5217 = vst [vmem:[%s13579_s4 + $0xa0] sm:$0xff] %v5056_v42  ;;  %v5057_v43 = vmul.f32 %v4897_v8, %v4386_v52  ;;  %v4388_v47 = vadd.f32 %v4387_v25, %v12059_v22  ;;  %v4906_v22 = vld [vmem:[%s13578_s3 + $0xf0] sm:$0xff] }
 0x430   :  { %v12452_v18 = vpop.f32.mrf.mxu0  ;;  %v4389_v7 = vpop.f32.mrf.mxu1 }
 0x431   :  { %5218 = vst [vmem:[%s13579_s4 + $0xa8] sm:$0xff] %v5057_v43  ;;  %v5061_v34 = vmul.f32 %v4901_v20, %v4388_v47  ;;  %v4390_v31 = vadd.f32 %v4389_v7, %v12063_v23  ;;  %v4907_v23 = vld [vmem:[%s13578_s3 + $0xf8] sm:$0xff] }
 0x432   :  { %v12461_v35 = vpop.f32.mrf.mxu0  ;;  %v4393_v42 = vpop.f32.mrf.mxu1 }
 0x433   :  { %5222 = vst [vmem:[%s13579_s4 + $0xc8] sm:$0xff] %v5061_v34  ;;  %v5062_v8 = vmul.f32 %v4902_v19, %v4390_v31  ;;  %v4394_v52 = vadd.f32 %v4393_v42, %v12067_v15  ;;  %v4911_v15 = vld [vmem:[%s13578_s3 + $0x118] sm:$0xff] }
 0x434   :  { %v12470_v25 = vpop.f32.mrf.mxu0  ;;  %v4395_v43 = vpop.f32.mrf.mxu1 }
 0x435   :  { %5223 = vst [vmem:[%s13579_s4 + $0xd0] sm:$0xff] %v5062_v8  ;;  %v5066_v20 = vmul.f32 %v4906_v22, %v4394_v52  ;;  %v4396_v47 = vadd.f32 %v4395_v43, %v12077_v30  ;;  %v4912_v30 = vld [vmem:[%s13578_s3 + $0x120] sm:$0xff] }
 0x436   :  { %v12479_v7 = vpop.f32.mrf.mxu0  ;;  %v4397_v34 = vpop.f32.mrf.mxu1 }
 0x437   :  { %5227 = vst [vmem:[%s13579_s4 + $0xf0] sm:$0xff] %v5066_v20  ;;  %v5067_v19 = vmul.f32 %v4907_v23, %v4396_v47  ;;  %v4398_v31 = vadd.f32 %v4397_v34, %v12081_v24  ;;  %v4916_v24 = vld [vmem:[%s13578_s3 + $0x140] sm:$0xff] }
 0x438   :  { %v12488_v42 = vpop.f32.mrf.mxu0  ;;  %v4399_v8 = vpop.f32.mrf.mxu1 }
 0x439   :  { %5228 = vst [vmem:[%s13579_s4 + $0xf8] sm:$0xff] %v5067_v19  ;;  %v5071_v22 = vmul.f32 %v4911_v15, %v4398_v31  ;;  %v4400_v52 = vadd.f32 %v4399_v8, %v12085_v46  ;;  %v4917_v46 = vld [vmem:[%s13578_s3 + $0x148] sm:$0xff] }
 0x43a   :  { %v12497_v43 = vpop.f32.mrf.mxu0  ;;  %v4403_v20 = vpop.f32.mrf.mxu1 }
 0x43b   :  { %5232 = vst [vmem:[%s13579_s4 + $0x118] sm:$0xff] %v5071_v22  ;;  %v5072_v23 = vmul.f32 %v4912_v30, %v4400_v52  ;;  %v4404_v47 = vadd.f32 %v4403_v20, %v12089_v56  ;;  %v4921_v56 = vld [vmem:[%s13578_s3 + $0x168] sm:$0xff] }
 0x43c   :  { %v12506_v34 = vpop.f32.mrf.mxu0  ;;  %v4405_v19 = vpop.f32.mrf.mxu1 }
 0x43d   :  { %5233 = vst [vmem:[%s13579_s4 + $0x120] sm:$0xff] %v5072_v23  ;;  %v5076_v15 = vmul.f32 %v4916_v24, %v4404_v47  ;;  %v4406_v31 = vadd.f32 %v4405_v19, %v12099_v57  ;;  %v4922_v57 = vld [vmem:[%s13578_s3 + $0x170] sm:$0xff] }
 0x43e   :  { %v12515_v8 = vpop.f32.mrf.mxu0  ;;  %v4407_v22 = vpop.f32.mrf.mxu1 }
 0x43f   :  { %5237 = vst [vmem:[%s13579_s4 + $0x140] sm:$0xff] %v5076_v15  ;;  %v5077_v30 = vmul.f32 %v4917_v46, %v4406_v31  ;;  %v4408_v52 = vadd.f32 %v4407_v22, %v12103_v41  ;;  %v4926_v41 = vld [vmem:[%s13578_s3 + $0x190] sm:$0xff] }
 0x440   :  { %v12524_v20 = vpop.f32.mrf.mxu0  ;;  %v4409_v23 = vpop.f32.mrf.mxu1 }
 0x441   :  { %5238 = vst [vmem:[%s13579_s4 + $0x148] sm:$0xff] %v5077_v30  ;;  %v5081_v24 = vmul.f32 %v4921_v56, %v4408_v52  ;;  %v4410_v47 = vadd.f32 %v4409_v23, %v12107_v37  ;;  %v4927_v37 = vld [vmem:[%s13578_s3 + $0x198] sm:$0xff] }
 0x442   :  { %v12533_v19 = vpop.f32.mrf.mxu0  ;;  %v4413_v15 = vpop.f32.mrf.mxu1 }
 0x443   :  { %5242 = vst [vmem:[%s13579_s4 + $0x168] sm:$0xff] %v5081_v24  ;;  %v5082_v46 = vmul.f32 %v4922_v57, %v4410_v47  ;;  %v4414_v31 = vadd.f32 %v4413_v15, %v12111_v28  ;;  %v4931_v28 = vld [vmem:[%s13578_s3 + $0x1b8] sm:$0xff] }
 0x444   :  { %v12542_v22 = vpop.f32.mrf.mxu0  ;;  %v4415_v30 = vpop.f32.mrf.mxu1 }
 0x445   :  { %5243 = vst [vmem:[%s13579_s4 + $0x170] sm:$0xff] %v5082_v46  ;;  %v5086_v56 = vmul.f32 %v4926_v41, %v4414_v31  ;;  %v4416_v52 = vadd.f32 %v4415_v30, %v12121_v29  ;;  %v4932_v29 = vld [vmem:[%s13578_s3 + $0x1c0] sm:$0xff] }
 0x446   :  { %v12551_v23 = vpop.f32.mrf.mxu0  ;;  %v4417_v24 = vpop.f32.mrf.mxu1 }
 0x447   :  { %5247 = vst [vmem:[%s13579_s4 + $0x190] sm:$0xff] %v5086_v56  ;;  %v5087_v57 = vmul.f32 %v4927_v37, %v4416_v52  ;;  %v4418_v47 = vadd.f32 %v4417_v24, %v12125_v39  ;;  %v4936_v39 = vld [vmem:[%s13578_s3 + $0x1e0] sm:$0xff] }
 0x448   :  { %v12560_v15 = vpop.f32.mrf.mxu0  ;;  %v4419_v46 = vpop.f32.mrf.mxu1 }
 0x449   :  { %5248 = vst [vmem:[%s13579_s4 + $0x198] sm:$0xff] %v5087_v57  ;;  %v5091_v41 = vmul.f32 %v4931_v28, %v4418_v47  ;;  %v4420_v31 = vadd.f32 %v4419_v46, %v12129_v48  ;;  %v4937_v48 = vld [vmem:[%s13578_s3 + $0x1e8] sm:$0xff] }
 0x44a   :  { %v12569_v30 = vpop.f32.mrf.mxu0  ;;  %v4423_v56 = vpop.f32.mrf.mxu1 }
 0x44b   :  { %5252 = vst [vmem:[%s13579_s4 + $0x1b8] sm:$0xff] %v5091_v41  ;;  %v5092_v37 = vmul.f32 %v4932_v29, %v4420_v31  ;;  %v4424_v52 = vadd.f32 %v4423_v56, %v12133_v33  ;;  %v4941_v33 = vld [vmem:[%s13578_s3 + $0x208] sm:$0xff] }
 0x44c   :  { %v12578_v24 = vpop.f32.mrf.mxu0  ;;  %v4425_v57 = vpop.f32.mrf.mxu1 }
 0x44d   :  { %5253 = vst [vmem:[%s13579_s4 + $0x1c0] sm:$0xff] %v5092_v37  ;;  %v5096_v28 = vmul.f32 %v4936_v39, %v4424_v52  ;;  %v4426_v47 = vadd.f32 %v4425_v57, %v12143_v49  ;;  %v4942_v49 = vld [vmem:[%s13578_s3 + $0x210] sm:$0xff] }
 0x44e   :  { %v12587_v46 = vpop.f32.mrf.mxu0  ;;  %v4427_v41 = vpop.f32.mrf.mxu1 }
 0x44f   :  { %5257 = vst [vmem:[%s13579_s4 + $0x1e0] sm:$0xff] %v5096_v28  ;;  %v5097_v29 = vmul.f32 %v4937_v48, %v4426_v47  ;;  %v4428_v31 = vadd.f32 %v4427_v41, %v12147_v12  ;;  %v4946_v12 = vld [vmem:[%s13578_s3 + $0x230] sm:$0xff] }
 0x450   :  { %v12596_v56 = vpop.f32.mrf.mxu0  ;;  %v4429_v37 = vpop.f32.mrf.mxu1 }
 0x451   :  { %5258 = vst [vmem:[%s13579_s4 + $0x1e8] sm:$0xff] %v5097_v29  ;;  %v5101_v39 = vmul.f32 %v4941_v33, %v4428_v31  ;;  %v4430_v52 = vadd.f32 %v4429_v37, %v12151_v26  ;;  %v4947_v26 = vld [vmem:[%s13578_s3 + $0x238] sm:$0xff] }
 0x452   :  { %v12605_v57 = vpop.f32.mrf.mxu0  ;;  %v4433_v28 = vpop.f32.mrf.mxu1 }
 0x453   :  { %5262 = vst [vmem:[%s13579_s4 + $0x208] sm:$0xff] %v5101_v39  ;;  %v5102_v48 = vmul.f32 %v4942_v49, %v4430_v52  ;;  %v4434_v47 = vadd.f32 %v4433_v28, %v12155_v59  ;;  %v4951_v59 = vld [vmem:[%s13578_s3 + $0x258] sm:$0xff] }
 0x454   :  { %v12614_v41 = vpop.f32.mrf.mxu0  ;;  %v4435_v29 = vpop.f32.mrf.mxu1 }
 0x455   :  { %5263 = vst [vmem:[%s13579_s4 + $0x210] sm:$0xff] %v5102_v48  ;;  %v5106_v33 = vmul.f32 %v4946_v12, %v4434_v47  ;;  %v4436_v31 = vadd.f32 %v4435_v29, %v12166_v63  ;;  %v4952_v63 = vld [vmem:[%s13578_s3 + $0x260] sm:$0xff] }
 0x456   :  { %v12623_v37 = vpop.f32.mrf.mxu0  ;;  %v4437_v39 = vpop.f32.mrf.mxu1 }
 0x457   :  { %5267 = vst [vmem:[%s13579_s4 + $0x230] sm:$0xff] %v5106_v33  ;;  %v5107_v49 = vmul.f32 %v4947_v26, %v4436_v31  ;;  %v4438_v52 = vadd.f32 %v4437_v39, %v12170_v6  ;;  %v4956_v26 = vld [vmem:[%s13578_s3 + $0x280] sm:$0xff]  ;;  %v4878_v33 = vld [vmem:[%s13578_s3 + $0x10] sm:$0xff] }
 0x458   :  { %v12632_v28 = vpop.f32.mrf.mxu0  ;;  %v4439_v48 = vpop.f32.mrf.mxu1 }
 0x459   :  { %14972 = vst [vmem:[#allocation80_spill] sm:$0xff] %v12632_v28  ;;  %5268 = vst [vmem:[%s13579_s4 + $0x238] sm:$0xff] %v5107_v49  ;;  %v5111_v12 = vmul.f32 %v4951_v59, %v4438_v52  ;;  %v4440_v47 = vadd.f32 %v4439_v48, %v12174_v27  ;;  %v4957_v49 = vld [vmem:[%s13578_s3 + $0x288] sm:$0xff]  ;;  %v4879_v48 = vld [vmem:[%s13578_s3 + $0x18] sm:$0xff] }
 0x45a   :  { %v4443_v29 = vpop.f32.mrf.mxu1  ;;  %v4556_v6 = vpop.f32.mrf.mxu0  ;;  %v4883_v28 = vld [vmem:[%s13578_s3 + $0x38] sm:$0xff] }
 0x45b   :  { %5272 = vst [vmem:[%s13579_s4 + $0x258] sm:$0xff] %v5111_v12  ;;  %v5112_v31 = vmul.f32 %v4952_v63, %v4440_v47  ;;  %v4444_v39 = vadd.f32 %v4443_v29, %v12178_v36  ;;  %v4557_v59 = vadd.f32 %v4556_v6, %v12003_v40  ;;  %v4961_v29 = vld [vmem:[%s13578_s3 + $0x2a8] sm:$0xff] }
 0x45c   :  { %v4445_v27 = vpop.f32.mrf.mxu1  ;;  %v4558_v52 = vpop.f32.mrf.mxu0 }
 0x45d   :  { %5273 = vst [vmem:[%s13579_s4 + $0x260] sm:$0xff] %v5112_v31  ;;  %v5116_v12 = vmul.f32 %v4956_v26, %v4444_v39  ;;  %v5038_v63 = vmul.f32 %v4878_v33, %v4557_v59  ;;  %v4446_v36 = vadd.f32 %v4445_v27, %v12189_v45  ;;  %v4559_v40 = vadd.f32 %v4558_v52, %v12013_v14  ;;  %v4962_v39 = vld [vmem:[%s13578_s3 + $0x2b0] sm:$0xff]  ;;  %v4884_v27 = vld [vmem:[%s13578_s3 + $0x40] sm:$0xff] }
 0x45e   :  { %v4447_v47 = vpop.f32.mrf.mxu1  ;;  %v4560_v6 = vpop.f32.mrf.mxu0 }
 0x45f   :  { %5277 = vst [vmem:[%s13579_s4 + $0x280] sm:$0xff] %v5116_v12  ;;  %5198 = vst [vmem:[%s13579_s4 + $0x10] sm:$0xff] %v5038_v63  ;;  %v5117_v45 = vmul.f32 %v4957_v49, %v4446_v36  ;;  %v5039_v14 = vmul.f32 %v4879_v48, %v4559_v40  ;;  %v4448_v26 = vadd.f32 %v4447_v47, %v12193_v9  ;;  %v4966_v12 = vld [vmem:[%s13578_s3 + $0x2d0] sm:$0xff]  ;;  %v4888_v36 = vld [vmem:[%s13578_s3 + $0x60] sm:$0xff] }
 0x460   :  { %v4561_v33 = vadd.f32 %v4560_v6, %v12017_v11  ;;  %v4449_v31 = vpop.f32.mrf.mxu1  ;;  %v4562_v59 = vpop.f32.mrf.mxu0 }
 0x461   :  { %5278 = vst [vmem:[%s13579_s4 + $0x288] sm:$0xff] %v5117_v45  ;;  %5199 = vst [vmem:[%s13579_s4 + $0x18] sm:$0xff] %v5039_v14  ;;  %v5121_v9 = vmul.f32 %v4961_v29, %v4448_v26  ;;  %v4450_v49 = vadd.f32 %v4449_v31, %v12197_v60  ;;  %v4563_v52 = vadd.f32 %v4562_v59, %v12021_v58  ;;  %v4967_v29 = vld [vmem:[%s13578_s3 + $0x2d8] sm:$0xff]  ;;  %v4889_v45 = vld [vmem:[%s13578_s3 + $0x68] sm:$0xff] }
 0x462   :  { %v5043_v11 = vmul.f32 %v4883_v28, %v4561_v33  ;;  %v4453_v48 = vpop.f32.mrf.mxu1  ;;  %v4566_v63 = vpop.f32.mrf.mxu0  ;;  %v4971_v31 = vld [vmem:[%s13578_s3 + $0x2f8] sm:$0xff]  ;;  %v4893_v59 = vld [vmem:[%s13578_s3 + $0x88] sm:$0xff] }
 0x463   :  { %5282 = vst [vmem:[%s13579_s4 + $0x2a8] sm:$0xff] %v5121_v9  ;;  %v5122_v60 = vmul.f32 %v4962_v39, %v4450_v49  ;;  %v5044_v58 = vmul.f32 %v4884_v27, %v4563_v52  ;;  %v4454_v28 = vadd.f32 %v4453_v48, %v12201_v0  ;;  %v4567_v40 = vadd.f32 %v4566_v63, %v12025_v44  ;;  %v14973_v9 = vld [vmem:[#allocation15_spill] sm:$0xff]  ;;  %v4972_v52 = vld [vmem:[%s13578_s3 + $0x300] sm:$0xff] }
 0x464   :  { %5204 = vst [vmem:[%s13579_s4 + $0x38] sm:$0xff] %v5043_v11  ;;  %v4455_v47 = vpop.f32.mrf.mxu1  ;;  %v4568_v6 = vpop.f32.mrf.mxu0 }
 0x465   :  { %5283 = vst [vmem:[%s13579_s4 + $0x2b0] sm:$0xff] %v5122_v60  ;;  %5205 = vst [vmem:[%s13579_s4 + $0x40] sm:$0xff] %v5044_v58  ;;  %v5126_v0 = vmul.f32 %v4966_v12, %v4454_v28  ;;  %v5048_v44 = vmul.f32 %v4888_v36, %v4567_v40  ;;  %v4456_v14 = vadd.f32 %v4455_v47, %v12212_v38  ;;  %v4894_v12 = vld [vmem:[%s13578_s3 + $0x90] sm:$0xff]  ;;  %v14974_v36 = vld [vmem:[#allocation35_spill] sm:$0xff] }
 0x466   :  { %v4569_v26 = vadd.f32 %v4568_v6, %v12035_v10  ;;  %v4457_v33 = vpop.f32.mrf.mxu1  ;;  %v4570_v39 = vpop.f32.mrf.mxu0  ;;  %v14975_v58 = vld [vmem:[#allocation16_spill] sm:$0xff]  ;;  %v4976_v47 = vld [vmem:[%s13578_s3 + $0x320] sm:$0xff] }
 0x467   :  { %5287 = vst [vmem:[%s13579_s4 + $0x2d0] sm:$0xff] %v5126_v0  ;;  %5209 = vst [vmem:[%s13579_s4 + $0x60] sm:$0xff] %v5048_v44  ;;  %v5127_v38 = vmul.f32 %v4967_v29, %v4456_v14  ;;  %v4458_v27 = vadd.f32 %v4457_v33, %v12216_v5  ;;  %v4571_v11 = vadd.f32 %v4570_v39, %v14973_v9  ;;  %v4898_v6 = vld [vmem:[%s13578_s3 + $0xb0] sm:$0xff]  ;;  %v14976_v44 = vld [vmem:[#allocation37_spill] sm:$0xff] }
 0x468   :  { %v5049_v10 = vmul.f32 %v4889_v45, %v4569_v26  ;;  %v4459_v49 = vpop.f32.mrf.mxu1  ;;  %v4572_v48 = vpop.f32.mrf.mxu0  ;;  %v14977_v26 = vld [vmem:[#allocation17_spill] sm:$0xff]  ;;  %v4977_v39 = vld [vmem:[%s13578_s3 + $0x328] sm:$0xff] }
 0x469   :  { %5288 = vst [vmem:[%s13579_s4 + $0x2d8] sm:$0xff] %v5127_v38  ;;  %v5131_v5 = vmul.f32 %v4971_v31, %v4458_v27  ;;  %v5053_v63 = vmul.f32 %v4893_v59, %v4571_v11  ;;  %v4460_v60 = vadd.f32 %v4459_v49, %v14974_v36  ;;  %v4573_v28 = vadd.f32 %v4572_v48, %v14975_v58  ;;  %v4899_v38 = vld [vmem:[%s13578_s3 + $0xb8] sm:$0xff]  ;;  %v14978_v11 = vld [vmem:[#allocation18_spill] sm:$0xff]  ;;  %v4981_v48 = vld [vmem:[%s13578_s3 + $0x348] sm:$0xff] }
 0x46a   :  { %5210 = vst [vmem:[%s13579_s4 + $0x68] sm:$0xff] %v5049_v10  ;;  %v4463_v40 = vpop.f32.mrf.mxu1  ;;  %v4576_v29 = vpop.f32.mrf.mxu0 }
 0x46b   :  { %5292 = vst [vmem:[%s13579_s4 + $0x2f8] sm:$0xff] %v5131_v5  ;;  %5214 = vst [vmem:[%s13579_s4 + $0x88] sm:$0xff] %v5053_v63  ;;  %v5132_v45 = vmul.f32 %v4972_v52, %v4460_v60  ;;  %v5054_v0 = vmul.f32 %v4894_v12, %v4573_v28  ;;  %v4464_v14 = vadd.f32 %v4463_v40, %v14976_v44  ;;  %v4903_v5 = vld [vmem:[%s13578_s3 + $0xd8] sm:$0xff]  ;;  %v14979_v60 = vld [vmem:[#allocation11_spill] sm:$0xff] }
 0x46c   :  { %v4577_v33 = vadd.f32 %v4576_v29, %v14977_v26  ;;  %v4465_v31 = vpop.f32.mrf.mxu1  ;;  %v4578_v59 = vpop.f32.mrf.mxu0  ;;  %v4982_v40 = vld [vmem:[%s13578_s3 + $0x350] sm:$0xff]  ;;  %v4904_v29 = vld [vmem:[%s13578_s3 + $0xe0] sm:$0xff]  ;;  %v14981_v44 = vld [vmem:[#allocation13_spill] sm:$0xff] }
 0x46d   :  { %5293 = vst [vmem:[%s13579_s4 + $0x300] sm:$0xff] %v5132_v45  ;;  %5215 = vst [vmem:[%s13579_s4 + $0x90] sm:$0xff] %v5054_v0  ;;  %v5136_v10 = vmul.f32 %v4976_v47, %v4464_v14  ;;  %v4466_v9 = vadd.f32 %v4465_v31, %v12235_v2  ;;  %v4579_v49 = vadd.f32 %v4578_v59, %v14978_v11  ;;  %v14980_v45 = vld [vmem:[#allocation41_spill] sm:$0xff] }
 0x46e   :  { %v5058_v27 = vmul.f32 %v4898_v6, %v4577_v33  ;;  %v4467_v52 = vpop.f32.mrf.mxu1  ;;  %v4580_v12 = vpop.f32.mrf.mxu0  ;;  %v4986_v33 = vld [vmem:[%s13578_s3 + $0x370] sm:$0xff] }
 0x46f   :  { %5297 = vst [vmem:[%s13579_s4 + $0x320] sm:$0xff] %v5136_v10  ;;  %v5137_v2 = vmul.f32 %v4977_v39, %v4466_v9  ;;  %v5059_v63 = vmul.f32 %v4899_v38, %v4579_v49  ;;  %v4468_v36 = vadd.f32 %v4467_v52, %v12239_v4  ;;  %v4581_v58 = vadd.f32 %v4580_v12, %v14979_v60  ;;  %v4908_v39 = vld [vmem:[%s13578_s3 + $0x100] sm:$0xff]  ;;  %v14982_v10 = vld [vmem:[#allocation43_spill] sm:$0xff]  ;;  %v4987_v52 = vld [vmem:[%s13578_s3 + $0x378] sm:$0xff] }
 0x470   :  { %5219 = vst [vmem:[%s13579_s4 + $0xb0] sm:$0xff] %v5058_v27  ;;  %v4469_v28 = vpop.f32.mrf.mxu1  ;;  %v4582_v47 = vpop.f32.mrf.mxu0  ;;  %v14983_v9 = vld [vmem:[#allocation14_spill] sm:$0xff]  ;;  %v4909_v12 = vld [vmem:[%s13578_s3 + $0x108] sm:$0xff] }
 0x471   :  { %5298 = vst [vmem:[%s13579_s4 + $0x328] sm:$0xff] %v5137_v2  ;;  %5220 = vst [vmem:[%s13579_s4 + $0xb8] sm:$0xff] %v5059_v63  ;;  %v5141_v4 = vmul.f32 %v4981_v48, %v4468_v36  ;;  %v5063_v6 = vmul.f32 %v4903_v5, %v4581_v58  ;;  %v4470_v0 = vadd.f32 %v4469_v28, %v14980_v45  ;;  %v14984_v36 = vld [vmem:[#allocation24_spill] sm:$0xff]  ;;  %v4991_v28 = vld [vmem:[%s13578_s3 + $0x398] sm:$0xff] }
 0x472   :  { %v4583_v14 = vadd.f32 %v4582_v47, %v14981_v44  ;;  %v4473_v26 = vpop.f32.mrf.mxu1  ;;  %v4586_v31 = vpop.f32.mrf.mxu0  ;;  %v4913_v47 = vld [vmem:[%s13578_s3 + $0x128] sm:$0xff]  ;;  %v4992_v44 = vld [vmem:[%s13578_s3 + $0x3a0] sm:$0xff] }
 0x473   :  { %5302 = vst [vmem:[%s13579_s4 + $0x348] sm:$0xff] %v5141_v4  ;;  %5224 = vst [vmem:[%s13579_s4 + $0xd8] sm:$0xff] %v5063_v6  ;;  %v5142_v59 = vmul.f32 %v4982_v40, %v4470_v0  ;;  %v4474_v27 = vadd.f32 %v4473_v26, %v14982_v10  ;;  %v4587_v11 = vadd.f32 %v4586_v31, %v14983_v9  ;;  %v14985_v6 = vld [vmem:[#allocation25_spill] sm:$0xff]  ;;  %v4914_v26 = vld [vmem:[%s13578_s3 + $0x130] sm:$0xff] }
 0x474   :  { %v5064_v38 = vmul.f32 %v4904_v29, %v4583_v14  ;;  %v4475_v49 = vpop.f32.mrf.mxu1  ;;  %v4588_v48 = vpop.f32.mrf.mxu0  ;;  %v14986_v31 = vld [vmem:[#allocation47_spill] sm:$0xff] }
 0x475   :  { %5303 = vst [vmem:[%s13579_s4 + $0x350] sm:$0xff] %v5142_v59  ;;  %v5146_v5 = vmul.f32 %v4986_v33, %v4474_v27  ;;  %v5068_v2 = vmul.f32 %v4908_v39, %v4587_v11  ;;  %v4476_v63 = vadd.f32 %v4475_v49, %v12258_v17  ;;  %v4589_v60 = vadd.f32 %v4588_v48, %v14984_v36  ;;  %v14987_v59 = vld [vmem:[#allocation8_spill] sm:$0xff]  ;;  %v4996_v27 = vld [vmem:[%s13578_s3 + $0x3c0] sm:$0xff]  ;;  %v14988_v48 = vld [vmem:[#allocation49_spill] sm:$0xff] }
 0x476   :  { %5225 = vst [vmem:[%s13579_s4 + $0xe0] sm:$0xff] %v5064_v38  ;;  %v4477_v58 = vpop.f32.mrf.mxu1  ;;  %v4590_v40 = vpop.f32.mrf.mxu0  ;;  %v4918_v11 = vld [vmem:[%s13578_s3 + $0x150] sm:$0xff]  ;;  %v4997_v36 = vld [vmem:[%s13578_s3 + $0x3c8] sm:$0xff] }
 0x477   :  { %5307 = vst [vmem:[%s13579_s4 + $0x370] sm:$0xff] %v5146_v5  ;;  %5229 = vst [vmem:[%s13579_s4 + $0x100] sm:$0xff] %v5068_v2  ;;  %v5147_v17 = vmul.f32 %v4987_v52, %v4476_v63  ;;  %v5069_v29 = vmul.f32 %v4909_v12, %v4589_v60  ;;  %v4478_v4 = vadd.f32 %v4477_v58, %v12262_v53  ;;  %v14989_v5 = vld [vmem:[#allocation20_spill] sm:$0xff]  ;;  %v4919_v58 = vld [vmem:[%s13578_s3 + $0x158] sm:$0xff] }
 0x478   :  { %v4591_v45 = vadd.f32 %v4590_v40, %v14985_v6  ;;  %v4479_v0 = vpop.f32.mrf.mxu1  ;;  %v4592_v14 = vpop.f32.mrf.mxu0  ;;  %v5001_v6 = vld [vmem:[%s13578_s3 + $0x3e8] sm:$0xff] }
 0x479   :  { %5308 = vst [vmem:[%s13579_s4 + $0x378] sm:$0xff] %v5147_v17  ;;  %5230 = vst [vmem:[%s13579_s4 + $0x108] sm:$0xff] %v5069_v29  ;;  %v5151_v53 = vmul.f32 %v4991_v28, %v4478_v4  ;;  %v4480_v39 = vadd.f32 %v4479_v0, %v14986_v31  ;;  %v4593_v38 = vadd.f32 %v4592_v14, %v14987_v59  ;;  %v14990_v17 = vld [vmem:[#allocation19_spill] sm:$0xff]  ;;  %v4923_v0 = vld [vmem:[%s13578_s3 + $0x178] sm:$0xff] }
 0x47a   :  { %v5073_v33 = vmul.f32 %v4913_v47, %v4591_v45  ;;  %v4483_v10 = vpop.f32.mrf.mxu1  ;;  %v4596_v9 = vpop.f32.mrf.mxu0  ;;  %v5002_v31 = vld [vmem:[%s13578_s3 + $0x3f0] sm:$0xff]  ;;  %v4924_v59 = vld [vmem:[%s13578_s3 + $0x180] sm:$0xff] }
 0x47b   :  { %5312 = vst [vmem:[%s13579_s4 + $0x398] sm:$0xff] %v5151_v53  ;;  %v5152_v49 = vmul.f32 %v4992_v44, %v4480_v39  ;;  %v5074_v52 = vmul.f32 %v4914_v26, %v4593_v38  ;;  %v4484_v12 = vadd.f32 %v4483_v10, %v14988_v48  ;;  %v4597_v2 = vadd.f32 %v4596_v9, %v14989_v5  ;;  %v14991_v26 = vld [vmem:[#allocation23_spill] sm:$0xff]  ;;  %v14992_v10 = vld [vmem:[#allocation53_spill] sm:$0xff] }
 0x47c   :  { %5234 = vst [vmem:[%s13579_s4 + $0x128] sm:$0xff] %v5073_v33  ;;  %v4485_v63 = vpop.f32.mrf.mxu1  ;;  %v4598_v60 = vpop.f32.mrf.mxu0  ;;  %v14993_v9 = vld [vmem:[#allocation21_spill] sm:$0xff] }
 0x47d   :  { %5313 = vst [vmem:[%s13579_s4 + $0x3a0] sm:$0xff] %v5152_v49  ;;  %5235 = vst [vmem:[%s13579_s4 + $0x130] sm:$0xff] %v5074_v52  ;;  %v5156_v28 = vmul.f32 %v4996_v27, %v4484_v12  ;;  %v5078_v40 = vmul.f32 %v4918_v11, %v4597_v2  ;;  %v4486_v47 = vadd.f32 %v4485_v63, %v12281_v51  ;;  %v5006_v52 = vld [vmem:[%s13578_s3 + $0x410] sm:$0xff]  ;;  %v4928_v12 = vld [vmem:[%s13578_s3 + $0x1a0] sm:$0xff] }
 0x47e   :  { %v4599_v29 = vadd.f32 %v4598_v60, %v14990_v17  ;;  %v4487_v4 = vpop.f32.mrf.mxu1  ;;  %v4600_v45 = vpop.f32.mrf.mxu0  ;;  %v14994_v63 = vld [vmem:[#allocation55_spill] sm:$0xff]  ;;  %v14995_v60 = vld [vmem:[#allocation9_spill] sm:$0xff] }
 0x47f   :  { %5317 = vst [vmem:[%s13579_s4 + $0x3c0] sm:$0xff] %v5156_v28  ;;  %5239 = vst [vmem:[%s13579_s4 + $0x150] sm:$0xff] %v5078_v40  ;;  %v5157_v51 = vmul.f32 %v4997_v36, %v4486_v47  ;;  %v4488_v14 = vadd.f32 %v4487_v4, %v12285_v13  ;;  %v4601_v53 = vadd.f32 %v4600_v45, %v14991_v26  ;;  %v5007_v40 = vld [vmem:[%s13578_s3 + $0x418] sm:$0xff]  ;;  %v4929_v17 = vld [vmem:[%s13578_s3 + $0x1a8] sm:$0xff] }
 0x480   :  { %v5079_v44 = vmul.f32 %v4919_v58, %v4599_v29  ;;  %v4489_v33 = vpop.f32.mrf.mxu1  ;;  %v4602_v39 = vpop.f32.mrf.mxu0  ;;  %v14996_v45 = vld [vmem:[#allocation10_spill] sm:$0xff]  ;;  %v4933_v26 = vld [vmem:[%s13578_s3 + $0x1c8] sm:$0xff] }
 0x481   :  { %5318 = vst [vmem:[%s13579_s4 + $0x3c8] sm:$0xff] %v5157_v51  ;;  %v5161_v13 = vmul.f32 %v5001_v6, %v4488_v14  ;;  %v5083_v38 = vmul.f32 %v4923_v0, %v4601_v53  ;;  %v4490_v27 = vadd.f32 %v4489_v33, %v14992_v10  ;;  %v4603_v11 = vadd.f32 %v4602_v39, %v14993_v9  ;;  %v14997_v33 = vld [vmem:[#allocation58_spill] sm:$0xff]  ;;  %v14998_v39 = vld [vmem:[#allocation4_spill] sm:$0xff] }
 0x482   :  { %5240 = vst [vmem:[%s13579_s4 + $0x158] sm:$0xff] %v5079_v44  ;;  %v4493_v49 = vpop.f32.mrf.mxu1  ;;  %v4606_v48 = vpop.f32.mrf.mxu0  ;;  %v5011_v44 = vld [vmem:[%s13578_s3 + $0x438] sm:$0xff] }
 0x483   :  { %5322 = vst [vmem:[%s13579_s4 + $0x3e8] sm:$0xff] %v5161_v13  ;;  %5244 = vst [vmem:[%s13579_s4 + $0x178] sm:$0xff] %v5083_v38  ;;  %v5162_v5 = vmul.f32 %v5002_v31, %v4490_v27  ;;  %v5084_v2 = vmul.f32 %v4924_v59, %v4603_v11  ;;  %v4494_v36 = vadd.f32 %v4493_v49, %v14994_v63  ;;  %v5012_v38 = vld [vmem:[%s13578_s3 + $0x440] sm:$0xff]  ;;  %v4934_v27 = vld [vmem:[%s13578_s3 + $0x1d0] sm:$0xff] }
 0x484   :  { %v4607_v58 = vadd.f32 %v4606_v48, %v14995_v60  ;;  %v4495_v28 = vpop.f32.mrf.mxu1  ;;  %v4608_v47 = vpop.f32.mrf.mxu0  ;;  %v14999_v49 = vld [vmem:[#allocation60_spill] sm:$0xff]  ;;  %v15000_v48 = vld [vmem:[#allocation3_spill] sm:$0xff] }
 0x485   :  { %5323 = vst [vmem:[%s13579_s4 + $0x3f0] sm:$0xff] %v5162_v5  ;;  %5245 = vst [vmem:[%s13579_s4 + $0x180] sm:$0xff] %v5084_v2  ;;  %v5166_v29 = vmul.f32 %v5006_v52, %v4494_v36  ;;  %v4496_v6 = vadd.f32 %v4495_v28, %v12304_v50  ;;  %v4609_v0 = vadd.f32 %v4608_v47, %v14996_v45  ;;  %v5016_v2 = vld [vmem:[%s13578_s3 + $0x460] sm:$0xff]  ;;  %v4938_v36 = vld [vmem:[%s13578_s3 + $0x1f0] sm:$0xff] }
 0x486   :  { %v5088_v4 = vmul.f32 %v4928_v12, %v4607_v58  ;;  %v4497_v51 = vpop.f32.mrf.mxu1  ;;  %v4610_v14 = vpop.f32.mrf.mxu0  ;;  %v15001_v28 = vld [vmem:[#allocation62_spill] sm:$0xff]  ;;  %v4939_v45 = vld [vmem:[%s13578_s3 + $0x1f8] sm:$0xff] }
 0x487   :  { %5327 = vst [vmem:[%s13579_s4 + $0x410] sm:$0xff] %v5166_v29  ;;  %v5167_v50 = vmul.f32 %v5007_v40, %v4496_v6  ;;  %v5089_v53 = vmul.f32 %v4929_v17, %v4609_v0  ;;  %v4498_v31 = vadd.f32 %v4497_v51, %v14997_v33  ;;  %v4611_v59 = vadd.f32 %v4610_v14, %v14998_v39  ;;  %v15002_v47 = vld [vmem:[#allocation22_spill] sm:$0xff]  ;;  %v5021_v33 = vld [vmem:[%s13578_s3 + $0x488] sm:$0xff]  ;;  %v4943_v39 = vld [vmem:[%s13578_s3 + $0x218] sm:$0xff] }
 0x488   :  { %5249 = vst [vmem:[%s13579_s4 + $0x1a0] sm:$0xff] %v5088_v4  ;;  %v4499_v13 = vpop.f32.mrf.mxu1  ;;  %v4612_v10 = vpop.f32.mrf.mxu0  ;;  %v5017_v4 = vld [vmem:[%s13578_s3 + $0x468] sm:$0xff] }
 0x489   :  { %5328 = vst [vmem:[%s13579_s4 + $0x418] sm:$0xff] %v5167_v50  ;;  %5250 = vst [vmem:[%s13579_s4 + $0x1a8] sm:$0xff] %v5089_v53  ;;  %v5171_v9 = vmul.f32 %v5011_v44, %v4498_v31  ;;  %v5093_v11 = vmul.f32 %v4933_v26, %v4611_v59  ;;  %v4500_v52 = vadd.f32 %v4499_v13, %v14999_v49  ;;  %v15003_v44 = vld [vmem:[#allocation64_spill] sm:$0xff]  ;;  %v15004_v26 = vld [vmem:[#allocation7_spill] sm:$0xff] }
 0x48a   :  { %v4613_v12 = vadd.f32 %v4612_v10, %v15000_v48  ;;  %v4503_v5 = vpop.f32.mrf.mxu1  ;;  %v4616_v63 = vpop.f32.mrf.mxu0  ;;  %v5022_v49 = vld [vmem:[%s13578_s3 + $0x490] sm:$0xff]  ;;  %v4944_v48 = vld [vmem:[%s13578_s3 + $0x220] sm:$0xff] }
 0x48b   :  { %5332 = vst [vmem:[%s13579_s4 + $0x438] sm:$0xff] %v5171_v9  ;;  %5254 = vst [vmem:[%s13579_s4 + $0x1c8] sm:$0xff] %v5093_v11  ;;  %v5172_v60 = vmul.f32 %v5012_v38, %v4500_v52  ;;  %v4504_v40 = vadd.f32 %v4503_v5, %v15001_v28  ;;  %v4617_v17 = vadd.f32 %v4616_v63, %v15002_v47  ;;  %v15005_v38 = vld [vmem:[#allocation66_spill] sm:$0xff]  ;;  %v5026_v28 = vld [vmem:[%s13578_s3 + $0x4b0] sm:$0xff] }
 0x48c   :  { %v5094_v58 = vmul.f32 %v4934_v27, %v4613_v12  ;;  %v4505_v29 = vpop.f32.mrf.mxu1  ;;  %v4618_v6 = vpop.f32.mrf.mxu0  ;;  %v15006_v27 = vld [vmem:[#allocation27_spill] sm:$0xff]  ;;  %v4948_v47 = vld [vmem:[%s13578_s3 + $0x240] sm:$0xff] }
 0x48d   :  { %5333 = vst [vmem:[%s13579_s4 + $0x440] sm:$0xff] %v5172_v60  ;;  %v5176_v0 = vmul.f32 %v5016_v2, %v4504_v40  ;;  %v5098_v51 = vmul.f32 %v4938_v36, %v4617_v17  ;;  %v4506_v14 = vadd.f32 %v4505_v29, %v15003_v44  ;;  %v4619_v50 = vadd.f32 %v4618_v6, %v15004_v26  ;;  %v15007_v2 = vld [vmem:[#allocation68_spill] sm:$0xff]  ;;  %v15008_v36 = vld [vmem:[#allocation26_spill] sm:$0xff]  ;;  %v5027_v44 = vld [vmem:[%s13578_s3 + $0x4b8] sm:$0xff] }
 0x48e   :  { %5255 = vst [vmem:[%s13579_s4 + $0x1d0] sm:$0xff] %v5094_v58  ;;  %v4507_v53 = vpop.f32.mrf.mxu1  ;;  %v4620_v31 = vpop.f32.mrf.mxu0  ;;  %v4949_v26 = vld [vmem:[%s13578_s3 + $0x248] sm:$0xff] }
 0x48f   :  { %5337 = vst [vmem:[%s13579_s4 + $0x460] sm:$0xff] %v5176_v0  ;;  %5259 = vst [vmem:[%s13579_s4 + $0x1f0] sm:$0xff] %v5098_v51  ;;  %v5177_v59 = vmul.f32 %v5017_v4, %v4506_v14  ;;  %v5099_v13 = vmul.f32 %v4939_v45, %v4619_v50  ;;  %v4508_v10 = vadd.f32 %v4507_v53, %v15005_v38  ;;  %v15009_v4 = vld [vmem:[#allocation70_spill] sm:$0xff]  ;;  %v5031_v38 = vld [vmem:[%s13578_s3 + $0x4d8] sm:$0xff] }
 0x490   :  { %v4621_v9 = vadd.f32 %v4620_v31, %v15006_v27  ;;  %v4509_v11 = vpop.f32.mrf.mxu1  ;;  %v4622_v52 = vpop.f32.mrf.mxu0  ;;  %v15010_v45 = vld [vmem:[#allocation6_spill] sm:$0xff]  ;;  %v4953_v27 = vld [vmem:[%s13578_s3 + $0x268] sm:$0xff] }
 0x491   :  { %5338 = vst [vmem:[%s13579_s4 + $0x468] sm:$0xff] %v5177_v59  ;;  %5260 = vst [vmem:[%s13579_s4 + $0x1f8] sm:$0xff] %v5099_v13  ;;  %v5181_v12 = vmul.f32 %v5021_v33, %v4508_v10  ;;  %v4510_v63 = vadd.f32 %v4509_v11, %v15007_v2  ;;  %v4623_v60 = vadd.f32 %v4622_v52, %v15008_v36  ;;  %v15011_v33 = vld [vmem:[#allocation72_spill] sm:$0xff]  ;;  %v5032_v2 = vld [vmem:[%s13578_s3 + $0x4e0] sm:$0xff] }
 0x492   :  { %v5103_v5 = vmul.f32 %v4943_v39, %v4621_v9  ;;  %v4513_v58 = vpop.f32.mrf.mxu1  ;;  %v4626_v40 = vpop.f32.mrf.mxu0  ;;  %v15012_v39 = vld [vmem:[#allocation5_spill] sm:$0xff]  ;;  %v4954_v36 = vld [vmem:[%s13578_s3 + $0x270] sm:$0xff] }
 0x493   :  { %5342 = vst [vmem:[%s13579_s4 + $0x488] sm:$0xff] %v5181_v12  ;;  %v5182_v17 = vmul.f32 %v5022_v49, %v4510_v63  ;;  %v5104_v29 = vmul.f32 %v4944_v48, %v4623_v60  ;;  %v4514_v6 = vadd.f32 %v4513_v58, %v15009_v4  ;;  %v4627_v0 = vadd.f32 %v4626_v40, %v15010_v45  ;;  %v15013_v49 = vld [vmem:[#allocation74_spill] sm:$0xff]  ;;  %v15014_v48 = vld [vmem:[#allocation12_spill] sm:$0xff] }
 0x494   :  { %5264 = vst [vmem:[%s13579_s4 + $0x218] sm:$0xff] %v5103_v5  ;;  %v4515_v51 = vpop.f32.mrf.mxu1  ;;  %v4628_v14 = vpop.f32.mrf.mxu0  ;;  %v4958_v4 = vld [vmem:[%s13578_s3 + $0x290] sm:$0xff] }
 0x495   :  { %5343 = vst [vmem:[%s13579_s4 + $0x490] sm:$0xff] %v5182_v17  ;;  %5265 = vst [vmem:[%s13579_s4 + $0x220] sm:$0xff] %v5104_v29  ;;  %v5186_v50 = vmul.f32 %v5026_v28, %v4514_v6  ;;  %v5108_v53 = vmul.f32 %v4948_v47, %v4627_v0  ;;  %v4516_v31 = vadd.f32 %v4515_v51, %v15011_v33  ;;  %v15015_v28 = vld [vmem:[#allocation76_spill] sm:$0xff]  ;;  %v15016_v47 = vld [vmem:[#allocation2_spill] sm:$0xff] }
 0x496   :  { %v4629_v59 = vadd.f32 %v4628_v14, %v15012_v39  ;;  %v4517_v13 = vpop.f32.mrf.mxu1  ;;  %v4630_v10 = vpop.f32.mrf.mxu0  ;;  %v4890_v45 = vld [vmem:[%s13578_s3 + $0x70] sm:$0xff]  ;;  %v4959_v33 = vld [vmem:[%s13578_s3 + $0x298] sm:$0xff]  ;;  %v4880_v39 = vld [vmem:[%s13578_s3 + $0x20] sm:$0xff] }
 0x497   :  { %5347 = vst [vmem:[%s13579_s4 + $0x4b0] sm:$0xff] %v5186_v50  ;;  %5269 = vst [vmem:[%s13579_s4 + $0x240] sm:$0xff] %v5108_v53  ;;  %v5187_v9 = vmul.f32 %v5027_v44, %v4516_v31  ;;  %v4518_v52 = vadd.f32 %v4517_v13, %v15013_v49  ;;  %v4631_v12 = vadd.f32 %v4630_v10, %v15014_v48  ;;  %v15017_v44 = vld [vmem:[#allocation28_spill] sm:$0xff]  ;;  %v4963_v49 = vld [vmem:[%s13578_s3 + $0x2b8] sm:$0xff] }
 0x498   :  { %v5109_v11 = vmul.f32 %v4949_v26, %v4629_v59  ;;  %v4519_v5 = vpop.f32.mrf.mxu1  ;;  %v4632_v63 = vpop.f32.mrf.mxu0  ;;  %v15018_v26 = vld [vmem:[#allocation78_spill] sm:$0xff]  ;;  %v4895_v48 = vld [vmem:[%s13578_s3 + $0x98] sm:$0xff] }
 0x499   :  { %5348 = vst [vmem:[%s13579_s4 + $0x4b8] sm:$0xff] %v5187_v9  ;;  %v5191_v60 = vmul.f32 %v5031_v38, %v4518_v52  ;;  %v5113_v58 = vmul.f32 %v4953_v27, %v4631_v12  ;;  %v4520_v40 = vadd.f32 %v4519_v5, %v15015_v28  ;;  %v4633_v17 = vadd.f32 %v4632_v63, %v15016_v47  ;;  %v15019_v38 = vld [vmem:[#allocation29_spill] sm:$0xff]  ;;  %v15020_v27 = vld [vmem:[#allocation79_spill] sm:$0xff] }
 0x49a   :  { %5270 = vst [vmem:[%s13579_s4 + $0x248] sm:$0xff] %v5109_v11  ;;  %v4636_v29 = vpop.f32.mrf.mxu0  ;;  %v6717_v6 = vpop.f32.mrf.mxu1 }
 0x49b   :  { %5352 = vst [vmem:[%s13579_s4 + $0x4d8] sm:$0xff] %v5191_v60  ;;  %5274 = vst [vmem:[%s13579_s4 + $0x268] sm:$0xff] %v5113_v58  ;;  %v5192_v0 = vmul.f32 %v5032_v2, %v4520_v40  ;;  %v5114_v51 = vmul.f32 %v4954_v36, %v4633_v17  ;;  %v4637_v14 = vadd.f32 %v4636_v29, %v15017_v44  ;;  %v15021_v2 = vld [vmem:[#allocation30_spill] sm:$0xff]  ;;  %v4885_v40 = vld [vmem:[%s13578_s3 + $0x48] sm:$0xff] }
 0x49c   :  { %v4758_v50 = vadd.f32 %v6717_v6, %v15018_v26  ;;  %v4638_v53 = vpop.f32.mrf.mxu0  ;;  %v4749_v31 = vpop.f32.mrf.mxu1  ;;  %v4964_v58 = vld [vmem:[%s13578_s3 + $0x2c0] sm:$0xff]  ;;  %v15022_v17 = vld [vmem:[#allocation31_spill] sm:$0xff] }
 0x49d   :  { %5353 = vst [vmem:[%s13579_s4 + $0x4e0] sm:$0xff] %v5192_v0  ;;  %5275 = vst [vmem:[%s13579_s4 + $0x270] sm:$0xff] %v5114_v51  ;;  %v5118_v59 = vmul.f32 %v4958_v4, %v4637_v14  ;;  %v4639_v10 = vadd.f32 %v4638_v53, %v15019_v38  ;;  %v4750_v9 = vadd.f32 %v4749_v31, %v15020_v27  ;;  %v4910_v51 = vld [vmem:[%s13578_s3 + $0x110] sm:$0xff] }
 0x49e   :  { %v5050_v13 = vmul.f32 %v4890_v45, %v4758_v50  ;;  %v4640_v11 = vpop.f32.mrf.mxu0  ;;  %v6718_v52 = vpop.f32.mrf.mxu1  ;;  %v4968_v45 = vld [vmem:[%s13578_s3 + $0x2e0] sm:$0xff]  ;;  %v15023_v14 = vld [vmem:[#allocation32_spill] sm:$0xff] }
 0x49f   :  { %5279 = vst [vmem:[%s13579_s4 + $0x290] sm:$0xff] %v5118_v59  ;;  %v5119_v12 = vmul.f32 %v4959_v33, %v4639_v10  ;;  %v5040_v5 = vmul.f32 %v4880_v39, %v4750_v9  ;;  %v4641_v63 = vadd.f32 %v4640_v11, %v15021_v2  ;;  %v4761_v36 = vadd.f32 %v6718_v52, %v12371_v32  ;;  %v4969_v33 = vld [vmem:[%s13578_s3 + $0x2e8] sm:$0xff]  ;;  %v4900_v39 = vld [vmem:[%s13578_s3 + $0xc0] sm:$0xff] }
 0x4a0   :  { %5211 = vst.msk [vmem:[%s13579_s4 + $0x70] sm:$0xff] %vm5200_vm8, %v5050_v13  ;;  %v4642_v60 = vpop.f32.mrf.mxu0  ;;  %v4752_v28 = vpop.f32.mrf.mxu1  ;;  %v15024_v13 = vld [vmem:[#allocation33_spill] sm:$0xff]  ;;  %v4973_v9 = vld [vmem:[%s13578_s3 + $0x308] sm:$0xff] }
 0x4a1   :  { %5280 = vst [vmem:[%s13579_s4 + $0x298] sm:$0xff] %v5119_v12  ;;  %5201 = vst.msk [vmem:[%s13579_s4 + $0x20] sm:$0xff] %vm5200_vm8, %v5040_v5  ;;  %v5123_v32 = vmul.f32 %v4963_v49, %v4641_v63  ;;  %v5055_v47 = vmul.f32 %v4895_v48, %v4761_v36  ;;  %v4643_v29 = vadd.f32 %v4642_v60, %v15022_v17  ;;  %v4915_v49 = vld [vmem:[%s13578_s3 + $0x138] sm:$0xff]  ;;  %v15025_v48 = vld [vmem:[#allocation34_spill] sm:$0xff] }
 0x4a2   :  { %v4753_v4 = vadd.f32 %v4752_v28, %v12380_v21  ;;  %v4646_v6 = vpop.f32.mrf.mxu0  ;;  %v6721_v0 = vpop.f32.mrf.mxu1  ;;  %v4974_v63 = vld [vmem:[%s13578_s3 + $0x310] sm:$0xff]  ;;  %v4905_v60 = vld [vmem:[%s13578_s3 + $0xe8] sm:$0xff] }
 0x4a3   :  { %5284 = vst [vmem:[%s13579_s4 + $0x2b8] sm:$0xff] %v5123_v32  ;;  %5216 = vst.msk [vmem:[%s13579_s4 + $0x98] sm:$0xff] %vm5200_vm8, %v5055_v47  ;;  %v5124_v21 = vmul.f32 %v4964_v58, %v4643_v29  ;;  %v4647_v26 = vadd.f32 %v4646_v6, %v15023_v14  ;;  %v4774_v50 = vadd.f32 %v6721_v0, %v12389_v55  ;;  %v15026_v28 = vld [vmem:[#allocation36_spill] sm:$0xff] }
 0x4a4   :  { %v5045_v44 = vmul.f32 %v4885_v40, %v4753_v4  ;;  %v4648_v53 = vpop.f32.mrf.mxu0  ;;  %v4765_v31 = vpop.f32.mrf.mxu1  ;;  %v4978_v17 = vld [vmem:[%s13578_s3 + $0x330] sm:$0xff] }
 0x4a5   :  { %5285 = vst [vmem:[%s13579_s4 + $0x2c0] sm:$0xff] %v5124_v21  ;;  %v5128_v55 = vmul.f32 %v4968_v45, %v4647_v26  ;;  %v5070_v59 = vmul.f32 %v4910_v51, %v4774_v50  ;;  %v4649_v38 = vadd.f32 %v4648_v53, %v15024_v13  ;;  %v4766_v10 = vadd.f32 %v4765_v31, %v12398_v61  ;;  %v4930_v4 = vld [vmem:[%s13578_s3 + $0x1b0] sm:$0xff]  ;;  %v15027_v45 = vld [vmem:[#allocation38_spill] sm:$0xff]  ;;  %v15028_v53 = vld [vmem:[#allocation39_spill] sm:$0xff] }
 0x4a6   :  { %5206 = vst.msk [vmem:[%s13579_s4 + $0x48] sm:$0xff] %vm5200_vm8, %v5045_v44  ;;  %v4650_v27 = vpop.f32.mrf.mxu0  ;;  %v6722_v11 = vpop.f32.mrf.mxu1  ;;  %v4979_v44 = vld [vmem:[%s13578_s3 + $0x338] sm:$0xff]  ;;  %v4920_v26 = vld [vmem:[%s13578_s3 + $0x160] sm:$0xff] }
 0x4a7   :  { %5289 = vst [vmem:[%s13579_s4 + $0x2e0] sm:$0xff] %v5128_v55  ;;  %5231 = vst.msk [vmem:[%s13579_s4 + $0x110] sm:$0xff] %vm5200_vm8, %v5070_v59  ;;  %v5129_v61 = vmul.f32 %v4969_v33, %v4649_v38  ;;  %v5060_v52 = vmul.f32 %v4900_v39, %v4766_v10  ;;  %v4651_v12 = vadd.f32 %v4650_v27, %v15025_v48  ;;  %v4983_v55 = vld [vmem:[%s13578_s3 + $0x358] sm:$0xff]  ;;  %v15029_v10 = vld [vmem:[#allocation40_spill] sm:$0xff] }
 0x4a8   :  { %v4777_v5 = vadd.f32 %v6722_v11, %v12407_v16  ;;  %v4652_v2 = vpop.f32.mrf.mxu0  ;;  %v4768_v36 = vpop.f32.mrf.mxu1  ;;  %v4935_v13 = vld [vmem:[%s13578_s3 + $0x1d8] sm:$0xff] }
 0x4a9   :  { %5290 = vst [vmem:[%s13579_s4 + $0x2e8] sm:$0xff] %v5129_v61  ;;  %5221 = vst.msk [vmem:[%s13579_s4 + $0xc0] sm:$0xff] %vm5200_vm8, %v5060_v52  ;;  %v5133_v16 = vmul.f32 %v4973_v9, %v4651_v12  ;;  %v4653_v40 = vadd.f32 %v4652_v2, %v15026_v28  ;;  %v4769_v32 = vadd.f32 %v4768_v36, %v12416_v62  ;;  %v4925_v52 = vld [vmem:[%s13578_s3 + $0x188] sm:$0xff]  ;;  %v15030_v12 = vld [vmem:[#allocation42_spill] sm:$0xff] }
 0x4aa   :  { %v5075_v58 = vmul.f32 %v4915_v49, %v4777_v5  ;;  %v4656_v47 = vpop.f32.mrf.mxu0  ;;  %v6725_v29 = vpop.f32.mrf.mxu1  ;;  %v4984_v49 = vld [vmem:[%s13578_s3 + $0x360] sm:$0xff]  ;;  %v15031_v28 = vld [vmem:[#allocation44_spill] sm:$0xff] }
 0x4ab   :  { %5294 = vst [vmem:[%s13579_s4 + $0x308] sm:$0xff] %v5133_v16  ;;  %v5134_v62 = vmul.f32 %v4974_v63, %v4653_v40  ;;  %v5065_v6 = vmul.f32 %v4905_v60, %v4769_v32  ;;  %v4657_v0 = vadd.f32 %v4656_v47, %v15027_v45  ;;  %v4790_v51 = vadd.f32 %v6725_v29, %v12425_v1  ;;  %v4988_v36 = vld [vmem:[%s13578_s3 + $0x380] sm:$0xff]  ;;  %v4950_v16 = vld [vmem:[%s13578_s3 + $0x250] sm:$0xff] }
 0x4ac   :  { %5236 = vst.msk [vmem:[%s13579_s4 + $0x138] sm:$0xff] %vm5200_vm8, %v5075_v58  ;;  %v4658_v21 = vpop.f32.mrf.mxu0  ;;  %v4781_v14 = vpop.f32.mrf.mxu1 }
 0x4ad   :  { %5295 = vst [vmem:[%s13579_s4 + $0x310] sm:$0xff] %v5134_v62  ;;  %5226 = vst.msk [vmem:[%s13579_s4 + $0xe8] sm:$0xff] %vm5200_vm8, %v5065_v6  ;;  %v5138_v1 = vmul.f32 %v4978_v17, %v4657_v0  ;;  %v5090_v50 = vmul.f32 %v4930_v4, %v4790_v51  ;;  %v4659_v33 = vadd.f32 %v4658_v21, %v15028_v53  ;;  %v4989_v17 = vld [vmem:[%s13578_s3 + $0x388] sm:$0xff]  ;;  %v4940_v4 = vld [vmem:[%s13578_s3 + $0x200] sm:$0xff] }
 0x4ae   :  { %v4782_v31 = vadd.f32 %v4781_v14, %v12434_v54  ;;  %v4660_v39 = vpop.f32.mrf.mxu0  ;;  %v6726_v59 = vpop.f32.mrf.mxu1  ;;  %v15032_v6 = vld [vmem:[#allocation45_spill] sm:$0xff]  ;;  %v4993_v21 = vld [vmem:[%s13578_s3 + $0x3a8] sm:$0xff] }
 0x4af   :  { %5299 = vst [vmem:[%s13579_s4 + $0x330] sm:$0xff] %v5138_v1  ;;  %5251 = vst.msk [vmem:[%s13579_s4 + $0x1b0] sm:$0xff] %vm5200_vm8, %v5090_v50  ;;  %v5139_v54 = vmul.f32 %v4979_v44, %v4659_v33  ;;  %v4661_v27 = vadd.f32 %v4660_v39, %v15029_v10  ;;  %v4793_v9 = vadd.f32 %v6726_v59, %v12443_v3  ;;  %v4955_v14 = vld [vmem:[%s13578_s3 + $0x278] sm:$0xff]  ;;  %v15033_v1 = vld [vmem:[#allocation46_spill] sm:$0xff] }
 0x4b0   :  { %v5080_v38 = vmul.f32 %v4920_v26, %v4782_v31  ;;  %v4662_v11 = vpop.f32.mrf.mxu0  ;;  %v4784_v61 = vpop.f32.mrf.mxu1  ;;  %v4994_v31 = vld [vmem:[%s13578_s3 + $0x3b0] sm:$0xff] }
 0x4b1   :  { %5300 = vst [vmem:[%s13579_s4 + $0x338] sm:$0xff] %v5139_v54  ;;  %v5143_v3 = vmul.f32 %v4983_v55, %v4661_v27  ;;  %v5095_v48 = vmul.f32 %v4935_v13, %v4793_v9  ;;  %v4663_v5 = vadd.f32 %v4662_v11, %v15030_v12  ;;  %v4785_v2 = vadd.f32 %v4784_v61, %v12452_v18  ;;  %v4945_v55 = vld [vmem:[%s13578_s3 + $0x228] sm:$0xff]  ;;  %v15034_v13 = vld [vmem:[#allocation48_spill] sm:$0xff]  ;;  %v15035_v61 = vld [vmem:[#allocation50_spill] sm:$0xff] }
 0x4b2   :  { %5241 = vst.msk [vmem:[%s13579_s4 + $0x160] sm:$0xff] %vm5200_vm8, %v5080_v38  ;;  %v4666_v63 = vpop.f32.mrf.mxu0  ;;  %v6729_v60 = vpop.f32.mrf.mxu1  ;;  %v4998_v27 = vld [vmem:[%s13578_s3 + $0x3d0] sm:$0xff]  ;;  %v4999_v12 = vld [vmem:[%s13578_s3 + $0x3d8] sm:$0xff] }
 0x4b3   :  { %5304 = vst [vmem:[%s13579_s4 + $0x358] sm:$0xff] %v5143_v3  ;;  %5256 = vst.msk [vmem:[%s13579_s4 + $0x1d8] sm:$0xff] %vm5200_vm8, %v5095_v48  ;;  %v5144_v18 = vmul.f32 %v4984_v49, %v4663_v5  ;;  %v5085_v58 = vmul.f32 %v4925_v52, %v4785_v2  ;;  %v4667_v40 = vadd.f32 %v4666_v63, %v15031_v28  ;;  %v4970_v11 = vld [vmem:[%s13578_s3 + $0x2f0] sm:$0xff]  ;;  %v4960_v2 = vld [vmem:[%s13578_s3 + $0x2a0] sm:$0xff] }
 0x4b4   :  { %v4806_v32 = vadd.f32 %v6729_v60, %v12461_v35  ;;  %v4668_v47 = vpop.f32.mrf.mxu0  ;;  %v4797_v29 = vpop.f32.mrf.mxu1 }
 0x4b5   :  { %5305 = vst [vmem:[%s13579_s4 + $0x360] sm:$0xff] %v5144_v18  ;;  %5246 = vst.msk [vmem:[%s13579_s4 + $0x188] sm:$0xff] %vm5200_vm8, %v5085_v58  ;;  %v5148_v35 = vmul.f32 %v4988_v36, %v4667_v40  ;;  %v4669_v45 = vadd.f32 %v4668_v47, %v15032_v6  ;;  %v4798_v0 = vadd.f32 %v4797_v29, %v12470_v25  ;;  %v15036_v36 = vld [vmem:[#allocation51_spill] sm:$0xff]  ;;  %v5003_v58 = vld [vmem:[%s13578_s3 + $0x3f8] sm:$0xff] }
 0x4b6   :  { %v5110_v62 = vmul.f32 %v4950_v16, %v4806_v32  ;;  %v4670_v51 = vpop.f32.mrf.mxu0  ;;  %v6730_v44 = vpop.f32.mrf.mxu1  ;;  %v4975_v40 = vld [vmem:[%s13578_s3 + $0x318] sm:$0xff]  ;;  %v15037_v47 = vld [vmem:[#allocation52_spill] sm:$0xff]  ;;  %v4965_v6 = vld [vmem:[%s13578_s3 + $0x2c8] sm:$0xff] }
 0x4b7   :  { %5309 = vst [vmem:[%s13579_s4 + $0x380] sm:$0xff] %v5148_v35  ;;  %v5149_v25 = vmul.f32 %v4989_v17, %v4669_v45  ;;  %v5100_v26 = vmul.f32 %v4940_v4, %v4798_v0  ;;  %v4671_v50 = vadd.f32 %v4670_v51, %v15033_v1  ;;  %v4809_v53 = vadd.f32 %v6730_v44, %v12479_v7  ;;  %v5004_v35 = vld [vmem:[%s13578_s3 + $0x400] sm:$0xff] }
 0x4b8   :  { %5271 = vst.msk [vmem:[%s13579_s4 + $0x250] sm:$0xff] %vm5200_vm8, %v5110_v62  ;;  %v4672_v33 = vpop.f32.mrf.mxu0  ;;  %v4800_v39 = vpop.f32.mrf.mxu1  ;;  %v15038_v0 = vld [vmem:[#allocation54_spill] sm:$0xff] }
 0x4b9   :  { %5310 = vst [vmem:[%s13579_s4 + $0x388] sm:$0xff] %v5149_v25  ;;  %5261 = vst.msk [vmem:[%s13579_s4 + $0x200] sm:$0xff] %vm5200_vm8, %v5100_v26  ;;  %v5153_v7 = vmul.f32 %v4993_v21, %v4671_v50  ;;  %v5115_v59 = vmul.f32 %v4955_v14, %v4809_v53  ;;  %v4673_v54 = vadd.f32 %v4672_v33, %v15034_v13  ;;  %v5008_v14 = vld [vmem:[%s13578_s3 + $0x420] sm:$0xff]  ;;  %v4990_v26 = vld [vmem:[%s13578_s3 + $0x390] sm:$0xff] }
 0x4ba   :  { %v4801_v38 = vadd.f32 %v4800_v39, %v12488_v42  ;;  %v4676_v10 = vpop.f32.mrf.mxu0  ;;  %v6733_v9 = vpop.f32.mrf.mxu1  ;;  %v15039_v50 = vld [vmem:[#allocation56_spill] sm:$0xff]  ;;  %v5009_v39 = vld [vmem:[%s13578_s3 + $0x428] sm:$0xff]  ;;  %v15040_v13 = vld [vmem:[#allocation57_spill] sm:$0xff] }
 0x4bb   :  { %5314 = vst [vmem:[%s13579_s4 + $0x3a8] sm:$0xff] %v5153_v7  ;;  %5276 = vst.msk [vmem:[%s13579_s4 + $0x278] sm:$0xff] %vm5200_vm8, %v5115_v59  ;;  %v5154_v42 = vmul.f32 %v4994_v31, %v4673_v54  ;;  %v4677_v52 = vadd.f32 %v4676_v10, %v15035_v61  ;;  %v4822_v3 = vadd.f32 %v6733_v9, %v12497_v43  ;;  %v4980_v7 = vld [vmem:[%s13578_s3 + $0x340] sm:$0xff] }
 0x4bc   :  { %v5105_v49 = vmul.f32 %v4945_v55, %v4801_v38  ;;  %v4678_v48 = vpop.f32.mrf.mxu0  ;;  %v4813_v5 = vpop.f32.mrf.mxu1 }
 0x4bd   :  { %5315 = vst [vmem:[%s13579_s4 + $0x3b0] sm:$0xff] %v5154_v42  ;;  %v5158_v43 = vmul.f32 %v4998_v27, %v4677_v52  ;;  %v5130_v63 = vmul.f32 %v4970_v11, %v4822_v3  ;;  %v4679_v60 = vadd.f32 %v4678_v48, %v15036_v36  ;;  %v4814_v16 = vadd.f32 %v4813_v5, %v12506_v34  ;;  %v5013_v27 = vld [vmem:[%s13578_s3 + $0x448] sm:$0xff]  ;;  %v4995_v11 = vld [vmem:[%s13578_s3 + $0x3b8] sm:$0xff]  ;;  %v5014_v48 = vld [vmem:[%s13578_s3 + $0x450] sm:$0xff] }
 0x4be   :  { %5266 = vst.msk [vmem:[%s13579_s4 + $0x228] sm:$0xff] %vm5200_vm8, %v5105_v49  ;;  %v4680_v18 = vpop.f32.mrf.mxu0  ;;  %v6734_v28 = vpop.f32.mrf.mxu1  ;;  %v15041_v49 = vld [vmem:[#allocation59_spill] sm:$0xff] }
 0x4bf   :  { %5319 = vst [vmem:[%s13579_s4 + $0x3d0] sm:$0xff] %v5158_v43  ;;  %5291 = vst.msk [vmem:[%s13579_s4 + $0x2f0] sm:$0xff] %vm5200_vm8, %v5130_v63  ;;  %v5159_v34 = vmul.f32 %v4999_v12, %v4679_v60  ;;  %v5120_v32 = vmul.f32 %v4960_v2, %v4814_v16  ;;  %v4681_v17 = vadd.f32 %v4680_v18, %v15037_v47  ;;  %v4985_v5 = vld [vmem:[%s13578_s3 + $0x368] sm:$0xff]  ;;  %v15042_v43 = vld [vmem:[#allocation61_spill] sm:$0xff] }
 0x4c0   :  { %v4825_v29 = vadd.f32 %v6734_v28, %v12515_v8  ;;  %v4682_v4 = vpop.f32.mrf.mxu0  ;;  %v4816_v62 = vpop.f32.mrf.mxu1  ;;  %v5018_v16 = vld [vmem:[%s13578_s3 + $0x470] sm:$0xff] }
 0x4c1   :  { %5320 = vst [vmem:[%s13579_s4 + $0x3d8] sm:$0xff] %v5159_v34  ;;  %5281 = vst.msk [vmem:[%s13579_s4 + $0x2a0] sm:$0xff] %vm5200_vm8, %v5120_v32  ;;  %v5163_v8 = vmul.f32 %v5003_v58, %v4681_v17  ;;  %v4683_v51 = vadd.f32 %v4682_v4, %v15038_v0  ;;  %v4817_v21 = vadd.f32 %v4816_v62, %v12524_v20  ;;  %v5010_v58 = vld [vmem:[%s13578_s3 + $0x430] sm:$0xff]  ;;  %v5019_v17 = vld [vmem:[%s13578_s3 + $0x478] sm:$0xff] }
 0x4c2   :  { %v5135_v45 = vmul.f32 %v4975_v40, %v4825_v29  ;;  %v4686_v44 = vpop.f32.mrf.mxu0  ;;  %v6737_v25 = vpop.f32.mrf.mxu1  ;;  %v15043_v40 = vld [vmem:[#allocation63_spill] sm:$0xff]  ;;  %v5000_v4 = vld [vmem:[%s13578_s3 + $0x3e0] sm:$0xff]  ;;  %v15044_v62 = vld [vmem:[#allocation65_spill] sm:$0xff] }
 0x4c3   :  { %5324 = vst [vmem:[%s13579_s4 + $0x3f8] sm:$0xff] %v5163_v8  ;;  %v5164_v20 = vmul.f32 %v5004_v35, %v4683_v51  ;;  %v5125_v1 = vmul.f32 %v4965_v6, %v4817_v21  ;;  %v4687_v53 = vadd.f32 %v4686_v44, %v15039_v50  ;;  %v4838_v33 = vadd.f32 %v6737_v25, %v12533_v19  ;;  %v5023_v0 = vld [vmem:[%s13578_s3 + $0x498] sm:$0xff] }
 0x4c4   :  { %5296 = vst.msk [vmem:[%s13579_s4 + $0x318] sm:$0xff] %vm5200_vm8, %v5135_v45  ;;  %v4688_v31 = vpop.f32.mrf.mxu0  ;;  %v4829_v55 = vpop.f32.mrf.mxu1  ;;  %v5015_v21 = vld [vmem:[%s13578_s3 + $0x458] sm:$0xff] }
 0x4c5   :  { %5325 = vst [vmem:[%s13579_s4 + $0x400] sm:$0xff] %v5164_v20  ;;  %5286 = vst.msk [vmem:[%s13579_s4 + $0x2c8] sm:$0xff] %vm5200_vm8, %v5125_v1  ;;  %v5168_v19 = vmul.f32 %v5008_v14, %v4687_v53  ;;  %v5150_v59 = vmul.f32 %v4990_v26, %v4838_v33  ;;  %v4689_v54 = vadd.f32 %v4688_v31, %v15040_v13  ;;  %v15045_v14 = vld [vmem:[#allocation67_spill] sm:$0xff]  ;;  %v5024_v1 = vld [vmem:[%s13578_s3 + $0x4a0] sm:$0xff] }
 0x4c6   :  { %v4830_v38 = vadd.f32 %v4829_v55, %v12542_v22  ;;  %v4690_v10 = vpop.f32.mrf.mxu0  ;;  %v6738_v9 = vpop.f32.mrf.mxu1  ;;  %v5005_v53 = vld [vmem:[%s13578_s3 + $0x408] sm:$0xff]  ;;  %v15046_v31 = vld [vmem:[#allocation69_spill] sm:$0xff]  ;;  %v5030_v13 = vld [vmem:[%s13578_s3 + $0x4d0] sm:$0xff] }
 0x4c7   :  { %5329 = vst [vmem:[%s13579_s4 + $0x420] sm:$0xff] %v5168_v19  ;;  %5311 = vst.msk [vmem:[%s13579_s4 + $0x390] sm:$0xff] %vm5200_vm8, %v5150_v59  ;;  %v5169_v22 = vmul.f32 %v5009_v39, %v4689_v54  ;;  %v4691_v61 = vadd.f32 %v4690_v10, %v15041_v49  ;;  %v4841_v52 = vadd.f32 %v6738_v9, %v12551_v23  ;;  %v5028_v19 = vld [vmem:[%s13578_s3 + $0x4c0] sm:$0xff] }
 0x4c8   :  { %v5140_v42 = vmul.f32 %v4980_v7, %v4830_v38  ;;  %v4692_v3 = vpop.f32.mrf.mxu0  ;;  %v4832_v12 = vpop.f32.mrf.mxu1  ;;  %v15047_v38 = vld [vmem:[#allocation71_spill] sm:$0xff] }
 0x4c9   :  { %5330 = vst [vmem:[%s13579_s4 + $0x428] sm:$0xff] %v5169_v22  ;;  %v5173_v23 = vmul.f32 %v5013_v27, %v4691_v61  ;;  %v5155_v2 = vmul.f32 %v4995_v11, %v4841_v52  ;;  %v4693_v63 = vadd.f32 %v4692_v3, %v15042_v43  ;;  %v4833_v36 = vadd.f32 %v4832_v12, %v12560_v15  ;;  %v5029_v11 = vld [vmem:[%s13578_s3 + $0x4c8] sm:$0xff]  ;;  %v15048_v61 = vld [vmem:[#allocation73_spill] sm:$0xff] }
 0x4ca   :  { %5301 = vst.msk [vmem:[%s13579_s4 + $0x340] sm:$0xff] %vm5200_vm8, %v5140_v42  ;;  %v4696_v60 = vpop.f32.mrf.mxu0  ;;  %v6741_v18 = vpop.f32.mrf.mxu1  ;;  %v5020_v42 = vld [vmem:[%s13578_s3 + $0x480] sm:$0xff]  ;;  %v5033_v12 = vld [vmem:[%s13578_s3 + $0x4e8] sm:$0xff] }
 0x4cb   :  { %5334 = vst [vmem:[%s13579_s4 + $0x448] sm:$0xff] %v5173_v23  ;;  %5316 = vst.msk [vmem:[%s13579_s4 + $0x3b8] sm:$0xff] %vm5200_vm8, %v5155_v2  ;;  %v5174_v15 = vmul.f32 %v5014_v48, %v4693_v63  ;;  %v5145_v28 = vmul.f32 %v4985_v5, %v4833_v36  ;;  %v4697_v34 = vadd.f32 %v4696_v60, %v15043_v40  ;;  %v5035_v23 = vld [vmem:[%s13578_s3 + $0x4f8] sm:$0xff]  ;;  %v15049_v43 = vld [vmem:[#allocation75_spill] sm:$0xff] }
 0x4cc   :  { %v4854_v32 = vadd.f32 %v6741_v18, %v12569_v30  ;;  %v4698_v47 = vpop.f32.mrf.mxu0  ;;  %v4845_v29 = vpop.f32.mrf.mxu1 }
 0x4cd   :  { %5335 = vst [vmem:[%s13579_s4 + $0x450] sm:$0xff] %v5174_v15  ;;  %5306 = vst.msk [vmem:[%s13579_s4 + $0x368] sm:$0xff] %vm5200_vm8, %v5145_v28  ;;  %v5178_v30 = vmul.f32 %v5018_v16, %v4697_v34  ;;  %v4699_v6 = vadd.f32 %v4698_v47, %v15044_v62  ;;  %v4846_v8 = vadd.f32 %v4845_v29, %v12578_v24  ;;  %v5034_v16 = vld [vmem:[%s13578_s3 + $0x4f0] sm:$0xff]  ;;  %v15050_v28 = vld [vmem:[#allocation77_spill] sm:$0xff] }
 0x4ce   :  { %v5170_v35 = vmul.f32 %v5010_v58, %v4854_v32  ;;  %v4700_v45 = vpop.f32.mrf.mxu0  ;;  %v6742_v51 = vpop.f32.mrf.mxu1  ;;  %v5025_v58 = vld [vmem:[%s13578_s3 + $0x4a8] sm:$0xff]  ;;  %v15051_v34 = vld [vmem:[#allocation80_spill] sm:$0xff] }
 0x4cf   :  { %5339 = vst [vmem:[%s13579_s4 + $0x470] sm:$0xff] %v5178_v30  ;;  %v5179_v24 = vmul.f32 %v5019_v17, %v4699_v6  ;;  %v5160_v44 = vmul.f32 %v5000_v4, %v4846_v8  ;;  %v4701_v25 = vadd.f32 %v4700_v45, %v15045_v14  ;;  %v4857_v26 = vadd.f32 %v6742_v51, %v12587_v46 }
 0x4d0   :  { %5331 = vst.msk [vmem:[%s13579_s4 + $0x430] sm:$0xff] %vm5200_vm8, %v5170_v35  ;;  %v4702_v20 = vpop.f32.mrf.mxu0  ;;  %v4848_v50 = vpop.f32.mrf.mxu1 }
 0x4d1   :  { %5340 = vst [vmem:[%s13579_s4 + $0x478] sm:$0xff] %v5179_v24  ;;  %5321 = vst.msk [vmem:[%s13579_s4 + $0x3e0] sm:$0xff] %vm5200_vm8, %v5160_v44  ;;  %v5183_v46 = vmul.f32 %v5023_v0, %v4701_v25  ;;  %v5175_v33 = vmul.f32 %v5015_v21, %v4857_v26  ;;  %v4703_v39 = vadd.f32 %v4702_v20, %v15046_v31 }
 0x4d2   :  { %v4849_v55 = vadd.f32 %v4848_v50, %v12596_v56  ;;  %v4706_v7 = vpop.f32.mrf.mxu0  ;;  %v6745_v59 = vpop.f32.mrf.mxu1 }
 0x4d3   :  { %5344 = vst [vmem:[%s13579_s4 + $0x498] sm:$0xff] %v5183_v46  ;;  %5336 = vst.msk [vmem:[%s13579_s4 + $0x458] sm:$0xff] %vm5200_vm8, %v5175_v33  ;;  %v5184_v56 = vmul.f32 %v5024_v1, %v4703_v39  ;;  %v4707_v10 = vadd.f32 %v4706_v7, %v15047_v38  ;;  %v4870_v27 = vadd.f32 %v6745_v59, %v12605_v57 }
 0x4d4   :  { %v5165_v54 = vmul.f32 %v5005_v53, %v4849_v55  ;;  %v4708_v9 = vpop.f32.mrf.mxu0  ;;  %v4861_v22 = vpop.f32.mrf.mxu1 }
 0x4d5   :  { %5345 = vst [vmem:[%s13579_s4 + $0x4a0] sm:$0xff] %v5184_v56  ;;  %v5188_v57 = vmul.f32 %v5028_v19, %v4707_v10  ;;  %v5190_v49 = vmul.f32 %v5030_v13, %v4870_v27  ;;  %v4709_v52 = vadd.f32 %v4708_v9, %v15048_v61  ;;  %v4862_v3 = vadd.f32 %v4861_v22, %v12614_v41 }
 0x4d6   :  { %5326 = vst.msk [vmem:[%s13579_s4 + $0x408] sm:$0xff] %vm5200_vm8, %v5165_v54  ;;  %v4710_v48 = vpop.f32.mrf.mxu0  ;;  %v6746_v5 = vpop.f32.mrf.mxu1 }
 0x4d7   :  { %5349 = vst [vmem:[%s13579_s4 + $0x4c0] sm:$0xff] %v5188_v57  ;;  %5351 = vst.msk [vmem:[%s13579_s4 + $0x4d0] sm:$0xff] %vm5200_vm8, %v5190_v49  ;;  %v5189_v41 = vmul.f32 %v5029_v11, %v4709_v52  ;;  %v5180_v2 = vmul.f32 %v5020_v42, %v4862_v3  ;;  %v4711_v63 = vadd.f32 %v4710_v48, %v15049_v43 }
 0x4d8   :  { %v4873_v36 = vadd.f32 %v6746_v5, %v12623_v37  ;;  %v4712_v60 = vpop.f32.mrf.mxu0  ;;  %v4864_v18 = vpop.f32.mrf.mxu1 }
 0x4d9   :  { %5350 = vst [vmem:[%s13579_s4 + $0x4c8] sm:$0xff] %v5189_v41  ;;  %5341 = vst.msk [vmem:[%s13579_s4 + $0x480] sm:$0xff] %vm5200_vm8, %v5180_v2  ;;  %v5193_v37 = vmul.f32 %v5033_v12, %v4711_v63  ;;  %v4713_v40 = vadd.f32 %v4712_v60, %v15050_v28  ;;  %v4865_v32 = vadd.f32 %v4864_v18, %v15051_v34 }
 0x4da   :  { %v5195_v15 = vmul.f32 %v5035_v23, %v4873_v36 }
 0x4db   :  { %5354 = vst [vmem:[%s13579_s4 + $0x4e8] sm:$0xff] %v5193_v37  ;;  %v5194_v47 = vmul.f32 %v5034_v16, %v4713_v40  ;;  %v5185_v17 = vmul.f32 %v5025_v58, %v4865_v32 }
 0x4dc   :  { %5356 = vst.msk [vmem:[%s13579_s4 + $0x4f8] sm:$0xff] %vm5200_vm8, %v5195_v15 }
 0x4dd   :  { %5355 = vst [vmem:[%s13579_s4 + $0x4f0] sm:$0xff] %v5194_v47  ;;  %5346 = vst.msk [vmem:[%s13579_s4 + $0x4a8] sm:$0xff] %vm5200_vm8, %v5185_v17 }

</bundles_post_ra>
